<compile_context>
chip_gen: v7x
topology: tpu7x:2x2x1
jax: 0.10.0
libtpu: 0.0.40
codegen_flags: <defaults>
</compile_context>

<pallas_src>
import functools
import math

import numpy as np

import jax
import jax.numpy as jnp
from jax import lax
from jax.experimental import pallas as pl
from jax.experimental.pallas import tpu as pltpu


# ----------------------------------------------------------------------------
# Tiling constants / helpers
# ----------------------------------------------------------------------------
_TM, _TN, _TK = 512, 256, 512               # base tiles (bf16 operands)
_VMEM_LIMIT = 48 * 1024 * 1024              # safe on v5e/v6e (128 MiB) and v7x (64 MiB)


def _round_up(x, m):
    return ((x + m - 1) // m) * m


# ----------------------------------------------------------------------------
# Pallas kernel 1: tiled matmul with fused bias + activation
# ----------------------------------------------------------------------------
def _matmul_act_kernel(x_ref, w_ref, b_ref, o_ref, acc_ref, *, act):
    """acc += x @ w (bf16 on MXU, f32 accumulate); on last K step: bias+act."""
    @pl.when(pl.program_id(2) == 0)
    def _init():
        acc_ref[...] = jnp.zeros_like(acc_ref)

    acc_ref[...] += jnp.dot(x_ref[...], w_ref[...],
                            preferred_element_type=jnp.float32)

    @pl.when(pl.program_id(2) == pl.num_programs(2) - 1)
    def _finalize():
        acc = acc_ref[...] + b_ref[...]
        if act == "leaky":
            acc = jnp.where(acc >= 0, acc, 0.1 * acc)        # LeakyReLU(0.1)
        o_ref[...] = acc.astype(o_ref.dtype)


def pallas_matmul_act(x, w, b, act="linear", out_dtype=jnp.bfloat16):
    """out = act(x @ w + b).  Operands cast to bf16, f32 accumulation.

    The wrapper pads M to the sublane tile, and K / N to lane-dense multiples
    of 128 (zero padding, sliced off afterwards), so small-Cout layers get
    unmasked vector stores."""
    M, K = x.shape
    K2, N = w.shape
    assert K == K2, (x.shape, w.shape)

    tm = min(_TM, _round_up(M, 16))
    tn = min(_TN, _round_up(N, 128))
    tk = min(_TK, _round_up(K, 128))
    Mp, Np, Kp = _round_up(M, tm), _round_up(N, tn), _round_up(K, tk)

    xb = x.astype(jnp.bfloat16)
    wb = w.astype(jnp.bfloat16)
    bb = jnp.asarray(b, jnp.float32).reshape(1, -1)
    assert bb.shape[1] == N, (bb.shape, N)

    if (Mp, Kp) != (M, K):
        xb = jnp.pad(xb, ((0, Mp - M), (0, Kp - K)))
    if (Kp, Np) != (K, N):
        wb = jnp.pad(wb, ((0, Kp - K), (0, Np - N)))
    if Np != N:
        bb = jnp.pad(bb, ((0, 0), (0, Np - N)))

    grid = (Mp // tm, Np // tn, Kp // tk)
    out = pl.pallas_call(
        functools.partial(_matmul_act_kernel, act=act),
        out_shape=jax.ShapeDtypeStruct((Mp, Np), out_dtype),
        grid=grid,
        in_specs=[
            pl.BlockSpec((tm, tk), lambda i, j, k: (i, k)),
            pl.BlockSpec((tk, tn), lambda i, j, k: (k, j)),
            pl.BlockSpec((1, tn), lambda i, j, k: (0, j)),
        ],
        out_specs=pl.BlockSpec((tm, tn), lambda i, j, k: (i, j)),
        scratch_shapes=[pltpu.VMEM((tm, tn), jnp.float32)],
        compiler_params=pltpu.CompilerParams(
            dimension_semantics=("parallel", "parallel", "arbitrary"),
            vmem_limit_bytes=_VMEM_LIMIT),
    )(xb, wb, bb)

    if (Mp, Np) != (M, N):
        out = out[:M, :N]
    return out


# ----------------------------------------------------------------------------
# Pallas kernel 2: MaxPool2d(4) as a (rows, 16, C) sublane reduction
# ----------------------------------------------------------------------------
def _maxpool_kernel(x_ref, o_ref):
    o_ref[...] = jnp.max(x_ref[...], axis=1)


def pallas_maxpool(x3):
    """x3: (rows, 16, C)  ->  (rows, C); the 4x4 window sits on sublanes."""
    R, KW, C = x3.shape
    tr = min(256, _round_up(R, 16))
    Rp = _round_up(R, tr)
    if Rp != R:
        x3 = jnp.pad(x3, ((0, Rp - R), (0, 0), (0, 0)))
    out = pl.pallas_call(
        _maxpool_kernel,
        out_shape=jax.ShapeDtypeStruct((Rp, C), x3.dtype),
        grid=(Rp // tr,),
        in_specs=[pl.BlockSpec((tr, KW, C), lambda i: (i, 0, 0))],
        out_specs=pl.BlockSpec((tr, C), lambda i: (i, 0)),
        compiler_params=pltpu.CompilerParams(
            dimension_semantics=("parallel",),
            vmem_limit_bytes=_VMEM_LIMIT),
    )(x3)
    return out[:R]


# ----------------------------------------------------------------------------
# Pallas kernel 3: fused bias + Tanh + (0.5 - 0.55*y) head, lane-dense output
# ----------------------------------------------------------------------------
def _final_act_kernel(x_ref, b_ref, o_ref):
    z = x_ref[...] + b_ref[...]
    o_ref[...] = (0.5 - 0.55 * jnp.tanh(z)).astype(o_ref.dtype)


def pallas_final_act(x2d, bias):
    """x2d: (rows, width) pre-activation; output last dim is spatial width."""
    R, C = x2d.shape
    x2d = x2d.astype(jnp.float32)
    tr = min(1024, _round_up(R, 8))
    Rp = _round_up(R, tr)
    if Rp != R:
        x2d = jnp.pad(x2d, ((0, Rp - R), (0, 0)))
    b_row = jnp.broadcast_to(jnp.asarray(bias, jnp.float32).reshape(1, 1), (1, C))
    out = pl.pallas_call(
        _final_act_kernel,
        out_shape=jax.ShapeDtypeStruct((Rp, C), jnp.float32),
        grid=(Rp // tr,),
        in_specs=[
            pl.BlockSpec((tr, C), lambda i: (i, 0)),
            pl.BlockSpec((1, C), lambda i: (0, 0)),
        ],
        out_specs=pl.BlockSpec((tr, C), lambda i: (i, 0)),
        compiler_params=pltpu.CompilerParams(
            dimension_semantics=("parallel",),
            vmem_limit_bytes=_VMEM_LIMIT),
    )(x2d, b_row)
    return out[:R]


# ----------------------------------------------------------------------------
# Matched-precision jnp versions of the three kernels (kernel plumbing check)
# ----------------------------------------------------------------------------
def _matmul_act_jnp(x, w, b, act="linear", out_dtype=jnp.bfloat16):
    acc = jnp.dot(x.astype(jnp.bfloat16), w.astype(jnp.bfloat16),
                  preferred_element_type=jnp.float32)
    acc = acc + jnp.asarray(b, jnp.float32).reshape(1, -1)
    if act == "leaky":
        acc = jnp.where(acc >= 0, acc, 0.1 * acc)
    return acc.astype(out_dtype)


def _maxpool_jnp(x3):
    return jnp.max(x3, axis=1)


def _final_act_jnp(x2d, bias):
    z = x2d.astype(jnp.float32) + jnp.asarray(bias, jnp.float32).reshape(1, 1)
    return 0.5 - 0.55 * jnp.tanh(z)


# ----------------------------------------------------------------------------
# Glue: im2col, weights, bilinear matrices, polyphase ConvTranspose
# ----------------------------------------------------------------------------
def im2col(x, KH, KW):
    """(N,H,W,C) -> (N*Ho*Wo, KH*KW*C), Ho, Wo  (VALID patches).

    # TODO(synk): fuse patch extraction into the matmul kernel (HBM-resident
    # activation + KH*KW shifted-tile accumulation) to avoid the KH*KW x HBM
    # traffic blowup on the memory-bound early layers."""
    N, H, W, C = x.shape
    Ho, Wo = H - KH + 1, W - KW + 1
    cols = [x[:, i:i + Ho, j:j + Wo, :] for i in range(KH) for j in range(KW)]
    p = jnp.concatenate(cols, axis=-1)
    return p.reshape(N * Ho * Wo, KH * KW * C), Ho, Wo


def conv_w_to_mat(w):
    """torch (Cout, Cin, KH, KW) -> im2col weight matrix (KH*KW*Cin, Cout)."""
    cout, cin, kh, kw = w.shape
    return jnp.transpose(w, (2, 3, 1, 0)).reshape(kh * kw * cin, cout)


def bilinear_matrix(in_size, out_size):
    """PyTorch Upsample(bilinear, align_corners=False) interpolation matrix."""
    scale = in_size / out_size
    M = np.zeros((out_size, in_size), np.float32)
    for i in range(out_size):
        src = (i + 0.5) * scale - 0.5
        src = max(src, 0.0)
        i0 = min(int(math.floor(src)), in_size - 1)
        i1 = min(i0 + 1, in_size - 1)
        w1 = src - i0
        M[i, i0] += 1.0 - w1
        M[i, i1] += w1
    return M


def bilinear_upsample4(f, mm):
    """Separable bilinear x4 upsample: matmul along H, then along W."""
    N, Hf, Wf, C = f.shape
    Mh = jnp.asarray(bilinear_matrix(Hf, 4 * Hf))          # (4Hf, Hf)
    Mw = jnp.asarray(bilinear_matrix(Wf, 4 * Wf))          # (4Wf, Wf)
    # along H: (4Hf, Hf) @ (Hf, N*Wf*C)
    fh = jnp.transpose(f, (1, 0, 2, 3)).reshape(Hf, N * Wf * C)
    th = mm(Mh, fh, jnp.zeros((1, N * Wf * C), jnp.float32), "linear")
    th = th.reshape(4 * Hf, N, Wf, C)
    # along W: (4Wf, Wf) @ (Wf, N*4Hf*C)
    tw_in = jnp.transpose(th, (2, 1, 0, 3)).reshape(Wf, N * 4 * Hf * C)
    tw = mm(Mw, tw_in, jnp.zeros((1, N * 4 * Hf * C), jnp.float32), "linear")
    tw = tw.reshape(4 * Wf, N, 4 * Hf, C)
    return jnp.transpose(tw, (1, 2, 0, 3))                 # (N, 4Hf, 4Wf, C)


def conv_transpose_polyphase(u, wt, bias, mm, fact):
    """ConvTranspose2d(256,1,4,2,3) without zero-dilation.

    One (M,256)x(256,16) tap-projection matmul (Pallas), then each output
    phase (oy%2, ox%2) sums its 4 contributing taps (thin glue adds), then a
    fused bias + Tanh + (0.5 - 0.55*y) Pallas kernel over (rows, width)."""
    N, Hu, Wu, C = u.shape
    Ho, Wo = Hu - 2, Wu - 2                                # output = 2*Hu - 4
    W16 = wt.reshape(C, 16)                                # [c, a*4 + b]
    T = mm(u.reshape(N * Hu * Wu, C), W16,
           jnp.zeros((1, 16), jnp.float32), "linear", out_dtype=jnp.float32)
    T = T.reshape(N, Hu, Wu, 4, 4)

    def tap(di, dj, a, b):
        return T[:, di:di + Ho, dj:dj + Wo, a, b]

    # output[oy,ox] = sum over (i,a) with oy = 2i - 3 + a  (and same for cols)
    y00 = tap(0, 0, 3, 3) + tap(0, 1, 3, 1) + tap(1, 0, 1, 3) + tap(1, 1, 1, 1)
    y01 = tap(0, 1, 3, 2) + tap(0, 2, 3, 0) + tap(1, 1, 1, 2) + tap(1, 2, 1, 0)
    y10 = tap(1, 0, 2, 3) + tap(1, 1, 2, 1) + tap(2, 0, 0, 3) + tap(2, 1, 0, 1)
    y11 = tap(1, 1, 2, 2) + tap(1, 2, 2, 0) + tap(2, 1, 0, 2) + tap(2, 2, 0, 0)

    ph = jnp.stack([y00, y01, y10, y11], axis=-1).reshape(N, Ho, Wo, 2, 2)
    y_pre = jnp.transpose(ph, (0, 1, 3, 2, 4)).reshape(N, 2 * Ho, 2 * Wo)
    y = fact(y_pre.reshape(N * 2 * Ho, 2 * Wo), bias)
    return y.reshape(N, 2 * Ho, 2 * Wo, 1)


def make_params(key):
    """Deterministic kaiming-normal(fan_out, a=0.1) style init; zero biases."""
    gain = math.sqrt(2.0 / (1.0 + 0.1 ** 2))
    conv_shapes = {
        "f1": (16, 1, 3, 3), "f2": (64, 16, 4, 4), "f3": (256, 64, 5, 5),
        "m1": (24, 3, 3, 3), "m2": (32, 24, 3, 3),
        "m3": (64, 32, 3, 3), "m4": (128, 64, 3, 3),
        "u1": (256, 384, 3, 3), "u2": (256, 256, 3, 3),
    }
    params = {}
    keys = jax.random.split(key, len(conv_shapes) + 1)
    for k_rng, (name, (cout, cin, kh, kw)) in zip(keys[:-1], conv_shapes.items()):
        std = gain / math.sqrt(cout * kh * kw)              # fan_out for Conv2d
        w = jax.random.normal(k_rng, (cout, cin, kh, kw), jnp.float32) * std
        params[f"{name}_w"] = conv_w_to_mat(w)
        params[f"{name}_b"] = jnp.zeros((1, cout), jnp.float32)
    # ConvTranspose2d(256, 1, 4, 2, 3): torch weight (Cin=256, Cout=1, 4, 4)
    cin, cout, kh, kw = 256, 1, 4, 4
    std = gain / math.sqrt(cin * kh * kw)                   # fan_out for ConvTranspose2d
    params["ut_wt"] = jax.random.normal(keys[-1], (cin, cout, kh, kw),
                                        jnp.float32) * std
    params["ut_b"] = jnp.zeros((1,), jnp.float32)
    return params


# ----------------------------------------------------------------------------
# Forward pass (matches UpConv_7_KanjiV2.forward)
# ----------------------------------------------------------------------------
def upconv7_forward(x_nchw, params, *, use_pallas=True):
    mm = pallas_matmul_act if use_pallas else _matmul_act_jnp
    mp = pallas_maxpool if use_pallas else _maxpool_jnp
    fact = pallas_final_act if use_pallas else _final_act_jnp

    x = jnp.transpose(x_nchw, (0, 2, 3, 1)).astype(jnp.float32)   # NCHW -> NHWC
    N = x.shape[0]

    def conv(h, name, KH, KW):
        wmat, b = params[f"{name}_w"], params[f"{name}_b"]
        p, Ho, Wo = im2col(h, KH, KW)
        y = mm(p, wmat, b, "leaky")
        return y.reshape(N, Ho, Wo, wmat.shape[1])

    # ---------------- Feature branch ----------------
    f = conv(x, "f1", 3, 3)
    f = conv(f, "f2", 4, 4)
    # MaxPool2d(4): window elements on the sublane axis, channels on lanes.
    Nb, Hh, Wh, Ch = f.shape
    Hp, Wp = Hh // 4, Wh // 4
    fp = f[:, :Hp * 4, :Wp * 4, :].reshape(Nb, Hp, 4, Wp, 4, Ch)
    fp = jnp.transpose(fp, (0, 1, 3, 2, 4, 5)).reshape(Nb * Hp * Wp, 16, Ch)
    f = mp(fp).reshape(Nb, Hp, Wp, Ch)
    f = conv(f, "f3", 5, 5)
    feat = bilinear_upsample4(f, mm)          # Upsample(x4, bilinear, align_corners=False)

    # ---------------- Main branch ----------------
    xm = 1.0 - x
    v = xm[:, 8:-8, 8:-8, :]
    dy = xm[:, 9:-7, 8:-8, :] - xm[:, 8:-8, 8:-8, :]      # torch.diff along H
    dx = xm[:, 8:-8, 9:-7, :] - xm[:, 8:-8, 8:-8, :]      # torch.diff along W
    h = jnp.concatenate([v, dy, dx], axis=-1)
    h = conv(h, "m1", 3, 3)
    h = conv(h, "m2", 3, 3)
    h = conv(h, "m3", 3, 3)
    h = conv(h, "m4", 3, 3)

    # ---------------- Upscale head ----------------
    u = jnp.concatenate([h, feat], axis=-1)               # cat([main, feat], C)
    u = conv(u, "u1", 3, 3)
    u = conv(u, "u2", 3, 3)
    y = conv_transpose_polyphase(u, params["ut_wt"], params["ut_b"], mm, fact)
    return jnp.transpose(y, (0, 3, 1, 2))                 # NHWC -> NCHW


# ----------------------------------------------------------------------------
# Independent pure-JAX f32 reference (different algorithmic formulation:
# dense im2col convs at HIGHEST precision, separable-einsum upsample, and the
# zero-dilated + flipped-kernel ConvTranspose).  Validates the restructuring.
# ----------------------------------------------------------------------------
def reference_forward_f32(x_nchw, params):
    x = jnp.transpose(x_nchw, (0, 2, 3, 1)).astype(jnp.float32)
    N = x.shape[0]

    def mmref(a, w, b):
        return jnp.dot(a, w, preferred_element_type=jnp.float32,
                       precision=lax.Precision.HIGHEST) + jnp.reshape(b, (1, -1))

    def conv(h, wmat, b, KH, KW, leaky=True):
        p, Ho, Wo = im2col(h, KH, KW)
        y = mmref(p, wmat, b)
        if leaky:
            y = jnp.where(y >= 0, y, 0.1 * y)
        return y.reshape(N, Ho, Wo, wmat.shape[1])

    f = conv(x, params["f1_w"], params["f1_b"], 3, 3)
    f = conv(f, params["f2_w"], params["f2_b"], 4, 4)
    Nb, Hh, Wh, Ch = f.shape
    Hp, Wp = Hh // 4, Wh // 4
    f = f[:, :Hp * 4, :Wp * 4, :].reshape(Nb, Hp, 4, Wp, 4, Ch).max(axis=(2, 4))
    f = conv(f, params["f3_w"], params["f3_b"], 5, 5)
    _, Hf, Wf, Cf = f.shape
    Mh = jnp.asarray(bilinear_matrix(Hf, 4 * Hf))
    Mw = jnp.asarray(bilinear_matrix(Wf, 4 * Wf))
    feat = jnp.einsum("oh,nhwc->nowc", Mh, f, precision=lax.Precision.HIGHEST)
    feat = jnp.einsum("pw,nowc->nopc", Mw, feat, precision=lax.Precision.HIGHEST)

    xm = 1.0 - x
    v = xm[:, 8:-8, 8:-8, :]
    dy = xm[:, 9:-7, 8:-8, :] - xm[:, 8:-8, 8:-8, :]
    dx = xm[:, 8:-8, 9:-7, :] - xm[:, 8:-8, 8:-8, :]
    h = jnp.concatenate([v, dy, dx], axis=-1)
    h = conv(h, params["m1_w"], params["m1_b"], 3, 3)
    h = conv(h, params["m2_w"], params["m2_b"], 3, 3)
    h = conv(h, params["m3_w"], params["m3_b"], 3, 3)
    h = conv(h, params["m4_w"], params["m4_b"], 3, 3)

    u = jnp.concatenate([h, feat], axis=-1)
    u = conv(u, params["u1_w"], params["u1_b"], 3, 3)
    u = conv(u, params["u2_w"], params["u2_b"], 3, 3)

    # ConvTranspose2d(256,1,4,2,3) == dilate-by-2 + VALID conv with flipped w.
    wt = params["ut_wt"]
    wt_eq = jnp.transpose(wt, (1, 0, 2, 3))[:, :, ::-1, ::-1]    # (1,256,4,4)
    wmat = conv_w_to_mat(wt_eq)                                   # (4096, 1)
    Nu, Hu, Wu, Cu = u.shape
    ud = jnp.zeros((Nu, 2 * Hu - 1, 2 * Wu - 1, Cu), u.dtype)
    ud = ud.at[:, ::2, ::2, :].set(u)
    p, Ho2, Wo2 = im2col(ud, 4, 4)
    y = mmref(p, wmat, params["ut_b"]).reshape(Nu, Ho2, Wo2, 1)
    y = 0.5 - 0.55 * jnp.tanh(y)
    return jnp.transpose(y, (0, 3, 1, 2))


# ----------------------------------------------------------------------------
if __name__ == "__main__":
    key = jax.random.PRNGKey(0)
    kx, kp = jax.random.split(key)

    # Smallest valid input for this architecture: H, W multiple of 4 and >= 32.
    x = jax.random.uniform(kx, (2, 1, 32, 32), dtype=jnp.float32)
    params = make_params(kp)

    fwd = jax.jit(functools.partial(upconv7_forward, use_pallas=True))
    y = jax.block_until_ready(fwd(x, params))
    assert y.shape == (2, 1, 4, 4), y.shape

    # 1) Matched-precision jnp path (same bf16 math): validates kernel plumbing.
    y_jnp = jax.block_until_ready(upconv7_forward(x, params, use_pallas=False))
    err_kernel = float(jnp.max(jnp.abs(y - y_jnp)))
    assert err_kernel < 1e-3, f"Pallas vs matched-jnp mismatch: {err_kernel}"

    # 2) Independent f32 reference (different algorithmic route): validates the
    #    separable-upsample / polyphase-ConvTranspose restructuring.
    y_ref = jax.block_until_ready(reference_forward_f32(x, params))
    err_algo = float(jnp.max(jnp.abs(y - y_ref)))
    assert err_algo < 5e-2, f"Pallas vs f32 reference mismatch: {err_algo}"

    print("KERNEL_OK")
</pallas_src>

<mosaic_0001>
module attributes {stable_mosaic.version = 11 : i64} {
  func.func @_matmul_act_kernel(%arg0: i32, %arg1: i32, %arg2: i32, %arg3: memref<512x128xbf16, #tpu.memory_space<vmem>>, %arg4: memref<128x128xbf16, #tpu.memory_space<vmem>>, %arg5: memref<1x128xf32, #tpu.memory_space<vmem>>, %arg6: memref<512x128xbf16, #tpu.memory_space<vmem>>, %arg7: memref<512x128xf32, #tpu.memory_space<vmem>>) attributes {dimension_semantics = [#tpu.dimension_semantics<parallel>, #tpu.dimension_semantics<parallel>, #tpu.dimension_semantics<arbitrary>], iteration_bounds = array<i64: 4, 1, 1>, scalar_prefetch = 0 : i64, scratch_operands = 1 : i64, tpu.core_type = #tpu.core_type<tc>, window_params = [{transform_indices = @transform_0, window_bounds = array<i64: 512, 128>}, {transform_indices = @transform_1, window_bounds = array<i64: 128, 128>}, {transform_indices = @transform_2, window_bounds = array<i64: 1, 128>}, {transform_indices = @transform_3, window_bounds = array<i64: 512, 128>}]} {
    %c0_i32 = arith.constant 0 : i32
    %0 = arith.cmpi eq, %arg2, %c0_i32 : i32
    %1 = arith.extui %0 : i1 to i32
    %c0_i32_0 = arith.constant 0 : i32
    %2 = arith.cmpi ne, %1, %c0_i32_0 : i32
    scf.if %2 {
      %cst_10 = arith.constant 0.000000e+00 : f32
      %12 = vector.broadcast %cst_10 : f32 to vector<512x128xf32>
      %c0_11 = arith.constant 0 : index
      %c0_12 = arith.constant 0 : index
      %13 = vector.load %arg7[%c0_11, %c0_12] : memref<512x128xf32, #tpu.memory_space<vmem>>, vector<512x128xf32>
      tpu.vector_store %arg7[%c0_11, %c0_12], %12 {strides = array<i32>} : memref<512x128xf32, #tpu.memory_space<vmem>>, vector<512x128xf32>,
    } else {
    }
    %c0 = arith.constant 0 : index
    %c0_1 = arith.constant 0 : index
    %3 = vector.load %arg7[%c0, %c0_1] : memref<512x128xf32, #tpu.memory_space<vmem>>, vector<512x128xf32>
    %c0_2 = arith.constant 0 : index
    %c0_3 = arith.constant 0 : index
    %4 = vector.load %arg3[%c0_2, %c0_3] : memref<512x128xbf16, #tpu.memory_space<vmem>>, vector<512x128xbf16>
    %c0_4 = arith.constant 0 : index
    %c0_5 = arith.constant 0 : index
    %5 = vector.load %arg4[%c0_4, %c0_5] : memref<128x128xbf16, #tpu.memory_space<vmem>>, vector<128x128xbf16>
    %cst = arith.constant dense<0.000000e+00> : vector<512x128xf32>
    %6 = tpu.matmul %4, %5, %cst {dimension_numbers = #tpu.dot_dimension_numbers<[1], [0], [0], [1], [0, 0, 1, 1], [], []>} : vector<512x128xbf16>, vector<128x128xbf16>, vector<512x128xf32> -> vector<512x128xf32>
    %7 = arith.addf %3, %6 : vector<512x128xf32>
    %c0_6 = arith.constant 0 : index
    %c0_7 = arith.constant 0 : index
    %8 = vector.load %arg7[%c0_6, %c0_7] : memref<512x128xf32, #tpu.memory_space<vmem>>, vector<512x128xf32>
    tpu.vector_store %arg7[%c0_6, %c0_7], %7 {strides = array<i32>} : memref<512x128xf32, #tpu.memory_space<vmem>>, vector<512x128xf32>,
    %c0_i32_8 = arith.constant 0 : i32
    %9 = arith.cmpi eq, %arg2, %c0_i32_8 : i32
    %10 = arith.extui %9 : i1 to i32
    %c0_i32_9 = arith.constant 0 : i32
    %11 = arith.cmpi ne, %10, %c0_i32_9 : i32
    scf.if %11 {
      %c0_10 = arith.constant 0 : index
      %c0_11 = arith.constant 0 : index
      %12 = vector.load %arg7[%c0_10, %c0_11] : memref<512x128xf32, #tpu.memory_space<vmem>>, vector<512x128xf32>
      %c0_12 = arith.constant 0 : index
      %c0_13 = arith.constant 0 : index
      %13 = vector.load %arg5[%c0_12, %c0_13] : memref<1x128xf32, #tpu.memory_space<vmem>>, vector<1x128xf32>
      %14 = vector.broadcast %13 : vector<1x128xf32> to vector<512x128xf32>
      %15 = arith.addf %12, %14 : vector<512x128xf32>
      %cst_14 = arith.constant 0.000000e+00 : f32
      %16 = vector.broadcast %cst_14 : f32 to vector<512x128xf32>
      %17 = arith.cmpf oge, %15, %16 : vector<512x128xf32>
      %cst_15 = arith.constant 1.000000e-01 : f32
      %18 = vector.broadcast %cst_15 : f32 to vector<512x128xf32>
      %19 = arith.mulf %18, %15 : vector<512x128xf32>
      %20 = arith.select %17, %15, %19 : vector<512x128xi1>, vector<512x128xf32>
      %21 = arith.truncf %20 : vector<512x128xf32> to vector<512x128xbf16>
      %c0_16 = arith.constant 0 : index
      %c0_17 = arith.constant 0 : index
      %22 = vector.load %arg6[%c0_16, %c0_17] : memref<512x128xbf16, #tpu.memory_space<vmem>>, vector<512x128xbf16>
      tpu.vector_store %arg6[%c0_16, %c0_17], %21 {strides = array<i32>} : memref<512x128xbf16, #tpu.memory_space<vmem>>, vector<512x128xbf16>,
    } else {
    }
    return
  }
  func.func @transform_0(%arg0: i32, %arg1: i32, %arg2: i32) -> (i32, i32) {
    %c0_i32 = arith.constant 0 : i32
    return %arg0, %arg2 : i32, i32
  }
  func.func @transform_1(%arg0: i32, %arg1: i32, %arg2: i32) -> (i32, i32) {
    %c0_i32 = arith.constant 0 : i32
    return %arg2, %arg1 : i32, i32
  }
  func.func @transform_2(%arg0: i32, %arg1: i32, %arg2: i32) -> (i32, i32) {
    %c0_i32 = arith.constant 0 : i32
    %c0_i32_0 = arith.constant 0 : i32
    return %c0_i32, %arg1 : i32, i32
  }
  func.func @transform_3(%arg0: i32, %arg1: i32, %arg2: i32) -> (i32, i32) {
    %c0_i32 = arith.constant 0 : i32
    return %arg0, %arg1 : i32, i32
  }
}

module attributes {stable_mosaic.version = 11 : i64} {
  func.func @_matmul_act_kernel(%arg0: i32, %arg1: i32, %arg2: i32, %arg3: memref<512x256xbf16, #tpu.memory_space<vmem>>, %arg4: memref<256x128xbf16, #tpu.memory_space<vmem>>, %arg5: memref<1x128xf32, #tpu.memory_space<vmem>>, %arg6: memref<512x128xbf16, #tpu.memory_space<vmem>>, %arg7: memref<512x128xf32, #tpu.memory_space<vmem>>) attributes {dimension_semantics = [#tpu.dimension_semantics<parallel>, #tpu.dimension_semantics<parallel>, #tpu.dimension_semantics<arbitrary>], iteration_bounds = array<i64: 3, 1, 1>, scalar_prefetch = 0 : i64, scratch_operands = 1 : i64, tpu.core_type = #tpu.core_type<tc>, window_params = [{transform_indices = @transform_0, window_bounds = array<i64: 512, 256>}, {transform_indices = @transform_1, window_bounds = array<i64: 256, 128>}, {transform_indices = @transform_2, window_bounds = array<i64: 1, 128>}, {transform_indices = @transform_3, window_bounds = array<i64: 512, 128>}]} {
    %c0_i32 = arith.constant 0 : i32
    %0 = arith.cmpi eq, %arg2, %c0_i32 : i32
    %1 = arith.extui %0 : i1 to i32
    %c0_i32_0 = arith.constant 0 : i32
    %2 = arith.cmpi ne, %1, %c0_i32_0 : i32
    scf.if %2 {
      %cst_10 = arith.constant 0.000000e+00 : f32
      %12 = vector.broadcast %cst_10 : f32 to vector<512x128xf32>
      %c0_11 = arith.constant 0 : index
      %c0_12 = arith.constant 0 : index
      %13 = vector.load %arg7[%c0_11, %c0_12] : memref<512x128xf32, #tpu.memory_space<vmem>>, vector<512x128xf32>
      tpu.vector_store %arg7[%c0_11, %c0_12], %12 {strides = array<i32>} : memref<512x128xf32, #tpu.memory_space<vmem>>, vector<512x128xf32>,
    } else {
    }
    %c0 = arith.constant 0 : index
    %c0_1 = arith.constant 0 : index
    %3 = vector.load %arg7[%c0, %c0_1] : memref<512x128xf32, #tpu.memory_space<vmem>>, vector<512x128xf32>
    %c0_2 = arith.constant 0 : index
    %c0_3 = arith.constant 0 : index
    %4 = vector.load %arg3[%c0_2, %c0_3] : memref<512x256xbf16, #tpu.memory_space<vmem>>, vector<512x256xbf16>
    %c0_4 = arith.constant 0 : index
    %c0_5 = arith.constant 0 : index
    %5 = vector.load %arg4[%c0_4, %c0_5] : memref<256x128xbf16, #tpu.memory_space<vmem>>, vector<256x128xbf16>
    %cst = arith.constant dense<0.000000e+00> : vector<512x128xf32>
    %6 = tpu.matmul %4, %5, %cst {dimension_numbers = #tpu.dot_dimension_numbers<[1], [0], [0], [1], [0, 0, 1, 1], [], []>} : vector<512x256xbf16>, vector<256x128xbf16>, vector<512x128xf32> -> vector<512x128xf32>
    %7 = arith.addf %3, %6 : vector<512x128xf32>
    %c0_6 = arith.constant 0 : index
    %c0_7 = arith.constant 0 : index
    %8 = vector.load %arg7[%c0_6, %c0_7] : memref<512x128xf32, #tpu.memory_space<vmem>>, vector<512x128xf32>
    tpu.vector_store %arg7[%c0_6, %c0_7], %7 {strides = array<i32>} : memref<512x128xf32, #tpu.memory_space<vmem>>, vector<512x128xf32>,
    %c0_i32_8 = arith.constant 0 : i32
    %9 = arith.cmpi eq, %arg2, %c0_i32_8 : i32
    %10 = arith.extui %9 : i1 to i32
    %c0_i32_9 = arith.constant 0 : i32
    %11 = arith.cmpi ne, %10, %c0_i32_9 : i32
    scf.if %11 {
      %c0_10 = arith.constant 0 : index
      %c0_11 = arith.constant 0 : index
      %12 = vector.load %arg7[%c0_10, %c0_11] : memref<512x128xf32, #tpu.memory_space<vmem>>, vector<512x128xf32>
      %c0_12 = arith.constant 0 : index
      %c0_13 = arith.constant 0 : index
      %13 = vector.load %arg5[%c0_12, %c0_13] : memref<1x128xf32, #tpu.memory_space<vmem>>, vector<1x128xf32>
      %14 = vector.broadcast %13 : vector<1x128xf32> to vector<512x128xf32>
      %15 = arith.addf %12, %14 : vector<512x128xf32>
      %cst_14 = arith.constant 0.000000e+00 : f32
      %16 = vector.broadcast %cst_14 : f32 to vector<512x128xf32>
      %17 = arith.cmpf oge, %15, %16 : vector<512x128xf32>
      %cst_15 = arith.constant 1.000000e-01 : f32
      %18 = vector.broadcast %cst_15 : f32 to vector<512x128xf32>
      %19 = arith.mulf %18, %15 : vector<512x128xf32>
      %20 = arith.select %17, %15, %19 : vector<512x128xi1>, vector<512x128xf32>
      %21 = arith.truncf %20 : vector<512x128xf32> to vector<512x128xbf16>
      %c0_16 = arith.constant 0 : index
      %c0_17 = arith.constant 0 : index
      %22 = vector.load %arg6[%c0_16, %c0_17] : memref<512x128xbf16, #tpu.memory_space<vmem>>, vector<512x128xbf16>
      tpu.vector_store %arg6[%c0_16, %c0_17], %21 {strides = array<i32>} : memref<512x128xbf16, #tpu.memory_space<vmem>>, vector<512x128xbf16>,
    } else {
    }
    return
  }
  func.func @transform_0(%arg0: i32, %arg1: i32, %arg2: i32) -> (i32, i32) {
    %c0_i32 = arith.constant 0 : i32
    return %arg0, %arg2 : i32, i32
  }
  func.func @transform_1(%arg0: i32, %arg1: i32, %arg2: i32) -> (i32, i32) {
    %c0_i32 = arith.constant 0 : i32
    return %arg2, %arg1 : i32, i32
  }
  func.func @transform_2(%arg0: i32, %arg1: i32, %arg2: i32) -> (i32, i32) {
    %c0_i32 = arith.constant 0 : i32
    %c0_i32_0 = arith.constant 0 : i32
    return %c0_i32, %arg1 : i32, i32
  }
  func.func @transform_3(%arg0: i32, %arg1: i32, %arg2: i32) -> (i32, i32) {
    %c0_i32 = arith.constant 0 : i32
    return %arg0, %arg1 : i32, i32
  }
}

module attributes {stable_mosaic.version = 11 : i64} {
  func.func @_maxpool_kernel(%arg0: i32, %arg1: memref<80x16x64xbf16, #tpu.memory_space<vmem>>, %arg2: memref<80x64xbf16, #tpu.memory_space<vmem>>) attributes {dimension_semantics = [#tpu.dimension_semantics<parallel>], iteration_bounds = array<i64: 1>, scalar_prefetch = 0 : i64, scratch_operands = 0 : i64, tpu.core_type = #tpu.core_type<tc>, window_params = [{transform_indices = @transform_0, window_bounds = array<i64: 80, 16, 64>}, {transform_indices = @transform_1, window_bounds = array<i64: 80, 64>}]} {
    %c0 = arith.constant 0 : index
    %c0_0 = arith.constant 0 : index
    %c0_1 = arith.constant 0 : index
    %0 = vector.load %arg1[%c0, %c0_0, %c0_1] : memref<80x16x64xbf16, #tpu.memory_space<vmem>>, vector<80x16x64xbf16>
    %cst = arith.constant dense<0xFF80> : vector<80x64xbf16>
    %1 = vector.multi_reduction <maximumf>, %0, %cst [1] : vector<80x16x64xbf16> to vector<80x64xbf16>
    %c0_2 = arith.constant 0 : index
    %c0_3 = arith.constant 0 : index
    %2 = vector.load %arg2[%c0_2, %c0_3] : memref<80x64xbf16, #tpu.memory_space<vmem>>, vector<80x64xbf16>
    tpu.vector_store %arg2[%c0_2, %c0_3], %1 {strides = array<i32>} : memref<80x64xbf16, #tpu.memory_space<vmem>>, vector<80x64xbf16>,
    return
  }
  func.func @transform_0(%arg0: i32) -> (i32, i32, i32) {
    %c0_i32 = arith.constant 0 : i32
    %c0_i32_0 = arith.constant 0 : i32
    %c0_i32_1 = arith.constant 0 : i32
    return %arg0, %c0_i32, %c0_i32_0 : i32, i32, i32
  }
  func.func @transform_1(%arg0: i32) -> (i32, i32) {
    %c0_i32 = arith.constant 0 : i32
    %c0_i32_0 = arith.constant 0 : i32
    return %arg0, %c0_i32 : i32, i32
  }
}

module attributes {stable_mosaic.version = 11 : i64} {
  func.func @_matmul_act_kernel(%arg0: i32, %arg1: i32, %arg2: i32, %arg3: memref<16x512xbf16, #tpu.memory_space<vmem>>, %arg4: memref<512x256xbf16, #tpu.memory_space<vmem>>, %arg5: memref<1x256xf32, #tpu.memory_space<vmem>>, %arg6: memref<16x256xbf16, #tpu.memory_space<vmem>>, %arg7: memref<16x256xf32, #tpu.memory_space<vmem>>) attributes {dimension_semantics = [#tpu.dimension_semantics<parallel>, #tpu.dimension_semantics<parallel>, #tpu.dimension_semantics<arbitrary>], iteration_bounds = array<i64: 1, 1, 4>, scalar_prefetch = 0 : i64, scratch_operands = 1 : i64, tpu.core_type = #tpu.core_type<tc>, window_params = [{transform_indices = @transform_0, window_bounds = array<i64: 16, 512>}, {transform_indices = @transform_1, window_bounds = array<i64: 512, 256>}, {transform_indices = @transform_2, window_bounds = array<i64: 1, 256>}, {transform_indices = @transform_3, window_bounds = array<i64: 16, 256>}]} {
    %c0_i32 = arith.constant 0 : i32
    %0 = arith.cmpi eq, %arg2, %c0_i32 : i32
    %1 = arith.extui %0 : i1 to i32
    %c0_i32_0 = arith.constant 0 : i32
    %2 = arith.cmpi ne, %1, %c0_i32_0 : i32
    scf.if %2 {
      %cst_9 = arith.constant 0.000000e+00 : f32
      %12 = vector.broadcast %cst_9 : f32 to vector<16x256xf32>
      %c0_10 = arith.constant 0 : index
      %c0_11 = arith.constant 0 : index
      %13 = vector.load %arg7[%c0_10, %c0_11] : memref<16x256xf32, #tpu.memory_space<vmem>>, vector<16x256xf32>
      tpu.vector_store %arg7[%c0_10, %c0_11], %12 {strides = array<i32>} : memref<16x256xf32, #tpu.memory_space<vmem>>, vector<16x256xf32>,
    } else {
    }
    %c0 = arith.constant 0 : index
    %c0_1 = arith.constant 0 : index
    %3 = vector.load %arg7[%c0, %c0_1] : memref<16x256xf32, #tpu.memory_space<vmem>>, vector<16x256xf32>
    %c0_2 = arith.constant 0 : index
    %c0_3 = arith.constant 0 : index
    %4 = vector.load %arg3[%c0_2, %c0_3] : memref<16x512xbf16, #tpu.memory_space<vmem>>, vector<16x512xbf16>
    %c0_4 = arith.constant 0 : index
    %c0_5 = arith.constant 0 : index
    %5 = vector.load %arg4[%c0_4, %c0_5] : memref<512x256xbf16, #tpu.memory_space<vmem>>, vector<512x256xbf16>
    %cst = arith.constant dense<0.000000e+00> : vector<16x256xf32>
    %6 = tpu.matmul %4, %5, %cst {dimension_numbers = #tpu.dot_dimension_numbers<[1], [0], [0], [1], [0, 0, 1, 1], [], []>} : vector<16x512xbf16>, vector<512x256xbf16>, vector<16x256xf32> -> vector<16x256xf32>
    %7 = arith.addf %3, %6 : vector<16x256xf32>
    %c0_6 = arith.constant 0 : index
    %c0_7 = arith.constant 0 : index
    %8 = vector.load %arg7[%c0_6, %c0_7] : memref<16x256xf32, #tpu.memory_space<vmem>>, vector<16x256xf32>
    tpu.vector_store %arg7[%c0_6, %c0_7], %7 {strides = array<i32>} : memref<16x256xf32, #tpu.memory_space<vmem>>, vector<16x256xf32>,
    %c3_i32 = arith.constant 3 : i32
    %9 = arith.cmpi eq, %arg2, %c3_i32 : i32
    %10 = arith.extui %9 : i1 to i32
    %c0_i32_8 = arith.constant 0 : i32
    %11 = arith.cmpi ne, %10, %c0_i32_8 : i32
    scf.if %11 {
      %c0_9 = arith.constant 0 : index
      %c0_10 = arith.constant 0 : index
      %12 = vector.load %arg7[%c0_9, %c0_10] : memref<16x256xf32, #tpu.memory_space<vmem>>, vector<16x256xf32>
      %c0_11 = arith.constant 0 : index
      %c0_12 = arith.constant 0 : index
      %13 = vector.load %arg5[%c0_11, %c0_12] : memref<1x256xf32, #tpu.memory_space<vmem>>, vector<1x256xf32>
      %14 = vector.broadcast %13 : vector<1x256xf32> to vector<16x256xf32>
      %15 = arith.addf %12, %14 : vector<16x256xf32>
      %cst_13 = arith.constant 0.000000e+00 : f32
      %16 = vector.broadcast %cst_13 : f32 to vector<16x256xf32>
      %17 = arith.cmpf oge, %15, %16 : vector<16x256xf32>
      %cst_14 = arith.constant 1.000000e-01 : f32
      %18 = vector.broadcast %cst_14 : f32 to vector<16x256xf32>
      %19 = arith.mulf %18, %15 : vector<16x256xf32>
      %20 = arith.select %17, %15, %19 : vector<16x256xi1>, vector<16x256xf32>
      %21 = arith.truncf %20 : vector<16x256xf32> to vector<16x256xbf16>
      %c0_15 = arith.constant 0 : index
      %c0_16 = arith.constant 0 : index
      %22 = vector.load %arg6[%c0_15, %c0_16] : memref<16x256xbf16, #tpu.memory_space<vmem>>, vector<16x256xbf16>
      tpu.vector_store %arg6[%c0_15, %c0_16], %21 {strides = array<i32>} : memref<16x256xbf16, #tpu.memory_space<vmem>>, vector<16x256xbf16>,
    } else {
    }
    return
  }
  func.func @transform_0(%arg0: i32, %arg1: i32, %arg2: i32) -> (i32, i32) {
    %c0_i32 = arith.constant 0 : i32
    return %arg0, %arg2 : i32, i32
  }
  func.func @transform_1(%arg0: i32, %arg1: i32, %arg2: i32) -> (i32, i32) {
    %c0_i32 = arith.constant 0 : i32
    return %arg2, %arg1 : i32, i32
  }
  func.func @transform_2(%arg0: i32, %arg1: i32, %arg2: i32) -> (i32, i32) {
    %c0_i32 = arith.constant 0 : i32
    %c0_i32_0 = arith.constant 0 : i32
    return %c0_i32, %arg1 : i32, i32
  }
  func.func @transform_3(%arg0: i32, %arg1: i32, %arg2: i32) -> (i32, i32) {
    %c0_i32 = arith.constant 0 : i32
    return %arg0, %arg1 : i32, i32
  }
}

module attributes {stable_mosaic.version = 11 : i64} {
  func.func @_matmul_act_kernel(%arg0: i32, %arg1: i32, %arg2: i32, %arg3: memref<16x128xbf16, #tpu.memory_space<vmem>>, %arg4: memref<128x256xbf16, #tpu.memory_space<vmem>>, %arg5: memref<1x256xf32, #tpu.memory_space<vmem>>, %arg6: memref<16x256xbf16, #tpu.memory_space<vmem>>, %arg7: memref<16x256xf32, #tpu.memory_space<vmem>>) attributes {dimension_semantics = [#tpu.dimension_semantics<parallel>, #tpu.dimension_semantics<parallel>, #tpu.dimension_semantics<arbitrary>], iteration_bounds = array<i64: 1, 4, 1>, scalar_prefetch = 0 : i64, scratch_operands = 1 : i64, tpu.core_type = #tpu.core_type<tc>, window_params = [{transform_indices = @transform_0, window_bounds = array<i64: 16, 128>}, {transform_indices = @transform_1, window_bounds = array<i64: 128, 256>}, {transform_indices = @transform_2, window_bounds = array<i64: 1, 256>}, {transform_indices = @transform_3, window_bounds = array<i64: 16, 256>}]} {
    %c0_i32 = arith.constant 0 : i32
    %0 = arith.cmpi eq, %arg2, %c0_i32 : i32
    %1 = arith.extui %0 : i1 to i32
    %c0_i32_0 = arith.constant 0 : i32
    %2 = arith.cmpi ne, %1, %c0_i32_0 : i32
    scf.if %2 {
      %cst_10 = arith.constant 0.000000e+00 : f32
      %12 = vector.broadcast %cst_10 : f32 to vector<16x256xf32>
      %c0_11 = arith.constant 0 : index
      %c0_12 = arith.constant 0 : index
      %13 = vector.load %arg7[%c0_11, %c0_12] : memref<16x256xf32, #tpu.memory_space<vmem>>, vector<16x256xf32>
      tpu.vector_store %arg7[%c0_11, %c0_12], %12 {strides = array<i32>} : memref<16x256xf32, #tpu.memory_space<vmem>>, vector<16x256xf32>,
    } else {
    }
    %c0 = arith.constant 0 : index
    %c0_1 = arith.constant 0 : index
    %3 = vector.load %arg7[%c0, %c0_1] : memref<16x256xf32, #tpu.memory_space<vmem>>, vector<16x256xf32>
    %c0_2 = arith.constant 0 : index
    %c0_3 = arith.constant 0 : index
    %4 = vector.load %arg3[%c0_2, %c0_3] : memref<16x128xbf16, #tpu.memory_space<vmem>>, vector<16x128xbf16>
    %c0_4 = arith.constant 0 : index
    %c0_5 = arith.constant 0 : index
    %5 = vector.load %arg4[%c0_4, %c0_5] : memref<128x256xbf16, #tpu.memory_space<vmem>>, vector<128x256xbf16>
    %cst = arith.constant dense<0.000000e+00> : vector<16x256xf32>
    %6 = tpu.matmul %4, %5, %cst {dimension_numbers = #tpu.dot_dimension_numbers<[1], [0], [0], [1], [0, 0, 1, 1], [], []>} : vector<16x128xbf16>, vector<128x256xbf16>, vector<16x256xf32> -> vector<16x256xf32>
    %7 = arith.addf %3, %6 : vector<16x256xf32>
    %c0_6 = arith.constant 0 : index
    %c0_7 = arith.constant 0 : index
    %8 = vector.load %arg7[%c0_6, %c0_7] : memref<16x256xf32, #tpu.memory_space<vmem>>, vector<16x256xf32>
    tpu.vector_store %arg7[%c0_6, %c0_7], %7 {strides = array<i32>} : memref<16x256xf32, #tpu.memory_space<vmem>>, vector<16x256xf32>,
    %c0_i32_8 = arith.constant 0 : i32
    %9 = arith.cmpi eq, %arg2, %c0_i32_8 : i32
    %10 = arith.extui %9 : i1 to i32
    %c0_i32_9 = arith.constant 0 : i32
    %11 = arith.cmpi ne, %10, %c0_i32_9 : i32
    scf.if %11 {
      %c0_10 = arith.constant 0 : index
      %c0_11 = arith.constant 0 : index
      %12 = vector.load %arg7[%c0_10, %c0_11] : memref<16x256xf32, #tpu.memory_space<vmem>>, vector<16x256xf32>
      %c0_12 = arith.constant 0 : index
      %c0_13 = arith.constant 0 : index
      %13 = vector.load %arg5[%c0_12, %c0_13] : memref<1x256xf32, #tpu.memory_space<vmem>>, vector<1x256xf32>
      %14 = vector.broadcast %13 : vector<1x256xf32> to vector<16x256xf32>
      %15 = arith.addf %12, %14 : vector<16x256xf32>
      %16 = arith.truncf %15 : vector<16x256xf32> to vector<16x256xbf16>
      %c0_14 = arith.constant 0 : index
      %c0_15 = arith.constant 0 : index
      %17 = vector.load %arg6[%c0_14, %c0_15] : memref<16x256xbf16, #tpu.memory_space<vmem>>, vector<16x256xbf16>
      tpu.vector_store %arg6[%c0_14, %c0_15], %16 {strides = array<i32>} : memref<16x256xbf16, #tpu.memory_space<vmem>>, vector<16x256xbf16>,
    } else {
    }
    return
  }
  func.func @transform_0(%arg0: i32, %arg1: i32, %arg2: i32) -> (i32, i32) {
    %c0_i32 = arith.constant 0 : i32
    return %arg0, %arg2 : i32, i32
  }
  func.func @transform_1(%arg0: i32, %arg1: i32, %arg2: i32) -> (i32, i32) {
    %c0_i32 = arith.constant 0 : i32
    return %arg2, %arg1 : i32, i32
  }
  func.func @transform_2(%arg0: i32, %arg1: i32, %arg2: i32) -> (i32, i32) {
    %c0_i32 = arith.constant 0 : i32
    %c0_i32_0 = arith.constant 0 : i32
    return %c0_i32, %arg1 : i32, i32
  }
  func.func @transform_3(%arg0: i32, %arg1: i32, %arg2: i32) -> (i32, i32) {
    %c0_i32 = arith.constant 0 : i32
    return %arg0, %arg1 : i32, i32
  }
}

module attributes {stable_mosaic.version = 11 : i64} {
  func.func @_matmul_act_kernel(%arg0: i32, %arg1: i32, %arg2: i32, %arg3: memref<16x128xbf16, #tpu.memory_space<vmem>>, %arg4: memref<128x256xbf16, #tpu.memory_space<vmem>>, %arg5: memref<1x256xf32, #tpu.memory_space<vmem>>, %arg6: memref<16x256xbf16, #tpu.memory_space<vmem>>, %arg7: memref<16x256xf32, #tpu.memory_space<vmem>>) attributes {dimension_semantics = [#tpu.dimension_semantics<parallel>, #tpu.dimension_semantics<parallel>, #tpu.dimension_semantics<arbitrary>], iteration_bounds = array<i64: 1, 16, 1>, scalar_prefetch = 0 : i64, scratch_operands = 1 : i64, tpu.core_type = #tpu.core_type<tc>, window_params = [{transform_indices = @transform_0, window_bounds = array<i64: 16, 128>}, {transform_indices = @transform_1, window_bounds = array<i64: 128, 256>}, {transform_indices = @transform_2, window_bounds = array<i64: 1, 256>}, {transform_indices = @transform_3, window_bounds = array<i64: 16, 256>}]} {
    %c0_i32 = arith.constant 0 : i32
    %0 = arith.cmpi eq, %arg2, %c0_i32 : i32
    %1 = arith.extui %0 : i1 to i32
    %c0_i32_0 = arith.constant 0 : i32
    %2 = arith.cmpi ne, %1, %c0_i32_0 : i32
    scf.if %2 {
      %cst_10 = arith.constant 0.000000e+00 : f32
      %12 = vector.broadcast %cst_10 : f32 to vector<16x256xf32>
      %c0_11 = arith.constant 0 : index
      %c0_12 = arith.constant 0 : index
      %13 = vector.load %arg7[%c0_11, %c0_12] : memref<16x256xf32, #tpu.memory_space<vmem>>, vector<16x256xf32>
      tpu.vector_store %arg7[%c0_11, %c0_12], %12 {strides = array<i32>} : memref<16x256xf32, #tpu.memory_space<vmem>>, vector<16x256xf32>,
    } else {
    }
    %c0 = arith.constant 0 : index
    %c0_1 = arith.constant 0 : index
    %3 = vector.load %arg7[%c0, %c0_1] : memref<16x256xf32, #tpu.memory_space<vmem>>, vector<16x256xf32>
    %c0_2 = arith.constant 0 : index
    %c0_3 = arith.constant 0 : index
    %4 = vector.load %arg3[%c0_2, %c0_3] : memref<16x128xbf16, #tpu.memory_space<vmem>>, vector<16x128xbf16>
    %c0_4 = arith.constant 0 : index
    %c0_5 = arith.constant 0 : index
    %5 = vector.load %arg4[%c0_4, %c0_5] : memref<128x256xbf16, #tpu.memory_space<vmem>>, vector<128x256xbf16>
    %cst = arith.constant dense<0.000000e+00> : vector<16x256xf32>
    %6 = tpu.matmul %4, %5, %cst {dimension_numbers = #tpu.dot_dimension_numbers<[1], [0], [0], [1], [0, 0, 1, 1], [], []>} : vector<16x128xbf16>, vector<128x256xbf16>, vector<16x256xf32> -> vector<16x256xf32>
    %7 = arith.addf %3, %6 : vector<16x256xf32>
    %c0_6 = arith.constant 0 : index
    %c0_7 = arith.constant 0 : index
    %8 = vector.load %arg7[%c0_6, %c0_7] : memref<16x256xf32, #tpu.memory_space<vmem>>, vector<16x256xf32>
    tpu.vector_store %arg7[%c0_6, %c0_7], %7 {strides = array<i32>} : memref<16x256xf32, #tpu.memory_space<vmem>>, vector<16x256xf32>,
    %c0_i32_8 = arith.constant 0 : i32
    %9 = arith.cmpi eq, %arg2, %c0_i32_8 : i32
    %10 = arith.extui %9 : i1 to i32
    %c0_i32_9 = arith.constant 0 : i32
    %11 = arith.cmpi ne, %10, %c0_i32_9 : i32
    scf.if %11 {
      %c0_10 = arith.constant 0 : index
      %c0_11 = arith.constant 0 : index
      %12 = vector.load %arg7[%c0_10, %c0_11] : memref<16x256xf32, #tpu.memory_space<vmem>>, vector<16x256xf32>
      %c0_12 = arith.constant 0 : index
      %c0_13 = arith.constant 0 : index
      %13 = vector.load %arg5[%c0_12, %c0_13] : memref<1x256xf32, #tpu.memory_space<vmem>>, vector<1x256xf32>
      %14 = vector.broadcast %13 : vector<1x256xf32> to vector<16x256xf32>
      %15 = arith.addf %12, %14 : vector<16x256xf32>
      %16 = arith.truncf %15 : vector<16x256xf32> to vector<16x256xbf16>
      %c0_14 = arith.constant 0 : index
      %c0_15 = arith.constant 0 : index
      %17 = vector.load %arg6[%c0_14, %c0_15] : memref<16x256xbf16, #tpu.memory_space<vmem>>, vector<16x256xbf16>
      tpu.vector_store %arg6[%c0_14, %c0_15], %16 {strides = array<i32>} : memref<16x256xbf16, #tpu.memory_space<vmem>>, vector<16x256xbf16>,
    } else {
    }
    return
  }
  func.func @transform_0(%arg0: i32, %arg1: i32, %arg2: i32) -> (i32, i32) {
    %c0_i32 = arith.constant 0 : i32
    return %arg0, %arg2 : i32, i32
  }
  func.func @transform_1(%arg0: i32, %arg1: i32, %arg2: i32) -> (i32, i32) {
    %c0_i32 = arith.constant 0 : i32
    return %arg2, %arg1 : i32, i32
  }
  func.func @transform_2(%arg0: i32, %arg1: i32, %arg2: i32) -> (i32, i32) {
    %c0_i32 = arith.constant 0 : i32
    %c0_i32_0 = arith.constant 0 : i32
    return %c0_i32, %arg1 : i32, i32
  }
  func.func @transform_3(%arg0: i32, %arg1: i32, %arg2: i32) -> (i32, i32) {
    %c0_i32 = arith.constant 0 : i32
    return %arg0, %arg1 : i32, i32
  }
}

module attributes {stable_mosaic.version = 11 : i64} {
  func.func @_matmul_act_kernel(%arg0: i32, %arg1: i32, %arg2: i32, %arg3: memref<400x128xbf16, #tpu.memory_space<vmem>>, %arg4: memref<128x128xbf16, #tpu.memory_space<vmem>>, %arg5: memref<1x128xf32, #tpu.memory_space<vmem>>, %arg6: memref<400x128xbf16, #tpu.memory_space<vmem>>, %arg7: memref<400x128xf32, #tpu.memory_space<vmem>>) attributes {dimension_semantics = [#tpu.dimension_semantics<parallel>, #tpu.dimension_semantics<parallel>, #tpu.dimension_semantics<arbitrary>], iteration_bounds = array<i64: 1, 1, 1>, scalar_prefetch = 0 : i64, scratch_operands = 1 : i64, tpu.core_type = #tpu.core_type<tc>, window_params = [{transform_indices = @transform_0, window_bounds = array<i64: 400, 128>}, {transform_indices = @transform_1, window_bounds = array<i64: 128, 128>}, {transform_indices = @transform_2, window_bounds = array<i64: 1, 128>}, {transform_indices = @transform_3, window_bounds = array<i64: 400, 128>}]} {
    %c0_i32 = arith.constant 0 : i32
    %0 = arith.cmpi eq, %arg2, %c0_i32 : i32
    %1 = arith.extui %0 : i1 to i32
    %c0_i32_0 = arith.constant 0 : i32
    %2 = arith.cmpi ne, %1, %c0_i32_0 : i32
    scf.if %2 {
      %cst_10 = arith.constant 0.000000e+00 : f32
      %12 = vector.broadcast %cst_10 : f32 to vector<400x128xf32>
      %c0_11 = arith.constant 0 : index
      %c0_12 = arith.constant 0 : index
      %13 = vector.load %arg7[%c0_11, %c0_12] : memref<400x128xf32, #tpu.memory_space<vmem>>, vector<400x128xf32>
      tpu.vector_store %arg7[%c0_11, %c0_12], %12 {strides = array<i32>} : memref<400x128xf32, #tpu.memory_space<vmem>>, vector<400x128xf32>,
    } else {
    }
    %c0 = arith.constant 0 : index
    %c0_1 = arith.constant 0 : index
    %3 = vector.load %arg7[%c0, %c0_1] : memref<400x128xf32, #tpu.memory_space<vmem>>, vector<400x128xf32>
    %c0_2 = arith.constant 0 : index
    %c0_3 = arith.constant 0 : index
    %4 = vector.load %arg3[%c0_2, %c0_3] : memref<400x128xbf16, #tpu.memory_space<vmem>>, vector<400x128xbf16>
    %c0_4 = arith.constant 0 : index
    %c0_5 = arith.constant 0 : index
    %5 = vector.load %arg4[%c0_4, %c0_5] : memref<128x128xbf16, #tpu.memory_space<vmem>>, vector<128x128xbf16>
    %cst = arith.constant dense<0.000000e+00> : vector<400x128xf32>
    %6 = tpu.matmul %4, %5, %cst {dimension_numbers = #tpu.dot_dimension_numbers<[1], [0], [0], [1], [0, 0, 1, 1], [], []>} : vector<400x128xbf16>, vector<128x128xbf16>, vector<400x128xf32> -> vector<400x128xf32>
    %7 = arith.addf %3, %6 : vector<400x128xf32>
    %c0_6 = arith.constant 0 : index
    %c0_7 = arith.constant 0 : index
    %8 = vector.load %arg7[%c0_6, %c0_7] : memref<400x128xf32, #tpu.memory_space<vmem>>, vector<400x128xf32>
    tpu.vector_store %arg7[%c0_6, %c0_7], %7 {strides = array<i32>} : memref<400x128xf32, #tpu.memory_space<vmem>>, vector<400x128xf32>,
    %c0_i32_8 = arith.constant 0 : i32
    %9 = arith.cmpi eq, %arg2, %c0_i32_8 : i32
    %10 = arith.extui %9 : i1 to i32
    %c0_i32_9 = arith.constant 0 : i32
    %11 = arith.cmpi ne, %10, %c0_i32_9 : i32
    scf.if %11 {
      %c0_10 = arith.constant 0 : index
      %c0_11 = arith.constant 0 : index
      %12 = vector.load %arg7[%c0_10, %c0_11] : memref<400x128xf32, #tpu.memory_space<vmem>>, vector<400x128xf32>
      %c0_12 = arith.constant 0 : index
      %c0_13 = arith.constant 0 : index
      %13 = vector.load %arg5[%c0_12, %c0_13] : memref<1x128xf32, #tpu.memory_space<vmem>>, vector<1x128xf32>
      %14 = vector.broadcast %13 : vector<1x128xf32> to vector<400x128xf32>
      %15 = arith.addf %12, %14 : vector<400x128xf32>
      %cst_14 = arith.constant 0.000000e+00 : f32
      %16 = vector.broadcast %cst_14 : f32 to vector<400x128xf32>
      %17 = arith.cmpf oge, %15, %16 : vector<400x128xf32>
      %cst_15 = arith.constant 1.000000e-01 : f32
      %18 = vector.broadcast %cst_15 : f32 to vector<400x128xf32>
      %19 = arith.mulf %18, %15 : vector<400x128xf32>
      %20 = arith.select %17, %15, %19 : vector<400x128xi1>, vector<400x128xf32>
      %21 = arith.truncf %20 : vector<400x128xf32> to vector<400x128xbf16>
      %c0_16 = arith.constant 0 : index
      %c0_17 = arith.constant 0 : index
      %22 = vector.load %arg6[%c0_16, %c0_17] : memref<400x128xbf16, #tpu.memory_space<vmem>>, vector<400x128xbf16>
      tpu.vector_store %arg6[%c0_16, %c0_17], %21 {strides = array<i32>} : memref<400x128xbf16, #tpu.memory_space<vmem>>, vector<400x128xbf16>,
    } else {
    }
    return
  }
  func.func @transform_0(%arg0: i32, %arg1: i32, %arg2: i32) -> (i32, i32) {
    %c0_i32 = arith.constant 0 : i32
    return %arg0, %arg2 : i32, i32
  }
  func.func @transform_1(%arg0: i32, %arg1: i32, %arg2: i32) -> (i32, i32) {
    %c0_i32 = arith.constant 0 : i32
    return %arg2, %arg1 : i32, i32
  }
  func.func @transform_2(%arg0: i32, %arg1: i32, %arg2: i32) -> (i32, i32) {
    %c0_i32 = arith.constant 0 : i32
    %c0_i32_0 = arith.constant 0 : i32
    return %c0_i32, %arg1 : i32, i32
  }
  func.func @transform_3(%arg0: i32, %arg1: i32, %arg2: i32) -> (i32, i32) {
    %c0_i32 = arith.constant 0 : i32
    return %arg0, %arg1 : i32, i32
  }
}

module attributes {stable_mosaic.version = 11 : i64} {
  func.func @_matmul_act_kernel(%arg0: i32, %arg1: i32, %arg2: i32, %arg3: memref<288x256xbf16, #tpu.memory_space<vmem>>, %arg4: memref<256x128xbf16, #tpu.memory_space<vmem>>, %arg5: memref<1x128xf32, #tpu.memory_space<vmem>>, %arg6: memref<288x128xbf16, #tpu.memory_space<vmem>>, %arg7: memref<288x128xf32, #tpu.memory_space<vmem>>) attributes {dimension_semantics = [#tpu.dimension_semantics<parallel>, #tpu.dimension_semantics<parallel>, #tpu.dimension_semantics<arbitrary>], iteration_bounds = array<i64: 1, 1, 1>, scalar_prefetch = 0 : i64, scratch_operands = 1 : i64, tpu.core_type = #tpu.core_type<tc>, window_params = [{transform_indices = @transform_0, window_bounds = array<i64: 288, 256>}, {transform_indices = @transform_1, window_bounds = array<i64: 256, 128>}, {transform_indices = @transform_2, window_bounds = array<i64: 1, 128>}, {transform_indices = @transform_3, window_bounds = array<i64: 288, 128>}]} {
    %c0_i32 = arith.constant 0 : i32
    %0 = arith.cmpi eq, %arg2, %c0_i32 : i32
    %1 = arith.extui %0 : i1 to i32
    %c0_i32_0 = arith.constant 0 : i32
    %2 = arith.cmpi ne, %1, %c0_i32_0 : i32
    scf.if %2 {
      %cst_10 = arith.constant 0.000000e+00 : f32
      %12 = vector.broadcast %cst_10 : f32 to vector<288x128xf32>
      %c0_11 = arith.constant 0 : index
      %c0_12 = arith.constant 0 : index
      %13 = vector.load %arg7[%c0_11, %c0_12] : memref<288x128xf32, #tpu.memory_space<vmem>>, vector<288x128xf32>
      tpu.vector_store %arg7[%c0_11, %c0_12], %12 {strides = array<i32>} : memref<288x128xf32, #tpu.memory_space<vmem>>, vector<288x128xf32>,
    } else {
    }
    %c0 = arith.constant 0 : index
    %c0_1 = arith.constant 0 : index
    %3 = vector.load %arg7[%c0, %c0_1] : memref<288x128xf32, #tpu.memory_space<vmem>>, vector<288x128xf32>
    %c0_2 = arith.constant 0 : index
    %c0_3 = arith.constant 0 : index
    %4 = vector.load %arg3[%c0_2, %c0_3] : memref<288x256xbf16, #tpu.memory_space<vmem>>, vector<288x256xbf16>
    %c0_4 = arith.constant 0 : index
    %c0_5 = arith.constant 0 : index
    %5 = vector.load %arg4[%c0_4, %c0_5] : memref<256x128xbf16, #tpu.memory_space<vmem>>, vector<256x128xbf16>
    %cst = arith.constant dense<0.000000e+00> : vector<288x128xf32>
    %6 = tpu.matmul %4, %5, %cst {dimension_numbers = #tpu.dot_dimension_numbers<[1], [0], [0], [1], [0, 0, 1, 1], [], []>} : vector<288x256xbf16>, vector<256x128xbf16>, vector<288x128xf32> -> vector<288x128xf32>
    %7 = arith.addf %3, %6 : vector<288x128xf32>
    %c0_6 = arith.constant 0 : index
    %c0_7 = arith.constant 0 : index
    %8 = vector.load %arg7[%c0_6, %c0_7] : memref<288x128xf32, #tpu.memory_space<vmem>>, vector<288x128xf32>
    tpu.vector_store %arg7[%c0_6, %c0_7], %7 {strides = array<i32>} : memref<288x128xf32, #tpu.memory_space<vmem>>, vector<288x128xf32>,
    %c0_i32_8 = arith.constant 0 : i32
    %9 = arith.cmpi eq, %arg2, %c0_i32_8 : i32
    %10 = arith.extui %9 : i1 to i32
    %c0_i32_9 = arith.constant 0 : i32
    %11 = arith.cmpi ne, %10, %c0_i32_9 : i32
    scf.if %11 {
      %c0_10 = arith.constant 0 : index
      %c0_11 = arith.constant 0 : index
      %12 = vector.load %arg7[%c0_10, %c0_11] : memref<288x128xf32, #tpu.memory_space<vmem>>, vector<288x128xf32>
      %c0_12 = arith.constant 0 : index
      %c0_13 = arith.constant 0 : index
      %13 = vector.load %arg5[%c0_12, %c0_13] : memref<1x128xf32, #tpu.memory_space<vmem>>, vector<1x128xf32>
      %14 = vector.broadcast %13 : vector<1x128xf32> to vector<288x128xf32>
      %15 = arith.addf %12, %14 : vector<288x128xf32>
      %cst_14 = arith.constant 0.000000e+00 : f32
      %16 = vector.broadcast %cst_14 : f32 to vector<288x128xf32>
      %17 = arith.cmpf oge, %15, %16 : vector<288x128xf32>
      %cst_15 = arith.constant 1.000000e-01 : f32
      %18 = vector.broadcast %cst_15 : f32 to vector<288x128xf32>
      %19 = arith.mulf %18, %15 : vector<288x128xf32>
      %20 = arith.select %17, %15, %19 : vector<288x128xi1>, vector<288x128xf32>
      %21 = arith.truncf %20 : vector<288x128xf32> to vector<288x128xbf16>
      %c0_16 = arith.constant 0 : index
      %c0_17 = arith.constant 0 : index
      %22 = vector.load %arg6[%c0_16, %c0_17] : memref<288x128xbf16, #tpu.memory_space<vmem>>, vector<288x128xbf16>
      tpu.vector_store %arg6[%c0_16, %c0_17], %21 {strides = array<i32>} : memref<288x128xbf16, #tpu.memory_space<vmem>>, vector<288x128xbf16>,
    } else {
    }
    return
  }
  func.func @transform_0(%arg0: i32, %arg1: i32, %arg2: i32) -> (i32, i32) {
    %c0_i32 = arith.constant 0 : i32
    return %arg0, %arg2 : i32, i32
  }
  func.func @transform_1(%arg0: i32, %arg1: i32, %arg2: i32) -> (i32, i32) {
    %c0_i32 = arith.constant 0 : i32
    return %arg2, %arg1 : i32, i32
  }
  func.func @transform_2(%arg0: i32, %arg1: i32, %arg2: i32) -> (i32, i32) {
    %c0_i32 = arith.constant 0 : i32
    %c0_i32_0 = arith.constant 0 : i32
    return %c0_i32, %arg1 : i32, i32
  }
  func.func @transform_3(%arg0: i32, %arg1: i32, %arg2: i32) -> (i32, i32) {
    %c0_i32 = arith.constant 0 : i32
    return %arg0, %arg1 : i32, i32
  }
}

module attributes {stable_mosaic.version = 11 : i64} {
  func.func @_matmul_act_kernel(%arg0: i32, %arg1: i32, %arg2: i32, %arg3: memref<208x384xbf16, #tpu.memory_space<vmem>>, %arg4: memref<384x128xbf16, #tpu.memory_space<vmem>>, %arg5: memref<1x128xf32, #tpu.memory_space<vmem>>, %arg6: memref<208x128xbf16, #tpu.memory_space<vmem>>, %arg7: memref<208x128xf32, #tpu.memory_space<vmem>>) attributes {dimension_semantics = [#tpu.dimension_semantics<parallel>, #tpu.dimension_semantics<parallel>, #tpu.dimension_semantics<arbitrary>], iteration_bounds = array<i64: 1, 1, 1>, scalar_prefetch = 0 : i64, scratch_operands = 1 : i64, tpu.core_type = #tpu.core_type<tc>, window_params = [{transform_indices = @transform_0, window_bounds = array<i64: 208, 384>}, {transform_indices = @transform_1, window_bounds = array<i64: 384, 128>}, {transform_indices = @transform_2, window_bounds = array<i64: 1, 128>}, {transform_indices = @transform_3, window_bounds = array<i64: 208, 128>}]} {
    %c0_i32 = arith.constant 0 : i32
    %0 = arith.cmpi eq, %arg2, %c0_i32 : i32
    %1 = arith.extui %0 : i1 to i32
    %c0_i32_0 = arith.constant 0 : i32
    %2 = arith.cmpi ne, %1, %c0_i32_0 : i32
    scf.if %2 {
      %cst_10 = arith.constant 0.000000e+00 : f32
      %12 = vector.broadcast %cst_10 : f32 to vector<208x128xf32>
      %c0_11 = arith.constant 0 : index
      %c0_12 = arith.constant 0 : index
      %13 = vector.load %arg7[%c0_11, %c0_12] : memref<208x128xf32, #tpu.memory_space<vmem>>, vector<208x128xf32>
      tpu.vector_store %arg7[%c0_11, %c0_12], %12 {strides = array<i32>} : memref<208x128xf32, #tpu.memory_space<vmem>>, vector<208x128xf32>,
    } else {
    }
    %c0 = arith.constant 0 : index
    %c0_1 = arith.constant 0 : index
    %3 = vector.load %arg7[%c0, %c0_1] : memref<208x128xf32, #tpu.memory_space<vmem>>, vector<208x128xf32>
    %c0_2 = arith.constant 0 : index
    %c0_3 = arith.constant 0 : index
    %4 = vector.load %arg3[%c0_2, %c0_3] : memref<208x384xbf16, #tpu.memory_space<vmem>>, vector<208x384xbf16>
    %c0_4 = arith.constant 0 : index
    %c0_5 = arith.constant 0 : index
    %5 = vector.load %arg4[%c0_4, %c0_5] : memref<384x128xbf16, #tpu.memory_space<vmem>>, vector<384x128xbf16>
    %cst = arith.constant dense<0.000000e+00> : vector<208x128xf32>
    %6 = tpu.matmul %4, %5, %cst {dimension_numbers = #tpu.dot_dimension_numbers<[1], [0], [0], [1], [0, 0, 1, 1], [], []>} : vector<208x384xbf16>, vector<384x128xbf16>, vector<208x128xf32> -> vector<208x128xf32>
    %7 = arith.addf %3, %6 : vector<208x128xf32>
    %c0_6 = arith.constant 0 : index
    %c0_7 = arith.constant 0 : index
    %8 = vector.load %arg7[%c0_6, %c0_7] : memref<208x128xf32, #tpu.memory_space<vmem>>, vector<208x128xf32>
    tpu.vector_store %arg7[%c0_6, %c0_7], %7 {strides = array<i32>} : memref<208x128xf32, #tpu.memory_space<vmem>>, vector<208x128xf32>,
    %c0_i32_8 = arith.constant 0 : i32
    %9 = arith.cmpi eq, %arg2, %c0_i32_8 : i32
    %10 = arith.extui %9 : i1 to i32
    %c0_i32_9 = arith.constant 0 : i32
    %11 = arith.cmpi ne, %10, %c0_i32_9 : i32
    scf.if %11 {
      %c0_10 = arith.constant 0 : index
      %c0_11 = arith.constant 0 : index
      %12 = vector.load %arg7[%c0_10, %c0_11] : memref<208x128xf32, #tpu.memory_space<vmem>>, vector<208x128xf32>
      %c0_12 = arith.constant 0 : index
      %c0_13 = arith.constant 0 : index
      %13 = vector.load %arg5[%c0_12, %c0_13] : memref<1x128xf32, #tpu.memory_space<vmem>>, vector<1x128xf32>
      %14 = vector.broadcast %13 : vector<1x128xf32> to vector<208x128xf32>
      %15 = arith.addf %12, %14 : vector<208x128xf32>
      %cst_14 = arith.constant 0.000000e+00 : f32
      %16 = vector.broadcast %cst_14 : f32 to vector<208x128xf32>
      %17 = arith.cmpf oge, %15, %16 : vector<208x128xf32>
      %cst_15 = arith.constant 1.000000e-01 : f32
      %18 = vector.broadcast %cst_15 : f32 to vector<208x128xf32>
      %19 = arith.mulf %18, %15 : vector<208x128xf32>
      %20 = arith.select %17, %15, %19 : vector<208x128xi1>, vector<208x128xf32>
      %21 = arith.truncf %20 : vector<208x128xf32> to vector<208x128xbf16>
      %c0_16 = arith.constant 0 : index
      %c0_17 = arith.constant 0 : index
      %22 = vector.load %arg6[%c0_16, %c0_17] : memref<208x128xbf16, #tpu.memory_space<vmem>>, vector<208x128xbf16>
      tpu.vector_store %arg6[%c0_16, %c0_17], %21 {strides = array<i32>} : memref<208x128xbf16, #tpu.memory_space<vmem>>, vector<208x128xbf16>,
    } else {
    }
    return
  }
  func.func @transform_0(%arg0: i32, %arg1: i32, %arg2: i32) -> (i32, i32) {
    %c0_i32 = arith.constant 0 : i32
    return %arg0, %arg2 : i32, i32
  }
  func.func @transform_1(%arg0: i32, %arg1: i32, %arg2: i32) -> (i32, i32) {
    %c0_i32 = arith.constant 0 : i32
    return %arg2, %arg1 : i32, i32
  }
  func.func @transform_2(%arg0: i32, %arg1: i32, %arg2: i32) -> (i32, i32) {
    %c0_i32 = arith.constant 0 : i32
    %c0_i32_0 = arith.constant 0 : i32
    return %c0_i32, %arg1 : i32, i32
  }
  func.func @transform_3(%arg0: i32, %arg1: i32, %arg2: i32) -> (i32, i32) {
    %c0_i32 = arith.constant 0 : i32
    return %arg0, %arg1 : i32, i32
  }
}

module attributes {stable_mosaic.version = 11 : i64} {
  func.func @_matmul_act_kernel(%arg0: i32, %arg1: i32, %arg2: i32, %arg3: memref<128x512xbf16, #tpu.memory_space<vmem>>, %arg4: memref<512x128xbf16, #tpu.memory_space<vmem>>, %arg5: memref<1x128xf32, #tpu.memory_space<vmem>>, %arg6: memref<128x128xbf16, #tpu.memory_space<vmem>>, %arg7: memref<128x128xf32, #tpu.memory_space<vmem>>) attributes {dimension_semantics = [#tpu.dimension_semantics<parallel>, #tpu.dimension_semantics<parallel>, #tpu.dimension_semantics<arbitrary>], iteration_bounds = array<i64: 1, 1, 2>, scalar_prefetch = 0 : i64, scratch_operands = 1 : i64, tpu.core_type = #tpu.core_type<tc>, window_params = [{transform_indices = @transform_0, window_bounds = array<i64: 128, 512>}, {transform_indices = @transform_1, window_bounds = array<i64: 512, 128>}, {transform_indices = @transform_2, window_bounds = array<i64: 1, 128>}, {transform_indices = @transform_3, window_bounds = array<i64: 128, 128>}]} {
    %c0_i32 = arith.constant 0 : i32
    %0 = arith.cmpi eq, %arg2, %c0_i32 : i32
    %1 = arith.extui %0 : i1 to i32
    %c0_i32_0 = arith.constant 0 : i32
    %2 = arith.cmpi ne, %1, %c0_i32_0 : i32
    scf.if %2 {
      %cst_9 = arith.constant 0.000000e+00 : f32
      %12 = vector.broadcast %cst_9 : f32 to vector<128x128xf32>
      %c0_10 = arith.constant 0 : index
      %c0_11 = arith.constant 0 : index
      %13 = vector.load %arg7[%c0_10, %c0_11] : memref<128x128xf32, #tpu.memory_space<vmem>>, vector<128x128xf32>
      tpu.vector_store %arg7[%c0_10, %c0_11], %12 {strides = array<i32>} : memref<128x128xf32, #tpu.memory_space<vmem>>, vector<128x128xf32>,
    } else {
    }
    %c0 = arith.constant 0 : index
    %c0_1 = arith.constant 0 : index
    %3 = vector.load %arg7[%c0, %c0_1] : memref<128x128xf32, #tpu.memory_space<vmem>>, vector<128x128xf32>
    %c0_2 = arith.constant 0 : index
    %c0_3 = arith.constant 0 : index
    %4 = vector.load %arg3[%c0_2, %c0_3] : memref<128x512xbf16, #tpu.memory_space<vmem>>, vector<128x512xbf16>
    %c0_4 = arith.constant 0 : index
    %c0_5 = arith.constant 0 : index
    %5 = vector.load %arg4[%c0_4, %c0_5] : memref<512x128xbf16, #tpu.memory_space<vmem>>, vector<512x128xbf16>
    %cst = arith.constant dense<0.000000e+00> : vector<128x128xf32>
    %6 = tpu.matmul %4, %5, %cst {dimension_numbers = #tpu.dot_dimension_numbers<[1], [0], [0], [1], [0, 0, 1, 1], [], []>} : vector<128x512xbf16>, vector<512x128xbf16>, vector<128x128xf32> -> vector<128x128xf32>
    %7 = arith.addf %3, %6 : vector<128x128xf32>
    %c0_6 = arith.constant 0 : index
    %c0_7 = arith.constant 0 : index
    %8 = vector.load %arg7[%c0_6, %c0_7] : memref<128x128xf32, #tpu.memory_space<vmem>>, vector<128x128xf32>
    tpu.vector_store %arg7[%c0_6, %c0_7], %7 {strides = array<i32>} : memref<128x128xf32, #tpu.memory_space<vmem>>, vector<128x128xf32>,
    %c1_i32 = arith.constant 1 : i32
    %9 = arith.cmpi eq, %arg2, %c1_i32 : i32
    %10 = arith.extui %9 : i1 to i32
    %c0_i32_8 = arith.constant 0 : i32
    %11 = arith.cmpi ne, %10, %c0_i32_8 : i32
    scf.if %11 {
      %c0_9 = arith.constant 0 : index
      %c0_10 = arith.constant 0 : index
      %12 = vector.load %arg7[%c0_9, %c0_10] : memref<128x128xf32, #tpu.memory_space<vmem>>, vector<128x128xf32>
      %c0_11 = arith.constant 0 : index
      %c0_12 = arith.constant 0 : index
      %13 = vector.load %arg5[%c0_11, %c0_12] : memref<1x128xf32, #tpu.memory_space<vmem>>, vector<1x128xf32>
      %14 = vector.broadcast %13 : vector<1x128xf32> to vector<128x128xf32>
      %15 = arith.addf %12, %14 : vector<128x128xf32>
      %cst_13 = arith.constant 0.000000e+00 : f32
      %16 = vector.broadcast %cst_13 : f32 to vector<128x128xf32>
      %17 = arith.cmpf oge, %15, %16 : vector<128x128xf32>
      %cst_14 = arith.constant 1.000000e-01 : f32
      %18 = vector.broadcast %cst_14 : f32 to vector<128x128xf32>
      %19 = arith.mulf %18, %15 : vector<128x128xf32>
      %20 = arith.select %17, %15, %19 : vector<128x128xi1>, vector<128x128xf32>
      %21 = arith.truncf %20 : vector<128x128xf32> to vector<128x128xbf16>
      %c0_15 = arith.constant 0 : index
      %c0_16 = arith.constant 0 : index
      %22 = vector.load %arg6[%c0_15, %c0_16] : memref<128x128xbf16, #tpu.memory_space<vmem>>, vector<128x128xbf16>
      tpu.vector_store %arg6[%c0_15, %c0_16], %21 {strides = array<i32>} : memref<128x128xbf16, #tpu.memory_space<vmem>>, vector<128x128xbf16>,
    } else {
    }
    return
  }
  func.func @transform_0(%arg0: i32, %arg1: i32, %arg2: i32) -> (i32, i32) {
    %c0_i32 = arith.constant 0 : i32
    return %arg0, %arg2 : i32, i32
  }
  func.func @transform_1(%arg0: i32, %arg1: i32, %arg2: i32) -> (i32, i32) {
    %c0_i32 = arith.constant 0 : i32
    return %arg2, %arg1 : i32, i32
  }
  func.func @transform_2(%arg0: i32, %arg1: i32, %arg2: i32) -> (i32, i32) {
    %c0_i32 = arith.constant 0 : i32
    %c0_i32_0 = arith.constant 0 : i32
    return %c0_i32, %arg1 : i32, i32
  }
  func.func @transform_3(%arg0: i32, %arg1: i32, %arg2: i32) -> (i32, i32) {
    %c0_i32 = arith.constant 0 : i32
    return %arg0, %arg1 : i32, i32
  }
}

module attributes {stable_mosaic.version = 11 : i64} {
  func.func @_matmul_act_kernel(%arg0: i32, %arg1: i32, %arg2: i32, %arg3: memref<80x512xbf16, #tpu.memory_space<vmem>>, %arg4: memref<512x256xbf16, #tpu.memory_space<vmem>>, %arg5: memref<1x256xf32, #tpu.memory_space<vmem>>, %arg6: memref<80x256xbf16, #tpu.memory_space<vmem>>, %arg7: memref<80x256xf32, #tpu.memory_space<vmem>>) attributes {dimension_semantics = [#tpu.dimension_semantics<parallel>, #tpu.dimension_semantics<parallel>, #tpu.dimension_semantics<arbitrary>], iteration_bounds = array<i64: 1, 1, 7>, scalar_prefetch = 0 : i64, scratch_operands = 1 : i64, tpu.core_type = #tpu.core_type<tc>, window_params = [{transform_indices = @transform_0, window_bounds = array<i64: 80, 512>}, {transform_indices = @transform_1, window_bounds = array<i64: 512, 256>}, {transform_indices = @transform_2, window_bounds = array<i64: 1, 256>}, {transform_indices = @transform_3, window_bounds = array<i64: 80, 256>}]} {
    %c0_i32 = arith.constant 0 : i32
    %0 = arith.cmpi eq, %arg2, %c0_i32 : i32
    %1 = arith.extui %0 : i1 to i32
    %c0_i32_0 = arith.constant 0 : i32
    %2 = arith.cmpi ne, %1, %c0_i32_0 : i32
    scf.if %2 {
      %cst_9 = arith.constant 0.000000e+00 : f32
      %12 = vector.broadcast %cst_9 : f32 to vector<80x256xf32>
      %c0_10 = arith.constant 0 : index
      %c0_11 = arith.constant 0 : index
      %13 = vector.load %arg7[%c0_10, %c0_11] : memref<80x256xf32, #tpu.memory_space<vmem>>, vector<80x256xf32>
      tpu.vector_store %arg7[%c0_10, %c0_11], %12 {strides = array<i32>} : memref<80x256xf32, #tpu.memory_space<vmem>>, vector<80x256xf32>,
    } else {
    }
    %c0 = arith.constant 0 : index
    %c0_1 = arith.constant 0 : index
    %3 = vector.load %arg7[%c0, %c0_1] : memref<80x256xf32, #tpu.memory_space<vmem>>, vector<80x256xf32>
    %c0_2 = arith.constant 0 : index
    %c0_3 = arith.constant 0 : index
    %4 = vector.load %arg3[%c0_2, %c0_3] : memref<80x512xbf16, #tpu.memory_space<vmem>>, vector<80x512xbf16>
    %c0_4 = arith.constant 0 : index
    %c0_5 = arith.constant 0 : index
    %5 = vector.load %arg4[%c0_4, %c0_5] : memref<512x256xbf16, #tpu.memory_space<vmem>>, vector<512x256xbf16>
    %cst = arith.constant dense<0.000000e+00> : vector<80x256xf32>
    %6 = tpu.matmul %4, %5, %cst {dimension_numbers = #tpu.dot_dimension_numbers<[1], [0], [0], [1], [0, 0, 1, 1], [], []>} : vector<80x512xbf16>, vector<512x256xbf16>, vector<80x256xf32> -> vector<80x256xf32>
    %7 = arith.addf %3, %6 : vector<80x256xf32>
    %c0_6 = arith.constant 0 : index
    %c0_7 = arith.constant 0 : index
    %8 = vector.load %arg7[%c0_6, %c0_7] : memref<80x256xf32, #tpu.memory_space<vmem>>, vector<80x256xf32>
    tpu.vector_store %arg7[%c0_6, %c0_7], %7 {strides = array<i32>} : memref<80x256xf32, #tpu.memory_space<vmem>>, vector<80x256xf32>,
    %c6_i32 = arith.constant 6 : i32
    %9 = arith.cmpi eq, %arg2, %c6_i32 : i32
    %10 = arith.extui %9 : i1 to i32
    %c0_i32_8 = arith.constant 0 : i32
    %11 = arith.cmpi ne, %10, %c0_i32_8 : i32
    scf.if %11 {
      %c0_9 = arith.constant 0 : index
      %c0_10 = arith.constant 0 : index
      %12 = vector.load %arg7[%c0_9, %c0_10] : memref<80x256xf32, #tpu.memory_space<vmem>>, vector<80x256xf32>
      %c0_11 = arith.constant 0 : index
      %c0_12 = arith.constant 0 : index
      %13 = vector.load %arg5[%c0_11, %c0_12] : memref<1x256xf32, #tpu.memory_space<vmem>>, vector<1x256xf32>
      %14 = vector.broadcast %13 : vector<1x256xf32> to vector<80x256xf32>
      %15 = arith.addf %12, %14 : vector<80x256xf32>
      %cst_13 = arith.constant 0.000000e+00 : f32
      %16 = vector.broadcast %cst_13 : f32 to vector<80x256xf32>
      %17 = arith.cmpf oge, %15, %16 : vector<80x256xf32>
      %cst_14 = arith.constant 1.000000e-01 : f32
      %18 = vector.broadcast %cst_14 : f32 to vector<80x256xf32>
      %19 = arith.mulf %18, %15 : vector<80x256xf32>
      %20 = arith.select %17, %15, %19 : vector<80x256xi1>, vector<80x256xf32>
      %21 = arith.truncf %20 : vector<80x256xf32> to vector<80x256xbf16>
      %c0_15 = arith.constant 0 : index
      %c0_16 = arith.constant 0 : index
      %22 = vector.load %arg6[%c0_15, %c0_16] : memref<80x256xbf16, #tpu.memory_space<vmem>>, vector<80x256xbf16>
      tpu.vector_store %arg6[%c0_15, %c0_16], %21 {strides = array<i32>} : memref<80x256xbf16, #tpu.memory_space<vmem>>, vector<80x256xbf16>,
    } else {
    }
    return
  }
  func.func @transform_0(%arg0: i32, %arg1: i32, %arg2: i32) -> (i32, i32) {
    %c0_i32 = arith.constant 0 : i32
    return %arg0, %arg2 : i32, i32
  }
  func.func @transform_1(%arg0: i32, %arg1: i32, %arg2: i32) -> (i32, i32) {
    %c0_i32 = arith.constant 0 : i32
    return %arg2, %arg1 : i32, i32
  }
  func.func @transform_2(%arg0: i32, %arg1: i32, %arg2: i32) -> (i32, i32) {
    %c0_i32 = arith.constant 0 : i32
    %c0_i32_0 = arith.constant 0 : i32
    return %c0_i32, %arg1 : i32, i32
  }
  func.func @transform_3(%arg0: i32, %arg1: i32, %arg2: i32) -> (i32, i32) {
    %c0_i32 = arith.constant 0 : i32
    return %arg0, %arg1 : i32, i32
  }
}

module attributes {stable_mosaic.version = 11 : i64} {
  func.func @_matmul_act_kernel(%arg0: i32, %arg1: i32, %arg2: i32, %arg3: memref<32x512xbf16, #tpu.memory_space<vmem>>, %arg4: memref<512x256xbf16, #tpu.memory_space<vmem>>, %arg5: memref<1x256xf32, #tpu.memory_space<vmem>>, %arg6: memref<32x256xbf16, #tpu.memory_space<vmem>>, %arg7: memref<32x256xf32, #tpu.memory_space<vmem>>) attributes {dimension_semantics = [#tpu.dimension_semantics<parallel>, #tpu.dimension_semantics<parallel>, #tpu.dimension_semantics<arbitrary>], iteration_bounds = array<i64: 1, 1, 5>, scalar_prefetch = 0 : i64, scratch_operands = 1 : i64, tpu.core_type = #tpu.core_type<tc>, window_params = [{transform_indices = @transform_0, window_bounds = array<i64: 32, 512>}, {transform_indices = @transform_1, window_bounds = array<i64: 512, 256>}, {transform_indices = @transform_2, window_bounds = array<i64: 1, 256>}, {transform_indices = @transform_3, window_bounds = array<i64: 32, 256>}]} {
    %c0_i32 = arith.constant 0 : i32
    %0 = arith.cmpi eq, %arg2, %c0_i32 : i32
    %1 = arith.extui %0 : i1 to i32
    %c0_i32_0 = arith.constant 0 : i32
    %2 = arith.cmpi ne, %1, %c0_i32_0 : i32
    scf.if %2 {
      %cst_9 = arith.constant 0.000000e+00 : f32
      %12 = vector.broadcast %cst_9 : f32 to vector<32x256xf32>
      %c0_10 = arith.constant 0 : index
      %c0_11 = arith.constant 0 : index
      %13 = vector.load %arg7[%c0_10, %c0_11] : memref<32x256xf32, #tpu.memory_space<vmem>>, vector<32x256xf32>
      tpu.vector_store %arg7[%c0_10, %c0_11], %12 {strides = array<i32>} : memref<32x256xf32, #tpu.memory_space<vmem>>, vector<32x256xf32>,
    } else {
    }
    %c0 = arith.constant 0 : index
    %c0_1 = arith.constant 0 : index
    %3 = vector.load %arg7[%c0, %c0_1] : memref<32x256xf32, #tpu.memory_space<vmem>>, vector<32x256xf32>
    %c0_2 = arith.constant 0 : index
    %c0_3 = arith.constant 0 : index
    %4 = vector.load %arg3[%c0_2, %c0_3] : memref<32x512xbf16, #tpu.memory_space<vmem>>, vector<32x512xbf16>
    %c0_4 = arith.constant 0 : index
    %c0_5 = arith.constant 0 : index
    %5 = vector.load %arg4[%c0_4, %c0_5] : memref<512x256xbf16, #tpu.memory_space<vmem>>, vector<512x256xbf16>
    %cst = arith.constant dense<0.000000e+00> : vector<32x256xf32>
    %6 = tpu.matmul %4, %5, %cst {dimension_numbers = #tpu.dot_dimension_numbers<[1], [0], [0], [1], [0, 0, 1, 1], [], []>} : vector<32x512xbf16>, vector<512x256xbf16>, vector<32x256xf32> -> vector<32x256xf32>
    %7 = arith.addf %3, %6 : vector<32x256xf32>
    %c0_6 = arith.constant 0 : index
    %c0_7 = arith.constant 0 : index
    %8 = vector.load %arg7[%c0_6, %c0_7] : memref<32x256xf32, #tpu.memory_space<vmem>>, vector<32x256xf32>
    tpu.vector_store %arg7[%c0_6, %c0_7], %7 {strides = array<i32>} : memref<32x256xf32, #tpu.memory_space<vmem>>, vector<32x256xf32>,
    %c4_i32 = arith.constant 4 : i32
    %9 = arith.cmpi eq, %arg2, %c4_i32 : i32
    %10 = arith.extui %9 : i1 to i32
    %c0_i32_8 = arith.constant 0 : i32
    %11 = arith.cmpi ne, %10, %c0_i32_8 : i32
    scf.if %11 {
      %c0_9 = arith.constant 0 : index
      %c0_10 = arith.constant 0 : index
      %12 = vector.load %arg7[%c0_9, %c0_10] : memref<32x256xf32, #tpu.memory_space<vmem>>, vector<32x256xf32>
      %c0_11 = arith.constant 0 : index
      %c0_12 = arith.constant 0 : index
      %13 = vector.load %arg5[%c0_11, %c0_12] : memref<1x256xf32, #tpu.memory_space<vmem>>, vector<1x256xf32>
      %14 = vector.broadcast %13 : vector<1x256xf32> to vector<32x256xf32>
      %15 = arith.addf %12, %14 : vector<32x256xf32>
      %cst_13 = arith.constant 0.000000e+00 : f32
      %16 = vector.broadcast %cst_13 : f32 to vector<32x256xf32>
      %17 = arith.cmpf oge, %15, %16 : vector<32x256xf32>
      %cst_14 = arith.constant 1.000000e-01 : f32
      %18 = vector.broadcast %cst_14 : f32 to vector<32x256xf32>
      %19 = arith.mulf %18, %15 : vector<32x256xf32>
      %20 = arith.select %17, %15, %19 : vector<32x256xi1>, vector<32x256xf32>
      %21 = arith.truncf %20 : vector<32x256xf32> to vector<32x256xbf16>
      %c0_15 = arith.constant 0 : index
      %c0_16 = arith.constant 0 : index
      %22 = vector.load %arg6[%c0_15, %c0_16] : memref<32x256xbf16, #tpu.memory_space<vmem>>, vector<32x256xbf16>
      tpu.vector_store %arg6[%c0_15, %c0_16], %21 {strides = array<i32>} : memref<32x256xbf16, #tpu.memory_space<vmem>>, vector<32x256xbf16>,
    } else {
    }
    return
  }
  func.func @transform_0(%arg0: i32, %arg1: i32, %arg2: i32) -> (i32, i32) {
    %c0_i32 = arith.constant 0 : i32
    return %arg0, %arg2 : i32, i32
  }
  func.func @transform_1(%arg0: i32, %arg1: i32, %arg2: i32) -> (i32, i32) {
    %c0_i32 = arith.constant 0 : i32
    return %arg2, %arg1 : i32, i32
  }
  func.func @transform_2(%arg0: i32, %arg1: i32, %arg2: i32) -> (i32, i32) {
    %c0_i32 = arith.constant 0 : i32
    %c0_i32_0 = arith.constant 0 : i32
    return %c0_i32, %arg1 : i32, i32
  }
  func.func @transform_3(%arg0: i32, %arg1: i32, %arg2: i32) -> (i32, i32) {
    %c0_i32 = arith.constant 0 : i32
    return %arg0, %arg1 : i32, i32
  }
}

module attributes {stable_mosaic.version = 11 : i64} {
  func.func @_matmul_act_kernel(%arg0: i32, %arg1: i32, %arg2: i32, %arg3: memref<32x256xbf16, #tpu.memory_space<vmem>>, %arg4: memref<256x128xbf16, #tpu.memory_space<vmem>>, %arg5: memref<1x128xf32, #tpu.memory_space<vmem>>, %arg6: memref<32x128xf32, #tpu.memory_space<vmem>>, %arg7: memref<32x128xf32, #tpu.memory_space<vmem>>) attributes {dimension_semantics = [#tpu.dimension_semantics<parallel>, #tpu.dimension_semantics<parallel>, #tpu.dimension_semantics<arbitrary>], iteration_bounds = array<i64: 1, 1, 1>, scalar_prefetch = 0 : i64, scratch_operands = 1 : i64, tpu.core_type = #tpu.core_type<tc>, window_params = [{transform_indices = @transform_0, window_bounds = array<i64: 32, 256>}, {transform_indices = @transform_1, window_bounds = array<i64: 256, 128>}, {transform_indices = @transform_2, window_bounds = array<i64: 1, 128>}, {transform_indices = @transform_3, window_bounds = array<i64: 32, 128>}]} {
    %c0_i32 = arith.constant 0 : i32
    %0 = arith.cmpi eq, %arg2, %c0_i32 : i32
    %1 = arith.extui %0 : i1 to i32
    %c0_i32_0 = arith.constant 0 : i32
    %2 = arith.cmpi ne, %1, %c0_i32_0 : i32
    scf.if %2 {
      %cst_10 = arith.constant 0.000000e+00 : f32
      %12 = vector.broadcast %cst_10 : f32 to vector<32x128xf32>
      %c0_11 = arith.constant 0 : index
      %c0_12 = arith.constant 0 : index
      %13 = vector.load %arg7[%c0_11, %c0_12] : memref<32x128xf32, #tpu.memory_space<vmem>>, vector<32x128xf32>
      tpu.vector_store %arg7[%c0_11, %c0_12], %12 {strides = array<i32>} : memref<32x128xf32, #tpu.memory_space<vmem>>, vector<32x128xf32>,
    } else {
    }
    %c0 = arith.constant 0 : index
    %c0_1 = arith.constant 0 : index
    %3 = vector.load %arg7[%c0, %c0_1] : memref<32x128xf32, #tpu.memory_space<vmem>>, vector<32x128xf32>
    %c0_2 = arith.constant 0 : index
    %c0_3 = arith.constant 0 : index
    %4 = vector.load %arg3[%c0_2, %c0_3] : memref<32x256xbf16, #tpu.memory_space<vmem>>, vector<32x256xbf16>
    %c0_4 = arith.constant 0 : index
    %c0_5 = arith.constant 0 : index
    %5 = vector.load %arg4[%c0_4, %c0_5] : memref<256x128xbf16, #tpu.memory_space<vmem>>, vector<256x128xbf16>
    %cst = arith.constant dense<0.000000e+00> : vector<32x128xf32>
    %6 = tpu.matmul %4, %5, %cst {dimension_numbers = #tpu.dot_dimension_numbers<[1], [0], [0], [1], [0, 0, 1, 1], [], []>} : vector<32x256xbf16>, vector<256x128xbf16>, vector<32x128xf32> -> vector<32x128xf32>
    %7 = arith.addf %3, %6 : vector<32x128xf32>
    %c0_6 = arith.constant 0 : index
    %c0_7 = arith.constant 0 : index
    %8 = vector.load %arg7[%c0_6, %c0_7] : memref<32x128xf32, #tpu.memory_space<vmem>>, vector<32x128xf32>
    tpu.vector_store %arg7[%c0_6, %c0_7], %7 {strides = array<i32>} : memref<32x128xf32, #tpu.memory_space<vmem>>, vector<32x128xf32>,
    %c0_i32_8 = arith.constant 0 : i32
    %9 = arith.cmpi eq, %arg2, %c0_i32_8 : i32
    %10 = arith.extui %9 : i1 to i32
    %c0_i32_9 = arith.constant 0 : i32
    %11 = arith.cmpi ne, %10, %c0_i32_9 : i32
    scf.if %11 {
      %c0_10 = arith.constant 0 : index
      %c0_11 = arith.constant 0 : index
      %12 = vector.load %arg7[%c0_10, %c0_11] : memref<32x128xf32, #tpu.memory_space<vmem>>, vector<32x128xf32>
      %c0_12 = arith.constant 0 : index
      %c0_13 = arith.constant 0 : index
      %13 = vector.load %arg5[%c0_12, %c0_13] : memref<1x128xf32, #tpu.memory_space<vmem>>, vector<1x128xf32>
      %14 = vector.broadcast %13 : vector<1x128xf32> to vector<32x128xf32>
      %15 = arith.addf %12, %14 : vector<32x128xf32>
      %c0_14 = arith.constant 0 : index
      %c0_15 = arith.constant 0 : index
      %16 = vector.load %arg6[%c0_14, %c0_15] : memref<32x128xf32, #tpu.memory_space<vmem>>, vector<32x128xf32>
      tpu.vector_store %arg6[%c0_14, %c0_15], %15 {strides = array<i32>} : memref<32x128xf32, #tpu.memory_space<vmem>>, vector<32x128xf32>,
    } else {
    }
    return
  }
  func.func @transform_0(%arg0: i32, %arg1: i32, %arg2: i32) -> (i32, i32) {
    %c0_i32 = arith.constant 0 : i32
    return %arg0, %arg2 : i32, i32
  }
  func.func @transform_1(%arg0: i32, %arg1: i32, %arg2: i32) -> (i32, i32) {
    %c0_i32 = arith.constant 0 : i32
    return %arg2, %arg1 : i32, i32
  }
  func.func @transform_2(%arg0: i32, %arg1: i32, %arg2: i32) -> (i32, i32) {
    %c0_i32 = arith.constant 0 : i32
    %c0_i32_0 = arith.constant 0 : i32
    return %c0_i32, %arg1 : i32, i32
  }
  func.func @transform_3(%arg0: i32, %arg1: i32, %arg2: i32) -> (i32, i32) {
    %c0_i32 = arith.constant 0 : i32
    return %arg0, %arg1 : i32, i32
  }
}

module attributes {stable_mosaic.version = 11 : i64} {
  func.func @_final_act_kernel(%arg0: i32, %arg1: memref<8x4xf32, #tpu.memory_space<vmem>>, %arg2: memref<1x4xf32, #tpu.memory_space<vmem>>, %arg3: memref<8x4xf32, #tpu.memory_space<vmem>>) attributes {dimension_semantics = [#tpu.dimension_semantics<parallel>], iteration_bounds = array<i64: 1>, scalar_prefetch = 0 : i64, scratch_operands = 0 : i64, tpu.core_type = #tpu.core_type<tc>, window_params = [{transform_indices = @transform_0, window_bounds = array<i64: 8, 4>}, {pipeline_mode = #tpu.pipeline_mode<synchronous>, transform_indices = @transform_1, window_bounds = array<i64: 1, 4>}, {transform_indices = @transform_2, window_bounds = array<i64: 8, 4>}]} {
    %c0 = arith.constant 0 : index
    %c0_0 = arith.constant 0 : index
    %0 = vector.load %arg1[%c0, %c0_0] : memref<8x4xf32, #tpu.memory_space<vmem>>, vector<8x4xf32>
    %c0_1 = arith.constant 0 : index
    %c0_2 = arith.constant 0 : index
    %1 = vector.load %arg2[%c0_1, %c0_2] : memref<1x4xf32, #tpu.memory_space<vmem>>, vector<1x4xf32>
    %2 = vector.broadcast %1 : vector<1x4xf32> to vector<8x4xf32>
    %3 = arith.addf %0, %2 : vector<8x4xf32>
    %4 = math.tanh %3 : vector<8x4xf32>
    %cst = arith.constant 5.500000e-01 : f32
    %5 = vector.broadcast %cst : f32 to vector<8x4xf32>
    %6 = arith.mulf %5, %4 : vector<8x4xf32>
    %cst_3 = arith.constant 5.000000e-01 : f32
    %7 = vector.broadcast %cst_3 : f32 to vector<8x4xf32>
    %8 = arith.subf %7, %6 : vector<8x4xf32>
    %c0_4 = arith.constant 0 : index
    %c0_5 = arith.constant 0 : index
    %9 = vector.load %arg3[%c0_4, %c0_5] : memref<8x4xf32, #tpu.memory_space<vmem>>, vector<8x4xf32>
    tpu.vector_store %arg3[%c0_4, %c0_5], %8 {strides = array<i32>} : memref<8x4xf32, #tpu.memory_space<vmem>>, vector<8x4xf32>,
    return
  }
  func.func @transform_0(%arg0: i32) -> (i32, i32) {
    %c0_i32 = arith.constant 0 : i32
    %c0_i32_0 = arith.constant 0 : i32
    return %arg0, %c0_i32 : i32, i32
  }
  func.func @transform_1(%arg0: i32) -> (i32, i32) {
    %c0_i32 = arith.constant 0 : i32
    %c0_i32_0 = arith.constant 0 : i32
    %c0_i32_1 = arith.constant 0 : i32
    return %c0_i32, %c0_i32_0 : i32, i32
  }
  func.func @transform_2(%arg0: i32) -> (i32, i32) {
    %c0_i32 = arith.constant 0 : i32
    %c0_i32_0 = arith.constant 0 : i32
    return %arg0, %c0_i32 : i32, i32
  }
}

</mosaic_0001>

<bundles_post_ra>
// kernel: upconv7_forward.14
= control target key start
LH: loop header
LB: loop body
LE: loop exit
PB: predicated region body
PF: predicated region fallthrough
CT: control target
= control target key end

     0   :  { %s2507_s12 = smov 0   ;;  %s2509_s13 = smov 0   ;;  %s2717_s0 = inlined_call_operand.vmem [shape: bf16[2048,128], index: 0, kind: input, shape index: {}]   ;;  %s2718_s1 = inlined_call_operand.vmem [shape: bf16[128,128], index: 1, kind: input, shape index: {}]   ;;  %s2719_s2 = inlined_call_operand.vmem [shape: f32[1,128], index: 2, kind: input, shape index: {}]   ;;  %s2720_s3 = inlined_call_operand.vmem [shape: bf16[2048,128], index: 3, kind: output, shape index: {}]  }
   0x1   :  { %s2511_s14 = smov 0  }
   0x2 LB: > { %s32_s15 = sadd.s32 1, %s2481_s13  ;;  %p1896_p0 = scmp.ge.s32.totalorder %s2485_s14, 1  ;;  %s2485_s14 = sphi %s2511_s14, %s13_s14   ;;  %s2481_s13 = sphi %s2509_s13, %s2722_s13   ;;  %s2477_s12 = sphi %s2507_s12, %s2721_s12  }
   0x3   : > { %p34_p1 = scmp.ge.s32.totalorder %s32_s15, 4  ;;  %p188_p2 = scmp.lt.s32.totalorder %s2485_s14, 5 }
   0x5   : > { %s2724_s15 = smov (%p34_p1, %s32_s15), 0  ;;  %p189_p3 = pnand %p1896_p0, %p188_p2 }
   0x6   : > { %v2423_v0 = vld [vmem:[%s2718_s1] sm:$0xff] (!%p189_p3)   ;;  %s1897_s18 = sshll.u32 (!%p189_p3), %s2477_s12, 6  ;;  %v2424_v1 = vld [vmem:[%s2718_s1 + $0x8] sm:$0xff] (!%p189_p3)   ;;  %v2425_v2 = vld [vmem:[%s2718_s1 + $0x10] sm:$0xff] (!%p189_p3)  }
   0x7   : > { %192 = sbr.rel (%p189_p3) target bundleno = 328 (0x148), region = 32  ;;  %p230_p4 = scmp.lt.s32.totalorder (!%p189_p3), %s1897_s18, 255  ;;  %2303 = vmatprep.subr.bf16.mxu0 (!%p189_p3), %v2423_v0  ;;  %2383 = vmatprep.subr.bf16.mxu1 (!%p189_p3), %v2423_v0  ;;  %v2426_v3 = vld [vmem:[%s2718_s1 + $0x18] sm:$0xff] (!%p189_p3)   ;;  %v2427_v6 = vld [vmem:[%s2718_s1 + $0x20] sm:$0xff] (!%p189_p3)   ;;  %v2428_v7 = vld [vmem:[%s2718_s1 + $0x28] sm:$0xff] (!%p189_p3)  }
   0x8   : > { %2304 = vmatpush3.bf16.msra.mxu0 (!%p189_p3), %v2423_v0  ;;  %2391 = vmatpush3.bf16.msra.mxu1 (!%p189_p3), %v2423_v0  ;;  %v2429_v8 = vld [vmem:[%s2718_s1 + $0x30] sm:$0xff] (!%p189_p3)   ;;  %v2430_v9 = vld [vmem:[%s2718_s1 + $0x38] sm:$0xff] (!%p189_p3)   ;;  %v2594_v40 = vld [vmem:[%s2719_s2] ss:$0 sm:$0xff] (!%p189_p3) }
   0x9   : > { %2305 = vmatprep.subr.bf16.mxu0 (!%p189_p3), %v2424_v1  ;;  %2384 = vmatprep.subr.bf16.mxu1 (!%p189_p3), %v2424_v1 }
   0xc   : > { %2306 = vmatpush3.bf16.msra.mxu0 (!%p189_p3), %v2424_v1  ;;  %2392 = vmatpush3.bf16.msra.mxu1 (!%p189_p3), %v2424_v1 }
   0xd   : > { %2307 = vmatprep.subr.bf16.mxu0 (!%p189_p3), %v2425_v2  ;;  %2385 = vmatprep.subr.bf16.mxu1 (!%p189_p3), %v2425_v2 }
   0xe   : > { %s2726_s18 = smov (!%p230_p4, %s1897_s18), 255 }
   0xf   : > { %s1898_s23 = sshll.u32 %s2726_s18, 2 }
  0x10   : > { %s2542_s26 = scalar_lea.vmem %s2717_s0, %s1898_s23  ;;  %2308 = vmatpush3.bf16.msra.mxu0 %v2425_v2  ;;  %2393 = vmatpush3.bf16.msra.mxu1 %v2425_v2  ;;  %s2611_s17 = scalar_lea.vmem %s2720_s3, %s1898_s23 }
  0x11   : > { %v2431_v4 = vld [vmem:[%s2542_s26] sm:$0xff]   ;;  %2309 = vmatprep.subr.bf16.mxu0 %v2426_v3  ;;  %2386 = vmatprep.subr.bf16.mxu1 %v2426_v3  ;;  %v2433_v10 = vld [vmem:[%s2542_s26 + $0x8] sm:$0xff]   ;;  %v2435_v12 = vld [vmem:[%s2542_s26 + $0x10] sm:$0xff]  }
  0x12   : > { %v2432_v5 = vld [vmem:[%s2542_s26 + $0x80] sm:$0xff]   ;;  %2319 = vmatprep.mubr.bf16.mxu0 %v2431_v4  ;;  %v2434_v11 = vld [vmem:[%s2542_s26 + $0x88] sm:$0xff]   ;;  %v2436_v13 = vld [vmem:[%s2542_s26 + $0x90] sm:$0xff]  }
  0x13   : > { %2351 = vmatprep.mubr.bf16.mxu1 %v2432_v5  ;;  %v2437_v14 = vld [vmem:[%s2542_s26 + $0x18] sm:$0xff]   ;;  %v2439_v16 = vld [vmem:[%s2542_s26 + $0x20] sm:$0xff]   ;;  %v2441_v18 = vld [vmem:[%s2542_s26 + $0x28] sm:$0xff]  }
  0x14   : > { %2310 = vmatpush3.bf16.msra.mxu0 %v2426_v3  ;;  %2394 = vmatpush3.bf16.msra.mxu1 %v2426_v3  ;;  %v2438_v15 = vld [vmem:[%s2542_s26 + $0x98] sm:$0xff]   ;;  %v2440_v17 = vld [vmem:[%s2542_s26 + $0xa0] sm:$0xff]   ;;  %v2442_v19 = vld [vmem:[%s2542_s26 + $0xa8] sm:$0xff]  }
  0x15   : > { %2311 = vmatprep.subr.bf16.mxu0 %v2427_v6  ;;  %2387 = vmatprep.subr.bf16.mxu1 %v2427_v6  ;;  %v2443_v20 = vld [vmem:[%s2542_s26 + $0x30] sm:$0xff]   ;;  %v2445_v22 = vld [vmem:[%s2542_s26 + $0x38] sm:$0xff]   ;;  %v2447_v24 = vld [vmem:[%s2542_s26 + $0x40] sm:$0xff]  }
  0x16   : > { %v2444_v21 = vld [vmem:[%s2542_s26 + $0xb0] sm:$0xff]   ;;  %v2446_v23 = vld [vmem:[%s2542_s26 + $0xb8] sm:$0xff]   ;;  %v2448_v25 = vld [vmem:[%s2542_s26 + $0xc0] sm:$0xff]  }
  0x17   : > { %v2449_v26 = vld [vmem:[%s2542_s26 + $0x48] sm:$0xff]   ;;  %v2451_v28 = vld [vmem:[%s2542_s26 + $0x50] sm:$0xff]   ;;  %v2453_v30 = vld [vmem:[%s2542_s26 + $0x58] sm:$0xff]  }
  0x18   : > { %2312 = vmatpush3.bf16.msra.mxu0 %v2427_v6  ;;  %2395 = vmatpush3.bf16.msra.mxu1 %v2427_v6  ;;  %v2450_v27 = vld [vmem:[%s2542_s26 + $0xc8] sm:$0xff]   ;;  %v2452_v29 = vld [vmem:[%s2542_s26 + $0xd0] sm:$0xff]   ;;  %v2454_v31 = vld [vmem:[%s2542_s26 + $0xd8] sm:$0xff]  }
  0x19   : > { %2313 = vmatprep.subr.bf16.mxu0 %v2428_v7  ;;  %2388 = vmatprep.subr.bf16.mxu1 %v2428_v7  ;;  %v2455_v32 = vld [vmem:[%s2542_s26 + $0x60] sm:$0xff]   ;;  %v2457_v34 = vld [vmem:[%s2542_s26 + $0x68] sm:$0xff]   ;;  %v2459_v36 = vld [vmem:[%s2542_s26 + $0x70] sm:$0xff]  }
  0x1a   : > { %v2456_v33 = vld [vmem:[%s2542_s26 + $0xe0] sm:$0xff]   ;;  %v2458_v35 = vld [vmem:[%s2542_s26 + $0xe8] sm:$0xff]   ;;  %v2460_v37 = vld [vmem:[%s2542_s26 + $0xf0] sm:$0xff]  }
  0x1b   : > { %v2461_v38 = vld [vmem:[%s2542_s26 + $0x78] sm:$0xff]  }
  0x1c   : > { %2314 = vmatpush3.bf16.msra.mxu0 %v2428_v7  ;;  %2396 = vmatpush3.bf16.msra.mxu1 %v2428_v7  ;;  %v2462_v39 = vld [vmem:[%s2542_s26 + $0xf8] sm:$0xff]  }
  0x1d   : > { %2315 = vmatprep.subr.bf16.mxu0 %v2429_v8  ;;  %2389 = vmatprep.subr.bf16.mxu1 %v2429_v8 }
  0x20   : > { %2316 = vmatpush3.bf16.msra.mxu0 %v2429_v8  ;;  %2397 = vmatpush3.bf16.msra.mxu1 %v2429_v8 }
  0x21   : > { %2317 = vmatprep.subr.bf16.mxu0 %v2430_v9  ;;  %2390 = vmatprep.subr.bf16.mxu1 %v2430_v9 }
  0x24   : > { %2318 = vmatpush3.bf16.msra.mxu0 %v2430_v9  ;;  %2398 = vmatpush3.bf16.msra.mxu1 %v2430_v9 }
  0x27   : > { %2320 = vmatmul.mubr.bf16.vlgmr.msra.gmra.mrb[0].mxu0 %v2433_v10  ;;  %2352 = vmatmul.mubr.bf16.vlgmr.msra.gmra.mrb[0].mxu1 %v2434_v11 }
  0x28   : > { %2323 = vmatprep.mubr.bf16.mxu0 %v2435_v12  ;;  %2355 = vmatprep.mubr.bf16.mxu1 %v2436_v13 }
  0x2f   : > { %2324 = vmatmul.mubr.bf16.gmra.mrb[4].mxu0 %v2437_v14  ;;  %2356 = vmatmul.mubr.bf16.gmra.mrb[4].mxu1 %v2438_v15 }
  0x30   : > { %2327 = vmatprep.mubr.bf16.mxu0 %v2439_v16  ;;  %2359 = vmatprep.mubr.bf16.mxu1 %v2440_v17 }
  0x37   : > { %2328 = vmatmul.mubr.bf16.gmra.mrb[8].mxu0 %v2441_v18  ;;  %2360 = vmatmul.mubr.bf16.gmra.mrb[8].mxu1 %v2442_v19 }
  0x38   : > { %2331 = vmatprep.mubr.bf16.mxu0 %v2443_v20  ;;  %2363 = vmatprep.mubr.bf16.mxu1 %v2444_v21 }
  0x3f   : > { %2332 = vmatmul.mubr.bf16.gmra.mrb[12].mxu0 %v2445_v22  ;;  %2364 = vmatmul.mubr.bf16.gmra.mrb[12].mxu1 %v2446_v23 }
  0x40   : > { %2335 = vmatprep.mubr.bf16.mxu0 %v2447_v24  ;;  %2367 = vmatprep.mubr.bf16.mxu1 %v2448_v25 }
  0x47   : > { %2336 = vmatmul.mubr.bf16.gmra.mrb[16].mxu0 %v2449_v26  ;;  %2368 = vmatmul.mubr.bf16.gmra.mrb[16].mxu1 %v2450_v27 }
  0x48   : > { %2339 = vmatprep.mubr.bf16.mxu0 %v2451_v28  ;;  %2371 = vmatprep.mubr.bf16.mxu1 %v2452_v29 }
  0x4f   : > { %2340 = vmatmul.mubr.bf16.gmra.mrb[20].mxu0 %v2453_v30  ;;  %2372 = vmatmul.mubr.bf16.gmra.mrb[20].mxu1 %v2454_v31 }
  0x50   : > { %2343 = vmatprep.mubr.bf16.mxu0 %v2455_v32  ;;  %2375 = vmatprep.mubr.bf16.mxu1 %v2456_v33 }
  0x57   : > { %2344 = vmatmul.mubr.bf16.gmra.mrb[24].mxu0 %v2457_v34  ;;  %2376 = vmatmul.mubr.bf16.gmra.mrb[24].mxu1 %v2458_v35 }
  0x58   : > { %2347 = vmatprep.mubr.bf16.mxu0 %v2459_v36  ;;  %2379 = vmatprep.mubr.bf16.mxu1 %v2460_v37 }
  0x5f   : > { %2348 = vmatmul.mubr.bf16.gmra.mrb[28].mxu0 %v2461_v38  ;;  %2380 = vmatmul.mubr.bf16.gmra.mrb[28].mxu1 %v2462_v39 }
  0xfa   : > { %v2321_v41 = vpop.f32.mrb[0].mxu0  ;;  %v2353_v42 = vpop.f32.mrb[0].mxu1 }
  0xfb   : > { %v1205_v43 = vadd.f32 %v2321_v41, %v2594_v40  ;;  %v1237_v44 = vadd.f32 %v2353_v42, %v2594_v40  ;;  %v746_v45 = vpop.f32.mrb[1].mxu0  ;;  %v874_v46 = vpop.f32.mrb[1].mxu1 }
  0xfc   : > { %v1203_v47 = vadd.f32 %v2594_v40, %v746_v45  ;;  %v1235_v48 = vadd.f32 %v2594_v40, %v874_v46  ;;  %v2322_v49 = vpop.f32.mrb[2].mxu0  ;;  %v2354_v50 = vpop.f32.mrb[2].mxu1 }
  0xfd   : > { %vm1269_vm0 = vcmp.ge.f32.partialorder %v1205_v43, 0.0  ;;  %v1333_v51 = vmul.f32 0.1, %v1205_v43  ;;  %vm1301_vm1 = vcmp.ge.f32.partialorder %v1237_v44, 0.0  ;;  %v1365_v52 = vmul.f32 0.1, %v1237_v44 }
  0xfe   : > { %vm1267_vm2 = vcmp.ge.f32.partialorder %v1203_v47, 0.0  ;;  %v1331_v53 = vmul.f32 0.1, %v1203_v47  ;;  %vm1299_vm3 = vcmp.ge.f32.partialorder %v1235_v48, 0.0  ;;  %v1363_v54 = vmul.f32 0.1, %v1235_v48 }
  0xff   : > { %v1206_v55 = vadd.f32 %v2322_v49, %v2594_v40  ;;  %v1238_v56 = vadd.f32 %v2354_v50, %v2594_v40  ;;  %v749_v57 = vpop.f32.mrb[3].mxu0  ;;  %v877_v58 = vpop.f32.mrb[3].mxu1  ;;  %v1397_v59 = vsel %vm1269_vm0, %v1205_v43, %v1333_v51  ;;  %v1429_v60 = vsel %vm1301_vm1, %v1237_v44, %v1365_v52 }
 0x100   : > { %v1204_v61 = vadd.f32 %v2594_v40, %v749_v57  ;;  %v1236_v62 = vadd.f32 %v2594_v40, %v877_v58  ;;  %v1395_v3 = vsel %vm1267_vm2, %v1203_v47, %v1331_v53  ;;  %v1427_v4 = vsel %vm1299_vm3, %v1235_v48, %v1363_v54 }
 0x101   : > { %vm1270_vm4 = vcmp.ge.f32.partialorder %v1206_v55, 0.0  ;;  %v1334_v63 = vmul.f32 0.1, %v1206_v55  ;;  %vm1302_vm5 = vcmp.ge.f32.partialorder %v1238_v56, 0.0  ;;  %v1366_v0 = vmul.f32 0.1, %v1238_v56 }
 0x102   : > { %vm1268_vm6 = vcmp.ge.f32.partialorder %v1204_v61, 0.0  ;;  %v1332_v1 = vmul.f32 0.1, %v1204_v61  ;;  %vm1300_vm7 = vcmp.ge.f32.partialorder %v1236_v62, 0.0  ;;  %v1364_v2 = vmul.f32 0.1, %v1236_v62 }
 0x103   : > { %v1398_v5 = vsel %vm1270_vm4, %v1206_v55, %v1334_v63  ;;  %v1430_v6 = vsel %vm1302_vm5, %v1238_v56, %v1366_v0  ;;  %v2325_v7 = vpop.f32.mrb[4].mxu0  ;;  %v2357_v8 = vpop.f32.mrb[4].mxu1 }
 0x104   : > { %v2080_v9 = vpack.c.bf16 %v1398_v5, %v1397_v59  ;;  %v2160_v10 = vpack.c.bf16 %v1430_v6, %v1429_v60  ;;  %v1396_v11 = vsel %vm1268_vm6, %v1204_v61, %v1332_v1  ;;  %v1428_v12 = vsel %vm1300_vm7, %v1236_v62, %v1364_v2  ;;  %v762_v13 = vpop.f32.mrb[5].mxu0  ;;  %v890_v14 = vpop.f32.mrb[5].mxu1 }
 0x105   : > { %v2075_v15 = vpack.c.bf16 %v1396_v11, %v1395_v3  ;;  %v2155_v16 = vpack.c.bf16 %v1428_v12, %v1427_v4  ;;  %v1209_v17 = vadd.f32 %v2325_v7, %v2594_v40  ;;  %v1241_v18 = vadd.f32 %v2357_v8, %v2594_v40  ;;  %v2326_v19 = vpop.f32.mrb[6].mxu0  ;;  %v2358_v20 = vpop.f32.mrb[6].mxu1 }
 0x106   : > { %2232 = vst [vmem:[%s2611_s17 + $0x8] sm:$0xff] %v2080_v9   ;;  %2248 = vst [vmem:[%s2611_s17 + $0x88] sm:$0xff] %v2160_v10   ;;  %v1207_v21 = vadd.f32 %v2594_v40, %v762_v13  ;;  %v1239_v22 = vadd.f32 %v2594_v40, %v890_v14  ;;  %v1210_v23 = vadd.f32 %v2326_v19, %v2594_v40  ;;  %v765_v25 = vpop.f32.mrb[7].mxu0  ;;  %v893_v26 = vpop.f32.mrb[7].mxu1 }
 0x107   : > { %v1242_v24 = vadd.f32 %v2358_v20, %v2594_v40  ;;  %2076 = vst [vmem:[%s2611_s17] sm:$0xff] %v2075_v15   ;;  %2247 = vst [vmem:[%s2611_s17 + $0x80] sm:$0xff] %v2155_v16   ;;  %vm1273_vm8 = vcmp.ge.f32.partialorder %v1209_v17, 0.0  ;;  %v1337_v27 = vmul.f32 0.1, %v1209_v17  ;;  %vm1305_vm9 = vcmp.ge.f32.partialorder %v1241_v18, 0.0 }
 0x108   : > { %v1369_v28 = vmul.f32 0.1, %v1241_v18  ;;  %vm1271_vm10 = vcmp.ge.f32.partialorder %v1207_v21, 0.0  ;;  %v1335_v29 = vmul.f32 0.1, %v1207_v21  ;;  %vm1303_vm11 = vcmp.ge.f32.partialorder %v1239_v22, 0.0 }
 0x109   : > { %v1367_v30 = vmul.f32 0.1, %v1239_v22  ;;  %v1401_v31 = vsel %vm1273_vm8, %v1209_v17, %v1337_v27  ;;  %vm1274_vm12 = vcmp.ge.f32.partialorder %v1210_v23, 0.0  ;;  %v1338_v33 = vmul.f32 0.1, %v1210_v23 }
 0x10a   : > { %v1433_v32 = vsel %vm1305_vm9, %v1241_v18, %v1369_v28  ;;  %v1399_v34 = vsel %vm1271_vm10, %v1207_v21, %v1335_v29  ;;  %vm1306_vm13 = vcmp.ge.f32.partialorder %v1242_v24, 0.0  ;;  %v1370_v36 = vmul.f32 0.1, %v1242_v24  ;;  %v2329_v37 = vpop.f32.mrb[8].mxu0  ;;  %v2361_v38 = vpop.f32.mrb[8].mxu1 }
 0x10b   : > { %v1431_v35 = vsel %vm1303_vm11, %v1239_v22, %v1367_v30  ;;  %v1402_v39 = vsel %vm1274_vm12, %v1210_v23, %v1338_v33  ;;  %v1208_v41 = vadd.f32 %v2594_v40, %v765_v25  ;;  %v1240_v42 = vadd.f32 %v2594_v40, %v893_v26  ;;  %v778_v44 = vpop.f32.mrb[9].mxu0  ;;  %v906_v45 = vpop.f32.mrb[9].mxu1 }
 0x10c   : > { %v1213_v43 = vadd.f32 %v2329_v37, %v2594_v40  ;;  %v2090_v46 = vpack.c.bf16 %v1402_v39, %v1401_v31  ;;  %v1434_v47 = vsel %vm1306_vm13, %v1242_v24, %v1370_v36  ;;  %v1245_v48 = vadd.f32 %v2361_v38, %v2594_v40  ;;  %v2330_v50 = vpop.f32.mrb[10].mxu0  ;;  %v2362_v51 = vpop.f32.mrb[10].mxu1 }
 0x10d   : > { %v1211_v49 = vadd.f32 %v2594_v40, %v778_v44  ;;  %v2170_v52 = vpack.c.bf16 %v1434_v47, %v1433_v32  ;;  %vm1272_vm14 = vcmp.ge.f32.partialorder %v1208_v41, 0.0  ;;  %v1336_v53 = vmul.f32 0.1, %v1208_v41  ;;  %v781_v54 = vpop.f32.mrb[11].mxu0  ;;  %v909_v55 = vpop.f32.mrb[11].mxu1 }
 0x10e   : > { %vm1304_vm15 = vcmp.ge.f32.partialorder %v1240_v42, 0.0  ;;  %2234 = vst [vmem:[%s2611_s17 + $0x18] sm:$0xff] %v2090_v46   ;;  %v1368_v56 = vmul.f32 0.1, %v1240_v42  ;;  %vm1277_vm0 = vcmp.ge.f32.partialorder %v1213_v43, 0.0  ;;  %vm1309_vm1 = vcmp.ge.f32.partialorder %v1245_v48, 0.0 }
 0x10f   : > { %v1341_v57 = vmul.f32 0.1, %v1213_v43  ;;  %2250 = vst [vmem:[%s2611_s17 + $0x98] sm:$0xff] %v2170_v52   ;;  %v1400_v58 = vsel %vm1272_vm14, %v1208_v41, %v1336_v53  ;;  %v1373_v59 = vmul.f32 0.1, %v1245_v48  ;;  %vm1275_vm2 = vcmp.ge.f32.partialorder %v1211_v49, 0.0 }
 0x110   : > { %v1339_v60 = vmul.f32 0.1, %v1211_v49  ;;  %v2085_v61 = vpack.c.bf16 %v1400_v58, %v1399_v34  ;;  %v1432_v62 = vsel %vm1304_vm15, %v1240_v42, %v1368_v56  ;;  %v1243_v0 = vadd.f32 %v2594_v40, %v906_v45 }
 0x111   : > { %v1405_v63 = vsel %vm1277_vm0, %v1213_v43, %v1341_v57  ;;  %v2165_v1 = vpack.c.bf16 %v1432_v62, %v1431_v35  ;;  %v1437_v2 = vsel %vm1309_vm1, %v1245_v48, %v1373_v59  ;;  %v1214_v4 = vadd.f32 %v2330_v50, %v2594_v40 }
 0x112   : > { %v1403_v3 = vsel %vm1275_vm2, %v1211_v49, %v1339_v60  ;;  %2233 = vst [vmem:[%s2611_s17 + $0x10] sm:$0xff] %v2085_v61   ;;  %vm1307_vm3 = vcmp.ge.f32.partialorder %v1243_v0, 0.0  ;;  %v1371_v5 = vmul.f32 0.1, %v1243_v0  ;;  %v1246_v6 = vadd.f32 %v2362_v51, %v2594_v40  ;;  %v2333_v8 = vpop.f32.mrb[12].mxu0  ;;  %v2365_v9 = vpop.f32.mrb[12].mxu1 }
 0x113   : > { %v1212_v7 = vadd.f32 %v2594_v40, %v781_v54  ;;  %2249 = vst [vmem:[%s2611_s17 + $0x90] sm:$0xff] %v2165_v1   ;;  %vm1278_vm4 = vcmp.ge.f32.partialorder %v1214_v4, 0.0  ;;  %v1342_v10 = vmul.f32 0.1, %v1214_v4  ;;  %v1244_v11 = vadd.f32 %v2594_v40, %v909_v55  ;;  %v794_v13 = vpop.f32.mrb[13].mxu0  ;;  %v922_v14 = vpop.f32.mrb[13].mxu1 }
 0x114   : > { %v1217_v12 = vadd.f32 %v2333_v8, %v2594_v40  ;;  %v1435_v15 = vsel %vm1307_vm3, %v1243_v0, %v1371_v5  ;;  %vm1310_vm5 = vcmp.ge.f32.partialorder %v1246_v6, 0.0  ;;  %v1374_v16 = vmul.f32 0.1, %v1246_v6  ;;  %v2334_v17 = vpop.f32.mrb[14].mxu0  ;;  %v2366_v18 = vpop.f32.mrb[14].mxu1 }
 0x115   : > { %vm1276_vm6 = vcmp.ge.f32.partialorder %v1212_v7, 0.0  ;;  %v1406_v19 = vsel %vm1278_vm4, %v1214_v4, %v1342_v10  ;;  %v1340_v20 = vmul.f32 0.1, %v1212_v7  ;;  %vm1308_vm7 = vcmp.ge.f32.partialorder %v1244_v11, 0.0  ;;  %v797_v22 = vpop.f32.mrb[15].mxu0  ;;  %v925_v26 = vpop.f32.mrb[15].mxu1 }
 0x116   : > { %v1372_v21 = vmul.f32 0.1, %v1244_v11  ;;  %v2100_v23 = vpack.c.bf16 %v1406_v19, %v1405_v63  ;;  %v1438_v24 = vsel %vm1310_vm5, %v1246_v6, %v1374_v16  ;;  %vm1281_vm8 = vcmp.ge.f32.partialorder %v1217_v12, 0.0 }
 0x117   : > { %v1345_v25 = vmul.f32 0.1, %v1217_v12  ;;  %v2180_v27 = vpack.c.bf16 %v1438_v24, %v1437_v2  ;;  %v1404_v28 = vsel %vm1276_vm6, %v1212_v7, %v1340_v20  ;;  %v1249_v30 = vadd.f32 %v2365_v9, %v2594_v40 }
 0x118   : > { %v1436_v29 = vsel %vm1308_vm7, %v1244_v11, %v1372_v21  ;;  %2236 = vst [vmem:[%s2611_s17 + $0x28] sm:$0xff] %v2100_v23   ;;  %v2095_v31 = vpack.c.bf16 %v1404_v28, %v1403_v3  ;;  %v1215_v34 = vadd.f32 %v2594_v40, %v794_v13  ;;  %v1247_v36 = vadd.f32 %v2594_v40, %v922_v14 }
 0x119   : > { %v2175_v32 = vpack.c.bf16 %v1436_v29, %v1435_v15  ;;  %v1409_v33 = vsel %vm1281_vm8, %v1217_v12, %v1345_v25  ;;  %2252 = vst [vmem:[%s2611_s17 + $0xa8] sm:$0xff] %v2180_v27   ;;  %vm1313_vm9 = vcmp.ge.f32.partialorder %v1249_v30, 0.0  ;;  %v1377_v35 = vmul.f32 0.1, %v1249_v30 }
 0x11a   : > { %v1218_v37 = vadd.f32 %v2334_v17, %v2594_v40  ;;  %2235 = vst [vmem:[%s2611_s17 + $0x20] sm:$0xff] %v2095_v31   ;;  %vm1279_vm10 = vcmp.ge.f32.partialorder %v1215_v34, 0.0  ;;  %v1343_v38 = vmul.f32 0.1, %v1215_v34  ;;  %v1250_v39 = vadd.f32 %v2366_v18, %v2594_v40  ;;  %v2337_v42 = vpop.f32.mrb[16].mxu0  ;;  %v2369_v43 = vpop.f32.mrb[16].mxu1 }
 0x11b   : > { %2251 = vst [vmem:[%s2611_s17 + $0xa0] sm:$0xff] %v2175_v32   ;;  %v1216_v41 = vadd.f32 %v2594_v40, %v797_v22  ;;  %v1441_v44 = vsel %vm1313_vm9, %v1249_v30, %v1377_v35  ;;  %vm1311_vm11 = vcmp.ge.f32.partialorder %v1247_v36, 0.0  ;;  %v1375_v45 = vmul.f32 0.1, %v1247_v36  ;;  %v810_v46 = vpop.f32.mrb[17].mxu0  ;;  %v938_v47 = vpop.f32.mrb[17].mxu1 }
 0x11c   : > { %vm1282_vm12 = vcmp.ge.f32.partialorder %v1218_v37, 0.0  ;;  %v1407_v48 = vsel %vm1279_vm10, %v1215_v34, %v1343_v38  ;;  %v1346_v49 = vmul.f32 0.1, %v1218_v37  ;;  %vm1314_vm13 = vcmp.ge.f32.partialorder %v1250_v39, 0.0  ;;  %v2338_v51 = vpop.f32.mrb[18].mxu0  ;;  %v2370_v55 = vpop.f32.mrb[18].mxu1 }
 0x11d   : > { %v1378_v50 = vmul.f32 0.1, %v1250_v39  ;;  %v1439_v52 = vsel %vm1311_vm11, %v1247_v36, %v1375_v45  ;;  %vm1280_vm14 = vcmp.ge.f32.partialorder %v1216_v41, 0.0  ;;  %v1344_v53 = vmul.f32 0.1, %v1216_v41  ;;  %v813_v56 = vpop.f32.mrb[19].mxu0 }
 0x11e   : > { %v1248_v54 = vadd.f32 %v2594_v40, %v925_v26  ;;  %v1410_v57 = vsel %vm1282_vm12, %v1218_v37, %v1346_v49  ;;  %v1221_v59 = vadd.f32 %v2337_v42, %v2594_v40  ;;  %v1253_v60 = vadd.f32 %v2369_v43, %v2594_v40  ;;  %v941_v61 = vpop.f32.mrb[19].mxu1 }
 0x11f   : > { %v1442_v58 = vsel %vm1314_vm13, %v1250_v39, %v1378_v50  ;;  %v2110_v62 = vpack.c.bf16 %v1410_v57, %v1409_v33  ;;  %v1408_v0 = vsel %vm1280_vm14, %v1216_v41, %v1344_v53  ;;  %v1219_v5 = vadd.f32 %v2594_v40, %v810_v46 }
 0x120   : > { %v2190_v63 = vpack.c.bf16 %v1442_v58, %v1441_v44  ;;  %vm1312_vm15 = vcmp.ge.f32.partialorder %v1248_v54, 0.0  ;;  %v2105_v1 = vpack.c.bf16 %v1408_v0, %v1407_v48  ;;  %v1376_v2 = vmul.f32 0.1, %v1248_v54 }
 0x121   : > { %vm1285_vm0 = vcmp.ge.f32.partialorder %v1221_v59, 0.0  ;;  %v1349_v3 = vmul.f32 0.1, %v1221_v59  ;;  %2238 = vst [vmem:[%s2611_s17 + $0x38] sm:$0xff] %v2110_v62   ;;  %vm1317_vm1 = vcmp.ge.f32.partialorder %v1253_v60, 0.0  ;;  %v1251_v6 = vadd.f32 %v2594_v40, %v938_v47 }
 0x122   : > { %2254 = vst [vmem:[%s2611_s17 + $0xb8] sm:$0xff] %v2190_v63   ;;  %v1381_v4 = vmul.f32 0.1, %v1253_v60  ;;  %2237 = vst [vmem:[%s2611_s17 + $0x30] sm:$0xff] %v2105_v1   ;;  %v1440_v7 = vsel %vm1312_vm15, %v1248_v54, %v1376_v2  ;;  %v1222_v9 = vadd.f32 %v2338_v51, %v2594_v40  ;;  %v1254_v10 = vadd.f32 %v2370_v55, %v2594_v40  ;;  %v2341_v11 = vpop.f32.mrb[20].mxu0  ;;  %v2373_v12 = vpop.f32.mrb[20].mxu1 }
 0x123   : > { %v1413_v8 = vsel %vm1285_vm0, %v1221_v59, %v1349_v3  ;;  %v2185_v13 = vpack.c.bf16 %v1440_v7, %v1439_v52  ;;  %vm1283_vm2 = vcmp.ge.f32.partialorder %v1219_v5, 0.0  ;;  %v1347_v15 = vmul.f32 0.1, %v1219_v5  ;;  %v826_v16 = vpop.f32.mrb[21].mxu0  ;;  %v954_v17 = vpop.f32.mrb[21].mxu1 }
 0x124   : > { %v1445_v14 = vsel %vm1317_vm1, %v1253_v60, %v1381_v4  ;;  %vm1315_vm3 = vcmp.ge.f32.partialorder %v1251_v6, 0.0  ;;  %v1379_v18 = vmul.f32 0.1, %v1251_v6  ;;  %vm1286_vm4 = vcmp.ge.f32.partialorder %v1222_v9, 0.0  ;;  %v2342_v23 = vpop.f32.mrb[22].mxu0  ;;  %v2374_v24 = vpop.f32.mrb[22].mxu1 }
 0x125   : > { %v1350_v19 = vmul.f32 0.1, %v1222_v9  ;;  %2253 = vst [vmem:[%s2611_s17 + $0xb0] sm:$0xff] %v2185_v13   ;;  %v1411_v20 = vsel %vm1283_vm2, %v1219_v5, %v1347_v15  ;;  %vm1318_vm5 = vcmp.ge.f32.partialorder %v1254_v10, 0.0  ;;  %v1382_v21 = vmul.f32 0.1, %v1254_v10 }
 0x126   : > { %v1220_v22 = vadd.f32 %v2594_v40, %v813_v56  ;;  %v1443_v25 = vsel %vm1315_vm3, %v1251_v6, %v1379_v18  ;;  %v1252_v27 = vadd.f32 %v2594_v40, %v941_v61  ;;  %v1225_v28 = vadd.f32 %v2341_v11, %v2594_v40  ;;  %v829_v29 = vpop.f32.mrb[23].mxu0  ;;  %v957_v30 = vpop.f32.mrb[23].mxu1 }
 0x127   : > { %v1414_v26 = vsel %vm1286_vm4, %v1222_v9, %v1350_v19  ;;  %v1446_v32 = vsel %vm1318_vm5, %v1254_v10, %v1382_v21  ;;  %v1257_v38 = vadd.f32 %v2373_v12, %v2594_v40  ;;  %v1223_v39 = vadd.f32 %v2594_v40, %v826_v16 }
 0x128   : > { %v2120_v31 = vpack.c.bf16 %v1414_v26, %v1413_v8  ;;  %vm1284_vm6 = vcmp.ge.f32.partialorder %v1220_v22, 0.0  ;;  %v1348_v33 = vmul.f32 0.1, %v1220_v22  ;;  %v2200_v34 = vpack.c.bf16 %v1446_v32, %v1445_v14 }
 0x129   : > { %vm1316_vm7 = vcmp.ge.f32.partialorder %v1252_v27, 0.0  ;;  %v1380_v35 = vmul.f32 0.1, %v1252_v27  ;;  %vm1289_vm8 = vcmp.ge.f32.partialorder %v1225_v28, 0.0  ;;  %v1353_v37 = vmul.f32 0.1, %v1225_v28 }
 0x12a   : > { %2240 = vst [vmem:[%s2611_s17 + $0x48] sm:$0xff] %v2120_v31   ;;  %v1412_v36 = vsel %vm1284_vm6, %v1220_v22, %v1348_v33  ;;  %2256 = vst [vmem:[%s2611_s17 + $0xc8] sm:$0xff] %v2200_v34   ;;  %v1255_v43 = vadd.f32 %v2594_v40, %v954_v17  ;;  %v1226_v44 = vadd.f32 %v2342_v23, %v2594_v40  ;;  %v2345_v45 = vpop.f32.mrb[24].mxu0  ;;  %v2377_v46 = vpop.f32.mrb[24].mxu1  ;;  %vm1321_vm9 = vcmp.ge.f32.partialorder %v1257_v38, 0.0 }
 0x12b   : > { %v2115_v41 = vpack.c.bf16 %v1412_v36, %v1411_v20  ;;  %v1444_v42 = vsel %vm1316_vm7, %v1252_v27, %v1380_v35  ;;  %v1385_v48 = vmul.f32 0.1, %v1257_v38  ;;  %v842_v49 = vpop.f32.mrb[25].mxu0  ;;  %v970_v50 = vpop.f32.mrb[25].mxu1  ;;  %v1417_v51 = vsel %vm1289_vm8, %v1225_v28, %v1353_v37 }
 0x12c   : > { %v2195_v47 = vpack.c.bf16 %v1444_v42, %v1443_v25  ;;  %vm1287_vm10 = vcmp.ge.f32.partialorder %v1223_v39, 0.0  ;;  %v1351_v52 = vmul.f32 0.1, %v1223_v39  ;;  %v1383_v53 = vmul.f32 0.1, %v1255_v43  ;;  %v2346_v56 = vpop.f32.mrb[26].mxu0 }
 0x12d   : > { %2239 = vst [vmem:[%s2611_s17 + $0x40] sm:$0xff] %v2115_v41   ;;  %vm1319_vm11 = vcmp.ge.f32.partialorder %v1255_v43, 0.0  ;;  %vm1290_vm12 = vcmp.ge.f32.partialorder %v1226_v44, 0.0  ;;  %v1354_v54 = vmul.f32 0.1, %v1226_v44  ;;  %v1258_v55 = vadd.f32 %v2374_v24, %v2594_v40  ;;  %v2378_v57 = vpop.f32.mrb[26].mxu1 }
 0x12e   : > { %2255 = vst [vmem:[%s2611_s17 + $0xc0] sm:$0xff] %v2195_v47   ;;  %v1449_v58 = vsel %vm1321_vm9, %v1257_v38, %v1385_v48  ;;  %v1415_v59 = vsel %vm1287_vm10, %v1223_v39, %v1351_v52  ;;  %v1224_v60 = vadd.f32 %v2594_v40, %v829_v29  ;;  %v1256_v61 = vadd.f32 %v2594_v40, %v957_v30  ;;  %v845_v62 = vpop.f32.mrb[27].mxu0  ;;  %v973_v63 = vpop.f32.mrb[27].mxu1 }
 0x12f   : > { %v1418_v0 = vsel %vm1290_vm12, %v1226_v44, %v1354_v54  ;;  %vm1322_vm13 = vcmp.ge.f32.partialorder %v1258_v55, 0.0  ;;  %v1386_v1 = vmul.f32 0.1, %v1258_v55  ;;  %v1229_v2 = vadd.f32 %v2345_v45, %v2594_v40 }
 0x130   : > { %v2130_v3 = vpack.c.bf16 %v1418_v0, %v1417_v51  ;;  %vm1288_vm14 = vcmp.ge.f32.partialorder %v1224_v60, 0.0  ;;  %v1352_v4 = vmul.f32 0.1, %v1224_v60  ;;  %vm1320_vm15 = vcmp.ge.f32.partialorder %v1256_v61, 0.0 }
 0x131   : > { %v1450_v5 = vsel %vm1322_vm13, %v1258_v55, %v1386_v1  ;;  %v1384_v6 = vmul.f32 0.1, %v1256_v61  ;;  %vm1293_vm0 = vcmp.ge.f32.partialorder %v1229_v2, 0.0  ;;  %v1357_v7 = vmul.f32 0.1, %v1229_v2 }
 0x132   : > { %2242 = vst [vmem:[%s2611_s17 + $0x58] sm:$0xff] %v2130_v3   ;;  %v2210_v8 = vpack.c.bf16 %v1450_v5, %v1449_v58  ;;  %v1416_v9 = vsel %vm1288_vm14, %v1224_v60, %v1352_v4  ;;  %v1261_v10 = vadd.f32 %v2377_v46, %v2594_v40  ;;  %v1227_v11 = vadd.f32 %v2594_v40, %v842_v49  ;;  %v2349_v12 = vpop.f32.mrb[28].mxu0  ;;  %v2381_v13 = vpop.f32.mrb[28].mxu1 }
 0x133   : > { %v1447_v14 = vsel %vm1319_vm11, %v1255_v43, %v1383_v53  ;;  %v2125_v15 = vpack.c.bf16 %v1416_v9, %v1415_v59  ;;  %v1448_v16 = vsel %vm1320_vm15, %v1256_v61, %v1384_v6  ;;  %v1259_v17 = vadd.f32 %v2594_v40, %v970_v50  ;;  %v858_v18 = vpop.f32.mrb[29].mxu0  ;;  %v986_v19 = vpop.f32.mrb[29].mxu1 }
 0x134   : > { %2258 = vst [vmem:[%s2611_s17 + $0xd8] sm:$0xff] %v2210_v8   ;;  %v2205_v20 = vpack.c.bf16 %v1448_v16, %v1447_v14  ;;  %vm1325_vm1 = vcmp.ge.f32.partialorder %v1261_v10, 0.0  ;;  %v1389_v21 = vmul.f32 0.1, %v1261_v10  ;;  %vm1291_vm2 = vcmp.ge.f32.partialorder %v1227_v11, 0.0  ;;  %v2350_v22 = vpop.f32.mrb[30].mxu0 }
 0x135   : > { %v2382_v23 = vpop.f32.mrb[30].mxu1  ;;  %2241 = vst [vmem:[%s2611_s17 + $0x50] sm:$0xff] %v2125_v15   ;;  %v1421_v24 = vsel %vm1293_vm0, %v1229_v2, %v1357_v7  ;;  %v1355_v25 = vmul.f32 0.1, %v1227_v11  ;;  %vm1323_vm3 = vcmp.ge.f32.partialorder %v1259_v17, 0.0  ;;  %v1230_v26 = vadd.f32 %v2346_v56, %v2594_v40  ;;  %v861_v27 = vpop.f32.mrb[31].mxu0 }
 0x136   : > { %2257 = vst [vmem:[%s2611_s17 + $0xd0] sm:$0xff] %v2205_v20   ;;  %v1387_v28 = vmul.f32 0.1, %v1259_v17  ;;  %v1262_v29 = vadd.f32 %v2378_v57, %v2594_v40  ;;  %v1228_v30 = vadd.f32 %v2594_v40, %v845_v62  ;;  %v1260_v31 = vadd.f32 %v2594_v40, %v973_v63  ;;  %v989_v32 = vpop.f32.mrb[31].mxu1 }
 0x137   : > { %v1453_v33 = vsel %vm1325_vm1, %v1261_v10, %v1389_v21  ;;  %v1419_v34 = vsel %vm1291_vm2, %v1227_v11, %v1355_v25  ;;  %vm1294_vm4 = vcmp.ge.f32.partialorder %v1230_v26, 0.0  ;;  %v1358_v35 = vmul.f32 0.1, %v1230_v26 }
 0x138   : > { %vm1326_vm5 = vcmp.ge.f32.partialorder %v1262_v29, 0.0  ;;  %v1390_v36 = vmul.f32 0.1, %v1262_v29  ;;  %vm1292_vm6 = vcmp.ge.f32.partialorder %v1228_v30, 0.0  ;;  %v1356_v37 = vmul.f32 0.1, %v1228_v30 }
 0x139   : > { %v1422_v38 = vsel %vm1294_vm4, %v1230_v26, %v1358_v35  ;;  %vm1324_vm7 = vcmp.ge.f32.partialorder %v1260_v31, 0.0  ;;  %v1388_v39 = vmul.f32 0.1, %v1260_v31  ;;  %v1233_v41 = vadd.f32 %v2349_v12, %v2594_v40 }
 0x13a   : > { %v2140_v42 = vpack.c.bf16 %v1422_v38, %v1421_v24  ;;  %v1454_v43 = vsel %vm1326_vm5, %v1262_v29, %v1390_v36  ;;  %v1420_v44 = vsel %vm1292_vm6, %v1228_v30, %v1356_v37  ;;  %v1265_v45 = vadd.f32 %v2381_v13, %v2594_v40 }
 0x13b   : > { %v1451_v46 = vsel %vm1323_vm3, %v1259_v17, %v1387_v28  ;;  %v2220_v47 = vpack.c.bf16 %v1454_v43, %v1453_v33  ;;  %v2135_v48 = vpack.c.bf16 %v1420_v44, %v1419_v34  ;;  %v1452_v49 = vsel %vm1324_vm7, %v1260_v31, %v1388_v39 }
 0x13c   : > { %2244 = vst [vmem:[%s2611_s17 + $0x68] sm:$0xff] %v2140_v42   ;;  %v2215_v50 = vpack.c.bf16 %v1452_v49, %v1451_v46  ;;  %vm1297_vm8 = vcmp.ge.f32.partialorder %v1233_v41, 0.0  ;;  %v1361_v51 = vmul.f32 0.1, %v1233_v41  ;;  %v1393_v52 = vmul.f32 0.1, %v1265_v45 }
 0x13d   : > { %2260 = vst [vmem:[%s2611_s17 + $0xe8] sm:$0xff] %v2220_v47   ;;  %2243 = vst [vmem:[%s2611_s17 + $0x60] sm:$0xff] %v2135_v48   ;;  %v1231_v53 = vadd.f32 %v2594_v40, %v858_v18  ;;  %v1263_v54 = vadd.f32 %v2594_v40, %v986_v19  ;;  %v1234_v55 = vadd.f32 %v2350_v22, %v2594_v40  ;;  %vm1329_vm9 = vcmp.ge.f32.partialorder %v1265_v45, 0.0 }
 0x13e   : > { %v1266_v56 = vadd.f32 %v2382_v23, %v2594_v40  ;;  %2259 = vst [vmem:[%s2611_s17 + $0xe0] sm:$0xff] %v2215_v50   ;;  %v1232_v57 = vadd.f32 %v2594_v40, %v861_v27  ;;  %v1264_v58 = vadd.f32 %v2594_v40, %v989_v32  ;;  %v1425_v59 = vsel %vm1297_vm8, %v1233_v41, %v1361_v51 }
 0x13f   : > { %vm1295_vm10 = vcmp.ge.f32.partialorder %v1231_v53, 0.0  ;;  %v1359_v60 = vmul.f32 0.1, %v1231_v53  ;;  %v1391_v61 = vmul.f32 0.1, %v1263_v54  ;;  %vm1298_vm11 = vcmp.ge.f32.partialorder %v1234_v55, 0.0 }
 0x140   : > { %v1362_v62 = vmul.f32 0.1, %v1234_v55  ;;  %vm1330_vm12 = vcmp.ge.f32.partialorder %v1266_v56, 0.0  ;;  %v1394_v63 = vmul.f32 0.1, %v1266_v56  ;;  %v1457_v0 = vsel %vm1329_vm9, %v1265_v45, %v1393_v52 }
 0x141   : > { %vm1327_vm13 = vcmp.ge.f32.partialorder %v1263_v54, 0.0  ;;  %vm1296_vm14 = vcmp.ge.f32.partialorder %v1232_v57, 0.0  ;;  %v1360_v1 = vmul.f32 0.1, %v1232_v57  ;;  %vm1328_vm15 = vcmp.ge.f32.partialorder %v1264_v58, 0.0 }
 0x142   : > { %v1426_v2 = vsel %vm1298_vm11, %v1234_v55, %v1362_v62  ;;  %v1458_v3 = vsel %vm1330_vm12, %v1266_v56, %v1394_v63  ;;  %v1392_v40 = vmul.f32 0.1, %v1264_v58  ;;  %v1423_v4 = vsel %vm1295_vm10, %v1231_v53, %v1359_v60 }
 0x143   : > { %v2150_v5 = vpack.c.bf16 %v1426_v2, %v1425_v59  ;;  %v2230_v6 = vpack.c.bf16 %v1458_v3, %v1457_v0  ;;  %v1424_v7 = vsel %vm1296_vm14, %v1232_v57, %v1360_v1  ;;  %v1455_v8 = vsel %vm1327_vm13, %v1263_v54, %v1391_v61 }
 0x144   : > { %v2145_v9 = vpack.c.bf16 %v1424_v7, %v1423_v4  ;;  %v1456_v10 = vsel %vm1328_vm15, %v1264_v58, %v1392_v40 }
 0x145   : > { %2246 = vst [vmem:[%s2611_s17 + $0x78] sm:$0xff] %v2150_v5   ;;  %2262 = vst [vmem:[%s2611_s17 + $0xf8] sm:$0xff] %v2230_v6   ;;  %v2225_v11 = vpack.c.bf16 %v1456_v10, %v1455_v8 }
 0x146   : > { %2245 = vst [vmem:[%s2611_s17 + $0x70] sm:$0xff] %v2145_v9  }
 0x147   : > { %2261 = vst [vmem:[%s2611_s17 + $0xf0] sm:$0xff] %v2225_v11  }
 0x148 PF: > { %s13_s14 = sadd.s32 1, %s2485_s14   ;;  %s2721_s12 = smov %s2481_s13 }
 0x149   : > { %p10_p5 = scmp.ge.s32.totalorder %s13_s14, 6   ;;  %s2722_s13 = smov %s2724_s15 }
 0x14b   :  { %12 = sbr.rel (!%p10_p5) target bundleno = 2 (0x2), region = 76 }

// kernel: upconv7_forward.15
= control target key start
LH: loop header
LB: loop body
LE: loop exit
PB: predicated region body
PF: predicated region fallthrough
CT: control target
= control target key end

     0   :  { %s2722_s12 = smov 0   ;;  %s2724_s13 = smov 0   ;;  %s3008_s0 = inlined_call_operand.vmem [shape: bf16[1536,256], index: 0, kind: input, shape index: {}]   ;;  %s3009_s1 = inlined_call_operand.vmem [shape: bf16[256,128], index: 1, kind: input, shape index: {}]   ;;  %s3010_s2 = inlined_call_operand.vmem [shape: f32[1,128], index: 2, kind: input, shape index: {}]   ;;  %s3011_s3 = inlined_call_operand.vmem [shape: bf16[1536,128], index: 3, kind: output, shape index: {}]  }
   0x1   :  { %s2726_s14 = smov 0  }
   0x2 LB: > { %s32_s15 = sadd.s32 1, %s2695_s13  ;;  %p2099_p0 = scmp.ge.s32.totalorder %s2699_s14, 1  ;;  %s2699_s14 = sphi %s2726_s14, %s13_s14   ;;  %s2695_s13 = sphi %s2724_s13, %s3013_s13   ;;  %s2691_s12 = sphi %s2722_s12, %s3012_s12  }
   0x3   : > { %p34_p1 = scmp.ge.s32.totalorder %s32_s15, 3  ;;  %p191_p2 = scmp.lt.s32.totalorder %s2699_s14, 4 }
   0x5   : > { %s3015_s15 = smov (%p34_p1, %s32_s15), 0  ;;  %p192_p3 = pnand %p2099_p0, %p191_p2 }
   0x6   : > { %v2565_v0 = vld [vmem:[%s3009_s1] sm:$0xff] (!%p192_p3)   ;;  %v2701_v1 = vmov (!%p192_p3), 0   ;;  %s2100_s18 = sshll.u32 (!%p192_p3), %s2691_s12, 6  ;;  %v2566_v2 = vld [vmem:[%s3009_s1 + $0x8] sm:$0xff] (!%p192_p3)   ;;  %v2567_v3 = vld [vmem:[%s3009_s1 + $0x10] sm:$0xff] (!%p192_p3)  }
   0x7   : > { %195 = sbr.rel (%p192_p3) target bundleno = 413 (0x19d), region = 32  ;;  %912 = vmatprep.subr.bf16.mxu0 (!%p192_p3), %v2701_v1  ;;  %2508 = vmatprep.subr.bf16.mxu1 (!%p192_p3), %v2701_v1  ;;  %p236_p4 = scmp.lt.s32.totalorder (!%p192_p3), %s2100_s18, 191  ;;  %v2568_v4 = vld [vmem:[%s3009_s1 + $0x18] sm:$0xff] (!%p192_p3)   ;;  %v2569_v5 = vld [vmem:[%s3009_s1 + $0x20] sm:$0xff] (!%p192_p3)   ;;  %v2570_v7 = vld [vmem:[%s3009_s1 + $0x28] sm:$0xff] (!%p192_p3)  }
   0x8   : > { %913 = vmatpush1.bf16.msra.mxu0 (!%p192_p3), %v2565_v0  ;;  %2524 = vmatpush1.bf16.msra.mxu1 (!%p192_p3), %v2565_v0  ;;  %v2571_v9 = vld [vmem:[%s3009_s1 + $0x30] sm:$0xff] (!%p192_p3)   ;;  %v2572_v10 = vld [vmem:[%s3009_s1 + $0x38] sm:$0xff] (!%p192_p3)   ;;  %v2573_v11 = vld [vmem:[%s3009_s1 + $0x40] sm:$0xff] (!%p192_p3)  }
   0x9   : > { %914 = vmatprep.subr.bf16.mxu0 (!%p192_p3), %v2701_v1  ;;  %2509 = vmatprep.subr.bf16.mxu1 (!%p192_p3), %v2701_v1  ;;  %v2574_v12 = vld [vmem:[%s3009_s1 + $0x48] sm:$0xff] (!%p192_p3)   ;;  %v2575_v13 = vld [vmem:[%s3009_s1 + $0x50] sm:$0xff] (!%p192_p3)   ;;  %v2576_v14 = vld [vmem:[%s3009_s1 + $0x58] sm:$0xff] (!%p192_p3)  }
   0xa   : > { %v2577_v15 = vld [vmem:[%s3009_s1 + $0x60] sm:$0xff] (!%p192_p3)   ;;  %v2578_v16 = vld [vmem:[%s3009_s1 + $0x68] sm:$0xff] (!%p192_p3)   ;;  %v2579_v17 = vld [vmem:[%s3009_s1 + $0x70] sm:$0xff] (!%p192_p3)  }
   0xb   : > { %v2580_v18 = vld [vmem:[%s3009_s1 + $0x78] sm:$0xff] (!%p192_p3)  }
   0xc   : > { %915 = vmatpush1.bf16.msra.mxu0 (!%p192_p3), %v2566_v2  ;;  %2525 = vmatpush1.bf16.msra.mxu1 (!%p192_p3), %v2566_v2 }
   0xd   : > { %916 = vmatprep.subr.bf16.mxu0 (!%p192_p3), %v2701_v1  ;;  %2510 = vmatprep.subr.bf16.mxu1 (!%p192_p3), %v2701_v1 }
   0xe   : > { %s3017_s18 = smov (!%p236_p4, %s2100_s18), 191 }
   0xf   : > { %s2252_s25 = sshll.u32 %s3017_s18, 3 }
  0x10   : > { %917 = vmatpush1.bf16.msra.mxu0 %v2567_v3  ;;  %2526 = vmatpush1.bf16.msra.mxu1 %v2567_v3  ;;  %s2769_s30 = scalar_lea.vmem %s3008_s0, %s2252_s25 }
  0x11   : > { %918 = vmatprep.subr.bf16.mxu0 %v2701_v1  ;;  %2511 = vmatprep.subr.bf16.mxu1 %v2701_v1  ;;  %v2583_v6 = vld [vmem:[%s2769_s30 + $0x4] ss:$8 sps:$4 sm:$0xff]   ;;  %v2581_v19 = vld [vmem:[%s2769_s30] ss:$8 sps:$4 sm:$0xff]   ;;  %v2587_v21 = vld [vmem:[%s2769_s30 + $0x14] ss:$8 sps:$4 sm:$0xff]  }
  0x12   : > { %v2586_v8 = vld [vmem:[%s2769_s30 + $0x104] ss:$8 sps:$4 sm:$0xff]   ;;  %944 = vmatprep.mubr.bf16.mxu0 %v2583_v6  ;;  %v2584_v20 = vld [vmem:[%s2769_s30 + $0x100] ss:$8 sps:$4 sm:$0xff]   ;;  %v2589_v22 = vld [vmem:[%s2769_s30 + $0x114] ss:$8 sps:$4 sm:$0xff]  }
  0x13   : > { %1072 = vmatprep.mubr.bf16.mxu1 %v2586_v8  ;;  %v2591_v23 = vld [vmem:[%s2769_s30 + $0x10] ss:$8 sps:$4 sm:$0xff]   ;;  %v2593_v25 = vld [vmem:[%s2769_s30 + $0x24] ss:$8 sps:$4 sm:$0xff]   ;;  %v2597_v27 = vld [vmem:[%s2769_s30 + $0x20] ss:$8 sps:$4 sm:$0xff]  }
  0x14   : > { %919 = vmatpush1.bf16.msra.mxu0 %v2568_v4  ;;  %2527 = vmatpush1.bf16.msra.mxu1 %v2568_v4  ;;  %v2592_v24 = vld [vmem:[%s2769_s30 + $0x110] ss:$8 sps:$4 sm:$0xff]   ;;  %v2595_v26 = vld [vmem:[%s2769_s30 + $0x124] ss:$8 sps:$4 sm:$0xff]   ;;  %v2598_v28 = vld [vmem:[%s2769_s30 + $0x120] ss:$8 sps:$4 sm:$0xff]  }
  0x15   : > { %920 = vmatprep.subr.bf16.mxu0 %v2701_v1  ;;  %2512 = vmatprep.subr.bf16.mxu1 %v2701_v1  ;;  %v2599_v29 = vld [vmem:[%s2769_s30 + $0x34] ss:$8 sps:$4 sm:$0xff]   ;;  %v2603_v31 = vld [vmem:[%s2769_s30 + $0x30] ss:$8 sps:$4 sm:$0xff]   ;;  %v2605_v33 = vld [vmem:[%s2769_s30 + $0x44] ss:$8 sps:$4 sm:$0xff]  }
  0x16   : > { %v2601_v30 = vld [vmem:[%s2769_s30 + $0x134] ss:$8 sps:$4 sm:$0xff]   ;;  %v2604_v32 = vld [vmem:[%s2769_s30 + $0x130] ss:$8 sps:$4 sm:$0xff]   ;;  %v2607_v34 = vld [vmem:[%s2769_s30 + $0x144] ss:$8 sps:$4 sm:$0xff]  }
  0x17   : > { %v2609_v35 = vld [vmem:[%s2769_s30 + $0x40] ss:$8 sps:$4 sm:$0xff]   ;;  %v2611_v37 = vld [vmem:[%s2769_s30 + $0x54] ss:$8 sps:$4 sm:$0xff]   ;;  %v2615_v39 = vld [vmem:[%s2769_s30 + $0x50] ss:$8 sps:$4 sm:$0xff]  }
  0x18   : > { %921 = vmatpush1.bf16.msra.mxu0 %v2569_v5  ;;  %2528 = vmatpush1.bf16.msra.mxu1 %v2569_v5  ;;  %v2610_v36 = vld [vmem:[%s2769_s30 + $0x140] ss:$8 sps:$4 sm:$0xff]   ;;  %v2613_v38 = vld [vmem:[%s2769_s30 + $0x154] ss:$8 sps:$4 sm:$0xff]   ;;  %v2616_v40 = vld [vmem:[%s2769_s30 + $0x150] ss:$8 sps:$4 sm:$0xff]  }
  0x19   : > { %922 = vmatprep.subr.bf16.mxu0 %v2701_v1  ;;  %2513 = vmatprep.subr.bf16.mxu1 %v2701_v1  ;;  %v2617_v41 = vld [vmem:[%s2769_s30 + $0x64] ss:$8 sps:$4 sm:$0xff]   ;;  %v2621_v43 = vld [vmem:[%s2769_s30 + $0x60] ss:$8 sps:$4 sm:$0xff]   ;;  %v2623_v45 = vld [vmem:[%s2769_s30 + $0x74] ss:$8 sps:$4 sm:$0xff]  }
  0x1a   : > { %v2619_v42 = vld [vmem:[%s2769_s30 + $0x164] ss:$8 sps:$4 sm:$0xff]   ;;  %v2622_v44 = vld [vmem:[%s2769_s30 + $0x160] ss:$8 sps:$4 sm:$0xff]   ;;  %v2625_v46 = vld [vmem:[%s2769_s30 + $0x174] ss:$8 sps:$4 sm:$0xff]  }
  0x1b   : > { %v2627_v47 = vld [vmem:[%s2769_s30 + $0x70] ss:$8 sps:$4 sm:$0xff]   ;;  %v2629_v49 = vld [vmem:[%s2769_s30 + $0x84] ss:$8 sps:$4 sm:$0xff]   ;;  %v2633_v51 = vld [vmem:[%s2769_s30 + $0x80] ss:$8 sps:$4 sm:$0xff]  }
  0x1c   : > { %923 = vmatpush1.bf16.msra.mxu0 %v2570_v7  ;;  %2529 = vmatpush1.bf16.msra.mxu1 %v2570_v7  ;;  %v2628_v48 = vld [vmem:[%s2769_s30 + $0x170] ss:$8 sps:$4 sm:$0xff]   ;;  %v2631_v50 = vld [vmem:[%s2769_s30 + $0x184] ss:$8 sps:$4 sm:$0xff]   ;;  %v2634_v52 = vld [vmem:[%s2769_s30 + $0x180] ss:$8 sps:$4 sm:$0xff]  }
  0x1d   : > { %924 = vmatprep.subr.bf16.mxu0 %v2701_v1  ;;  %2514 = vmatprep.subr.bf16.mxu1 %v2701_v1  ;;  %v2635_v53 = vld [vmem:[%s2769_s30 + $0x94] ss:$8 sps:$4 sm:$0xff]   ;;  %v2639_v55 = vld [vmem:[%s2769_s30 + $0x90] ss:$8 sps:$4 sm:$0xff]   ;;  %v2641_v57 = vld [vmem:[%s2769_s30 + $0xa4] ss:$8 sps:$4 sm:$0xff]  }
  0x1e   : > { %v2637_v54 = vld [vmem:[%s2769_s30 + $0x194] ss:$8 sps:$4 sm:$0xff]   ;;  %v2640_v56 = vld [vmem:[%s2769_s30 + $0x190] ss:$8 sps:$4 sm:$0xff]   ;;  %v2643_v58 = vld [vmem:[%s2769_s30 + $0x1a4] ss:$8 sps:$4 sm:$0xff]  }
  0x1f   : > { %v2645_v59 = vld [vmem:[%s2769_s30 + $0xa0] ss:$8 sps:$4 sm:$0xff]   ;;  %v2647_v61 = vld [vmem:[%s2769_s30 + $0xb4] ss:$8 sps:$4 sm:$0xff]   ;;  %v2651_v63 = vld [vmem:[%s2769_s30 + $0xb0] ss:$8 sps:$4 sm:$0xff]  }
  0x20   : > { %925 = vmatpush1.bf16.msra.mxu0 %v2571_v9  ;;  %2530 = vmatpush1.bf16.msra.mxu1 %v2571_v9  ;;  %v2646_v60 = vld [vmem:[%s2769_s30 + $0x1a0] ss:$8 sps:$4 sm:$0xff]   ;;  %v2649_v62 = vld [vmem:[%s2769_s30 + $0x1b4] ss:$8 sps:$4 sm:$0xff]   ;;  %v2652_v0 = vld [vmem:[%s2769_s30 + $0x1b0] ss:$8 sps:$4 sm:$0xff]  }
  0x21   : > { %926 = vmatprep.subr.bf16.mxu0 %v2701_v1  ;;  %2515 = vmatprep.subr.bf16.mxu1 %v2701_v1  ;;  %v2655_v2 = vld [vmem:[%s2769_s30 + $0x1c4] ss:$8 sps:$4 sm:$0xff]   ;;  %v2657_v3 = vld [vmem:[%s2769_s30 + $0xc0] ss:$8 sps:$4 sm:$0xff]   ;;  %v2659_v5 = vld [vmem:[%s2769_s30 + $0xd4] ss:$8 sps:$4 sm:$0xff]  }
  0x22   : > { %v2658_v4 = vld [vmem:[%s2769_s30 + $0x1c0] ss:$8 sps:$4 sm:$0xff]   ;;  %v2661_v6 = vld [vmem:[%s2769_s30 + $0x1d4] ss:$8 sps:$4 sm:$0xff]   ;;  %v2663_v7 = vld [vmem:[%s2769_s30 + $0xd0] ss:$8 sps:$4 sm:$0xff]  }
  0x23   : > { %v2664_v8 = vld [vmem:[%s2769_s30 + $0x1d0] ss:$8 sps:$4 sm:$0xff]   ;;  %v2665_v9 = vld [vmem:[%s2769_s30 + $0xe4] ss:$8 sps:$4 sm:$0xff]  }
  0x24   : > { %927 = vmatpush1.bf16.msra.mxu0 %v2572_v10  ;;  %2531 = vmatpush1.bf16.msra.mxu1 %v2572_v10  ;;  %v2667_v10 = vld [vmem:[%s2769_s30 + $0x1e4] ss:$8 sps:$4 sm:$0xff]  }
  0x25   : > { %928 = vmatprep.subr.bf16.mxu0 %v2701_v1  ;;  %2516 = vmatprep.subr.bf16.mxu1 %v2701_v1 }
  0x28   : > { %929 = vmatpush1.bf16.msra.mxu0 %v2573_v11  ;;  %2532 = vmatpush1.bf16.msra.mxu1 %v2573_v11  ;;  %v2669_v11 = vld [vmem:[%s2769_s30 + $0xe0] ss:$8 sps:$4 sm:$0xff]  }
  0x29   : > { %930 = vmatprep.subr.bf16.mxu0 %v2701_v1  ;;  %2517 = vmatprep.subr.bf16.mxu1 %v2701_v1 }
  0x2c   : > { %931 = vmatpush1.bf16.msra.mxu0 %v2574_v12  ;;  %2533 = vmatpush1.bf16.msra.mxu1 %v2574_v12  ;;  %v2670_v12 = vld [vmem:[%s2769_s30 + $0x1e0] ss:$8 sps:$4 sm:$0xff]  }
  0x2d   : > { %932 = vmatprep.subr.bf16.mxu0 %v2701_v1  ;;  %2518 = vmatprep.subr.bf16.mxu1 %v2701_v1 }
  0x30   : > { %933 = vmatpush1.bf16.msra.mxu0 %v2575_v13  ;;  %2534 = vmatpush1.bf16.msra.mxu1 %v2575_v13  ;;  %v2671_v13 = vld [vmem:[%s2769_s30 + $0xf4] ss:$8 sps:$4 sm:$0xff]  }
  0x31   : > { %934 = vmatprep.subr.bf16.mxu0 %v2701_v1  ;;  %2519 = vmatprep.subr.bf16.mxu1 %v2701_v1 }
  0x34   : > { %935 = vmatpush1.bf16.msra.mxu0 %v2576_v14  ;;  %2535 = vmatpush1.bf16.msra.mxu1 %v2576_v14  ;;  %v2673_v14 = vld [vmem:[%s2769_s30 + $0x1f4] ss:$8 sps:$4 sm:$0xff]  }
  0x35   : > { %936 = vmatprep.subr.bf16.mxu0 %v2701_v1  ;;  %2520 = vmatprep.subr.bf16.mxu1 %v2701_v1 }
  0x38   : > { %937 = vmatpush1.bf16.msra.mxu0 %v2577_v15  ;;  %2536 = vmatpush1.bf16.msra.mxu1 %v2577_v15  ;;  %v2675_v15 = vld [vmem:[%s2769_s30 + $0xf0] ss:$8 sps:$4 sm:$0xff]  }
  0x39   : > { %938 = vmatprep.subr.bf16.mxu0 %v2701_v1  ;;  %2521 = vmatprep.subr.bf16.mxu1 %v2701_v1 }
  0x3c   : > { %939 = vmatpush1.bf16.msra.mxu0 %v2578_v16  ;;  %2537 = vmatpush1.bf16.msra.mxu1 %v2578_v16  ;;  %v2676_v16 = vld [vmem:[%s2769_s30 + $0x1f0] ss:$8 sps:$4 sm:$0xff]  }
  0x3d   : > { %940 = vmatprep.subr.bf16.mxu0 %v2701_v1  ;;  %2522 = vmatprep.subr.bf16.mxu1 %v2701_v1 }
  0x40   : > { %941 = vmatpush1.bf16.msra.mxu0 %v2579_v17  ;;  %2538 = vmatpush1.bf16.msra.mxu1 %v2579_v17  ;;  %v2895_v17 = vld [vmem:[%s3010_s2] ss:$0 sm:$0xff] }
  0x41   : > { %942 = vmatprep.subr.bf16.mxu0 %v2701_v1  ;;  %2523 = vmatprep.subr.bf16.mxu1 %v2701_v1  ;;  %v2653_v1 = vld [vmem:[%s2769_s30 + $0xc4] ss:$8 sps:$4 sm:$0xff]   ;;  %s2104_s30 = sshll.u32 %s3017_s18, 2 }
  0x42   : > { %s2905_s8 = scalar_lea.vmem %s3011_s3, %s2104_s30 }
  0x44   : > { %943 = vmatpush1.bf16.msra.mxu0 %v2580_v18  ;;  %2539 = vmatpush1.bf16.msra.mxu1 %v2580_v18 }
  0x47   : > { %945 = vmatmul.mubr.bf16.vlgmr.msra.gmra.mrb[0].mxu0 %v2581_v19  ;;  %1073 = vmatmul.mubr.bf16.vlgmr.msra.gmra.mrb[0].mxu1 %v2584_v20 }
  0x48   : > { %952 = vmatprep.mubr.bf16.mxu0 %v2587_v21  ;;  %1080 = vmatprep.mubr.bf16.mxu1 %v2589_v22 }
  0x4f   : > { %953 = vmatmul.mubr.bf16.gmra.mrb[4].mxu0 %v2591_v23  ;;  %1081 = vmatmul.mubr.bf16.gmra.mrb[4].mxu1 %v2592_v24 }
  0x50   : > { %960 = vmatprep.mubr.bf16.mxu0 %v2593_v25  ;;  %1088 = vmatprep.mubr.bf16.mxu1 %v2595_v26 }
  0x57   : > { %961 = vmatmul.mubr.bf16.gmra.mrb[8].mxu0 %v2597_v27  ;;  %1089 = vmatmul.mubr.bf16.gmra.mrb[8].mxu1 %v2598_v28 }
  0x58   : > { %968 = vmatprep.mubr.bf16.mxu0 %v2599_v29  ;;  %1096 = vmatprep.mubr.bf16.mxu1 %v2601_v30 }
  0x5f   : > { %969 = vmatmul.mubr.bf16.gmra.mrb[12].mxu0 %v2603_v31  ;;  %1097 = vmatmul.mubr.bf16.gmra.mrb[12].mxu1 %v2604_v32 }
  0x60   : > { %976 = vmatprep.mubr.bf16.mxu0 %v2605_v33  ;;  %1104 = vmatprep.mubr.bf16.mxu1 %v2607_v34 }
  0x67   : > { %977 = vmatmul.mubr.bf16.gmra.mrb[16].mxu0 %v2609_v35  ;;  %1105 = vmatmul.mubr.bf16.gmra.mrb[16].mxu1 %v2610_v36 }
  0x68   : > { %984 = vmatprep.mubr.bf16.mxu0 %v2611_v37  ;;  %1112 = vmatprep.mubr.bf16.mxu1 %v2613_v38 }
  0x6f   : > { %985 = vmatmul.mubr.bf16.gmra.mrb[20].mxu0 %v2615_v39  ;;  %1113 = vmatmul.mubr.bf16.gmra.mrb[20].mxu1 %v2616_v40 }
  0x70   : > { %992 = vmatprep.mubr.bf16.mxu0 %v2617_v41  ;;  %1120 = vmatprep.mubr.bf16.mxu1 %v2619_v42 }
  0x77   : > { %993 = vmatmul.mubr.bf16.gmra.mrb[24].mxu0 %v2621_v43  ;;  %1121 = vmatmul.mubr.bf16.gmra.mrb[24].mxu1 %v2622_v44 }
  0x78   : > { %1000 = vmatprep.mubr.bf16.mxu0 %v2623_v45  ;;  %1128 = vmatprep.mubr.bf16.mxu1 %v2625_v46 }
  0x7f   : > { %1001 = vmatmul.mubr.bf16.gmra.mrb[28].mxu0 %v2627_v47  ;;  %1129 = vmatmul.mubr.bf16.gmra.mrb[28].mxu1 %v2628_v48 }
  0x80   : > { %1008 = vmatprep.mubr.bf16.mxu0 %v2629_v49  ;;  %1136 = vmatprep.mubr.bf16.mxu1 %v2631_v50 }
  0x87   : > { %1009 = vmatmul.mubr.bf16.gmra.mrb[32].mxu0 %v2633_v51  ;;  %1137 = vmatmul.mubr.bf16.gmra.mrb[32].mxu1 %v2634_v52 }
  0x88   : > { %1016 = vmatprep.mubr.bf16.mxu0 %v2635_v53  ;;  %1144 = vmatprep.mubr.bf16.mxu1 %v2637_v54 }
  0x8f   : > { %1017 = vmatmul.mubr.bf16.gmra.mrb[36].mxu0 %v2639_v55  ;;  %1145 = vmatmul.mubr.bf16.gmra.mrb[36].mxu1 %v2640_v56 }
  0x90   : > { %1024 = vmatprep.mubr.bf16.mxu0 %v2641_v57  ;;  %1152 = vmatprep.mubr.bf16.mxu1 %v2643_v58 }
  0x97   : > { %1025 = vmatmul.mubr.bf16.gmra.mrb[40].mxu0 %v2645_v59  ;;  %1153 = vmatmul.mubr.bf16.gmra.mrb[40].mxu1 %v2646_v60 }
  0x98   : > { %1032 = vmatprep.mubr.bf16.mxu0 %v2647_v61  ;;  %1160 = vmatprep.mubr.bf16.mxu1 %v2649_v62 }
  0x9f   : > { %1033 = vmatmul.mubr.bf16.gmra.mrb[44].mxu0 %v2651_v63  ;;  %1161 = vmatmul.mubr.bf16.gmra.mrb[44].mxu1 %v2652_v0 }
  0xa0   : > { %1040 = vmatprep.mubr.bf16.mxu0 %v2653_v1  ;;  %1168 = vmatprep.mubr.bf16.mxu1 %v2655_v2 }
  0xa7   : > { %1041 = vmatmul.mubr.bf16.gmra.mrb[48].mxu0 %v2657_v3  ;;  %1169 = vmatmul.mubr.bf16.gmra.mrb[48].mxu1 %v2658_v4 }
  0xa8   : > { %1048 = vmatprep.mubr.bf16.mxu0 %v2659_v5  ;;  %1176 = vmatprep.mubr.bf16.mxu1 %v2661_v6 }
  0xaf   : > { %1049 = vmatmul.mubr.bf16.gmra.mrb[52].mxu0 %v2663_v7  ;;  %1177 = vmatmul.mubr.bf16.gmra.mrb[52].mxu1 %v2664_v8 }
  0xb0   : > { %1056 = vmatprep.mubr.bf16.mxu0 %v2665_v9  ;;  %1184 = vmatprep.mubr.bf16.mxu1 %v2667_v10 }
  0xb7   : > { %1057 = vmatmul.mubr.bf16.gmra.mrb[56].mxu0 %v2669_v11  ;;  %1185 = vmatmul.mubr.bf16.gmra.mrb[56].mxu1 %v2670_v12 }
  0xb8   : > { %1064 = vmatprep.mubr.bf16.mxu0 %v2671_v13  ;;  %1192 = vmatprep.mubr.bf16.mxu1 %v2673_v14 }
  0xbf   : > { %1065 = vmatmul.mubr.bf16.gmra.mrb[60].mxu0 %v2675_v15  ;;  %1193 = vmatmul.mubr.bf16.gmra.mrb[60].mxu1 %v2676_v16 }
 0x11a   : > { %v946_v18 = vpop.f32.mrb[0].mxu0  ;;  %v1074_v19 = vpop.f32.mrb[0].mxu1 }
 0x11b   : > { %v1403_v20 = vadd.f32 %v2895_v17, %v946_v18  ;;  %v1435_v21 = vadd.f32 %v2895_v17, %v1074_v19  ;;  %v948_v22 = vpop.f32.mrb[1].mxu0  ;;  %v1076_v23 = vpop.f32.mrb[1].mxu1 }
 0x11c   : > { %v949_v24 = vpop.f32.mrb[2].mxu0  ;;  %v1077_v25 = vpop.f32.mrb[2].mxu1 }
 0x11d   : > { %v1531_v26 = vmul.f32 0.1, %v1403_v20  ;;  %v1563_v27 = vmul.f32 0.1, %v1435_v21  ;;  %v1404_v28 = vadd.f32 %v2895_v17, %v949_v24  ;;  %v1436_v29 = vadd.f32 %v2895_v17, %v1077_v25  ;;  %v951_v30 = vpop.f32.mrb[3].mxu0  ;;  %v1079_v31 = vpop.f32.mrb[3].mxu1 }
 0x11e   : > { %vm1467_vm0 = vcmp.ge.f32.partialorder %v1403_v20, 0.0  ;;  %vm1499_vm1 = vcmp.ge.f32.partialorder %v1435_v21, 0.0 }
 0x11f   : > { %vm1468_vm2 = vcmp.ge.f32.partialorder %v1404_v28, 0.0  ;;  %v1532_v32 = vmul.f32 0.1, %v1404_v28  ;;  %vm1500_vm3 = vcmp.ge.f32.partialorder %v1436_v29, 0.0  ;;  %v1564_v33 = vmul.f32 0.1, %v1436_v29 }
 0x120   : > { %v1595_v34 = vsel %vm1467_vm0, %v1403_v20, %v1531_v26  ;;  %v1627_v35 = vsel %vm1499_vm1, %v1435_v21, %v1563_v27 }
 0x121   : > { %v1596_v36 = vsel %vm1468_vm2, %v1404_v28, %v1532_v32  ;;  %v1628_v37 = vsel %vm1500_vm3, %v1436_v29, %v1564_v33 }
 0x122   : > { %v954_v38 = vpop.f32.mrb[4].mxu0  ;;  %v1082_v39 = vpop.f32.mrb[4].mxu1  ;;  %v2320_v40 = vpack.c.bf16 %v1596_v36, %v1595_v34  ;;  %v2400_v41 = vpack.c.bf16 %v1628_v37, %v1627_v35 }
 0x123   : > { %v1405_v42 = vadd.f32 %v2895_v17, %v954_v38  ;;  %v1437_v43 = vadd.f32 %v2895_v17, %v1082_v39  ;;  %v956_v44 = vpop.f32.mrb[5].mxu0  ;;  %v1084_v45 = vpop.f32.mrb[5].mxu1 }
 0x124   : > { %v957_v46 = vpop.f32.mrb[6].mxu0  ;;  %v1085_v47 = vpop.f32.mrb[6].mxu1  ;;  %2321 = vst [vmem:[%s2905_s8] sm:$0xff] %v2320_v40   ;;  %2492 = vst [vmem:[%s2905_s8 + $0x80] sm:$0xff] %v2400_v41  }
 0x125   : > { %v1533_v48 = vmul.f32 0.1, %v1405_v42  ;;  %v1565_v49 = vmul.f32 0.1, %v1437_v43  ;;  %v1406_v50 = vadd.f32 %v2895_v17, %v957_v46  ;;  %v1438_v51 = vadd.f32 %v2895_v17, %v1085_v47  ;;  %v959_v52 = vpop.f32.mrb[7].mxu0  ;;  %v1087_v53 = vpop.f32.mrb[7].mxu1 }
 0x126   : > { %vm1469_vm4 = vcmp.ge.f32.partialorder %v1405_v42, 0.0  ;;  %vm1501_vm5 = vcmp.ge.f32.partialorder %v1437_v43, 0.0 }
 0x127   : > { %vm1470_vm6 = vcmp.ge.f32.partialorder %v1406_v50, 0.0  ;;  %v1534_v54 = vmul.f32 0.1, %v1406_v50  ;;  %vm1502_vm7 = vcmp.ge.f32.partialorder %v1438_v51, 0.0  ;;  %v1566_v55 = vmul.f32 0.1, %v1438_v51 }
 0x128   : > { %v1597_v56 = vsel %vm1469_vm4, %v1405_v42, %v1533_v48  ;;  %v1629_v57 = vsel %vm1501_vm5, %v1437_v43, %v1565_v49 }
 0x129   : > { %v1598_v58 = vsel %vm1470_vm6, %v1406_v50, %v1534_v54  ;;  %v1630_v59 = vsel %vm1502_vm7, %v1438_v51, %v1566_v55 }
 0x12a   : > { %v962_v60 = vpop.f32.mrb[8].mxu0  ;;  %v1090_v61 = vpop.f32.mrb[8].mxu1  ;;  %v2325_v62 = vpack.c.bf16 %v1598_v58, %v1597_v56  ;;  %v2405_v63 = vpack.c.bf16 %v1630_v59, %v1629_v57 }
 0x12b   : > { %v1407_v0 = vadd.f32 %v2895_v17, %v962_v60  ;;  %v1439_v1 = vadd.f32 %v2895_v17, %v1090_v61  ;;  %v964_v2 = vpop.f32.mrb[9].mxu0  ;;  %v1092_v3 = vpop.f32.mrb[9].mxu1 }
 0x12c   : > { %v965_v4 = vpop.f32.mrb[10].mxu0  ;;  %v1093_v5 = vpop.f32.mrb[10].mxu1  ;;  %2477 = vst [vmem:[%s2905_s8 + $0x8] sm:$0xff] %v2325_v62   ;;  %2493 = vst [vmem:[%s2905_s8 + $0x88] sm:$0xff] %v2405_v63  }
 0x12d   : > { %v1535_v6 = vmul.f32 0.1, %v1407_v0  ;;  %v1567_v7 = vmul.f32 0.1, %v1439_v1  ;;  %v1408_v8 = vadd.f32 %v2895_v17, %v965_v4  ;;  %v1440_v9 = vadd.f32 %v2895_v17, %v1093_v5  ;;  %v967_v10 = vpop.f32.mrb[11].mxu0  ;;  %v1095_v11 = vpop.f32.mrb[11].mxu1 }
 0x12e   : > { %vm1471_vm8 = vcmp.ge.f32.partialorder %v1407_v0, 0.0  ;;  %vm1503_vm9 = vcmp.ge.f32.partialorder %v1439_v1, 0.0 }
 0x12f   : > { %vm1472_vm10 = vcmp.ge.f32.partialorder %v1408_v8, 0.0  ;;  %v1536_v12 = vmul.f32 0.1, %v1408_v8  ;;  %vm1504_vm11 = vcmp.ge.f32.partialorder %v1440_v9, 0.0  ;;  %v1568_v13 = vmul.f32 0.1, %v1440_v9 }
 0x130   : > { %v1599_v14 = vsel %vm1471_vm8, %v1407_v0, %v1535_v6  ;;  %v1631_v15 = vsel %vm1503_vm9, %v1439_v1, %v1567_v7 }
 0x131   : > { %v1600_v16 = vsel %vm1472_vm10, %v1408_v8, %v1536_v12  ;;  %v1632_v18 = vsel %vm1504_vm11, %v1440_v9, %v1568_v13 }
 0x132   : > { %v970_v19 = vpop.f32.mrb[12].mxu0  ;;  %v1098_v20 = vpop.f32.mrb[12].mxu1  ;;  %v2330_v21 = vpack.c.bf16 %v1600_v16, %v1599_v14  ;;  %v2410_v22 = vpack.c.bf16 %v1632_v18, %v1631_v15 }
 0x133   : > { %v1409_v23 = vadd.f32 %v2895_v17, %v970_v19  ;;  %v1441_v24 = vadd.f32 %v2895_v17, %v1098_v20  ;;  %v972_v25 = vpop.f32.mrb[13].mxu0  ;;  %v1100_v26 = vpop.f32.mrb[13].mxu1 }
 0x134   : > { %v973_v27 = vpop.f32.mrb[14].mxu0  ;;  %v1101_v28 = vpop.f32.mrb[14].mxu1  ;;  %2478 = vst [vmem:[%s2905_s8 + $0x10] sm:$0xff] %v2330_v21   ;;  %2494 = vst [vmem:[%s2905_s8 + $0x90] sm:$0xff] %v2410_v22  }
 0x135   : > { %v1537_v29 = vmul.f32 0.1, %v1409_v23  ;;  %v1569_v30 = vmul.f32 0.1, %v1441_v24  ;;  %v1410_v31 = vadd.f32 %v2895_v17, %v973_v27  ;;  %v1442_v32 = vadd.f32 %v2895_v17, %v1101_v28  ;;  %v975_v33 = vpop.f32.mrb[15].mxu0  ;;  %v1103_v34 = vpop.f32.mrb[15].mxu1 }
 0x136   : > { %vm1473_vm12 = vcmp.ge.f32.partialorder %v1409_v23, 0.0  ;;  %vm1505_vm13 = vcmp.ge.f32.partialorder %v1441_v24, 0.0 }
 0x137   : > { %vm1474_vm14 = vcmp.ge.f32.partialorder %v1410_v31, 0.0  ;;  %v1538_v35 = vmul.f32 0.1, %v1410_v31  ;;  %vm1506_vm15 = vcmp.ge.f32.partialorder %v1442_v32, 0.0  ;;  %v1570_v36 = vmul.f32 0.1, %v1442_v32 }
 0x138   : > { %v1601_v37 = vsel %vm1473_vm12, %v1409_v23, %v1537_v29  ;;  %v1633_v38 = vsel %vm1505_vm13, %v1441_v24, %v1569_v30 }
 0x139   : > { %v1602_v39 = vsel %vm1474_vm14, %v1410_v31, %v1538_v35  ;;  %v1634_v40 = vsel %vm1506_vm15, %v1442_v32, %v1570_v36 }
 0x13a   : > { %v978_v41 = vpop.f32.mrb[16].mxu0  ;;  %v1106_v42 = vpop.f32.mrb[16].mxu1  ;;  %v2335_v43 = vpack.c.bf16 %v1602_v39, %v1601_v37  ;;  %v2415_v44 = vpack.c.bf16 %v1634_v40, %v1633_v38 }
 0x13b   : > { %v1411_v45 = vadd.f32 %v2895_v17, %v978_v41  ;;  %v1443_v46 = vadd.f32 %v2895_v17, %v1106_v42  ;;  %v980_v47 = vpop.f32.mrb[17].mxu0  ;;  %v1108_v48 = vpop.f32.mrb[17].mxu1 }
 0x13c   : > { %v981_v49 = vpop.f32.mrb[18].mxu0  ;;  %v1109_v50 = vpop.f32.mrb[18].mxu1  ;;  %2479 = vst [vmem:[%s2905_s8 + $0x18] sm:$0xff] %v2335_v43   ;;  %2495 = vst [vmem:[%s2905_s8 + $0x98] sm:$0xff] %v2415_v44  }
 0x13d   : > { %v1539_v51 = vmul.f32 0.1, %v1411_v45  ;;  %v1571_v52 = vmul.f32 0.1, %v1443_v46  ;;  %v1412_v53 = vadd.f32 %v2895_v17, %v981_v49  ;;  %v1444_v54 = vadd.f32 %v2895_v17, %v1109_v50  ;;  %v983_v55 = vpop.f32.mrb[19].mxu0  ;;  %v1111_v56 = vpop.f32.mrb[19].mxu1 }
 0x13e   : > { %vm1475_vm0 = vcmp.ge.f32.partialorder %v1411_v45, 0.0  ;;  %vm1507_vm1 = vcmp.ge.f32.partialorder %v1443_v46, 0.0 }
 0x13f   : > { %vm1476_vm2 = vcmp.ge.f32.partialorder %v1412_v53, 0.0  ;;  %v1540_v57 = vmul.f32 0.1, %v1412_v53  ;;  %vm1508_vm3 = vcmp.ge.f32.partialorder %v1444_v54, 0.0  ;;  %v1572_v58 = vmul.f32 0.1, %v1444_v54 }
 0x140   : > { %v1603_v59 = vsel %vm1475_vm0, %v1411_v45, %v1539_v51  ;;  %v1635_v60 = vsel %vm1507_vm1, %v1443_v46, %v1571_v52 }
 0x141   : > { %v1604_v61 = vsel %vm1476_vm2, %v1412_v53, %v1540_v57  ;;  %v1636_v62 = vsel %vm1508_vm3, %v1444_v54, %v1572_v58 }
 0x142   : > { %v986_v63 = vpop.f32.mrb[20].mxu0  ;;  %v1114_v0 = vpop.f32.mrb[20].mxu1  ;;  %v2340_v1 = vpack.c.bf16 %v1604_v61, %v1603_v59  ;;  %v2420_v2 = vpack.c.bf16 %v1636_v62, %v1635_v60 }
 0x143   : > { %v1413_v3 = vadd.f32 %v2895_v17, %v986_v63  ;;  %v1445_v4 = vadd.f32 %v2895_v17, %v1114_v0  ;;  %v988_v5 = vpop.f32.mrb[21].mxu0  ;;  %v1116_v6 = vpop.f32.mrb[21].mxu1 }
 0x144   : > { %v989_v7 = vpop.f32.mrb[22].mxu0  ;;  %v1117_v8 = vpop.f32.mrb[22].mxu1  ;;  %2480 = vst [vmem:[%s2905_s8 + $0x20] sm:$0xff] %v2340_v1   ;;  %2496 = vst [vmem:[%s2905_s8 + $0xa0] sm:$0xff] %v2420_v2  }
 0x145   : > { %v1541_v9 = vmul.f32 0.1, %v1413_v3  ;;  %v1573_v10 = vmul.f32 0.1, %v1445_v4  ;;  %v1414_v11 = vadd.f32 %v2895_v17, %v989_v7  ;;  %v1446_v12 = vadd.f32 %v2895_v17, %v1117_v8  ;;  %v991_v13 = vpop.f32.mrb[23].mxu0  ;;  %v1119_v14 = vpop.f32.mrb[23].mxu1 }
 0x146   : > { %vm1477_vm4 = vcmp.ge.f32.partialorder %v1413_v3, 0.0  ;;  %vm1509_vm5 = vcmp.ge.f32.partialorder %v1445_v4, 0.0 }
 0x147   : > { %vm1478_vm6 = vcmp.ge.f32.partialorder %v1414_v11, 0.0  ;;  %v1542_v15 = vmul.f32 0.1, %v1414_v11  ;;  %vm1510_vm7 = vcmp.ge.f32.partialorder %v1446_v12, 0.0  ;;  %v1574_v16 = vmul.f32 0.1, %v1446_v12 }
 0x148   : > { %v1605_v18 = vsel %vm1477_vm4, %v1413_v3, %v1541_v9  ;;  %v1637_v19 = vsel %vm1509_vm5, %v1445_v4, %v1573_v10 }
 0x149   : > { %v1606_v20 = vsel %vm1478_vm6, %v1414_v11, %v1542_v15  ;;  %v1638_v21 = vsel %vm1510_vm7, %v1446_v12, %v1574_v16 }
 0x14a   : > { %v994_v22 = vpop.f32.mrb[24].mxu0  ;;  %v1122_v23 = vpop.f32.mrb[24].mxu1  ;;  %v2345_v24 = vpack.c.bf16 %v1606_v20, %v1605_v18  ;;  %v2425_v25 = vpack.c.bf16 %v1638_v21, %v1637_v19 }
 0x14b   : > { %v1415_v26 = vadd.f32 %v2895_v17, %v994_v22  ;;  %v1447_v27 = vadd.f32 %v2895_v17, %v1122_v23  ;;  %v996_v28 = vpop.f32.mrb[25].mxu0  ;;  %v1124_v29 = vpop.f32.mrb[25].mxu1 }
 0x14c   : > { %v997_v30 = vpop.f32.mrb[26].mxu0  ;;  %v1125_v31 = vpop.f32.mrb[26].mxu1  ;;  %2481 = vst [vmem:[%s2905_s8 + $0x28] sm:$0xff] %v2345_v24   ;;  %2497 = vst [vmem:[%s2905_s8 + $0xa8] sm:$0xff] %v2425_v25  }
 0x14d   : > { %v1543_v32 = vmul.f32 0.1, %v1415_v26  ;;  %v1575_v33 = vmul.f32 0.1, %v1447_v27  ;;  %v1416_v34 = vadd.f32 %v2895_v17, %v997_v30  ;;  %v1448_v35 = vadd.f32 %v2895_v17, %v1125_v31  ;;  %v999_v36 = vpop.f32.mrb[27].mxu0  ;;  %v1127_v37 = vpop.f32.mrb[27].mxu1 }
 0x14e   : > { %vm1479_vm8 = vcmp.ge.f32.partialorder %v1415_v26, 0.0  ;;  %vm1511_vm9 = vcmp.ge.f32.partialorder %v1447_v27, 0.0 }
 0x14f   : > { %vm1480_vm10 = vcmp.ge.f32.partialorder %v1416_v34, 0.0  ;;  %v1544_v38 = vmul.f32 0.1, %v1416_v34  ;;  %vm1512_vm11 = vcmp.ge.f32.partialorder %v1448_v35, 0.0  ;;  %v1576_v39 = vmul.f32 0.1, %v1448_v35 }
 0x150   : > { %v1607_v40 = vsel %vm1479_vm8, %v1415_v26, %v1543_v32  ;;  %v1639_v41 = vsel %vm1511_vm9, %v1447_v27, %v1575_v33 }
 0x151   : > { %v1608_v42 = vsel %vm1480_vm10, %v1416_v34, %v1544_v38  ;;  %v1640_v43 = vsel %vm1512_vm11, %v1448_v35, %v1576_v39 }
 0x152   : > { %v1002_v44 = vpop.f32.mrb[28].mxu0  ;;  %v1130_v45 = vpop.f32.mrb[28].mxu1  ;;  %v2350_v46 = vpack.c.bf16 %v1608_v42, %v1607_v40  ;;  %v2430_v47 = vpack.c.bf16 %v1640_v43, %v1639_v41 }
 0x153   : > { %v1417_v48 = vadd.f32 %v2895_v17, %v1002_v44  ;;  %v1449_v49 = vadd.f32 %v2895_v17, %v1130_v45  ;;  %v1004_v50 = vpop.f32.mrb[29].mxu0  ;;  %v1132_v51 = vpop.f32.mrb[29].mxu1 }
 0x154   : > { %v1005_v52 = vpop.f32.mrb[30].mxu0  ;;  %v1133_v53 = vpop.f32.mrb[30].mxu1  ;;  %2482 = vst [vmem:[%s2905_s8 + $0x30] sm:$0xff] %v2350_v46   ;;  %2498 = vst [vmem:[%s2905_s8 + $0xb0] sm:$0xff] %v2430_v47  }
 0x155   : > { %v1545_v54 = vmul.f32 0.1, %v1417_v48  ;;  %v1577_v55 = vmul.f32 0.1, %v1449_v49  ;;  %v1418_v56 = vadd.f32 %v2895_v17, %v1005_v52  ;;  %v1450_v57 = vadd.f32 %v2895_v17, %v1133_v53  ;;  %v1007_v58 = vpop.f32.mrb[31].mxu0  ;;  %v1135_v59 = vpop.f32.mrb[31].mxu1 }
 0x156   : > { %vm1481_vm12 = vcmp.ge.f32.partialorder %v1417_v48, 0.0  ;;  %vm1513_vm13 = vcmp.ge.f32.partialorder %v1449_v49, 0.0 }
 0x157   : > { %vm1482_vm14 = vcmp.ge.f32.partialorder %v1418_v56, 0.0  ;;  %v1546_v60 = vmul.f32 0.1, %v1418_v56  ;;  %vm1514_vm15 = vcmp.ge.f32.partialorder %v1450_v57, 0.0  ;;  %v1578_v61 = vmul.f32 0.1, %v1450_v57 }
 0x158   : > { %v1609_v62 = vsel %vm1481_vm12, %v1417_v48, %v1545_v54  ;;  %v1641_v63 = vsel %vm1513_vm13, %v1449_v49, %v1577_v55 }
 0x159   : > { %v1610_v0 = vsel %vm1482_vm14, %v1418_v56, %v1546_v60  ;;  %v1642_v1 = vsel %vm1514_vm15, %v1450_v57, %v1578_v61 }
 0x15a   : > { %v1010_v2 = vpop.f32.mrb[32].mxu0  ;;  %v1138_v3 = vpop.f32.mrb[32].mxu1  ;;  %v2355_v4 = vpack.c.bf16 %v1610_v0, %v1609_v62  ;;  %v2435_v5 = vpack.c.bf16 %v1642_v1, %v1641_v63 }
 0x15b   : > { %v1419_v6 = vadd.f32 %v2895_v17, %v1010_v2  ;;  %v1451_v7 = vadd.f32 %v2895_v17, %v1138_v3  ;;  %v1012_v8 = vpop.f32.mrb[33].mxu0  ;;  %v1140_v9 = vpop.f32.mrb[33].mxu1 }
 0x15c   : > { %v1013_v10 = vpop.f32.mrb[34].mxu0  ;;  %v1141_v11 = vpop.f32.mrb[34].mxu1  ;;  %2483 = vst [vmem:[%s2905_s8 + $0x38] sm:$0xff] %v2355_v4   ;;  %2499 = vst [vmem:[%s2905_s8 + $0xb8] sm:$0xff] %v2435_v5  }
 0x15d   : > { %v1547_v12 = vmul.f32 0.1, %v1419_v6  ;;  %v1579_v13 = vmul.f32 0.1, %v1451_v7  ;;  %v1420_v14 = vadd.f32 %v2895_v17, %v1013_v10  ;;  %v1452_v15 = vadd.f32 %v2895_v17, %v1141_v11  ;;  %v1015_v16 = vpop.f32.mrb[35].mxu0  ;;  %v1143_v18 = vpop.f32.mrb[35].mxu1 }
 0x15e   : > { %vm1483_vm0 = vcmp.ge.f32.partialorder %v1419_v6, 0.0  ;;  %vm1515_vm1 = vcmp.ge.f32.partialorder %v1451_v7, 0.0 }
 0x15f   : > { %vm1484_vm2 = vcmp.ge.f32.partialorder %v1420_v14, 0.0  ;;  %v1548_v19 = vmul.f32 0.1, %v1420_v14  ;;  %vm1516_vm3 = vcmp.ge.f32.partialorder %v1452_v15, 0.0  ;;  %v1580_v20 = vmul.f32 0.1, %v1452_v15 }
 0x160   : > { %v1611_v21 = vsel %vm1483_vm0, %v1419_v6, %v1547_v12  ;;  %v1643_v22 = vsel %vm1515_vm1, %v1451_v7, %v1579_v13 }
 0x161   : > { %v1612_v23 = vsel %vm1484_vm2, %v1420_v14, %v1548_v19  ;;  %v1644_v24 = vsel %vm1516_vm3, %v1452_v15, %v1580_v20 }
 0x162   : > { %v1018_v25 = vpop.f32.mrb[36].mxu0  ;;  %v1146_v26 = vpop.f32.mrb[36].mxu1  ;;  %v2360_v27 = vpack.c.bf16 %v1612_v23, %v1611_v21  ;;  %v2440_v28 = vpack.c.bf16 %v1644_v24, %v1643_v22 }
 0x163   : > { %v1421_v29 = vadd.f32 %v2895_v17, %v1018_v25  ;;  %v1453_v30 = vadd.f32 %v2895_v17, %v1146_v26  ;;  %v1020_v31 = vpop.f32.mrb[37].mxu0  ;;  %v1148_v32 = vpop.f32.mrb[37].mxu1 }
 0x164   : > { %v1021_v33 = vpop.f32.mrb[38].mxu0  ;;  %v1149_v34 = vpop.f32.mrb[38].mxu1  ;;  %2484 = vst [vmem:[%s2905_s8 + $0x40] sm:$0xff] %v2360_v27   ;;  %2500 = vst [vmem:[%s2905_s8 + $0xc0] sm:$0xff] %v2440_v28  }
 0x165   : > { %v1549_v35 = vmul.f32 0.1, %v1421_v29  ;;  %v1581_v36 = vmul.f32 0.1, %v1453_v30  ;;  %v1422_v37 = vadd.f32 %v2895_v17, %v1021_v33  ;;  %v1454_v38 = vadd.f32 %v2895_v17, %v1149_v34  ;;  %v1023_v39 = vpop.f32.mrb[39].mxu0  ;;  %v1151_v40 = vpop.f32.mrb[39].mxu1 }
 0x166   : > { %vm1485_vm4 = vcmp.ge.f32.partialorder %v1421_v29, 0.0  ;;  %vm1517_vm5 = vcmp.ge.f32.partialorder %v1453_v30, 0.0 }
 0x167   : > { %vm1486_vm6 = vcmp.ge.f32.partialorder %v1422_v37, 0.0  ;;  %v1550_v41 = vmul.f32 0.1, %v1422_v37  ;;  %vm1518_vm7 = vcmp.ge.f32.partialorder %v1454_v38, 0.0  ;;  %v1582_v42 = vmul.f32 0.1, %v1454_v38 }
 0x168   : > { %v1613_v43 = vsel %vm1485_vm4, %v1421_v29, %v1549_v35  ;;  %v1645_v44 = vsel %vm1517_vm5, %v1453_v30, %v1581_v36 }
 0x169   : > { %v1614_v45 = vsel %vm1486_vm6, %v1422_v37, %v1550_v41  ;;  %v1646_v46 = vsel %vm1518_vm7, %v1454_v38, %v1582_v42 }
 0x16a   : > { %v1026_v47 = vpop.f32.mrb[40].mxu0  ;;  %v1154_v48 = vpop.f32.mrb[40].mxu1  ;;  %v2365_v49 = vpack.c.bf16 %v1614_v45, %v1613_v43  ;;  %v2445_v50 = vpack.c.bf16 %v1646_v46, %v1645_v44 }
 0x16b   : > { %v1423_v51 = vadd.f32 %v2895_v17, %v1026_v47  ;;  %v1455_v52 = vadd.f32 %v2895_v17, %v1154_v48  ;;  %v1028_v53 = vpop.f32.mrb[41].mxu0  ;;  %v1156_v54 = vpop.f32.mrb[41].mxu1 }
 0x16c   : > { %v1029_v55 = vpop.f32.mrb[42].mxu0  ;;  %v1157_v56 = vpop.f32.mrb[42].mxu1  ;;  %2485 = vst [vmem:[%s2905_s8 + $0x48] sm:$0xff] %v2365_v49   ;;  %2501 = vst [vmem:[%s2905_s8 + $0xc8] sm:$0xff] %v2445_v50  }
 0x16d   : > { %v1551_v57 = vmul.f32 0.1, %v1423_v51  ;;  %v1583_v58 = vmul.f32 0.1, %v1455_v52  ;;  %v1424_v59 = vadd.f32 %v2895_v17, %v1029_v55  ;;  %v1456_v60 = vadd.f32 %v2895_v17, %v1157_v56  ;;  %v1031_v61 = vpop.f32.mrb[43].mxu0  ;;  %v1159_v62 = vpop.f32.mrb[43].mxu1 }
 0x16e   : > { %vm1487_vm8 = vcmp.ge.f32.partialorder %v1423_v51, 0.0  ;;  %vm1519_vm9 = vcmp.ge.f32.partialorder %v1455_v52, 0.0 }
 0x16f   : > { %vm1488_vm10 = vcmp.ge.f32.partialorder %v1424_v59, 0.0  ;;  %v1552_v63 = vmul.f32 0.1, %v1424_v59  ;;  %vm1520_vm11 = vcmp.ge.f32.partialorder %v1456_v60, 0.0  ;;  %v1584_v0 = vmul.f32 0.1, %v1456_v60 }
 0x170   : > { %v1615_v1 = vsel %vm1487_vm8, %v1423_v51, %v1551_v57  ;;  %v1647_v2 = vsel %vm1519_vm9, %v1455_v52, %v1583_v58 }
 0x171   : > { %v1616_v3 = vsel %vm1488_vm10, %v1424_v59, %v1552_v63  ;;  %v1648_v4 = vsel %vm1520_vm11, %v1456_v60, %v1584_v0 }
 0x172   : > { %v1034_v5 = vpop.f32.mrb[44].mxu0  ;;  %v1162_v6 = vpop.f32.mrb[44].mxu1  ;;  %v2370_v7 = vpack.c.bf16 %v1616_v3, %v1615_v1  ;;  %v2450_v8 = vpack.c.bf16 %v1648_v4, %v1647_v2 }
 0x173   : > { %v1425_v9 = vadd.f32 %v2895_v17, %v1034_v5  ;;  %v1457_v10 = vadd.f32 %v2895_v17, %v1162_v6  ;;  %v1036_v11 = vpop.f32.mrb[45].mxu0  ;;  %v1164_v12 = vpop.f32.mrb[45].mxu1 }
 0x174   : > { %v1037_v13 = vpop.f32.mrb[46].mxu0  ;;  %v1165_v14 = vpop.f32.mrb[46].mxu1  ;;  %2486 = vst [vmem:[%s2905_s8 + $0x50] sm:$0xff] %v2370_v7   ;;  %2502 = vst [vmem:[%s2905_s8 + $0xd0] sm:$0xff] %v2450_v8  }
 0x175   : > { %v1553_v15 = vmul.f32 0.1, %v1425_v9  ;;  %v1585_v16 = vmul.f32 0.1, %v1457_v10  ;;  %v1426_v18 = vadd.f32 %v2895_v17, %v1037_v13  ;;  %v1458_v19 = vadd.f32 %v2895_v17, %v1165_v14  ;;  %v1039_v20 = vpop.f32.mrb[47].mxu0  ;;  %v1167_v21 = vpop.f32.mrb[47].mxu1 }
 0x176   : > { %vm1489_vm12 = vcmp.ge.f32.partialorder %v1425_v9, 0.0  ;;  %vm1521_vm13 = vcmp.ge.f32.partialorder %v1457_v10, 0.0 }
 0x177   : > { %vm1490_vm14 = vcmp.ge.f32.partialorder %v1426_v18, 0.0  ;;  %v1554_v22 = vmul.f32 0.1, %v1426_v18  ;;  %vm1522_vm15 = vcmp.ge.f32.partialorder %v1458_v19, 0.0  ;;  %v1586_v23 = vmul.f32 0.1, %v1458_v19 }
 0x178   : > { %v1617_v24 = vsel %vm1489_vm12, %v1425_v9, %v1553_v15  ;;  %v1649_v25 = vsel %vm1521_vm13, %v1457_v10, %v1585_v16 }
 0x179   : > { %v1618_v26 = vsel %vm1490_vm14, %v1426_v18, %v1554_v22  ;;  %v1650_v27 = vsel %vm1522_vm15, %v1458_v19, %v1586_v23 }
 0x17a   : > { %v1042_v28 = vpop.f32.mrb[48].mxu0  ;;  %v1170_v29 = vpop.f32.mrb[48].mxu1  ;;  %v2375_v30 = vpack.c.bf16 %v1618_v26, %v1617_v24  ;;  %v2455_v31 = vpack.c.bf16 %v1650_v27, %v1649_v25 }
 0x17b   : > { %v1427_v32 = vadd.f32 %v2895_v17, %v1042_v28  ;;  %v1459_v33 = vadd.f32 %v2895_v17, %v1170_v29  ;;  %v1044_v34 = vpop.f32.mrb[49].mxu0  ;;  %v1172_v35 = vpop.f32.mrb[49].mxu1 }
 0x17c   : > { %v1045_v36 = vpop.f32.mrb[50].mxu0  ;;  %v1173_v37 = vpop.f32.mrb[50].mxu1  ;;  %2487 = vst [vmem:[%s2905_s8 + $0x58] sm:$0xff] %v2375_v30   ;;  %2503 = vst [vmem:[%s2905_s8 + $0xd8] sm:$0xff] %v2455_v31  }
 0x17d   : > { %v1555_v38 = vmul.f32 0.1, %v1427_v32  ;;  %v1587_v39 = vmul.f32 0.1, %v1459_v33  ;;  %v1428_v40 = vadd.f32 %v2895_v17, %v1045_v36  ;;  %v1460_v41 = vadd.f32 %v2895_v17, %v1173_v37  ;;  %v1047_v42 = vpop.f32.mrb[51].mxu0  ;;  %v1175_v43 = vpop.f32.mrb[51].mxu1 }
 0x17e   : > { %vm1491_vm0 = vcmp.ge.f32.partialorder %v1427_v32, 0.0  ;;  %vm1523_vm1 = vcmp.ge.f32.partialorder %v1459_v33, 0.0 }
 0x17f   : > { %vm1492_vm2 = vcmp.ge.f32.partialorder %v1428_v40, 0.0  ;;  %v1556_v44 = vmul.f32 0.1, %v1428_v40  ;;  %vm1524_vm3 = vcmp.ge.f32.partialorder %v1460_v41, 0.0  ;;  %v1588_v45 = vmul.f32 0.1, %v1460_v41 }
 0x180   : > { %v1619_v46 = vsel %vm1491_vm0, %v1427_v32, %v1555_v38  ;;  %v1651_v47 = vsel %vm1523_vm1, %v1459_v33, %v1587_v39 }
 0x181   : > { %v1620_v48 = vsel %vm1492_vm2, %v1428_v40, %v1556_v44  ;;  %v1652_v49 = vsel %vm1524_vm3, %v1460_v41, %v1588_v45 }
 0x182   : > { %v1050_v50 = vpop.f32.mrb[52].mxu0  ;;  %v1178_v51 = vpop.f32.mrb[52].mxu1  ;;  %v2380_v52 = vpack.c.bf16 %v1620_v48, %v1619_v46  ;;  %v2460_v53 = vpack.c.bf16 %v1652_v49, %v1651_v47 }
 0x183   : > { %v1429_v54 = vadd.f32 %v2895_v17, %v1050_v50  ;;  %v1461_v55 = vadd.f32 %v2895_v17, %v1178_v51  ;;  %v1052_v56 = vpop.f32.mrb[53].mxu0  ;;  %v1180_v57 = vpop.f32.mrb[53].mxu1 }
 0x184   : > { %v1053_v58 = vpop.f32.mrb[54].mxu0  ;;  %v1181_v59 = vpop.f32.mrb[54].mxu1  ;;  %2488 = vst [vmem:[%s2905_s8 + $0x60] sm:$0xff] %v2380_v52   ;;  %2504 = vst [vmem:[%s2905_s8 + $0xe0] sm:$0xff] %v2460_v53  }
 0x185   : > { %v1557_v60 = vmul.f32 0.1, %v1429_v54  ;;  %v1589_v61 = vmul.f32 0.1, %v1461_v55  ;;  %v1430_v62 = vadd.f32 %v2895_v17, %v1053_v58  ;;  %v1462_v63 = vadd.f32 %v2895_v17, %v1181_v59  ;;  %v1055_v0 = vpop.f32.mrb[55].mxu0  ;;  %v1183_v1 = vpop.f32.mrb[55].mxu1 }
 0x186   : > { %vm1493_vm4 = vcmp.ge.f32.partialorder %v1429_v54, 0.0  ;;  %vm1525_vm5 = vcmp.ge.f32.partialorder %v1461_v55, 0.0 }
 0x187   : > { %vm1494_vm6 = vcmp.ge.f32.partialorder %v1430_v62, 0.0  ;;  %v1558_v2 = vmul.f32 0.1, %v1430_v62  ;;  %vm1526_vm7 = vcmp.ge.f32.partialorder %v1462_v63, 0.0  ;;  %v1590_v3 = vmul.f32 0.1, %v1462_v63 }
 0x188   : > { %v1621_v4 = vsel %vm1493_vm4, %v1429_v54, %v1557_v60  ;;  %v1653_v5 = vsel %vm1525_vm5, %v1461_v55, %v1589_v61 }
 0x189   : > { %v1622_v6 = vsel %vm1494_vm6, %v1430_v62, %v1558_v2  ;;  %v1654_v7 = vsel %vm1526_vm7, %v1462_v63, %v1590_v3 }
 0x18a   : > { %v1058_v8 = vpop.f32.mrb[56].mxu0  ;;  %v1186_v9 = vpop.f32.mrb[56].mxu1  ;;  %v2385_v10 = vpack.c.bf16 %v1622_v6, %v1621_v4  ;;  %v2465_v11 = vpack.c.bf16 %v1654_v7, %v1653_v5 }
 0x18b   : > { %v1431_v12 = vadd.f32 %v2895_v17, %v1058_v8  ;;  %v1463_v13 = vadd.f32 %v2895_v17, %v1186_v9  ;;  %v1060_v14 = vpop.f32.mrb[57].mxu0  ;;  %v1188_v15 = vpop.f32.mrb[57].mxu1 }
 0x18c   : > { %v1061_v16 = vpop.f32.mrb[58].mxu0  ;;  %v1189_v18 = vpop.f32.mrb[58].mxu1  ;;  %2489 = vst [vmem:[%s2905_s8 + $0x68] sm:$0xff] %v2385_v10   ;;  %2505 = vst [vmem:[%s2905_s8 + $0xe8] sm:$0xff] %v2465_v11  }
 0x18d   : > { %v1559_v19 = vmul.f32 0.1, %v1431_v12  ;;  %v1591_v20 = vmul.f32 0.1, %v1463_v13  ;;  %v1432_v21 = vadd.f32 %v2895_v17, %v1061_v16  ;;  %v1464_v22 = vadd.f32 %v2895_v17, %v1189_v18  ;;  %v1063_v23 = vpop.f32.mrb[59].mxu0  ;;  %v1191_v24 = vpop.f32.mrb[59].mxu1 }
 0x18e   : > { %vm1495_vm8 = vcmp.ge.f32.partialorder %v1431_v12, 0.0  ;;  %vm1527_vm9 = vcmp.ge.f32.partialorder %v1463_v13, 0.0 }
 0x18f   : > { %vm1496_vm10 = vcmp.ge.f32.partialorder %v1432_v21, 0.0  ;;  %v1560_v25 = vmul.f32 0.1, %v1432_v21  ;;  %vm1528_vm11 = vcmp.ge.f32.partialorder %v1464_v22, 0.0  ;;  %v1592_v26 = vmul.f32 0.1, %v1464_v22 }
 0x190   : > { %v1623_v27 = vsel %vm1495_vm8, %v1431_v12, %v1559_v19  ;;  %v1655_v28 = vsel %vm1527_vm9, %v1463_v13, %v1591_v20 }
 0x191   : > { %v1624_v29 = vsel %vm1496_vm10, %v1432_v21, %v1560_v25  ;;  %v1656_v30 = vsel %vm1528_vm11, %v1464_v22, %v1592_v26 }
 0x192   : > { %v1066_v31 = vpop.f32.mrb[60].mxu0  ;;  %v1194_v32 = vpop.f32.mrb[60].mxu1  ;;  %v2390_v33 = vpack.c.bf16 %v1624_v29, %v1623_v27  ;;  %v2470_v34 = vpack.c.bf16 %v1656_v30, %v1655_v28 }
 0x193   : > { %v1433_v35 = vadd.f32 %v2895_v17, %v1066_v31  ;;  %v1465_v36 = vadd.f32 %v2895_v17, %v1194_v32  ;;  %v1068_v37 = vpop.f32.mrb[61].mxu0  ;;  %v1196_v38 = vpop.f32.mrb[61].mxu1 }
 0x194   : > { %v1069_v39 = vpop.f32.mrb[62].mxu0  ;;  %v1197_v40 = vpop.f32.mrb[62].mxu1  ;;  %2490 = vst [vmem:[%s2905_s8 + $0x70] sm:$0xff] %v2390_v33   ;;  %2506 = vst [vmem:[%s2905_s8 + $0xf0] sm:$0xff] %v2470_v34  }
 0x195   : > { %v1561_v41 = vmul.f32 0.1, %v1433_v35  ;;  %v1593_v42 = vmul.f32 0.1, %v1465_v36  ;;  %v1434_v43 = vadd.f32 %v2895_v17, %v1069_v39  ;;  %v1466_v44 = vadd.f32 %v2895_v17, %v1197_v40  ;;  %v1071_v45 = vpop.f32.mrb[63].mxu0  ;;  %v1199_v46 = vpop.f32.mrb[63].mxu1 }
 0x196   : > { %vm1497_vm12 = vcmp.ge.f32.partialorder %v1433_v35, 0.0  ;;  %vm1529_vm13 = vcmp.ge.f32.partialorder %v1465_v36, 0.0 }
 0x197   : > { %vm1498_vm14 = vcmp.ge.f32.partialorder %v1434_v43, 0.0  ;;  %v1562_v47 = vmul.f32 0.1, %v1434_v43  ;;  %vm1530_vm15 = vcmp.ge.f32.partialorder %v1466_v44, 0.0  ;;  %v1594_v48 = vmul.f32 0.1, %v1466_v44 }
 0x198   : > { %v1625_v49 = vsel %vm1497_vm12, %v1433_v35, %v1561_v41  ;;  %v1657_v50 = vsel %vm1529_vm13, %v1465_v36, %v1593_v42 }
 0x199   : > { %v1626_v51 = vsel %vm1498_vm14, %v1434_v43, %v1562_v47  ;;  %v1658_v52 = vsel %vm1530_vm15, %v1466_v44, %v1594_v48 }
 0x19a   : > { %v2395_v53 = vpack.c.bf16 %v1626_v51, %v1625_v49  ;;  %v2475_v54 = vpack.c.bf16 %v1658_v52, %v1657_v50 }
 0x19c   : > { %2491 = vst [vmem:[%s2905_s8 + $0x78] sm:$0xff] %v2395_v53   ;;  %2507 = vst [vmem:[%s2905_s8 + $0xf8] sm:$0xff] %v2475_v54  }
 0x19d PF: > { %s13_s14 = sadd.s32 1, %s2699_s14   ;;  %s3012_s12 = smov %s2695_s13 }
 0x19e   : > { %p10_p5 = scmp.ge.s32.totalorder %s13_s14, 5   ;;  %s3013_s13 = smov %s3015_s15 }
 0x1a0   :  { %12 = sbr.rel (!%p10_p5) target bundleno = 2 (0x2), region = 76 }

// kernel: upconv7_forward.16
= control target key start
LH: loop header
LB: loop body
LE: loop exit
PB: predicated region body
PF: predicated region fallthrough
CT: control target
= control target key end

     0   :  { %vm569_vm0 = vcmask 523264   ;;  %vm1931_vm1 = vcmask 1041409   ;;  %vm1933_vm2 = vcmask 1042434   ;;  %vm1935_vm3 = vcmask 1043459   ;;  %s3517_s0 = inlined_call_operand.vmem [shape: bf16[80,16,64], index: 0, kind: input, shape index: {}]   ;;  %s3518_s1 = inlined_call_operand.vmem [shape: bf16[80,64], index: 1, kind: output, shape index: {}]  }
   0x1   :  { %v2203_v0 = vld [vmem:[%s3517_s0] sm:$0xff]   ;;  %v2204_v1 = vld [vmem:[%s3517_s0 + $0x8] sm:$0xff]   ;;  %v2205_v2 = vld [vmem:[%s3517_s0 + $0x10] sm:$0xff]   ;;  %vm1937_vm4 = vcmask 1044484   ;;  %vm1939_vm5 = vcmask 1045509   ;;  %vm1941_vm6 = vcmask 1046534  }
   0x2   :  { %v2206_v3 = vld [vmem:[%s3517_s0 + $0x18] sm:$0xff]   ;;  %v2207_v4 = vld [vmem:[%s3517_s0 + $0x20] sm:$0xff]   ;;  %v572_v5 = vsel %vm569_vm0, %v2203_v0, 4286644096  ;;  %v585_v8 = vsel %vm569_vm0, %v2204_v1, 4286644096 }
   0x3   :  { %v574_v6 = vunpack.i.l.bf16 %v572_v5  ;;  %v575_v7 = vunpack.i.h.bf16 %v572_v5  ;;  %v2208_v9 = vld [vmem:[%s3517_s0 + $0x28] sm:$0xff]   ;;  %v587_v10 = vunpack.i.l.bf16 %v585_v8  ;;  %v588_v11 = vunpack.i.h.bf16 %v585_v8  ;;  %v2209_v17 = vld [vmem:[%s3517_s0 + $0x30] sm:$0xff]   ;;  %v2210_v29 = vld [vmem:[%s3517_s0 + $0x38] sm:$0xff]  }
   0x4   :  { %v598_v12 = vsel %vm569_vm0, %v2205_v2, 4286644096  ;;  %v611_v16 = vsel %vm569_vm0, %v2206_v3, 4286644096  ;;  %v624_v21 = vsel %vm569_vm0, %v2207_v4, 4286644096 }
   0x5   :  { %v576_v13 = vmax.f32 %v574_v6, %v575_v7  ;;  %v600_v14 = vunpack.i.l.bf16 %v598_v12  ;;  %v601_v15 = vunpack.i.h.bf16 %v598_v12  ;;  %v589_v18 = vmax.f32 %v587_v10, %v588_v11  ;;  %v2211_v62 = vld [vmem:[%s3517_s0 + $0x40] sm:$0xff]   ;;  %v2212_v7 = vld [vmem:[%s3517_s0 + $0x48] sm:$0xff]  }
   0x6   :  { %v613_v19 = vunpack.i.l.bf16 %v611_v16  ;;  %v614_v20 = vunpack.i.h.bf16 %v611_v16  ;;  %v626_v24 = vunpack.i.l.bf16 %v624_v21  ;;  %v627_v25 = vunpack.i.h.bf16 %v624_v21 }
   0x7   :  { %v577_v22 = vrot.slane %v576_v13, 4  ;;  %v602_v23 = vmax.f32 %v600_v14, %v601_v15  ;;  %v590_v26 = vrot.slane %v589_v18, 4  ;;  %v637_v28 = vsel %vm569_vm0, %v2208_v9, 4286644096  ;;  %v2213_v15 = vld [vmem:[%s3517_s0 + $0x50] sm:$0xff]  }
   0x8   :  { %v615_v27 = vmax.f32 %v613_v19, %v614_v20  ;;  %v628_v32 = vmax.f32 %v626_v24, %v627_v25  ;;  %v639_v33 = vunpack.i.l.bf16 %v637_v28  ;;  %v640_v36 = vunpack.i.h.bf16 %v637_v28  ;;  %v2214_v24 = vld [vmem:[%s3517_s0 + $0x58] sm:$0xff]  }
   0x9   :  { %v578_v30 = vmax.f32 %v576_v13, %v577_v22  ;;  %v603_v31 = vrot.slane %v602_v23, 4  ;;  %v591_v34 = vmax.f32 %v589_v18, %v590_v26  ;;  %v650_v37 = vsel %vm569_vm0, %v2209_v17, 4286644096 }
   0xa   :  { %v616_v35 = vrot.slane %v615_v27, 4  ;;  %v629_v40 = vrot.slane %v628_v32, 4  ;;  %v652_v41 = vunpack.i.l.bf16 %v650_v37  ;;  %v641_v44 = vmax.f32 %v639_v33, %v640_v36  ;;  %v2215_v33 = vld [vmem:[%s3517_s0 + $0x60] sm:$0xff]  }
   0xb   :  { %v579_v38 = vrot.slane %v578_v30, 2  ;;  %v604_v39 = vmax.f32 %v602_v23, %v603_v31  ;;  %v592_v42 = vrot.slane %v591_v34, 2  ;;  %v653_v45 = vunpack.i.h.bf16 %v650_v37 }
   0xc   :  { %v617_v43 = vmax.f32 %v615_v27, %v616_v35  ;;  %v630_v48 = vmax.f32 %v628_v32, %v629_v40  ;;  %v663_v49 = vsel %vm569_vm0, %v2210_v29, 4286644096  ;;  %v642_v52 = vrot.slane %v641_v44, 4 }
   0xd   :  { %v580_v46 = vmax.f32 %v578_v30, %v579_v38  ;;  %v605_v47 = vrot.slane %v604_v39, 2  ;;  %v593_v50 = vmax.f32 %v591_v34, %v592_v42  ;;  %v654_v53 = vmax.f32 %v652_v41, %v653_v45  ;;  %v2216_v42 = vld [vmem:[%s3517_s0 + $0x68] sm:$0xff]  }
   0xe   :  { %v618_v51 = vrot.slane %v617_v43, 2  ;;  %v631_v56 = vrot.slane %v630_v48, 2  ;;  %v665_v57 = vunpack.i.l.bf16 %v663_v49  ;;  %v643_v60 = vmax.f32 %v641_v44, %v642_v52 }
   0xf   :  { %v581_v54 = vrot.slane %v580_v46, 1  ;;  %v606_v55 = vmax.f32 %v604_v39, %v605_v47  ;;  %v594_v58 = vrot.slane %v593_v50, 1  ;;  %v655_v61 = vrot.slane %v654_v53, 4 }
  0x10   :  { %v619_v59 = vmax.f32 %v617_v43, %v618_v51  ;;  %v632_v1 = vmax.f32 %v630_v48, %v631_v56  ;;  %v666_v2 = vunpack.i.h.bf16 %v663_v49  ;;  %v644_v5 = vrot.slane %v643_v60, 2 }
  0x11   :  { %v582_v63 = vmax.f32 %v580_v46, %v581_v54  ;;  %v607_v0 = vrot.slane %v606_v55, 1  ;;  %v595_v3 = vmax.f32 %v593_v50, %v594_v58  ;;  %v656_v6 = vmax.f32 %v654_v53, %v655_v61 }
  0x12   :  { %v620_v4 = vrot.slane %v619_v59, 1  ;;  %v633_v9 = vrot.slane %v632_v1, 1  ;;  %v667_v10 = vmax.f32 %v665_v57, %v666_v2  ;;  %v645_v13 = vmax.f32 %v643_v60, %v644_v5 }
  0x13   :  { %v608_v8 = vmax.f32 %v606_v55, %v607_v0  ;;  %v2331_v11 = vpack.i.bf16 %v582_v63, %v582_v63  ;;  %v657_v14 = vrot.slane %v656_v6, 2  ;;  %v2336_v16 = vpack.i.bf16 %v595_v3, %v595_v3  ;;  %v2217_v55 = vld [vmem:[%s3517_s0 + $0x70] sm:$0xff]  }
  0x14   :  { %v621_v12 = vmax.f32 %v619_v59, %v620_v4  ;;  %v634_v17 = vmax.f32 %v632_v1, %v633_v9  ;;  %v668_v18 = vrot.slane %v667_v10, 4  ;;  %v676_v19 = vsel %vm569_vm0, %v2211_v62, 4286644096  ;;  %v2218_v4 = vld [vmem:[%s3517_s0 + $0x78] sm:$0xff]  }
  0x15   :  { %v2339_v20 = vpack.i.bf16 %v608_v8, %v608_v8  ;;  %v646_v21 = vrot.slane %v645_v13, 1  ;;  %v658_v22 = vmax.f32 %v656_v6, %v657_v14  ;;  %v678_v23 = vunpack.i.l.bf16 %v676_v19 }
  0x16   :  { %v2344_v25 = vpack.i.bf16 %v621_v12, %v621_v12  ;;  %v669_v26 = vmax.f32 %v667_v10, %v668_v18  ;;  %v679_v27 = vunpack.i.h.bf16 %v676_v19  ;;  %v689_v28 = vsel %vm569_vm0, %v2212_v7, 4286644096 }
  0x17   :  { %v647_v29 = vmax.f32 %v645_v13, %v646_v21  ;;  %v659_v30 = vrot.slane %v658_v22, 1  ;;  %v691_v31 = vunpack.i.l.bf16 %v689_v28  ;;  %v692_v32 = vunpack.i.h.bf16 %v689_v28 }
  0x18   :  { %v2350_v34 = vpack.i.bf16 %v634_v17, %v634_v17  ;;  %v670_v35 = vrot.slane %v669_v26, 2  ;;  %v680_v36 = vmax.f32 %v678_v23, %v679_v27  ;;  %v702_v37 = vsel %vm569_vm0, %v2213_v15, 4286644096 }
  0x19   :  { %v2353_v38 = vpack.i.bf16 %v647_v29, %v647_v29  ;;  %v660_v39 = vmax.f32 %v658_v22, %v659_v30  ;;  %v693_v40 = vmax.f32 %v691_v31, %v692_v32  ;;  %v704_v41 = vunpack.i.l.bf16 %v702_v37 }
  0x1a   :  { %v671_v43 = vmax.f32 %v669_v26, %v670_v35  ;;  %v681_v44 = vrot.slane %v680_v36, 4  ;;  %v705_v45 = vunpack.i.h.bf16 %v702_v37  ;;  %v715_v46 = vsel %vm569_vm0, %v2214_v24, 4286644096  ;;  %v2219_v24 = vld [vmem:[%s3517_s0 + $0x80] sm:$0xff]  }
  0x1b   :  { %v2359_v47 = vpack.i.bf16 %v660_v39, %v660_v39  ;;  %v694_v48 = vrot.slane %v693_v40, 4  ;;  %v717_v49 = vunpack.i.l.bf16 %v715_v46  ;;  %v718_v50 = vunpack.i.h.bf16 %v715_v46 }
  0x1c   :  { %v672_v51 = vrot.slane %v671_v43, 1  ;;  %v682_v52 = vmax.f32 %v680_v36, %v681_v44  ;;  %v706_v53 = vmax.f32 %v704_v41, %v705_v45  ;;  %v728_v54 = vsel %vm569_vm0, %v2215_v33, 4286644096 }
  0x1d   :  { %v695_v56 = vmax.f32 %v693_v40, %v694_v48  ;;  %v719_v57 = vmax.f32 %v717_v49, %v718_v50  ;;  %v730_v58 = vunpack.i.l.bf16 %v728_v54  ;;  %v731_v59 = vunpack.i.h.bf16 %v728_v54  ;;  %v2220_v40 = vld [vmem:[%s3517_s0 + $0x88] sm:$0xff]   ;;  %v2221_v50 = vld [vmem:[%s3517_s0 + $0x90] sm:$0xff]  }
  0x1e   :  { %v673_v60 = vmax.f32 %v671_v43, %v672_v51  ;;  %v683_v61 = vrot.slane %v682_v52, 2  ;;  %v707_v62 = vrot.slane %v706_v53, 4  ;;  %v741_v63 = vsel %vm569_vm0, %v2216_v42, 4286644096 }
  0x1f   :  { %v696_v0 = vrot.slane %v695_v56, 2  ;;  %v720_v1 = vrot.slane %v719_v57, 4  ;;  %v732_v2 = vmax.f32 %v730_v58, %v731_v59  ;;  %v743_v3 = vunpack.i.l.bf16 %v741_v63  ;;  %v2222_v59 = vld [vmem:[%s3517_s0 + $0x98] sm:$0xff]  }
  0x20   :  { %v2369_v5 = vpack.i.bf16 %v673_v60, %v673_v60  ;;  %v684_v6 = vmax.f32 %v682_v52, %v683_v61  ;;  %v708_v7 = vmax.f32 %v706_v53, %v707_v62  ;;  %v744_v8 = vunpack.i.h.bf16 %v741_v63 }
  0x21   :  { %v697_v9 = vmax.f32 %v695_v56, %v696_v0  ;;  %v721_v10 = vmax.f32 %v719_v57, %v720_v1  ;;  %v733_v12 = vrot.slane %v732_v2, 4  ;;  %v754_v13 = vsel %vm569_vm0, %v2217_v55, 4286644096 }
  0x22   :  { %v685_v14 = vrot.slane %v684_v6, 1  ;;  %v709_v15 = vrot.slane %v708_v7, 2  ;;  %v745_v17 = vmax.f32 %v743_v3, %v744_v8  ;;  %v756_v18 = vunpack.i.l.bf16 %v754_v13 }
  0x23   :  { %v698_v19 = vrot.slane %v697_v9, 1  ;;  %v722_v21 = vrot.slane %v721_v10, 2  ;;  %v734_v22 = vmax.f32 %v732_v2, %v733_v12  ;;  %v757_v23 = vunpack.i.h.bf16 %v754_v13 }
  0x24   :  { %v686_v26 = vmax.f32 %v684_v6, %v685_v14  ;;  %v710_v27 = vmax.f32 %v708_v7, %v709_v15  ;;  %v746_v28 = vrot.slane %v745_v17, 4  ;;  %v767_v29 = vsel %vm569_vm0, %v2218_v4, 4286644096 }
  0x25   :  { %v699_v30 = vmax.f32 %v697_v9, %v698_v19  ;;  %v723_v31 = vmax.f32 %v721_v10, %v722_v21  ;;  %v735_v32 = vrot.slane %v734_v22, 2  ;;  %v758_v33 = vmax.f32 %v756_v18, %v757_v23  ;;  %v2223_v9 = vld [vmem:[%s3517_s0 + $0xa0] sm:$0xff]   ;;  %v2224_v10 = vld [vmem:[%s3517_s0 + $0xa8] sm:$0xff]  }
  0x26   :  { %v2376_v35 = vpack.i.bf16 %v686_v26, %v686_v26  ;;  %v711_v36 = vrot.slane %v710_v27, 1  ;;  %v747_v37 = vmax.f32 %v745_v17, %v746_v28  ;;  %v769_v39 = vunpack.i.l.bf16 %v767_v29 }
  0x27   :  { %v2381_v41 = vpack.i.bf16 %v699_v30, %v699_v30  ;;  %v724_v42 = vrot.slane %v723_v31, 1  ;;  %v736_v43 = vmax.f32 %v734_v22, %v735_v32  ;;  %v759_v44 = vrot.slane %v758_v33, 4 }
  0x28   :  { %v712_v45 = vmax.f32 %v710_v27, %v711_v36  ;;  %v748_v46 = vrot.slane %v747_v37, 2  ;;  %v770_v48 = vunpack.i.h.bf16 %v767_v29  ;;  %v780_v49 = vsel %vm569_vm0, %v2219_v24, 4286644096 }
  0x29   :  { %v725_v51 = vmax.f32 %v723_v31, %v724_v42  ;;  %v737_v52 = vrot.slane %v736_v43, 1  ;;  %v760_v53 = vmax.f32 %v758_v33, %v759_v44  ;;  %v782_v54 = vunpack.i.l.bf16 %v780_v49 }
  0x2a   :  { %v2387_v55 = vpack.i.bf16 %v712_v45, %v712_v45  ;;  %v749_v56 = vmax.f32 %v747_v37, %v748_v46  ;;  %v771_v57 = vmax.f32 %v769_v39, %v770_v48  ;;  %v783_v58 = vunpack.i.h.bf16 %v780_v49  ;;  %v2225_v37 = vld [vmem:[%s3517_s0 + $0xb0] sm:$0xff]  }
  0x2b   :  { %v2392_v60 = vpack.i.bf16 %v725_v51, %v725_v51  ;;  %v738_v61 = vmax.f32 %v736_v43, %v737_v52  ;;  %v761_v62 = vrot.slane %v760_v53, 2  ;;  %v793_v63 = vsel %vm569_vm0, %v2220_v40, 4286644096 }
  0x2c   :  { %v750_v0 = vrot.slane %v749_v56, 1  ;;  %v772_v1 = vrot.slane %v771_v57, 4  ;;  %v784_v2 = vmax.f32 %v782_v54, %v783_v58  ;;  %v795_v3 = vunpack.i.l.bf16 %v793_v63  ;;  %v2226_v58 = vld [vmem:[%s3517_s0 + $0xb8] sm:$0xff]  }
  0x2d   :  { %v2395_v4 = vpack.i.bf16 %v738_v61, %v738_v61  ;;  %v762_v6 = vmax.f32 %v760_v53, %v761_v62  ;;  %v796_v7 = vunpack.i.h.bf16 %v793_v63  ;;  %v806_v8 = vsel %vm569_vm0, %v2221_v50, 4286644096 }
  0x2e   :  { %v751_v12 = vmax.f32 %v749_v56, %v750_v0  ;;  %v773_v13 = vmax.f32 %v771_v57, %v772_v1  ;;  %v785_v14 = vrot.slane %v784_v2, 4  ;;  %v808_v15 = vunpack.i.l.bf16 %v806_v8 }
  0x2f   :  { %v763_v17 = vrot.slane %v762_v6, 1  ;;  %v797_v18 = vmax.f32 %v795_v3, %v796_v7  ;;  %v809_v19 = vunpack.i.h.bf16 %v806_v8  ;;  %v819_v21 = vsel %vm569_vm0, %v2222_v59, 4286644096 }
  0x30   :  { %v2405_v22 = vpack.i.bf16 %v751_v12, %v751_v12  ;;  %v774_v23 = vrot.slane %v773_v13, 2  ;;  %v786_v24 = vmax.f32 %v784_v2, %v785_v14  ;;  %v821_v26 = vunpack.i.l.bf16 %v819_v21 }
  0x31   :  { %v764_v27 = vmax.f32 %v762_v6, %v763_v17  ;;  %v798_v28 = vrot.slane %v797_v18, 4  ;;  %v810_v29 = vmax.f32 %v808_v15, %v809_v19  ;;  %v822_v30 = vunpack.i.h.bf16 %v819_v21 }
  0x32   :  { %v775_v31 = vmax.f32 %v773_v13, %v774_v23  ;;  %v787_v32 = vrot.slane %v786_v24, 2  ;;  %v832_v33 = vsel %vm569_vm0, %v2223_v9, 4286644096  ;;  %v845_v36 = vsel %vm569_vm0, %v2224_v10, 4286644096  ;;  %v2227_v10 = vld [vmem:[%s3517_s0 + $0xc0] sm:$0xff]  }
  0x33   :  { %v2412_v39 = vpack.i.bf16 %v764_v27, %v764_v27  ;;  %v799_v40 = vmax.f32 %v797_v18, %v798_v28  ;;  %v811_v42 = vrot.slane %v810_v29, 4  ;;  %v823_v43 = vmax.f32 %v821_v26, %v822_v30  ;;  %v2228_v28 = vld [vmem:[%s3517_s0 + $0xc8] sm:$0xff]  }
  0x34   :  { %v776_v44 = vrot.slane %v775_v31, 1  ;;  %v788_v45 = vmax.f32 %v786_v24, %v787_v32  ;;  %v834_v46 = vunpack.i.l.bf16 %v832_v33  ;;  %v835_v48 = vunpack.i.h.bf16 %v832_v33 }
  0x35   :  { %v800_v49 = vrot.slane %v799_v40, 2  ;;  %v812_v50 = vmax.f32 %v810_v29, %v811_v42  ;;  %v824_v51 = vrot.slane %v823_v43, 4  ;;  %v847_v52 = vunpack.i.l.bf16 %v845_v36  ;;  %v2229_v29 = vld [vmem:[%s3517_s0 + $0xd0] sm:$0xff]  }
  0x36   :  { %v777_v53 = vmax.f32 %v775_v31, %v776_v44  ;;  %v789_v54 = vrot.slane %v788_v45, 1  ;;  %v836_v56 = vmax.f32 %v834_v46, %v835_v48  ;;  %v848_v57 = vunpack.i.h.bf16 %v845_v36 }
  0x37   :  { %v801_v59 = vmax.f32 %v799_v40, %v800_v49  ;;  %v813_v61 = vrot.slane %v812_v50, 2  ;;  %v825_v62 = vmax.f32 %v823_v43, %v824_v51  ;;  %v858_v63 = vsel %vm569_vm0, %v2225_v37, 4286644096 }
  0x38   :  { %v2418_v0 = vpack.i.bf16 %v777_v53, %v777_v53  ;;  %v790_v1 = vmax.f32 %v788_v45, %v789_v54  ;;  %v837_v2 = vrot.slane %v836_v56, 4  ;;  %v849_v3 = vmax.f32 %v847_v52, %v848_v57  ;;  %v2230_v52 = vld [vmem:[%s3517_s0 + $0xd8] sm:$0xff]  }
  0x39   :  { %v802_v6 = vrot.slane %v801_v59, 1  ;;  %v814_v7 = vmax.f32 %v812_v50, %v813_v61  ;;  %v826_v8 = vrot.slane %v825_v62, 2  ;;  %v860_v9 = vunpack.i.l.bf16 %v858_v63 }
  0x3a   :  { %v2423_v12 = vpack.i.bf16 %v790_v1, %v790_v1  ;;  %v838_v13 = vmax.f32 %v836_v56, %v837_v2  ;;  %v850_v14 = vrot.slane %v849_v3, 4  ;;  %v861_v15 = vunpack.i.h.bf16 %v858_v63 }
  0x3b   :  { %v803_v17 = vmax.f32 %v801_v59, %v802_v6  ;;  %v815_v18 = vrot.slane %v814_v7, 1  ;;  %v827_v19 = vmax.f32 %v825_v62, %v826_v8  ;;  %v871_v21 = vsel %vm569_vm0, %v2226_v58, 4286644096  ;;  %v2231_v6 = vld [vmem:[%s3517_s0 + $0xe0] sm:$0xff]  }
  0x3c   :  { %v839_v23 = vrot.slane %v838_v13, 2  ;;  %v851_v24 = vmax.f32 %v849_v3, %v850_v14  ;;  %v862_v26 = vmax.f32 %v860_v9, %v861_v15  ;;  %v873_v27 = vunpack.i.l.bf16 %v871_v21 }
  0x3d   :  { %v2432_v30 = vpack.i.bf16 %v803_v17, %v803_v17  ;;  %v816_v31 = vmax.f32 %v814_v7, %v815_v18  ;;  %v828_v32 = vrot.slane %v827_v19, 1  ;;  %v874_v33 = vunpack.i.h.bf16 %v871_v21  ;;  %v2232_v7 = vld [vmem:[%s3517_s0 + $0xe8] sm:$0xff]  }
  0x3e   :  { %v840_v36 = vmax.f32 %v838_v13, %v839_v23  ;;  %v852_v37 = vrot.slane %v851_v24, 2  ;;  %v863_v40 = vrot.slane %v862_v26, 4  ;;  %v884_v42 = vsel %vm569_vm0, %v2227_v10, 4286644096 }
  0x3f   :  { %v2435_v43 = vpack.i.bf16 %v816_v31, %v816_v31  ;;  %v829_v44 = vmax.f32 %v827_v19, %v828_v32  ;;  %v875_v45 = vmax.f32 %v873_v27, %v874_v33  ;;  %v886_v46 = vunpack.i.l.bf16 %v884_v42 }
  0x40   :  { %v841_v48 = vrot.slane %v840_v36, 1  ;;  %v853_v49 = vmax.f32 %v851_v24, %v852_v37  ;;  %v864_v50 = vmax.f32 %v862_v26, %v863_v40  ;;  %v887_v51 = vunpack.i.h.bf16 %v884_v42 }
  0x41   :  { %v2440_v53 = vpack.i.bf16 %v829_v44, %v829_v44  ;;  %v876_v54 = vrot.slane %v875_v45, 4  ;;  %v897_v56 = vsel %vm569_vm0, %v2228_v28, 4286644096  ;;  %v910_v57 = vsel %vm569_vm0, %v2229_v29, 4286644096 }
  0x42   :  { %v842_v58 = vmax.f32 %v840_v36, %v841_v48  ;;  %v854_v59 = vrot.slane %v853_v49, 1  ;;  %v865_v61 = vrot.slane %v864_v50, 2  ;;  %v888_v62 = vmax.f32 %v886_v46, %v887_v51 }
  0x43   :  { %v877_v63 = vmax.f32 %v875_v45, %v876_v54  ;;  %v899_v1 = vunpack.i.l.bf16 %v897_v56  ;;  %v900_v2 = vunpack.i.h.bf16 %v897_v56  ;;  %v912_v3 = vunpack.i.l.bf16 %v910_v57  ;;  %v2233_v45 = vld [vmem:[%s3517_s0 + $0xf0] sm:$0xff]  }
  0x44   :  { %v2450_v8 = vpack.i.bf16 %v842_v58, %v842_v58  ;;  %v855_v9 = vmax.f32 %v853_v49, %v854_v59  ;;  %v866_v10 = vmax.f32 %v864_v50, %v865_v61  ;;  %v889_v13 = vrot.slane %v888_v62, 4 }
  0x45   :  { %v878_v14 = vrot.slane %v877_v63, 2  ;;  %v901_v15 = vmax.f32 %v899_v1, %v900_v2  ;;  %v913_v17 = vunpack.i.h.bf16 %v910_v57  ;;  %v923_v18 = vsel %vm569_vm0, %v2230_v52, 4286644096 }
  0x46   :  { %v2453_v19 = vpack.i.bf16 %v855_v9, %v855_v9  ;;  %v867_v21 = vrot.slane %v866_v10, 1  ;;  %v890_v23 = vmax.f32 %v888_v62, %v889_v13  ;;  %v925_v24 = vunpack.i.l.bf16 %v923_v18  ;;  %v2234_v62 = vld [vmem:[%s3517_s0 + $0xf8] sm:$0xff]  }
  0x47   :  { %v879_v26 = vmax.f32 %v877_v63, %v878_v14  ;;  %v902_v27 = vrot.slane %v901_v15, 4  ;;  %v914_v28 = vmax.f32 %v912_v3, %v913_v17  ;;  %v926_v29 = vunpack.i.h.bf16 %v923_v18  ;;  %v2235_v18 = vld [vmem:[%s3517_s0 + $0x100] sm:$0xff]  }
  0x48   :  { %v868_v31 = vmax.f32 %v866_v10, %v867_v21  ;;  %v891_v32 = vrot.slane %v890_v23, 2  ;;  %v936_v33 = vsel %vm569_vm0, %v2231_v6, 4286644096  ;;  %v949_v36 = vsel %vm569_vm0, %v2232_v7, 4286644096 }
  0x49   :  { %v880_v37 = vrot.slane %v879_v26, 1  ;;  %v903_v40 = vmax.f32 %v901_v15, %v902_v27  ;;  %v915_v42 = vrot.slane %v914_v28, 4  ;;  %v927_v44 = vmax.f32 %v925_v24, %v926_v29 }
  0x4a   :  { %v2460_v46 = vpack.i.bf16 %v868_v31, %v868_v31  ;;  %v892_v48 = vmax.f32 %v890_v23, %v891_v32  ;;  %v938_v49 = vunpack.i.l.bf16 %v936_v33  ;;  %v939_v50 = vunpack.i.h.bf16 %v936_v33 }
  0x4b   :  { %v881_v51 = vmax.f32 %v879_v26, %v880_v37  ;;  %v904_v52 = vrot.slane %v903_v40, 2  ;;  %v916_v54 = vmax.f32 %v914_v28, %v915_v42  ;;  %v928_v56 = vrot.slane %v927_v44, 4  ;;  %v2237_v42 = vld [vmem:[%s3517_s0 + $0x110] sm:$0xff]  }
  0x4c   :  { %v893_v57 = vrot.slane %v892_v48, 1  ;;  %v940_v58 = vmax.f32 %v938_v49, %v939_v50  ;;  %v951_v59 = vunpack.i.l.bf16 %v949_v36  ;;  %v952_v61 = vunpack.i.h.bf16 %v949_v36 }
  0x4d   :  { %v2465_v63 = vpack.i.bf16 %v881_v51, %v881_v51  ;;  %v905_v1 = vmax.f32 %v903_v40, %v904_v52  ;;  %v917_v2 = vrot.slane %v916_v54, 2  ;;  %v929_v3 = vmax.f32 %v927_v44, %v928_v56  ;;  %v2236_v40 = vld [vmem:[%s3517_s0 + $0x108] sm:$0xff]  }
  0x4e   :  { %v894_v6 = vmax.f32 %v892_v48, %v893_v57  ;;  %v941_v7 = vrot.slane %v940_v58, 4  ;;  %v953_v9 = vmax.f32 %v951_v59, %v952_v61  ;;  %v962_v10 = vsel %vm569_vm0, %v2233_v45, 4286644096 }
  0x4f   :  { %v906_v13 = vrot.slane %v905_v1, 1  ;;  %v918_v14 = vmax.f32 %v916_v54, %v917_v2  ;;  %v930_v15 = vrot.slane %v929_v3, 2  ;;  %v964_v17 = vunpack.i.l.bf16 %v962_v10 }
  0x50   :  { %v2471_v21 = vpack.i.bf16 %v894_v6, %v894_v6  ;;  %v942_v23 = vmax.f32 %v940_v58, %v941_v7  ;;  %v954_v24 = vrot.slane %v953_v9, 4  ;;  %v965_v26 = vunpack.i.h.bf16 %v962_v10 }
  0x51   :  { %v907_v27 = vmax.f32 %v905_v1, %v906_v13  ;;  %v919_v28 = vrot.slane %v918_v14, 1  ;;  %v931_v29 = vmax.f32 %v929_v3, %v930_v15  ;;  %v975_v31 = vsel %vm569_vm0, %v2234_v62, 4286644096  ;;  %v2238_v3 = vld [vmem:[%s3517_s0 + $0x118] sm:$0xff]  }
  0x52   :  { %v943_v32 = vrot.slane %v942_v23, 2  ;;  %v955_v33 = vmax.f32 %v953_v9, %v954_v24  ;;  %v966_v36 = vmax.f32 %v964_v17, %v965_v26  ;;  %v977_v37 = vunpack.i.l.bf16 %v975_v31 }
  0x53   :  { %v2480_v44 = vpack.i.bf16 %v907_v27, %v907_v27  ;;  %v920_v45 = vmax.f32 %v918_v14, %v919_v28  ;;  %v932_v48 = vrot.slane %v931_v29, 1  ;;  %v978_v49 = vunpack.i.h.bf16 %v975_v31  ;;  %v2239_v27 = vld [vmem:[%s3517_s0 + $0x120] sm:$0xff]   ;;  %v2240_v28 = vld [vmem:[%s3517_s0 + $0x128] sm:$0xff]  }
  0x54   :  { %v944_v50 = vmax.f32 %v942_v23, %v943_v32  ;;  %v956_v51 = vrot.slane %v955_v33, 2  ;;  %v967_v52 = vrot.slane %v966_v36, 4  ;;  %v988_v54 = vsel %vm569_vm0, %v2235_v18, 4286644096 }
  0x55   :  { %v2483_v56 = vpack.i.bf16 %v920_v45, %v920_v45  ;;  %v933_v57 = vmax.f32 %v931_v29, %v932_v48  ;;  %v979_v58 = vmax.f32 %v977_v37, %v978_v49  ;;  %v990_v59 = vunpack.i.l.bf16 %v988_v54 }
  0x56   :  { %v945_v61 = vrot.slane %v944_v50, 1  ;;  %v957_v62 = vmax.f32 %v955_v33, %v956_v51  ;;  %v968_v1 = vmax.f32 %v966_v36, %v967_v52  ;;  %v991_v2 = vunpack.i.h.bf16 %v988_v54 }
  0x57   :  { %v2488_v6 = vpack.i.bf16 %v933_v57, %v933_v57  ;;  %v980_v7 = vrot.slane %v979_v58, 4  ;;  %v1001_v9 = vsel %vm569_vm0, %v2236_v40, 4286644096  ;;  %v1014_v10 = vsel %vm569_vm0, %v2237_v42, 4286644096 }
  0x58   :  { %v946_v13 = vmax.f32 %v944_v50, %v945_v61  ;;  %v958_v14 = vrot.slane %v957_v62, 1  ;;  %v969_v15 = vrot.slane %v968_v1, 2  ;;  %v992_v17 = vmax.f32 %v990_v59, %v991_v2 }
  0x59   :  { %v981_v18 = vmax.f32 %v979_v58, %v980_v7  ;;  %v1003_v23 = vunpack.i.l.bf16 %v1001_v9  ;;  %v1004_v24 = vunpack.i.h.bf16 %v1001_v9  ;;  %v1016_v26 = vunpack.i.l.bf16 %v1014_v10 }
  0x5a   :  { %v2498_v29 = vpack.i.bf16 %v946_v13, %v946_v13  ;;  %v959_v31 = vmax.f32 %v957_v62, %v958_v14  ;;  %v970_v32 = vmax.f32 %v968_v1, %v969_v15  ;;  %v993_v33 = vrot.slane %v992_v17, 4 }
  0x5b   :  { %v982_v36 = vrot.slane %v981_v18, 2  ;;  %v1005_v37 = vmax.f32 %v1003_v23, %v1004_v24  ;;  %v1017_v40 = vunpack.i.h.bf16 %v1014_v10  ;;  %v1027_v42 = vsel %vm569_vm0, %v2238_v3, 4286644096  ;;  %v2241_v3 = vld [vmem:[%s3517_s0 + $0x130] sm:$0xff]  }
  0x5c   :  { %v2501_v45 = vpack.i.bf16 %v959_v31, %v959_v31  ;;  %v971_v48 = vrot.slane %v970_v32, 1  ;;  %v994_v49 = vmax.f32 %v992_v17, %v993_v33  ;;  %v1029_v50 = vunpack.i.l.bf16 %v1027_v42 }
  0x5d   :  { %v983_v51 = vmax.f32 %v981_v18, %v982_v36  ;;  %v1006_v52 = vrot.slane %v1005_v37, 4  ;;  %v1018_v54 = vmax.f32 %v1016_v26, %v1017_v40  ;;  %v1030_v57 = vunpack.i.h.bf16 %v1027_v42 }
  0x5e   :  { %v972_v58 = vmax.f32 %v970_v32, %v971_v48  ;;  %v995_v59 = vrot.slane %v994_v49, 2  ;;  %v1040_v61 = vsel %vm569_vm0, %v2239_v27, 4286644096  ;;  %v1053_v62 = vsel %vm569_vm0, %v2240_v28, 4286644096  ;;  %v2242_v32 = vld [vmem:[%s3517_s0 + $0x138] sm:$0xff]  }
  0x5f   :  { %v984_v1 = vrot.slane %v983_v51, 1  ;;  %v1007_v2 = vmax.f32 %v1005_v37, %v1006_v52  ;;  %v1019_v7 = vrot.slane %v1018_v54, 4  ;;  %v1031_v9 = vmax.f32 %v1029_v50, %v1030_v57 }
  0x60   :  { %v2508_v10 = vpack.i.bf16 %v972_v58, %v972_v58  ;;  %v996_v13 = vmax.f32 %v994_v49, %v995_v59  ;;  %v1042_v14 = vunpack.i.l.bf16 %v1040_v61  ;;  %v1043_v15 = vunpack.i.h.bf16 %v1040_v61  ;;  %v2243_v58 = vld [vmem:[%s3517_s0 + $0x140] sm:$0xff]  }
  0x61   :  { %v985_v17 = vmax.f32 %v983_v51, %v984_v1  ;;  %v1008_v18 = vrot.slane %v1007_v2, 2  ;;  %v1020_v23 = vmax.f32 %v1018_v54, %v1019_v7  ;;  %v1032_v24 = vrot.slane %v1031_v9, 4 }
  0x62   :  { %v997_v26 = vrot.slane %v996_v13, 1  ;;  %v1044_v27 = vmax.f32 %v1042_v14, %v1043_v15  ;;  %v1055_v28 = vunpack.i.l.bf16 %v1053_v62  ;;  %v1056_v31 = vunpack.i.h.bf16 %v1053_v62 }
  0x63   :  { %v2513_v33 = vpack.i.bf16 %v985_v17, %v985_v17  ;;  %v1009_v36 = vmax.f32 %v1007_v2, %v1008_v18  ;;  %v1021_v37 = vrot.slane %v1020_v23, 2  ;;  %v1033_v40 = vmax.f32 %v1031_v9, %v1032_v24  ;;  %v2244_v18 = vld [vmem:[%s3517_s0 + $0x148] sm:$0xff]  }
  0x64   :  { %v998_v42 = vmax.f32 %v996_v13, %v997_v26  ;;  %v1045_v48 = vrot.slane %v1044_v27, 4  ;;  %v1057_v49 = vmax.f32 %v1055_v28, %v1056_v31  ;;  %v1066_v50 = vsel %vm569_vm0, %v2241_v3, 4286644096 }
  0x65   :  { %v1010_v51 = vrot.slane %v1009_v36, 1  ;;  %v1022_v52 = vmax.f32 %v1020_v23, %v1021_v37  ;;  %v1034_v54 = vrot.slane %v1033_v40, 2  ;;  %v1068_v57 = vunpack.i.l.bf16 %v1066_v50  ;;  %v2245_v23 = vld [vmem:[%s3517_s0 + $0x150] sm:$0xff]  }
  0x66   :  { %v2519_v59 = vpack.i.bf16 %v998_v42, %v998_v42  ;;  %v1046_v61 = vmax.f32 %v1044_v27, %v1045_v48  ;;  %v1058_v62 = vrot.slane %v1057_v49, 4  ;;  %v1069_v1 = vunpack.i.h.bf16 %v1066_v50 }
  0x67   :  { %v1011_v2 = vmax.f32 %v1009_v36, %v1010_v51  ;;  %v1023_v7 = vrot.slane %v1022_v52, 1  ;;  %v1035_v9 = vmax.f32 %v1033_v40, %v1034_v54  ;;  %v1079_v13 = vsel %vm569_vm0, %v2242_v32, 4286644096 }
  0x68   :  { %v1047_v14 = vrot.slane %v1046_v61, 2  ;;  %v1059_v3 = vmax.f32 %v1057_v49, %v1058_v62  ;;  %v1070_v15 = vmax.f32 %v1068_v57, %v1069_v1  ;;  %v1081_v17 = vunpack.i.l.bf16 %v1079_v13 }
  0x69   :  { %v2528_v24 = vpack.i.bf16 %v1011_v2, %v1011_v2  ;;  %v1024_v26 = vmax.f32 %v1022_v52, %v1023_v7  ;;  %v1036_v27 = vrot.slane %v1035_v9, 1  ;;  %v1082_v28 = vunpack.i.h.bf16 %v1079_v13  ;;  %v2246_v52 = vld [vmem:[%s3517_s0 + $0x158] sm:$0xff]  }
  0x6a   :  { %v1048_v31 = vmax.f32 %v1046_v61, %v1047_v14  ;;  %v1060_v36 = vrot.slane %v1059_v3, 2  ;;  %v1071_v32 = vrot.slane %v1070_v15, 4  ;;  %v1092_v37 = vsel %vm569_vm0, %v2243_v58, 4286644096 }
  0x6b   :  { %3561 = vst [vmem:[#allocation2_spill] sm:$0xff] %v2528_v24  ;;  %v2531_v40 = vpack.i.bf16 %v1024_v26, %v1024_v26  ;;  %v1037_v42 = vmax.f32 %v1035_v9, %v1036_v27  ;;  %v1083_v48 = vmax.f32 %v1081_v17, %v1082_v28  ;;  %v1094_v49 = vunpack.i.l.bf16 %v1092_v37  ;;  %v2247_v26 = vld [vmem:[%s3517_s0 + $0x160] sm:$0xff]   ;;  %v2248_v27 = vld [vmem:[%s3517_s0 + $0x168] sm:$0xff]  }
  0x6c   :  { %v1049_v50 = vrot.slane %v1048_v31, 1  ;;  %v1061_v51 = vmax.f32 %v1059_v3, %v1060_v36  ;;  %v1072_v54 = vmax.f32 %v1070_v15, %v1071_v32  ;;  %v1095_v57 = vunpack.i.h.bf16 %v1092_v37 }
  0x6d   :  { %3562 = vst [vmem:[#allocation3_spill] sm:$0xff] %v2531_v40  ;;  %v2536_v62 = vpack.i.bf16 %v1037_v42, %v1037_v42  ;;  %v1084_v61 = vrot.slane %v1083_v48, 4  ;;  %v1105_v1 = vsel %vm569_vm0, %v2244_v18, 4286644096  ;;  %v1118_v58 = vsel %vm569_vm0, %v2245_v23, 4286644096 }
  0x6e   :  { %v1050_v2 = vmax.f32 %v1048_v31, %v1049_v50  ;;  %v1062_v7 = vrot.slane %v1061_v51, 1  ;;  %v1073_v9 = vrot.slane %v1072_v54, 2  ;;  %v1096_v13 = vmax.f32 %v1094_v49, %v1095_v57 }
  0x6f   :  { %3563 = vst [vmem:[#allocation4_spill] sm:$0xff] %v2536_v62  ;;  %v1085_v14 = vmax.f32 %v1083_v48, %v1084_v61  ;;  %v1107_v17 = vunpack.i.l.bf16 %v1105_v1  ;;  %v1108_v3 = vunpack.i.h.bf16 %v1105_v1  ;;  %v1120_v15 = vunpack.i.l.bf16 %v1118_v58 }
  0x70   :  { %v2546_v28 = vpack.i.bf16 %v1050_v2, %v1050_v2  ;;  %v1063_v18 = vmax.f32 %v1061_v51, %v1062_v7  ;;  %v1074_v23 = vmax.f32 %v1072_v54, %v1073_v9  ;;  %v1097_v31 = vrot.slane %v1096_v13, 4 }
  0x71   :  { %v1086_v36 = vrot.slane %v1085_v14, 2  ;;  %v1109_v32 = vmax.f32 %v1107_v17, %v1108_v3  ;;  %v1121_v37 = vunpack.i.h.bf16 %v1118_v58  ;;  %v1131_v42 = vsel %vm569_vm0, %v2246_v52, 4286644096  ;;  %v2249_v52 = vld [vmem:[%s3517_s0 + $0x170] sm:$0xff]  }
  0x72   :  { %3564 = vst [vmem:[#allocation5_spill] sm:$0xff] %v2546_v28  ;;  %v2549_v48 = vpack.i.bf16 %v1063_v18, %v1063_v18  ;;  %v1075_v49 = vrot.slane %v1074_v23, 1  ;;  %v1098_v50 = vmax.f32 %v1096_v13, %v1097_v31  ;;  %v1133_v57 = vunpack.i.l.bf16 %v1131_v42 }
  0x73   :  { %v1087_v61 = vmax.f32 %v1085_v14, %v1086_v36  ;;  %v1110_v1 = vrot.slane %v1109_v32, 4  ;;  %v1122_v62 = vmax.f32 %v1120_v15, %v1121_v37  ;;  %v1134_v40 = vunpack.i.h.bf16 %v1131_v42 }
  0x74   :  { %3565 = vst [vmem:[#allocation6_spill] sm:$0xff] %v2549_v48  ;;  %v1076_v24 = vmax.f32 %v1074_v23, %v1075_v49  ;;  %v1099_v2 = vrot.slane %v1098_v50, 2  ;;  %v1144_v51 = vsel %vm569_vm0, %v2247_v26, 4286644096  ;;  %v1157_v54 = vsel %vm569_vm0, %v2248_v27, 4286644096 }
  0x75   :  { %v1088_v7 = vrot.slane %v1087_v61, 1  ;;  %v1111_v9 = vmax.f32 %v1109_v32, %v1110_v1  ;;  %v1123_v58 = vrot.slane %v1122_v62, 4  ;;  %v1135_v17 = vmax.f32 %v1133_v57, %v1134_v40  ;;  %v2250_v40 = vld [vmem:[%s3517_s0 + $0x178] sm:$0xff]  }
  0x76   :  { %v2556_v13 = vpack.i.bf16 %v1076_v24, %v1076_v24  ;;  %v1100_v14 = vmax.f32 %v1098_v50, %v1099_v2  ;;  %v1146_v3 = vunpack.i.l.bf16 %v1144_v51  ;;  %v1147_v15 = vunpack.i.h.bf16 %v1144_v51 }
  0x77   :  { %v1089_v18 = vmax.f32 %v1087_v61, %v1088_v7  ;;  %v1112_v23 = vrot.slane %v1111_v9, 2  ;;  %v1124_v31 = vmax.f32 %v1122_v62, %v1123_v58  ;;  %v1136_v36 = vrot.slane %v1135_v17, 4 }
  0x78   :  { %3566 = vst [vmem:[#allocation7_spill] sm:$0xff] %v2556_v13  ;;  %v1101_v26 = vrot.slane %v1100_v14, 1  ;;  %v1148_v37 = vmax.f32 %v1146_v3, %v1147_v15  ;;  %v1159_v27 = vunpack.i.l.bf16 %v1157_v54  ;;  %v1160_v42 = vunpack.i.h.bf16 %v1157_v54  ;;  %v2251_v54 = vld [vmem:[%s3517_s0 + $0x180] sm:$0xff]  }
  0x79   :  { %v2561_v32 = vpack.i.bf16 %v1089_v18, %v1089_v18  ;;  %v1113_v49 = vmax.f32 %v1111_v9, %v1112_v23  ;;  %v1125_v24 = vrot.slane %v1124_v31, 2  ;;  %v1137_v57 = vmax.f32 %v1135_v17, %v1136_v36 }
  0x7a   :  { %v1102_v50 = vmax.f32 %v1100_v14, %v1101_v26  ;;  %v1149_v1 = vrot.slane %v1148_v37, 4  ;;  %v1161_v2 = vmax.f32 %v1159_v27, %v1160_v42  ;;  %v1170_v61 = vsel %vm569_vm0, %v2249_v52, 4286644096  ;;  %v2252_v42 = vld [vmem:[%s3517_s0 + $0x188] sm:$0xff]  }
  0x7b   :  { %3567 = vst [vmem:[#allocation8_spill] sm:$0xff] %v2561_v32  ;;  %v1114_v62 = vrot.slane %v1113_v49, 1  ;;  %v1126_v51 = vmax.f32 %v1124_v31, %v1125_v24  ;;  %v1138_v7 = vrot.slane %v1137_v57, 2  ;;  %v1172_v58 = vunpack.i.l.bf16 %v1170_v61  ;;  %v2253_v24 = vld [vmem:[%s3517_s0 + $0x190] sm:$0xff]  }
  0x7c   :  { %v2567_v3 = vpack.i.bf16 %v1102_v50, %v1102_v50  ;;  %v1150_v15 = vmax.f32 %v1148_v37, %v1149_v1  ;;  %v1162_v18 = vrot.slane %v1161_v2, 4  ;;  %v1173_v9 = vunpack.i.h.bf16 %v1170_v61 }
  0x7d   :  { %v1115_v23 = vmax.f32 %v1113_v49, %v1114_v62  ;;  %v1127_v17 = vrot.slane %v1126_v51, 1  ;;  %v1139_v14 = vmax.f32 %v1137_v57, %v1138_v7  ;;  %v1183_v36 = vsel %vm569_vm0, %v2250_v40, 4286644096 }
  0x7e   :  { %3568 = vst [vmem:[#allocation9_spill] sm:$0xff] %v2567_v3  ;;  %v1151_v26 = vrot.slane %v1150_v15, 2  ;;  %v1163_v52 = vmax.f32 %v1161_v2, %v1162_v18  ;;  %v1174_v27 = vmax.f32 %v1172_v58, %v1173_v9  ;;  %v1185_v31 = vunpack.i.l.bf16 %v1183_v36 }
  0x7f   :  { %v2576_v37 = vpack.i.bf16 %v1115_v23, %v1115_v23  ;;  %v1128_v50 = vmax.f32 %v1126_v51, %v1127_v17  ;;  %v1140_v49 = vrot.slane %v1139_v14, 1  ;;  %v1186_v1 = vunpack.i.h.bf16 %v1183_v36  ;;  %v2254_v51 = vld [vmem:[%s3517_s0 + $0x198] sm:$0xff]  }
  0x80   :  { %v1152_v57 = vmax.f32 %v1150_v15, %v1151_v26  ;;  %v1164_v61 = vrot.slane %v1163_v52, 2  ;;  %v1175_v40 = vrot.slane %v1174_v27, 4  ;;  %v1196_v2 = vsel %vm569_vm0, %v2251_v54, 4286644096 }
  0x81   :  { %3569 = vst [vmem:[#allocation10_spill] sm:$0xff] %v2576_v37  ;;  %v2579_v62 = vpack.i.bf16 %v1128_v50, %v1128_v50  ;;  %v1141_v7 = vmax.f32 %v1139_v14, %v1140_v49  ;;  %v1187_v58 = vmax.f32 %v1185_v31, %v1186_v1  ;;  %v1198_v18 = vunpack.i.l.bf16 %v1196_v2  ;;  %v2255_v1 = vld [vmem:[%s3517_s0 + $0x1a0] sm:$0xff]  }
  0x82   :  { %v1153_v9 = vrot.slane %v1152_v57, 1  ;;  %v1165_v3 = vmax.f32 %v1163_v52, %v1164_v61  ;;  %v1176_v32 = vmax.f32 %v1174_v27, %v1175_v40  ;;  %v1199_v13 = vunpack.i.h.bf16 %v1196_v2  ;;  %v2256_v61 = vld [vmem:[%s3517_s0 + $0x1a8] sm:$0xff]  }
  0x83   :  { %3570 = vst [vmem:[#allocation11_spill] sm:$0xff] %v2579_v62  ;;  %v2584_v23 = vpack.i.bf16 %v1141_v7, %v1141_v7  ;;  %v1188_v15 = vrot.slane %v1187_v58, 4  ;;  %v1209_v17 = vsel %vm569_vm0, %v2252_v42, 4286644096  ;;  %v1222_v54 = vsel %vm569_vm0, %v2253_v24, 4286644096 }
  0x84   :  { %v1154_v36 = vmax.f32 %v1152_v57, %v1153_v9  ;;  %v1166_v26 = vrot.slane %v1165_v3, 1  ;;  %v1177_v14 = vrot.slane %v1176_v32, 2  ;;  %v1200_v31 = vmax.f32 %v1198_v18, %v1199_v13 }
  0x85   :  { %3571 = vst [vmem:[#allocation12_spill] sm:$0xff] %v2584_v23  ;;  %v1189_v50 = vmax.f32 %v1187_v58, %v1188_v15  ;;  %v1211_v49 = vunpack.i.l.bf16 %v1209_v17  ;;  %v1212_v52 = vunpack.i.h.bf16 %v1209_v17  ;;  %v1224_v27 = vunpack.i.l.bf16 %v1222_v54 }
  0x86   :  { %v2594_v40 = vpack.i.bf16 %v1154_v36, %v1154_v36  ;;  %v1167_v42 = vmax.f32 %v1165_v3, %v1166_v26  ;;  %v1178_v24 = vmax.f32 %v1176_v32, %v1177_v14  ;;  %v1201_v57 = vrot.slane %v1200_v31, 4 }
  0x87   :  { %v1190_v2 = vrot.slane %v1189_v50, 2  ;;  %v1213_v7 = vmax.f32 %v1211_v49, %v1212_v52  ;;  %v1225_v13 = vunpack.i.h.bf16 %v1222_v54  ;;  %v1235_v58 = vsel %vm569_vm0, %v2254_v51, 4286644096  ;;  %v2257_v51 = vld [vmem:[%s3517_s0 + $0x1b0] sm:$0xff]  }
  0x88   :  { %3572 = vst [vmem:[#allocation13_spill] sm:$0xff] %v2594_v40  ;;  %v2597_v18 = vpack.i.bf16 %v1167_v42, %v1167_v42  ;;  %v1179_v9 = vrot.slane %v1178_v24, 1  ;;  %v1202_v15 = vmax.f32 %v1200_v31, %v1201_v57  ;;  %v1237_v17 = vunpack.i.l.bf16 %v1235_v58 }
  0x89   :  { %v1191_v23 = vmax.f32 %v1189_v50, %v1190_v2  ;;  %v1214_v62 = vrot.slane %v1213_v7, 4  ;;  %v1226_v37 = vmax.f32 %v1224_v27, %v1225_v13  ;;  %v1238_v48 = vunpack.i.h.bf16 %v1235_v58 }
  0x8a   :  { %3573 = vst [vmem:[#allocation14_spill] sm:$0xff] %v2597_v18  ;;  %v1180_v28 = vmax.f32 %v1178_v24, %v1179_v9  ;;  %v1203_v36 = vrot.slane %v1202_v15, 2  ;;  %v1248_v3 = vsel %vm569_vm0, %v2255_v1, 4286644096  ;;  %v1261_v32 = vsel %vm569_vm0, %v2256_v61, 4286644096 }
  0x8b   :  { %v1192_v26 = vrot.slane %v1191_v23, 1  ;;  %v1215_v14 = vmax.f32 %v1213_v7, %v1214_v62  ;;  %v1227_v54 = vrot.slane %v1226_v37, 4  ;;  %v1239_v49 = vmax.f32 %v1237_v17, %v1238_v48  ;;  %v2258_v48 = vld [vmem:[%s3517_s0 + $0x1b8] sm:$0xff]  }
  0x8c   :  { %v2604_v31 = vpack.i.bf16 %v1180_v28, %v1180_v28  ;;  %v1204_v50 = vmax.f32 %v1202_v15, %v1203_v36  ;;  %v1250_v52 = vunpack.i.l.bf16 %v1248_v3  ;;  %v1251_v27 = vunpack.i.h.bf16 %v1248_v3 }
  0x8d   :  { %v1193_v42 = vmax.f32 %v1191_v23, %v1192_v26  ;;  %v1216_v24 = vrot.slane %v1215_v14, 2  ;;  %v1228_v57 = vmax.f32 %v1226_v37, %v1227_v54  ;;  %v1240_v2 = vrot.slane %v1239_v49, 4 }
  0x8e   :  { %3574 = vst [vmem:[#allocation15_spill] sm:$0xff] %v2604_v31  ;;  %v1205_v1 = vrot.slane %v1204_v50, 1  ;;  %v1252_v13 = vmax.f32 %v1250_v52, %v1251_v27  ;;  %v1263_v61 = vunpack.i.l.bf16 %v1261_v32  ;;  %v1264_v58 = vunpack.i.h.bf16 %v1261_v32  ;;  %v2259_v32 = vld [vmem:[%s3517_s0 + $0x1c0] sm:$0xff]  }
  0x8f   :  { %v2609_v62 = vpack.i.bf16 %v1193_v42, %v1193_v42  ;;  %v1217_v7 = vmax.f32 %v1215_v14, %v1216_v24  ;;  %v1229_v28 = vrot.slane %v1228_v57, 2  ;;  %v1241_v9 = vmax.f32 %v1239_v49, %v1240_v2 }
  0x90   :  { %v1206_v15 = vmax.f32 %v1204_v50, %v1205_v1  ;;  %v1253_v17 = vrot.slane %v1252_v13, 4  ;;  %v1265_v36 = vmax.f32 %v1263_v61, %v1264_v58  ;;  %v1274_v23 = vsel %vm569_vm0, %v2257_v51, 4286644096  ;;  %v2260_v58 = vld [vmem:[%s3517_s0 + $0x1c8] sm:$0xff]  }
  0x91   :  { %3575 = vst [vmem:[#allocation16_spill] sm:$0xff] %v2609_v62  ;;  %v1218_v37 = vrot.slane %v1217_v7, 1  ;;  %v1230_v3 = vmax.f32 %v1228_v57, %v1229_v28  ;;  %v1242_v26 = vrot.slane %v1241_v9, 2  ;;  %v1276_v54 = vunpack.i.l.bf16 %v1274_v23  ;;  %v2261_v28 = vld [vmem:[%s3517_s0 + $0x1d0] sm:$0xff]  }
  0x92   :  { %v2615_v52 = vpack.i.bf16 %v1206_v15, %v1206_v15  ;;  %v1254_v27 = vmax.f32 %v1252_v13, %v1253_v17  ;;  %v1266_v42 = vrot.slane %v1265_v36, 4  ;;  %v1277_v14 = vunpack.i.h.bf16 %v1274_v23 }
  0x93   :  { %v1219_v24 = vmax.f32 %v1217_v7, %v1218_v37  ;;  %v1231_v49 = vrot.slane %v1230_v3, 1  ;;  %v1243_v50 = vmax.f32 %v1241_v9, %v1242_v26  ;;  %v1287_v2 = vsel %vm569_vm0, %v2258_v48, 4286644096 }
  0x94   :  { %3576 = vst [vmem:[#allocation17_spill] sm:$0xff] %v2615_v52  ;;  %v1255_v1 = vrot.slane %v1254_v27, 2  ;;  %v1267_v51 = vmax.f32 %v1265_v36, %v1266_v42  ;;  %v1278_v61 = vmax.f32 %v1276_v54, %v1277_v14  ;;  %v1289_v57 = vunpack.i.l.bf16 %v1287_v2 }
  0x95   :  { %v2624_v13 = vpack.i.bf16 %v1219_v24, %v1219_v24  ;;  %v1232_v15 = vmax.f32 %v1230_v3, %v1231_v49  ;;  %v1244_v7 = vrot.slane %v1243_v50, 1  ;;  %v1290_v17 = vunpack.i.h.bf16 %v1287_v2  ;;  %v2262_v3 = vld [vmem:[%s3517_s0 + $0x1d8] sm:$0xff]  }
  0x96   :  { %v1256_v9 = vmax.f32 %v1254_v27, %v1255_v1  ;;  %v1268_v23 = vrot.slane %v1267_v51, 2  ;;  %v1279_v48 = vrot.slane %v1278_v61, 4  ;;  %v1300_v36 = vsel %vm569_vm0, %v2259_v32, 4286644096 }
  0x97   :  { %3577 = vst [vmem:[#allocation18_spill] sm:$0xff] %v2624_v13  ;;  %v2627_v37 = vpack.i.bf16 %v1232_v15, %v1232_v15  ;;  %v1245_v26 = vmax.f32 %v1243_v50, %v1244_v7  ;;  %v1291_v54 = vmax.f32 %v1289_v57, %v1290_v17  ;;  %v1302_v42 = vunpack.i.l.bf16 %v1300_v36  ;;  %v2263_v17 = vld [vmem:[%s3517_s0 + $0x1e0] sm:$0xff]  }
  0x98   :  { %v1257_v14 = vrot.slane %v1256_v9, 1  ;;  %v1269_v52 = vmax.f32 %v1267_v51, %v1268_v23  ;;  %v1280_v62 = vmax.f32 %v1278_v61, %v1279_v48  ;;  %v1303_v31 = vunpack.i.h.bf16 %v1300_v36  ;;  %v2264_v23 = vld [vmem:[%s3517_s0 + $0x1e8] sm:$0xff]  }
  0x99   :  { %3578 = vst [vmem:[#allocation19_spill] sm:$0xff] %v2627_v37  ;;  %v2632_v24 = vpack.i.bf16 %v1245_v26, %v1245_v26  ;;  %v1292_v27 = vrot.slane %v1291_v54, 4  ;;  %v1313_v49 = vsel %vm569_vm0, %v2260_v58, 4286644096  ;;  %v1326_v32 = vsel %vm569_vm0, %v2261_v28, 4286644096 }
  0x9a   :  { %v1258_v2 = vmax.f32 %v1256_v9, %v1257_v14  ;;  %v1270_v1 = vrot.slane %v1269_v52, 1  ;;  %v1281_v50 = vrot.slane %v1280_v62, 2  ;;  %v1304_v57 = vmax.f32 %v1302_v42, %v1303_v31 }
  0x9b   :  { %3579 = vst [vmem:[#allocation20_spill] sm:$0xff] %v2632_v24  ;;  %v1293_v15 = vmax.f32 %v1291_v54, %v1292_v27  ;;  %v1315_v7 = vunpack.i.l.bf16 %v1313_v49  ;;  %v1316_v51 = vunpack.i.h.bf16 %v1313_v49  ;;  %v1328_v61 = vunpack.i.l.bf16 %v1326_v32 }
  0x9c   :  { %v2642_v48 = vpack.i.bf16 %v1258_v2, %v1258_v2  ;;  %v1271_v58 = vmax.f32 %v1269_v52, %v1270_v1  ;;  %v1282_v28 = vmax.f32 %v1280_v62, %v1281_v50  ;;  %v1305_v9 = vrot.slane %v1304_v57, 4 }
  0x9d   :  { %v1294_v36 = vrot.slane %v1293_v15, 2  ;;  %v1317_v26 = vmax.f32 %v1315_v7, %v1316_v51  ;;  %v1329_v31 = vunpack.i.h.bf16 %v1326_v32  ;;  %v1339_v54 = vsel %vm569_vm0, %v2262_v3, 4286644096  ;;  %v2265_v3 = vld [vmem:[%s3517_s0 + $0x1f0] sm:$0xff]  }
  0x9e   :  { %3580 = vst [vmem:[#allocation21_spill] sm:$0xff] %v2642_v48  ;;  %v2645_v42 = vpack.i.bf16 %v1271_v58, %v1271_v58  ;;  %v1283_v14 = vrot.slane %v1282_v28, 1  ;;  %v1306_v27 = vmax.f32 %v1304_v57, %v1305_v9  ;;  %v1341_v49 = vunpack.i.l.bf16 %v1339_v54 }
  0x9f   :  { %v1295_v24 = vmax.f32 %v1293_v15, %v1294_v36  ;;  %v1318_v37 = vrot.slane %v1317_v26, 4  ;;  %v1330_v13 = vmax.f32 %v1328_v61, %v1329_v31  ;;  %v1342_v18 = vunpack.i.h.bf16 %v1339_v54 }
  0xa0   :  { %3581 = vst [vmem:[#allocation22_spill] sm:$0xff] %v2645_v42  ;;  %v1284_v40 = vmax.f32 %v1282_v28, %v1283_v14  ;;  %v1307_v2 = vrot.slane %v1306_v27, 2  ;;  %v1352_v52 = vsel %vm569_vm0, %v2263_v17, 4286644096  ;;  %v1365_v62 = vsel %vm569_vm0, %v2264_v23, 4286644096 }
  0xa1   :  { %v1296_v1 = vrot.slane %v1295_v24, 1  ;;  %v1319_v50 = vmax.f32 %v1317_v26, %v1318_v37  ;;  %v1331_v32 = vrot.slane %v1330_v13, 4  ;;  %v1343_v7 = vmax.f32 %v1341_v49, %v1342_v18  ;;  %v2266_v18 = vld [vmem:[%s3517_s0 + $0x1f8] sm:$0xff]  }
  0xa2   :  { %v2652_v57 = vpack.i.bf16 %v1284_v40, %v1284_v40  ;;  %v1308_v15 = vmax.f32 %v1306_v27, %v1307_v2  ;;  %v1354_v51 = vunpack.i.l.bf16 %v1352_v52  ;;  %v1355_v61 = vunpack.i.h.bf16 %v1352_v52 }
  0xa3   :  { %v1297_v58 = vmax.f32 %v1295_v24, %v1296_v1  ;;  %v1320_v28 = vrot.slane %v1319_v50, 2  ;;  %v1332_v9 = vmax.f32 %v1330_v13, %v1331_v32  ;;  %v1344_v36 = vrot.slane %v1343_v7, 4 }
  0xa4   :  { %3582 = vst [vmem:[#allocation23_spill] sm:$0xff] %v2652_v57  ;;  %v1309_v17 = vrot.slane %v1308_v15, 1  ;;  %v1356_v31 = vmax.f32 %v1354_v51, %v1355_v61  ;;  %v1367_v23 = vunpack.i.l.bf16 %v1365_v62  ;;  %v1368_v54 = vunpack.i.h.bf16 %v1365_v62  ;;  %v2267_v62 = vld [vmem:[%s3517_s0 + $0x200] sm:$0xff]  }
  0xa5   :  { %v2657_v37 = vpack.i.bf16 %v1297_v58, %v1297_v58  ;;  %v1321_v26 = vmax.f32 %v1319_v50, %v1320_v28  ;;  %v1333_v40 = vrot.slane %v1332_v9, 2  ;;  %v1345_v14 = vmax.f32 %v1343_v7, %v1344_v36 }
  0xa6   :  { %v1310_v27 = vmax.f32 %v1308_v15, %v1309_v17  ;;  %v1357_v49 = vrot.slane %v1356_v31, 4  ;;  %v1369_v2 = vmax.f32 %v1367_v23, %v1368_v54  ;;  %v1378_v24 = vsel %vm569_vm0, %v2265_v3, 4286644096  ;;  %v2268_v54 = vld [vmem:[%s3517_s0 + $0x208] sm:$0xff]  }
  0xa7   :  { %3583 = vst [vmem:[#allocation24_spill] sm:$0xff] %v2657_v37  ;;  %v1322_v13 = vrot.slane %v1321_v26, 1  ;;  %v1334_v52 = vmax.f32 %v1332_v9, %v1333_v40  ;;  %v1346_v1 = vrot.slane %v1345_v14, 2  ;;  %v1380_v32 = vunpack.i.l.bf16 %v1378_v24  ;;  %v2269_v40 = vld [vmem:[%s3517_s0 + $0x210] sm:$0xff]  }
  0xa8   :  { %v2663_v51 = vpack.i.bf16 %v1310_v27, %v1310_v27  ;;  %v1358_v61 = vmax.f32 %v1356_v31, %v1357_v49  ;;  %v1370_v58 = vrot.slane %v1369_v2, 4  ;;  %v1381_v50 = vunpack.i.h.bf16 %v1378_v24 }
  0xa9   :  { %v1323_v28 = vmax.f32 %v1321_v26, %v1322_v13  ;;  %v1335_v7 = vrot.slane %v1334_v52, 1  ;;  %v1347_v15 = vmax.f32 %v1345_v14, %v1346_v1  ;;  %v1391_v36 = vsel %vm569_vm0, %v2266_v18, 4286644096 }
  0xaa   :  { %3584 = vst [vmem:[#allocation25_spill] sm:$0xff] %v2663_v51  ;;  %v1359_v17 = vrot.slane %v1358_v61, 2  ;;  %v1371_v3 = vmax.f32 %v1369_v2, %v1370_v58  ;;  %v1382_v23 = vmax.f32 %v1380_v32, %v1381_v50  ;;  %v1393_v9 = vunpack.i.l.bf16 %v1391_v36 }
  0xab   :  { %v2672_v31 = vpack.i.bf16 %v1323_v28, %v1323_v28  ;;  %v1336_v27 = vmax.f32 %v1334_v52, %v1335_v7  ;;  %v1348_v26 = vrot.slane %v1347_v15, 1  ;;  %v1394_v49 = vunpack.i.h.bf16 %v1391_v36  ;;  %v2270_v52 = vld [vmem:[%s3517_s0 + $0x218] sm:$0xff]  }
  0xac   :  { %v1360_v14 = vmax.f32 %v1358_v61, %v1359_v17  ;;  %v1372_v24 = vrot.slane %v1371_v3, 2  ;;  %v1383_v18 = vrot.slane %v1382_v23, 4  ;;  %v1404_v2 = vsel %vm569_vm0, %v2267_v62, 4286644096 }
  0xad   :  { %3585 = vst [vmem:[#allocation26_spill] sm:$0xff] %v2672_v31  ;;  %v2675_v13 = vpack.i.bf16 %v1336_v27, %v1336_v27  ;;  %v1349_v1 = vmax.f32 %v1347_v15, %v1348_v26  ;;  %v1395_v32 = vmax.f32 %v1393_v9, %v1394_v49  ;;  %v1406_v58 = vunpack.i.l.bf16 %v1404_v2  ;;  %v2271_v49 = vld [vmem:[%s3517_s0 + $0x220] sm:$0xff]  }
  0xae   :  { %v1361_v50 = vrot.slane %v1360_v14, 1  ;;  %v1373_v51 = vmax.f32 %v1371_v3, %v1372_v24  ;;  %v1384_v37 = vmax.f32 %v1382_v23, %v1383_v18  ;;  %v1407_v57 = vunpack.i.h.bf16 %v1404_v2  ;;  %v2272_v24 = vld [vmem:[%s3517_s0 + $0x228] sm:$0xff]  }
  0xaf   :  { %3586 = vst [vmem:[#allocation27_spill] sm:$0xff] %v2675_v13  ;;  %v2680_v28 = vpack.i.bf16 %v1349_v1, %v1349_v1  ;;  %v1396_v61 = vrot.slane %v1395_v32, 4  ;;  %v1417_v7 = vsel %vm569_vm0, %v2268_v54, 4286644096  ;;  %v1430_v62 = vsel %vm569_vm0, %v2269_v40, 4286644096 }
  0xb0   :  { %v1362_v36 = vmax.f32 %v1360_v14, %v1361_v50  ;;  %v1374_v17 = vrot.slane %v1373_v51, 1  ;;  %v1385_v15 = vrot.slane %v1384_v37, 2  ;;  %v1408_v9 = vmax.f32 %v1406_v58, %v1407_v57 }
  0xb1   :  { %3587 = vst [vmem:[#allocation28_spill] sm:$0xff] %v2680_v28  ;;  %v1397_v27 = vmax.f32 %v1395_v32, %v1396_v61  ;;  %v1419_v26 = vunpack.i.l.bf16 %v1417_v7  ;;  %v1420_v3 = vunpack.i.h.bf16 %v1417_v7  ;;  %v1432_v23 = vunpack.i.l.bf16 %v1430_v62 }
  0xb2   :  { %v2690_v18 = vpack.i.bf16 %v1362_v36, %v1362_v36  ;;  %v1375_v54 = vmax.f32 %v1373_v51, %v1374_v17  ;;  %v1386_v40 = vmax.f32 %v1384_v37, %v1385_v15  ;;  %v1409_v14 = vrot.slane %v1408_v9, 4 }
  0xb3   :  { %v1398_v2 = vrot.slane %v1397_v27, 2  ;;  %v1421_v1 = vmax.f32 %v1419_v26, %v1420_v3  ;;  %v1433_v57 = vunpack.i.h.bf16 %v1430_v62  ;;  %v1443_v32 = vsel %vm569_vm0, %v2270_v52, 4286644096  ;;  %v2273_v52 = vld [vmem:[%s3517_s0 + $0x230] sm:$0xff]  }
  0xb4   :  { %3588 = vst [vmem:[#allocation29_spill] sm:$0xff] %v2690_v18  ;;  %v2693_v58 = vpack.i.bf16 %v1375_v54, %v1375_v54  ;;  %v1387_v50 = vrot.slane %v1386_v40, 1  ;;  %v1410_v61 = vmax.f32 %v1408_v9, %v1409_v14  ;;  %v1445_v7 = vunpack.i.l.bf16 %v1443_v32 }
  0xb5   :  { %v1399_v28 = vmax.f32 %v1397_v27, %v1398_v2  ;;  %v1422_v13 = vrot.slane %v1421_v1, 4  ;;  %v1434_v31 = vmax.f32 %v1432_v23, %v1433_v57  ;;  %v1446_v42 = vunpack.i.h.bf16 %v1443_v32 }
  0xb6   :  { %3589 = vst [vmem:[#allocation30_spill] sm:$0xff] %v2693_v58  ;;  %v1388_v48 = vmax.f32 %v1386_v40, %v1387_v50  ;;  %v1411_v36 = vrot.slane %v1410_v61, 2  ;;  %v1456_v51 = vsel %vm569_vm0, %v2271_v49, 4286644096  ;;  %v1469_v37 = vsel %vm569_vm0, %v2272_v24, 4286644096 }
  0xb7   :  { %v1400_v17 = vrot.slane %v1399_v28, 1  ;;  %v1423_v15 = vmax.f32 %v1421_v1, %v1422_v13  ;;  %v1435_v62 = vrot.slane %v1434_v31, 4  ;;  %v1447_v26 = vmax.f32 %v1445_v7, %v1446_v42  ;;  %v2274_v42 = vld [vmem:[%s3517_s0 + $0x238] sm:$0xff]  }
  0xb8   :  { %v2700_v9 = vpack.i.bf16 %v1388_v48, %v1388_v48  ;;  %v1412_v27 = vmax.f32 %v1410_v61, %v1411_v36  ;;  %v1458_v3 = vunpack.i.l.bf16 %v1456_v51  ;;  %v1459_v23 = vunpack.i.h.bf16 %v1456_v51 }
  0xb9   :  { %v1401_v54 = vmax.f32 %v1399_v28, %v1400_v17  ;;  %v1424_v40 = vrot.slane %v1423_v15, 2  ;;  %v1436_v14 = vmax.f32 %v1434_v31, %v1435_v62  ;;  %v1448_v2 = vrot.slane %v1447_v26, 4 }
  0xba   :  { %3590 = vst [vmem:[#allocation31_spill] sm:$0xff] %v2700_v9  ;;  %v1413_v49 = vrot.slane %v1412_v27, 1  ;;  %v1460_v57 = vmax.f32 %v1458_v3, %v1459_v23  ;;  %v1471_v24 = vunpack.i.l.bf16 %v1469_v37  ;;  %v1472_v32 = vunpack.i.h.bf16 %v1469_v37  ;;  %v2275_v37 = vld [vmem:[%s3517_s0 + $0x240] sm:$0xff]  }
  0xbb   :  { %v2705_v13 = vpack.i.bf16 %v1401_v54, %v1401_v54  ;;  %v1425_v1 = vmax.f32 %v1423_v15, %v1424_v40  ;;  %v1437_v48 = vrot.slane %v1436_v14, 2  ;;  %v1449_v50 = vmax.f32 %v1447_v26, %v1448_v2 }
  0xbc   :  { %v1414_v61 = vmax.f32 %v1412_v27, %v1413_v49  ;;  %v1461_v7 = vrot.slane %v1460_v57, 4  ;;  %v1473_v36 = vmax.f32 %v1471_v24, %v1472_v32  ;;  %v1482_v28 = vsel %vm569_vm0, %v2273_v52, 4286644096  ;;  %v2276_v32 = vld [vmem:[%s3517_s0 + $0x248] sm:$0xff]  }
  0xbd   :  { %3591 = vst [vmem:[#allocation32_spill] sm:$0xff] %v2705_v13  ;;  %v1426_v31 = vrot.slane %v1425_v1, 1  ;;  %v1438_v51 = vmax.f32 %v1436_v14, %v1437_v48  ;;  %v1450_v17 = vrot.slane %v1449_v50, 2  ;;  %v1484_v62 = vunpack.i.l.bf16 %v1482_v28  ;;  %v2277_v48 = vld [vmem:[%s3517_s0 + $0x250] sm:$0xff]  }
  0xbe   :  { %v2711_v3 = vpack.i.bf16 %v1414_v61, %v1414_v61  ;;  %v1462_v23 = vmax.f32 %v1460_v57, %v1461_v7  ;;  %v1474_v54 = vrot.slane %v1473_v36, 4  ;;  %v1485_v15 = vunpack.i.h.bf16 %v1482_v28 }
  0xbf   :  { %v1427_v40 = vmax.f32 %v1425_v1, %v1426_v31  ;;  %v1439_v26 = vrot.slane %v1438_v51, 1  ;;  %v1451_v27 = vmax.f32 %v1449_v50, %v1450_v17  ;;  %v1495_v2 = vsel %vm569_vm0, %v2274_v42, 4286644096 }
  0xc0   :  { %3592 = vst [vmem:[#allocation33_spill] sm:$0xff] %v2711_v3  ;;  %v1463_v49 = vrot.slane %v1462_v23, 2  ;;  %v1475_v52 = vmax.f32 %v1473_v36, %v1474_v54  ;;  %v1486_v24 = vmax.f32 %v1484_v62, %v1485_v15  ;;  %v1497_v14 = vunpack.i.l.bf16 %v1495_v2 }
  0xc1   :  { %v2720_v57 = vpack.i.bf16 %v1427_v40, %v1427_v40  ;;  %v1440_v61 = vmax.f32 %v1438_v51, %v1439_v26  ;;  %v1452_v1 = vrot.slane %v1451_v27, 1  ;;  %v1498_v7 = vunpack.i.h.bf16 %v1495_v2  ;;  %v2278_v51 = vld [vmem:[%s3517_s0 + $0x258] sm:$0xff]  }
  0xc2   :  { %v1464_v50 = vmax.f32 %v1462_v23, %v1463_v49  ;;  %v1476_v28 = vrot.slane %v1475_v52, 2  ;;  %v1487_v42 = vrot.slane %v1486_v24, 4  ;;  %v1508_v36 = vsel %vm569_vm0, %v2275_v37, 4286644096 }
  0xc3   :  { %3593 = vst [vmem:[#allocation34_spill] sm:$0xff] %v2720_v57  ;;  %v2723_v31 = vpack.i.bf16 %v1440_v61, %v1440_v61  ;;  %v1453_v17 = vmax.f32 %v1451_v27, %v1452_v1  ;;  %v1499_v62 = vmax.f32 %v1497_v14, %v1498_v7  ;;  %v1510_v54 = vunpack.i.l.bf16 %v1508_v36  ;;  %v2279_v7 = vld [vmem:[%s3517_s0 + $0x260] sm:$0xff]  }
  0xc4   :  { %v1465_v15 = vrot.slane %v1464_v50, 1  ;;  %v1477_v3 = vmax.f32 %v1475_v52, %v1476_v28  ;;  %v1488_v13 = vmax.f32 %v1486_v24, %v1487_v42  ;;  %v1511_v9 = vunpack.i.h.bf16 %v1508_v36  ;;  %v2280_v28 = vld [vmem:[%s3517_s0 + $0x268] sm:$0xff]  }
  0xc5   :  { %3594 = vst [vmem:[#allocation35_spill] sm:$0xff] %v2723_v31  ;;  %v2728_v40 = vpack.i.bf16 %v1453_v17, %v1453_v17  ;;  %v1500_v23 = vrot.slane %v1499_v62, 4  ;;  %v1521_v26 = vsel %vm569_vm0, %v2276_v32, 4286644096  ;;  %v1534_v37 = vsel %vm569_vm0, %v2277_v48, 4286644096 }
  0xc6   :  { %v1466_v2 = vmax.f32 %v1464_v50, %v1465_v15  ;;  %v1478_v49 = vrot.slane %v1477_v3, 1  ;;  %v1489_v27 = vrot.slane %v1488_v13, 2  ;;  %v1512_v14 = vmax.f32 %v1510_v54, %v1511_v9 }
  0xc7   :  { %3595 = vst [vmem:[#allocation36_spill] sm:$0xff] %v2728_v40  ;;  %v1501_v61 = vmax.f32 %v1499_v62, %v1500_v23  ;;  %v1523_v1 = vunpack.i.l.bf16 %v1521_v26  ;;  %v1524_v52 = vunpack.i.h.bf16 %v1521_v26  ;;  %v1536_v24 = vunpack.i.l.bf16 %v1534_v37 }
  0xc8   :  { %v2738_v42 = vpack.i.bf16 %v1466_v2, %v1466_v2  ;;  %v1479_v32 = vmax.f32 %v1477_v3, %v1478_v49  ;;  %v1490_v48 = vmax.f32 %v1488_v13, %v1489_v27  ;;  %v1513_v50 = vrot.slane %v1512_v14, 4 }
  0xc9   :  { %v1502_v36 = vrot.slane %v1501_v61, 2  ;;  %v1525_v17 = vmax.f32 %v1523_v1, %v1524_v52  ;;  %v1537_v9 = vunpack.i.h.bf16 %v1534_v37  ;;  %v1547_v62 = vsel %vm569_vm0, %v2278_v51, 4286644096  ;;  %v2281_v51 = vld [vmem:[%s3517_s0 + $0x270] sm:$0xff]  }
  0xca   :  { %v2741_v54 = vpack.i.bf16 %v1479_v32, %v1479_v32  ;;  %v1491_v15 = vrot.slane %v1490_v48, 1  ;;  %v1514_v23 = vmax.f32 %v1512_v14, %v1513_v50  ;;  %v1549_v26 = vunpack.i.l.bf16 %v1547_v62 }
  0xcb   :  { %v1503_v40 = vmax.f32 %v1501_v61, %v1502_v36  ;;  %v1526_v31 = vrot.slane %v1525_v17, 4  ;;  %v1538_v57 = vmax.f32 %v1536_v24, %v1537_v9  ;;  %v1550_v58 = vunpack.i.h.bf16 %v1547_v62 }
  0xcc   :  { %3596 = vst [vmem:[#allocation37_spill] sm:$0xff] %v2741_v54  ;;  %v1492_v18 = vmax.f32 %v1490_v48, %v1491_v15  ;;  %v1515_v2 = vrot.slane %v1514_v23, 2  ;;  %v1560_v3 = vsel %vm569_vm0, %v2279_v7, 4286644096  ;;  %v1573_v13 = vsel %vm569_vm0, %v2280_v28, 4286644096 }
  0xcd   :  { %v1504_v49 = vrot.slane %v1503_v40, 1  ;;  %v1527_v27 = vmax.f32 %v1525_v17, %v1526_v31  ;;  %v1539_v37 = vrot.slane %v1538_v57, 4  ;;  %v1551_v1 = vmax.f32 %v1549_v26, %v1550_v58  ;;  %v2282_v58 = vld [vmem:[%s3517_s0 + $0x278] sm:$0xff]  }
  0xce   :  { %v2748_v14 = vpack.i.bf16 %v1492_v18, %v1492_v18  ;;  %v1516_v61 = vmax.f32 %v1514_v23, %v1515_v2  ;;  %v1562_v52 = vunpack.i.l.bf16 %v1560_v3  ;;  %v1563_v24 = vunpack.i.h.bf16 %v1560_v3 }
  0xcf   :  { %v1505_v32 = vmax.f32 %v1503_v40, %v1504_v49  ;;  %v1528_v48 = vrot.slane %v1527_v27, 2  ;;  %v1540_v50 = vmax.f32 %v1538_v57, %v1539_v37  ;;  %v1552_v36 = vrot.slane %v1551_v1, 4 }
  0xd0   :  { %3597 = vst [vmem:[#allocation38_spill] sm:$0xff] %v2748_v14  ;;  %v1517_v7 = vrot.slane %v1516_v61, 1  ;;  %v1564_v9 = vmax.f32 %v1562_v52, %v1563_v24  ;;  %v1575_v28 = vunpack.i.l.bf16 %v1573_v13  ;;  %v1576_v62 = vunpack.i.h.bf16 %v1573_v13 }
  0xd1   :  { %v2753_v31 = vpack.i.bf16 %v1505_v32, %v1505_v32  ;;  %v1529_v17 = vmax.f32 %v1527_v27, %v1528_v48  ;;  %v1541_v18 = vrot.slane %v1540_v50, 2  ;;  %v1553_v15 = vmax.f32 %v1551_v1, %v1552_v36 }
  0xd2   :  { %v1518_v23 = vmax.f32 %v1516_v61, %v1517_v7  ;;  %v1565_v26 = vrot.slane %v1564_v9, 4  ;;  %v1577_v2 = vmax.f32 %v1575_v28, %v1576_v62  ;;  %v1586_v40 = vsel %vm569_vm0, %v2281_v51, 4286644096 }
  0xd3   :  { %3598 = vst [vmem:[#allocation39_spill] sm:$0xff] %v2753_v31  ;;  %v1530_v57 = vrot.slane %v1529_v17, 1  ;;  %v1542_v3 = vmax.f32 %v1540_v50, %v1541_v18  ;;  %v1554_v49 = vrot.slane %v1553_v15, 2  ;;  %v1588_v37 = vunpack.i.l.bf16 %v1586_v40 }
  0xd4   :  { %v2756_v52 = vpack.i.bf16 %v1518_v23, %v1518_v23  ;;  %v1566_v13 = vmax.f32 %v1564_v9, %v1565_v26  ;;  %v1578_v24 = vrot.slane %v1577_v2, 4  ;;  %v1589_v14 = vunpack.i.h.bf16 %v1586_v40  ;;  %v3636_v40 = vld [vmem:[#allocation37_spill] sm:$0xff] }
  0xd5   :  { %v1531_v54 = vmax.f32 %v1529_v17, %v1530_v57  ;;  %v1543_v32 = vrot.slane %v1542_v3, 1  ;;  %v1555_v31 = vmax.f32 %v1553_v15, %v1554_v49  ;;  %v1599_v27 = vsel %vm569_vm0, %v2282_v58, 4286644096  ;;  %v3628_v49 = vld [vmem:[#allocation29_spill] sm:$0xff] }
  0xd6   :  { %v1567_v1 = vrot.slane %v1566_v13, 2  ;;  %v1579_v61 = vmax.f32 %v1577_v2, %v1578_v24  ;;  %v1590_v48 = vmax.f32 %v1588_v37, %v1589_v14  ;;  %v1601_v36 = vunpack.i.l.bf16 %v1599_v27  ;;  %v3635_v37 = vld [vmem:[#allocation36_spill] sm:$0xff] }
  0xd7   :  { %v2759_v7 = vpack.i.bf16 %v1531_v54, %v1531_v54  ;;  %v1544_v51 = vmax.f32 %v1542_v3, %v1543_v32  ;;  %v1556_v50 = vrot.slane %v1555_v31, 1  ;;  %v1602_v28 = vunpack.i.h.bf16 %v1599_v27  ;;  %v3634_v32 = vld [vmem:[#allocation35_spill] sm:$0xff]  ;;  %v3637_v58 = vld [vmem:[#allocation38_spill] sm:$0xff] }
  0xd8   :  { %v1568_v62 = vmax.f32 %v1566_v13, %v1567_v1  ;;  %v1580_v18 = vrot.slane %v1579_v61, 2  ;;  %v1591_v23 = vrot.slane %v1590_v48, 4  ;;  %v3633_v1 = vld [vmem:[#allocation34_spill] sm:$0xff]  ;;  %vm1943_vm7 = vcmask 1047559  }
  0xd9   :  { %3599 = vst [vmem:[#allocation40_spill] sm:$0xff] %v2759_v7  ;;  %v2763_v17 = vpack.i.bf16 %v1544_v51, %v1544_v51  ;;  %v1557_v15 = vmax.f32 %v1555_v31, %v1556_v50  ;;  %v1603_v26 = vmax.f32 %v1601_v36, %v1602_v28  ;;  %v3606_v28 = vld [vmem:[#allocation7_spill] sm:$0xff]  ;;  %vm2028_vm8 = vcmask 519168  }
  0xda   :  { %v1569_v14 = vrot.slane %v1568_v62, 1  ;;  %v1581_v2 = vmax.f32 %v1579_v61, %v1580_v18  ;;  %v1592_v54 = vmax.f32 %v1590_v48, %v1591_v23  ;;  %v3604_v23 = vld [vmem:[#allocation5_spill] sm:$0xff]  ;;  %v3605_v18 = vld [vmem:[#allocation6_spill] sm:$0xff]  ;;  %v3607_v48 = vld [vmem:[#allocation8_spill] sm:$0xff]  ;;  %v3640_v61 = vcombine.low %v2336_v16, %v2336_v16 }
  0xdb   :  { %v2769_v57 = vpack.i.bf16 %v1557_v15, %v1557_v15  ;;  %v1604_v3 = vrot.slane %v1603_v26, 4  ;;  %v3638_v9 = vld [vmem:[#allocation39_spill] sm:$0xff]  ;;  %v3644_v16 = vcombine.low %v2353_v38, %v2353_v38  ;;  %v3648_v38 = vcombine.low %v2381_v41, %v2381_v41 }
  0xdc   :  { %v1570_v31 = vmax.f32 %v1568_v62, %v1569_v14  ;;  %v1582_v13 = vrot.slane %v1581_v2, 1  ;;  %v1593_v24 = vrot.slane %v1592_v54, 2  ;;  %v3652_v41 = vcombine.low %v2405_v22, %v2405_v22 }
  0xdd   :  { %v1605_v27 = vmax.f32 %v1603_v26, %v1604_v3  ;;  %v3656_v22 = vcombine.low %v2432_v30, %v2432_v30  ;;  %v3660_v30 = vcombine.low %v2453_v19, %v2453_v19  ;;  %v3664_v19 = vcombine.low %v2480_v44, %v2480_v44 }
  0xde   :  { %v2783_v36 = vpack.i.bf16 %v1570_v31, %v1570_v31  ;;  %v1583_v51 = vmax.f32 %v1581_v2, %v1582_v13  ;;  %v1594_v50 = vmax.f32 %v1592_v54, %v1593_v24  ;;  %v3601_v54 = vld [vmem:[#allocation2_spill] sm:$0xff]  ;;  %v3603_v31 = vld [vmem:[#allocation4_spill] sm:$0xff]  ;;  %v3639_v2 = vcombine.low %v2331_v11, %v2331_v11 }
  0xdf   :  { %v1606_v62 = vrot.slane %v1605_v27, 2  ;;  %v3641_v13 = vcombine.low %v2339_v20, %v2339_v20  ;;  %v3642_v24 = vcombine.low %v2344_v25, %v2344_v25  ;;  %v3643_v11 = vcombine.low %v2350_v34, %v2350_v34 }
  0xe0   :  { %v2793_v26 = vpack.i.bf16 %v1583_v51, %v1583_v51  ;;  %v1595_v14 = vrot.slane %v1594_v50, 1  ;;  %v2936_v7 = vunpack.c.l.b16 %v3639_v2  ;;  %v3645_v20 = vcombine.low %v2359_v47, %v2359_v47 }
  0xe1   :  { %v1607_v3 = vmax.f32 %v1605_v27, %v1606_v62  ;;  %v3602_v62 = vld [vmem:[#allocation3_spill] sm:$0xff]  ;;  %v2956_v2 = vunpack.c.l.b16 %v3643_v11  ;;  %v3646_v25 = vcombine.low %v2369_v5, %v2369_v5  ;;  %v3647_v34 = vcombine.low %v2376_v35, %v2376_v35 }
  0xe2   :  { %v1596_v15 = vmax.f32 %v1594_v50, %v1595_v14  ;;  %v3649_v47 = vcombine.low %v2387_v55, %v2387_v55  ;;  %v3650_v5 = vcombine.low %v2392_v60, %v2392_v60  ;;  %v3651_v35 = vcombine.low %v2395_v4, %v2395_v4  ;;  %v3683_v14 = vld [vmem:[#allocation9_spill] sm:$0xff] }
  0xe3   :  { %v1608_v27 = vrot.slane %v1607_v3, 1  ;;  %v2976_v11 = vunpack.c.l.b16 %v3647_v34  ;;  %v3653_v55 = vcombine.low %v2412_v39, %v2412_v39  ;;  %v3654_v60 = vcombine.low %v2418_v0, %v2418_v0 }
  0xe4   :  { %v2817_v50 = vpack.i.bf16 %v1596_v15, %v1596_v15  ;;  %v2946_v15 = vunpack.c.l.b16 %v3641_v13  ;;  %v2966_v13 = vunpack.c.l.b16 %v3645_v20  ;;  %v2986_v20 = vunpack.c.l.b16 %v3649_v47 }
  0xe5   :  { %v1609_v51 = vmax.f32 %v1607_v3, %v1608_v27  ;;  %v2941_v3 = vunpack.c.l.b16 %v3640_v61  ;;  %v2961_v61 = vunpack.c.l.b16 %v3644_v16  ;;  %v2981_v16 = vunpack.c.l.b16 %v3648_v38 }
  0xe6   :  { %3600 = vst [vmem:[#allocation41_spill] sm:$0xff] %v2817_v50  ;;  %v2951_v50 = vunpack.c.l.b16 %v3642_v24  ;;  %v2971_v24 = vunpack.c.l.b16 %v3646_v25  ;;  %v2991_v25 = vunpack.c.l.b16 %v3650_v5  ;;  %v2996_v34 = vunpack.c.l.b16 %v3651_v35 }
  0xe7   :  { %v2839_v27 = vpack.i.bf16 %v1609_v51, %v1609_v51  ;;  %v3632_v51 = vld [vmem:[#allocation33_spill] sm:$0xff]  ;;  %v3001_v38 = vunpack.c.l.b16 %v3652_v41  ;;  %v3006_v47 = vunpack.c.l.b16 %v3653_v55  ;;  %v3011_v5 = vunpack.c.l.b16 %v3654_v60 }
  0xe8   :  { %v3655_v4 = vcombine.low %v2423_v12, %v2423_v12  ;;  %v3021_v41 = vunpack.c.l.b16 %v3656_v22  ;;  %v3657_v39 = vcombine.low %v2435_v43, %v2435_v43  ;;  %v3658_v0 = vcombine.low %v2440_v53, %v2440_v53 }
  0xe9   :  { %v3659_v12 = vcombine.low %v2450_v8, %v2450_v8  ;;  %v3041_v22 = vunpack.c.l.b16 %v3660_v30  ;;  %v3661_v43 = vcombine.low %v2460_v46, %v2460_v46  ;;  %v3662_v53 = vcombine.low %v2465_v63, %v2465_v63 }
  0xea   :  { %v3016_v35 = vunpack.c.l.b16 %v3655_v4  ;;  %v3026_v55 = vunpack.c.l.b16 %v3657_v39  ;;  %v3031_v60 = vunpack.c.l.b16 %v3658_v0  ;;  %v3663_v8 = vcombine.low %v2471_v21, %v2471_v21 }
  0xeb   :  { %v3036_v4 = vunpack.c.l.b16 %v3659_v12  ;;  %v3046_v39 = vunpack.c.l.b16 %v3661_v43  ;;  %v3051_v0 = vunpack.c.l.b16 %v3662_v53  ;;  %v3061_v30 = vunpack.c.l.b16 %v3664_v19 }
  0xec   :  { %v3056_v12 = vunpack.c.l.b16 %v3663_v8  ;;  %v3665_v46 = vcombine.low %v2483_v56, %v2483_v56  ;;  %v3666_v63 = vcombine.low %v2488_v6, %v2488_v6  ;;  %v3667_v21 = vcombine.low %v2498_v29, %v2498_v29 }
  0xed   :  { %v3668_v44 = vcombine.low %v2501_v45, %v2501_v45  ;;  %v3669_v56 = vcombine.low %v2508_v10, %v2508_v10  ;;  %v3670_v6 = vcombine.low %v2513_v33, %v2513_v33  ;;  %v3671_v29 = vcombine.low %v2519_v59, %v2519_v59 }
  0xee   :  { %v3066_v43 = vunpack.c.l.b16 %v3665_v46  ;;  %v3071_v53 = vunpack.c.l.b16 %v3666_v63  ;;  %v3076_v8 = vunpack.c.l.b16 %v3667_v21  ;;  %v3672_v45 = vcombine.low %v3601_v54, %v3601_v54 }
  0xef   :  { %v3081_v19 = vunpack.c.l.b16 %v3668_v44  ;;  %v3086_v46 = vunpack.c.l.b16 %v3669_v56  ;;  %v3091_v63 = vunpack.c.l.b16 %v3670_v6  ;;  %v3096_v21 = vunpack.c.l.b16 %v3671_v29 }
  0xf0   :  { %v3101_v44 = vunpack.c.l.b16 %v3672_v45  ;;  %v3673_v10 = vcombine.low %v3602_v62, %v3602_v62  ;;  %v3674_v33 = vcombine.low %v3603_v31, %v3603_v31  ;;  %v3675_v59 = vcombine.low %v3604_v23, %v3604_v23 }
  0xf1   :  { %v3677_v54 = vcombine.low %v3605_v18, %v3605_v18  ;;  %v3679_v62 = vcombine.low %v3606_v28, %v3606_v28  ;;  %v3681_v31 = vcombine.low %v3607_v48, %v3607_v48  ;;  %v3684_v23 = vcombine.low %v3683_v14, %v3683_v14 }
  0xf2   :  { %v3106_v56 = vunpack.c.l.b16 %v3673_v10  ;;  %v3111_v6 = vunpack.c.l.b16 %v3674_v33  ;;  %v3116_v29 = vunpack.c.l.b16 %v3675_v59 }
  0xf3   :  { %v3121_v45 = vunpack.c.l.b16 %v3677_v54  ;;  %v3126_v10 = vunpack.c.l.b16 %v3679_v62  ;;  %v3131_v33 = vunpack.c.l.b16 %v3681_v31  ;;  %v3136_v59 = vunpack.c.l.b16 %v3684_v23 }
  0xf4   :  { %3676 = vst [vmem:[#allocation2_spill] sm:$0xff] %v3116_v29  ;;  %v3686_v29 = vld [vmem:[#allocation10_spill] sm:$0xff] }
  0xf5   :  { %3678 = vst [vmem:[#allocation3_spill] sm:$0xff] %v3121_v45  ;;  %3680 = vst [vmem:[#allocation4_spill] sm:$0xff] %v3126_v10  ;;  %v3687_v18 = vcombine.low %v3686_v29, %v3686_v29  ;;  %v3689_v45 = vld [vmem:[#allocation11_spill] sm:$0xff]  ;;  %v3692_v10 = vld [vmem:[#allocation12_spill] sm:$0xff] }
  0xf6   :  { %3682 = vst [vmem:[#allocation5_spill] sm:$0xff] %v3131_v33  ;;  %3685 = vst [vmem:[#allocation6_spill] sm:$0xff] %v3136_v59  ;;  %v3690_v28 = vcombine.low %v3689_v45, %v3689_v45  ;;  %v3693_v48 = vcombine.low %v3692_v10, %v3692_v10  ;;  %v3695_v33 = vld [vmem:[#allocation13_spill] sm:$0xff]  ;;  %v3698_v59 = vld [vmem:[#allocation14_spill] sm:$0xff] }
  0xf7   :  { %v3141_v54 = vunpack.c.l.b16 %v3687_v18  ;;  %v3696_v14 = vcombine.low %v3695_v33, %v3695_v33  ;;  %v3699_v29 = vcombine.low %v3698_v59, %v3698_v59 }
  0xf8   :  { %v3146_v62 = vunpack.c.l.b16 %v3690_v28  ;;  %v3151_v31 = vunpack.c.l.b16 %v3693_v48 }
  0xf9   :  { %3688 = vst [vmem:[#allocation7_spill] sm:$0xff] %v3141_v54  ;;  %v3156_v23 = vunpack.c.l.b16 %v3696_v14  ;;  %v3161_v18 = vunpack.c.l.b16 %v3699_v29  ;;  %v3701_v54 = vld [vmem:[#allocation15_spill] sm:$0xff] }
  0xfa   :  { %3691 = vst [vmem:[#allocation8_spill] sm:$0xff] %v3146_v62  ;;  %3694 = vst [vmem:[#allocation29_spill] sm:$0xff] %v3151_v31  ;;  %v3702_v45 = vcombine.low %v3701_v54, %v3701_v54  ;;  %v3704_v62 = vld [vmem:[#allocation16_spill] sm:$0xff]  ;;  %v3707_v31 = vld [vmem:[#allocation17_spill] sm:$0xff] }
  0xfb   :  { %3697 = vst [vmem:[#allocation33_spill] sm:$0xff] %v3156_v23  ;;  %3700 = vst [vmem:[#allocation34_spill] sm:$0xff] %v3161_v18  ;;  %v3705_v10 = vcombine.low %v3704_v62, %v3704_v62  ;;  %v3708_v33 = vcombine.low %v3707_v31, %v3707_v31  ;;  %v3710_v23 = vld [vmem:[#allocation18_spill] sm:$0xff]  ;;  %v3713_v18 = vld [vmem:[#allocation19_spill] sm:$0xff] }
  0xfc   :  { %v3166_v28 = vunpack.c.l.b16 %v3702_v45  ;;  %v3711_v59 = vcombine.low %v3710_v23, %v3710_v23  ;;  %v3714_v54 = vcombine.low %v3713_v18, %v3713_v18 }
  0xfd   :  { %v3171_v48 = vunpack.c.l.b16 %v3705_v10  ;;  %v3176_v14 = vunpack.c.l.b16 %v3708_v33 }
  0xfe   :  { %3703 = vst [vmem:[#allocation35_spill] sm:$0xff] %v3166_v28  ;;  %v3181_v29 = vunpack.c.l.b16 %v3711_v59  ;;  %v3186_v45 = vunpack.c.l.b16 %v3714_v54  ;;  %v3716_v28 = vld [vmem:[#allocation20_spill] sm:$0xff] }
  0xff   :  { %3706 = vst [vmem:[#allocation36_spill] sm:$0xff] %v3171_v48  ;;  %3709 = vst [vmem:[#allocation37_spill] sm:$0xff] %v3176_v14  ;;  %v3717_v62 = vcombine.low %v3716_v28, %v3716_v28  ;;  %v3719_v48 = vld [vmem:[#allocation21_spill] sm:$0xff]  ;;  %v3722_v14 = vld [vmem:[#allocation22_spill] sm:$0xff] }
 0x100   :  { %3712 = vst [vmem:[#allocation38_spill] sm:$0xff] %v3181_v29  ;;  %3715 = vst [vmem:[#allocation39_spill] sm:$0xff] %v3186_v45  ;;  %v3720_v31 = vcombine.low %v3719_v48, %v3719_v48  ;;  %v3723_v23 = vcombine.low %v3722_v14, %v3722_v14  ;;  %v3725_v29 = vld [vmem:[#allocation23_spill] sm:$0xff]  ;;  %v3728_v45 = vld [vmem:[#allocation24_spill] sm:$0xff] }
 0x101   :  { %v3191_v10 = vunpack.c.l.b16 %v3717_v62  ;;  %v3726_v18 = vcombine.low %v3725_v29, %v3725_v29  ;;  %v3729_v28 = vcombine.low %v3728_v45, %v3728_v45 }
 0x102   :  { %v3196_v33 = vunpack.c.l.b16 %v3720_v31  ;;  %v3201_v59 = vunpack.c.l.b16 %v3723_v23 }
 0x103   :  { %3718 = vst [vmem:[#allocation9_spill] sm:$0xff] %v3191_v10  ;;  %v3206_v54 = vunpack.c.l.b16 %v3726_v18  ;;  %v3211_v62 = vunpack.c.l.b16 %v3729_v28  ;;  %v3731_v10 = vld [vmem:[#allocation25_spill] sm:$0xff] }
 0x104   :  { %3721 = vst [vmem:[#allocation10_spill] sm:$0xff] %v3196_v33  ;;  %3724 = vst [vmem:[#allocation11_spill] sm:$0xff] %v3201_v59  ;;  %v3732_v48 = vcombine.low %v3731_v10, %v3731_v10  ;;  %v3733_v33 = vld [vmem:[#allocation26_spill] sm:$0xff]  ;;  %v3736_v59 = vld [vmem:[#allocation27_spill] sm:$0xff]  ;;  %v3741_v10 = vcombine.low %v3628_v49, %v3628_v49  ;;  %v3748_v49 = vcombine.low %v3632_v51, %v3632_v51 }
 0x105   :  { %3727 = vst [vmem:[#allocation12_spill] sm:$0xff] %v3206_v54  ;;  %3730 = vst [vmem:[#allocation13_spill] sm:$0xff] %v3211_v62  ;;  %v3734_v14 = vcombine.low %v3733_v33, %v3733_v33  ;;  %v3737_v29 = vcombine.low %v3736_v59, %v3736_v59  ;;  %v3739_v54 = vld [vmem:[#allocation28_spill] sm:$0xff]  ;;  %v3742_v62 = vld [vmem:[#allocation30_spill] sm:$0xff]  ;;  %v3752_v51 = vcombine.low %v2738_v42, %v2738_v42 }
 0x106   :  { %v3216_v31 = vunpack.c.l.b16 %v3732_v48  ;;  %v3740_v45 = vcombine.low %v3739_v54, %v3739_v54  ;;  %v3236_v48 = vunpack.c.l.b16 %v3741_v10  ;;  %v3743_v33 = vcombine.low %v3742_v62, %v3742_v62 }
 0x107   :  { %v3221_v23 = vunpack.c.l.b16 %v3734_v14  ;;  %v3226_v18 = vunpack.c.l.b16 %v3737_v29  ;;  %v3256_v10 = vunpack.c.l.b16 %v3748_v49  ;;  %v3749_v62 = vcombine.low %v3633_v1, %v3633_v1 }
 0x108   :  { %v3231_v28 = vunpack.c.l.b16 %v3740_v45  ;;  %v3241_v14 = vunpack.c.l.b16 %v3743_v33  ;;  %v3276_v49 = vunpack.c.l.b16 %v3752_v51  ;;  %v3754_v1 = vcombine.low %v3636_v40, %v3636_v40 }
 0x109   :  { %3735 = vst [vmem:[#allocation14_spill] sm:$0xff] %v3221_v23  ;;  %3738 = vst [vmem:[#allocation15_spill] sm:$0xff] %v3226_v18  ;;  %v3744_v23 = vld [vmem:[#allocation31_spill] sm:$0xff]  ;;  %v3746_v18 = vld [vmem:[#allocation32_spill] sm:$0xff]  ;;  %v3261_v33 = vunpack.c.l.b16 %v3749_v62  ;;  %v3758_v42 = vcombine.low %v2756_v52, %v2756_v52  ;;  %v3763_v52 = vcombine.low %v2783_v36, %v2783_v36  ;;  %v1932_v36 = vsel %vm1931_vm1, %v2941_v3, %v2936_v7 }
 0x10a   :  { %v3745_v59 = vcombine.low %v3744_v23, %v3744_v23  ;;  %v3747_v54 = vcombine.low %v3746_v18, %v3746_v18  ;;  %v3750_v23 = vcombine.low %v3634_v32, %v3634_v32  ;;  %v3751_v18 = vcombine.low %v3635_v37, %v3635_v37  ;;  %3753 = vst [vmem:[#allocation16_spill] sm:$0xff] %v3276_v49  ;;  %v3759_v49 = vld [vmem:[#allocation40_spill] sm:$0xff] }
 0x10b   :  { %v3281_v62 = vunpack.c.l.b16 %v3754_v1  ;;  %v3755_v32 = vcombine.low %v3637_v58, %v3637_v58  ;;  %v3756_v37 = vcombine.low %v3638_v9, %v3638_v9  ;;  %v3296_v51 = vunpack.c.l.b16 %v3758_v42 }
 0x10c   :  { %v3246_v29 = vunpack.c.l.b16 %v3745_v59  ;;  %v3251_v45 = vunpack.c.l.b16 %v3747_v54  ;;  %v3266_v59 = vunpack.c.l.b16 %v3750_v23  ;;  %v3271_v54 = vunpack.c.l.b16 %v3751_v18 }
 0x10d   :  { %v3286_v23 = vunpack.c.l.b16 %v3755_v32  ;;  %v3291_v18 = vunpack.c.l.b16 %v3756_v37  ;;  %v3760_v40 = vcombine.low %v3759_v49, %v3759_v49  ;;  %v3761_v58 = vcombine.low %v2763_v17, %v2763_v17 }
 0x10e   :  { %v3762_v9 = vcombine.low %v2769_v57, %v2769_v57  ;;  %v3316_v42 = vunpack.c.l.b16 %v3763_v52  ;;  %v3764_v49 = vcombine.low %v2793_v26, %v2793_v26  ;;  %v3767_v57 = vcombine.low %v2839_v27, %v2839_v27 }
 0x10f   :  { %3757 = vst [vmem:[#allocation17_spill] sm:$0xff] %v3291_v18  ;;  %v3301_v1 = vunpack.c.l.b16 %v3760_v40  ;;  %v3306_v32 = vunpack.c.l.b16 %v3761_v58  ;;  %v3765_v18 = vld [vmem:[#allocation41_spill] sm:$0xff]  ;;  %v1934_v26 = vsel %vm1933_vm2, %v2946_v15, %v1932_v36  ;;  %v1945_v27 = vsel %vm1931_vm1, %v2981_v16, %v2976_v11  ;;  %v3775_v36 = vld [vmem:[#allocation39_spill] sm:$0xff] }
 0x110   :  { %v3311_v37 = vunpack.c.l.b16 %v3762_v9  ;;  %v3321_v40 = vunpack.c.l.b16 %v3764_v49  ;;  %v3766_v17 = vcombine.low %v3765_v18, %v3765_v18  ;;  %v3331_v9 = vunpack.c.l.b16 %v3767_v57  ;;  %v3772_v49 = vld [vmem:[#allocation14_spill] sm:$0xff]  ;;  %v3774_v57 = vld [vmem:[#allocation8_spill] sm:$0xff] }
 0x111   :  { %v1936_v18 = vsel %vm1935_vm3, %v2951_v50, %v1934_v26  ;;  %v1952_v7 = vsel %vm1931_vm1, %v3021_v41, %v3016_v35  ;;  %v1959_v3 = vsel %vm1931_vm1, %v3061_v30, %v3056_v12  ;;  %v1946_v52 = vsel %vm1933_vm2, %v2986_v20, %v1945_v27  ;;  %v3776_v26 = vld [vmem:[#allocation15_spill] sm:$0xff] }
 0x112   :  { %v3326_v58 = vunpack.c.l.b16 %v3766_v17  ;;  %v1938_v15 = vsel %vm1937_vm4, %v2956_v2, %v1936_v18  ;;  %v1953_v50 = vsel %vm1933_vm2, %v3026_v55, %v1952_v7  ;;  %v1960_v11 = vsel %vm1933_vm2, %v3066_v43, %v1959_v3  ;;  %v3773_v17 = vld [vmem:[#allocation2_spill] sm:$0xff]  ;;  %v3777_v27 = vld [vmem:[#allocation3_spill] sm:$0xff]  ;;  %v3778_v3 = vld [vmem:[#allocation29_spill] sm:$0xff] }
 0x113   :  { %v1940_v16 = vsel %vm1939_vm5, %v2961_v61, %v1938_v15  ;;  %v1947_v35 = vsel %vm1935_vm3, %v2991_v25, %v1946_v52  ;;  %v1954_v41 = vsel %vm1935_vm3, %v3031_v60, %v1953_v50  ;;  %v1961_v2 = vsel %vm1935_vm3, %v3071_v53, %v1960_v11  ;;  %v3779_v52 = vld [vmem:[#allocation9_spill] sm:$0xff]  ;;  %v3780_v11 = vld [vmem:[#allocation4_spill] sm:$0xff] }
 0x114   :  { %v1942_v20 = vsel %vm1941_vm6, %v2966_v13, %v1940_v16  ;;  %v1948_v55 = vsel %vm1937_vm4, %v2996_v34, %v1947_v35  ;;  %v1955_v12 = vsel %vm1937_vm4, %v3036_v4, %v1954_v41  ;;  %v1962_v61 = vsel %vm1937_vm4, %v3076_v8, %v1961_v2  ;;  %v3768_v8 = vld [vmem:[#allocation6_spill] sm:$0xff]  ;;  %v3781_v35 = vld [vmem:[#allocation33_spill] sm:$0xff] }
 0x115   :  { %v3375_v25 = vsel %vm1943_vm7, %v2971_v24, %v1942_v20  ;;  %v1949_v60 = vsel %vm1939_vm5, %v3001_v38, %v1948_v55  ;;  %v1956_v30 = vsel %vm1939_vm5, %v3041_v22, %v1955_v12  ;;  %v1963_v13 = vsel %vm1939_vm5, %v3081_v19, %v1962_v61  ;;  %v3769_v19 = vld [vmem:[#allocation7_spill] sm:$0xff]  ;;  %v3782_v2 = vld [vmem:[#allocation10_spill] sm:$0xff]  ;;  %v3783_v12 = vld [vmem:[#allocation5_spill] sm:$0xff] }
 0x116   :  { %v1950_v34 = vsel %vm1941_vm6, %v3006_v47, %v1949_v60  ;;  %v1957_v4 = vsel %vm1941_vm6, %v3046_v39, %v1956_v30  ;;  %v1964_v43 = vsel %vm1941_vm6, %v3086_v46, %v1963_v13  ;;  %v1966_v24 = vsel %vm1931_vm1, %v3101_v44, %v3096_v21  ;;  %v3770_v21 = vld [vmem:[#allocation37_spill] sm:$0xff]  ;;  %v3771_v44 = vld [vmem:[#allocation38_spill] sm:$0xff]  ;;  %v3785_v13 = vld [vmem:[#allocation11_spill] sm:$0xff] }
 0x117   :  { %v1951_v38 = vsel %vm1943_vm7, %v3011_v5, %v1950_v34  ;;  %v1958_v22 = vsel %vm1943_vm7, %v3051_v0, %v1957_v4  ;;  %v1965_v53 = vsel %vm1943_vm7, %v3091_v63, %v1964_v43  ;;  %v1967_v47 = vsel %vm1933_vm2, %v3106_v56, %v1966_v24  ;;  %v3784_v60 = vld [vmem:[#allocation34_spill] sm:$0xff]  ;;  %v3786_v4 = vld [vmem:[#allocation35_spill] sm:$0xff]  ;;  %v3787_v24 = vld [vmem:[#allocation12_spill] sm:$0xff] }
 0x118   :  { %v1968_v39 = vsel %vm1935_vm3, %v3111_v6, %v1967_v47  ;;  %v1973_v46 = vsel %vm1931_vm1, %v3769_v19, %v3768_v8  ;;  %v1980_v5 = vsel %vm1931_vm1, %v3771_v44, %v3770_v21  ;;  %v1987_v0 = vsel %vm1931_vm1, %v3772_v49, %v3216_v31  ;;  %v3788_v8 = vld [vmem:[#allocation36_spill] sm:$0xff] }
 0x119   :  { %v1969_v63 = vsel %vm1937_vm4, %v3773_v17, %v1968_v39  ;;  %v1974_v56 = vsel %vm1933_vm2, %v3774_v57, %v1973_v46  ;;  %v1981_v6 = vsel %vm1933_vm2, %v3775_v36, %v1980_v5  ;;  %v1988_v18 = vsel %vm1933_vm2, %v3776_v26, %v1987_v0  ;;  %v3789_v46 = vld [vmem:[#allocation13_spill] sm:$0xff]  ;;  %v3790_v49 = vld [vmem:[#allocation16_spill] sm:$0xff] }
 0x11a   :  { %v1970_v7 = vsel %vm1939_vm5, %v3777_v27, %v1969_v63  ;;  %v1975_v15 = vsel %vm1935_vm3, %v3778_v3, %v1974_v56  ;;  %v1982_v31 = vsel %vm1935_vm3, %v3779_v52, %v1981_v6  ;;  %v1989_v50 = vsel %vm1935_vm3, %v3231_v28, %v1988_v18  ;;  %v3791_v36 = vld [vmem:[#allocation17_spill] sm:$0xff] }
 0x11b   :  { %v1971_v16 = vsel %vm1941_vm6, %v3780_v11, %v1970_v7  ;;  %v1976_v41 = vsel %vm1937_vm4, %v3781_v35, %v1975_v15  ;;  %v1983_v20 = vsel %vm1937_vm4, %v3782_v2, %v1982_v31  ;;  %v1990_v55 = vsel %vm1937_vm4, %v3236_v48, %v1989_v50 }
 0x11c   :  { %v1972_v61 = vsel %vm1943_vm7, %v3783_v12, %v1971_v16  ;;  %v1977_v30 = vsel %vm1939_vm5, %v3784_v60, %v1976_v41  ;;  %v1984_v28 = vsel %vm1939_vm5, %v3785_v13, %v1983_v20  ;;  %v1991_v34 = vsel %vm1939_vm5, %v3241_v14, %v1990_v55 }
 0x11d   :  { %v1978_v43 = vsel %vm1941_vm6, %v3786_v4, %v1977_v30  ;;  %v1985_v47 = vsel %vm1941_vm6, %v3787_v24, %v1984_v28  ;;  %v1992_v48 = vsel %vm1941_vm6, %v3246_v29, %v1991_v34  ;;  %v1994_v39 = vsel %vm1931_vm1, %v3261_v33, %v3256_v10 }
 0x11e   :  { %v1979_v19 = vsel %vm1943_vm7, %v3788_v8, %v1978_v43  ;;  %v1986_v21 = vsel %vm1943_vm7, %v3789_v46, %v1985_v47  ;;  %v1993_v14 = vsel %vm1943_vm7, %v3251_v45, %v1992_v48  ;;  %v1995_v44 = vsel %vm1933_vm2, %v3266_v59, %v1994_v39 }
 0x11f   :  { %v1996_v5 = vsel %vm1935_vm3, %v3271_v54, %v1995_v44  ;;  %v2001_v29 = vsel %vm1931_vm1, %v3301_v1, %v3296_v51  ;;  %v2008_v10 = vpack.c.b16 %v3375_v25, %v3375_v25  ;;  %v2009_v33 = vpack.c.b16 %v1951_v38, %v1951_v38 }
 0x120   :  { %v1997_v0 = vsel %vm1937_vm4, %v3790_v49, %v1996_v5  ;;  %v2002_v45 = vsel %vm1933_vm2, %v3306_v32, %v2001_v29  ;;  %v2010_v17 = vpack.c.b16 %v1958_v22, %v1958_v22  ;;  %v2011_v63 = vpack.c.b16 %v1965_v53, %v1965_v53 }
 0x121   :  { %v1998_v59 = vsel %vm1939_vm5, %v3281_v62, %v1997_v0  ;;  %v2003_v54 = vsel %vm1935_vm3, %v3311_v37, %v2002_v45  ;;  %v2012_v57 = vpack.c.b16 %v1972_v61, %v1972_v61  ;;  %v2013_v51 = vpack.c.b16 %v1979_v19, %v1979_v19  ;;  %2029 = vst.msk [vmem:[%s3518_s1] sm:$0xf] %vm2028_vm8, %v2008_v10 }
 0x122   :  { %v1999_v1 = vsel %vm1941_vm6, %v3286_v23, %v1998_v59  ;;  %v2004_v25 = vsel %vm1937_vm4, %v3316_v42, %v2003_v54  ;;  %v2014_v38 = vpack.c.b16 %v1986_v21, %v1986_v21  ;;  %v2015_v56 = vpack.c.b16 %v1993_v14, %v1993_v14  ;;  %2030 = vst.msk [vmem:[%s3518_s1 + $0x4] sm:$0xf] %vm2028_vm8, %v2009_v33 }
 0x123   :  { %v2000_v32 = vsel %vm1943_vm7, %v3791_v36, %v1999_v1  ;;  %v2005_v22 = vsel %vm1939_vm5, %v3321_v40, %v2004_v25  ;;  %2031 = vst.msk [vmem:[%s3518_s1 + $0x8] sm:$0xf] %vm2028_vm8, %v2010_v17  ;;  %2032 = vst.msk [vmem:[%s3518_s1 + $0xc] sm:$0xf] %vm2028_vm8, %v2011_v63 }
 0x124   :  { %v2006_v62 = vsel %vm1941_vm6, %v3326_v58, %v2005_v22  ;;  %v2016_v37 = vpack.c.b16 %v2000_v32, %v2000_v32  ;;  %2033 = vst.msk [vmem:[%s3518_s1 + $0x10] sm:$0xf] %vm2028_vm8, %v2012_v57  ;;  %2034 = vst.msk [vmem:[%s3518_s1 + $0x14] sm:$0xf] %vm2028_vm8, %v2013_v51 }
 0x125   :  { %2035 = vst.msk [vmem:[%s3518_s1 + $0x18] sm:$0xf] %vm2028_vm8, %v2014_v38  ;;  %2036 = vst.msk [vmem:[%s3518_s1 + $0x1c] sm:$0xf] %vm2028_vm8, %v2015_v56  ;;  %v2007_v23 = vsel %vm1943_vm7, %v3331_v9, %v2006_v62 }
 0x126   :  { %v2017_v42 = vpack.c.b16 %v2007_v23, %v2007_v23  ;;  %2037 = vst.msk [vmem:[%s3518_s1 + $0x20] sm:$0xf] %vm2028_vm8, %v2016_v37 }
 0x128   :  { %2038 = vst.msk [vmem:[%s3518_s1 + $0x24] sm:$0xf] %vm2028_vm8, %v2017_v42 }

// kernel: upconv7_forward.17
= control target key start
LH: loop header
LB: loop body
LE: loop exit
PB: predicated region body
PF: predicated region fallthrough
CT: control target
= control target key end

     0   :  { %s1284_s12 = smov 0   ;;  %s1286_s13 = smov 0   ;;  %s1432_s0 = inlined_call_operand.vmem [shape: bf16[16,2048], index: 0, kind: input, shape index: {}]   ;;  %s1433_s1 = inlined_call_operand.vmem [shape: bf16[2048,256], index: 1, kind: input, shape index: {}]   ;;  %s1434_s2 = inlined_call_operand.vmem [shape: f32[1,256], index: 2, kind: input, shape index: {}]   ;;  %s1435_s3 = inlined_call_operand.vmem [shape: bf16[16,256], index: 3, kind: output, shape index: {}]  }
   0x1   :  { %s1288_s14 = smov 0   ;;  %s1290_s15 = smov 0  }
   0x2   :  { %s1292_s16 = smov 0  }
   0x3 LB: > { %s25_s17 = sadd.s32 1, %s1257_s15  ;;  %p48_p1 = scmp.ne.s32.totalorder %s1249_s13, %s1245_s12  ;;  %s1261_s16 = sphi %s1292_s16, %s13_s16   ;;  %s1257_s15 = sphi %s1290_s15, %s1439_s15   ;;  %s1253_s14 = sphi %s1288_s14, %s1438_s14   ;;  %s1249_s13 = sphi %s1286_s13, %s1437_s13   ;;  %s1245_s12 = sphi %s1284_s12, %s1436_s12  }
   0x4   : > { %p26_p0 = scmp.ge.s32.totalorder %s25_s17, 4  ;;  %p49_p2 = scmp.eq.s32.totalorder %s1261_s16, 0 }
   0x5   : > { %s41_s19 = sadd.s32 1, %s1249_s13  ;;  %p987_p5 = scmp.ge.s32.totalorder %s1261_s16, 4 }
   0x6   : > { %s1441_s17 = smov (%p26_p0, %s25_s17), 0  ;;  %p50_p3 = por %p49_p2, %p48_p1 }
   0x7   : > { %s37_s18 = ssub.s32 %s1257_s15, %s1441_s17  ;;  %164 = sbr.rel (%p987_p5) target bundleno = 21 (0x15), region = 20 }
   0x8   : > { %p39_p4 = scmp.eq.s32.totalorder %s37_s18, 0 }
   0xa   : > { %s1319_s20 = scalar_select %p39_p4, %s1249_s13, %s41_s19  }
   0xe   : > { %167 = sbr.rel (!%p50_p3) target bundleno = 21 (0x15), region = 24  ;;  %s169_s21 = sand.u32 (%p50_p3), 1, %s1249_s13  }
   0xf   : > { %s1072_s22 = sshll.u32 (%p50_p3), %s1257_s15, 4  ;;  %s988_s23 = sshll.u32 (%p50_p3), %s169_s21, 5 }
  0x10   : > { %s177_s26 = scalar_lea.vmem (%p50_p3), %s1432_s0, %s1072_s22  ;;  %s171_s27 = scalar_lea.vmem (%p50_p3), [#allocation3], %s988_s23 }
  0x11   : > { %v190_v0 = vld [vmem:[%s177_s26] sm:$0xff] (%p50_p3)  ;;  %v192_v1 = vld [vmem:[%s177_s26 + $0x8] sm:$0xff] (%p50_p3) }
  0x12   : > { %v194_v2 = vld [vmem:[%s177_s26 + $0x40] sm:$0xff] (%p50_p3)  ;;  %191 = vst [vmem:[%s171_s27] sm:$0xff] (%p50_p3), %v190_v0  ;;  %193 = vst [vmem:[%s171_s27 + $0x8] sm:$0xff] (%p50_p3), %v192_v1  ;;  %v196_v3 = vld [vmem:[%s177_s26 + $0x48] sm:$0xff] (%p50_p3) }
  0x13   : > { %195 = vst [vmem:[%s171_s27 + $0x10] sm:$0xff] (%p50_p3), %v194_v2  ;;  %197 = vst [vmem:[%s171_s27 + $0x18] sm:$0xff] (%p50_p3), %v196_v3 }
  0x15 PF: > { %p991_p6 = scmp.ge.s32.totalorder %s1261_s16, 1  ;;  %p217_p7 = scmp.lt.s32.totalorder %s1261_s16, 5 }
  0x17   : > { %p218_p8 = pnand %p991_p6, %p217_p7 }
  0x18   : > { %s224_s28 = sand.u32 (!%p218_p8), 1, %s1245_s12   ;;  %s993_s29 = sshll.u32 (!%p218_p8), %s1253_s14, 6 }
  0x19   : > { %221 = sbr.rel (%p218_p8) target bundleno = 340 (0x154), region = 51  ;;  %s992_s30 = sshll.u32 (!%p218_p8), %s224_s28, 5 }
  0x1a   : > { %p270_p9 = scmp.lt.s32.totalorder (!%p218_p8), %s993_s29, 255  ;;  %s1336_s8 = scalar_lea.vmem (!%p218_p8), [#allocation3], %s992_s30 }
  0x1b   : > { %p996_p10 = scmp.ne.s32.totalorder (!%p218_p8), %s1253_s14, 0 }
  0x20   : > { %s1443_s29 = smov (!%p270_p9, %s993_s29), 255  ;;  %300 = sbr.rel (%p996_p10) target bundleno = 39 (0x27), region = 59 }
  0x21   : > { %s1073_s4 = sshll.u32 %s1443_s29, 3  ;;  %v1263_v4 = vmov (!%p996_p10), 0.0  }
  0x22   : > { %s1334_s7 = scalar_lea.vmem %s1433_s1, %s1073_s4  ;;  %301 = vst [vmem:[#allocation2] sm:$0xff] (!%p996_p10), %v1263_v4  ;;  %302 = vst [vmem:[#allocation2 + $0x8] sm:$0xff] (!%p996_p10), %v1263_v4 }
  0x23   : > { %303 = vst [vmem:[#allocation2 + $0x10] sm:$0xff] (!%p996_p10), %v1263_v4  ;;  %304 = vst [vmem:[#allocation2 + $0x18] sm:$0xff] (!%p996_p10), %v1263_v4 }
  0x27 PF: > { %v1121_v5 = vld [vmem:[%s1334_s7 + $0x4] ss:$8 sps:$4 sm:$0xff]   ;;  %v1125_v7 = vld [vmem:[%s1334_s7] ss:$8 sps:$4 sm:$0xff]   ;;  %v1127_v9 = vld [vmem:[%s1334_s7 + $0x14] ss:$8 sps:$4 sm:$0xff]  }
  0x28   : > { %v1123_v6 = vld [vmem:[%s1334_s7 + $0x104] ss:$8 sps:$4 sm:$0xff]   ;;  %717 = vmatprep.subr.bf16.mxu1 %v1121_v5  ;;  %v1126_v8 = vld [vmem:[%s1334_s7 + $0x100] ss:$8 sps:$4 sm:$0xff]   ;;  %v1129_v10 = vld [vmem:[%s1334_s7 + $0x114] ss:$8 sps:$4 sm:$0xff]  }
  0x29   : > { %760 = vmatprep.subr.bf16.mxu0 %v1123_v6  ;;  %718 = vmatpush1.bf16.msra.mxu1 %v1125_v7  ;;  %v1131_v11 = vld [vmem:[%s1334_s7 + $0x10] ss:$8 sps:$4 sm:$0xff]   ;;  %v1133_v13 = vld [vmem:[%s1334_s7 + $0x24] ss:$8 sps:$4 sm:$0xff]   ;;  %v1137_v15 = vld [vmem:[%s1334_s7 + $0x20] ss:$8 sps:$4 sm:$0xff]  }
  0x2a   : > { %761 = vmatpush1.bf16.msra.mxu0 %v1126_v8  ;;  %719 = vmatprep.subr.bf16.mxu1 %v1127_v9  ;;  %v1132_v12 = vld [vmem:[%s1334_s7 + $0x110] ss:$8 sps:$4 sm:$0xff]   ;;  %v1135_v14 = vld [vmem:[%s1334_s7 + $0x124] ss:$8 sps:$4 sm:$0xff]   ;;  %v1138_v16 = vld [vmem:[%s1334_s7 + $0x120] ss:$8 sps:$4 sm:$0xff]  }
  0x2b   : > { %762 = vmatprep.subr.bf16.mxu0 %v1129_v10  ;;  %v1139_v17 = vld [vmem:[%s1334_s7 + $0x34] ss:$8 sps:$4 sm:$0xff]   ;;  %v1143_v19 = vld [vmem:[%s1334_s7 + $0x30] ss:$8 sps:$4 sm:$0xff]   ;;  %v1145_v21 = vld [vmem:[%s1334_s7 + $0x44] ss:$8 sps:$4 sm:$0xff]  }
  0x2c   : > { %v1141_v18 = vld [vmem:[%s1334_s7 + $0x134] ss:$8 sps:$4 sm:$0xff]   ;;  %v1144_v20 = vld [vmem:[%s1334_s7 + $0x130] ss:$8 sps:$4 sm:$0xff]   ;;  %v1147_v22 = vld [vmem:[%s1334_s7 + $0x144] ss:$8 sps:$4 sm:$0xff]  }
  0x2d   : > { %720 = vmatpush1.bf16.msra.mxu1 %v1131_v11  ;;  %v1149_v23 = vld [vmem:[%s1334_s7 + $0x40] ss:$8 sps:$4 sm:$0xff]   ;;  %v1151_v25 = vld [vmem:[%s1334_s7 + $0x54] ss:$8 sps:$4 sm:$0xff]   ;;  %v1155_v27 = vld [vmem:[%s1334_s7 + $0x50] ss:$8 sps:$4 sm:$0xff]  }
  0x2e   : > { %763 = vmatpush1.bf16.msra.mxu0 %v1132_v12  ;;  %721 = vmatprep.subr.bf16.mxu1 %v1133_v13  ;;  %v1150_v24 = vld [vmem:[%s1334_s7 + $0x140] ss:$8 sps:$4 sm:$0xff]   ;;  %v1153_v26 = vld [vmem:[%s1334_s7 + $0x154] ss:$8 sps:$4 sm:$0xff]   ;;  %v1156_v28 = vld [vmem:[%s1334_s7 + $0x150] ss:$8 sps:$4 sm:$0xff]  }
  0x2f   : > { %764 = vmatprep.subr.bf16.mxu0 %v1135_v14  ;;  %v1157_v29 = vld [vmem:[%s1334_s7 + $0x64] ss:$8 sps:$4 sm:$0xff]   ;;  %v1161_v31 = vld [vmem:[%s1334_s7 + $0x60] ss:$8 sps:$4 sm:$0xff]   ;;  %v1163_v33 = vld [vmem:[%s1334_s7 + $0x74] ss:$8 sps:$4 sm:$0xff]  }
  0x30   : > { %v1159_v30 = vld [vmem:[%s1334_s7 + $0x164] ss:$8 sps:$4 sm:$0xff]   ;;  %v1162_v32 = vld [vmem:[%s1334_s7 + $0x160] ss:$8 sps:$4 sm:$0xff]   ;;  %v1165_v34 = vld [vmem:[%s1334_s7 + $0x174] ss:$8 sps:$4 sm:$0xff]  }
  0x31   : > { %722 = vmatpush1.bf16.msra.mxu1 %v1137_v15  ;;  %v1167_v35 = vld [vmem:[%s1334_s7 + $0x70] ss:$8 sps:$4 sm:$0xff]   ;;  %v1169_v37 = vld [vmem:[%s1334_s7 + $0x84] ss:$8 sps:$4 sm:$0xff]   ;;  %v1173_v39 = vld [vmem:[%s1334_s7 + $0x80] ss:$8 sps:$4 sm:$0xff]  }
  0x32   : > { %765 = vmatpush1.bf16.msra.mxu0 %v1138_v16  ;;  %723 = vmatprep.subr.bf16.mxu1 %v1139_v17  ;;  %v1168_v36 = vld [vmem:[%s1334_s7 + $0x170] ss:$8 sps:$4 sm:$0xff]   ;;  %v1171_v38 = vld [vmem:[%s1334_s7 + $0x184] ss:$8 sps:$4 sm:$0xff]   ;;  %v1174_v40 = vld [vmem:[%s1334_s7 + $0x180] ss:$8 sps:$4 sm:$0xff]  }
  0x33   : > { %766 = vmatprep.subr.bf16.mxu0 %v1141_v18  ;;  %v1175_v41 = vld [vmem:[%s1334_s7 + $0x94] ss:$8 sps:$4 sm:$0xff]   ;;  %v1179_v43 = vld [vmem:[%s1334_s7 + $0x90] ss:$8 sps:$4 sm:$0xff]   ;;  %v1181_v45 = vld [vmem:[%s1334_s7 + $0xa4] ss:$8 sps:$4 sm:$0xff]  }
  0x34   : > { %v1177_v42 = vld [vmem:[%s1334_s7 + $0x194] ss:$8 sps:$4 sm:$0xff]   ;;  %v1180_v44 = vld [vmem:[%s1334_s7 + $0x190] ss:$8 sps:$4 sm:$0xff]   ;;  %v1183_v46 = vld [vmem:[%s1334_s7 + $0x1a4] ss:$8 sps:$4 sm:$0xff]  }
  0x35   : > { %724 = vmatpush1.bf16.msra.mxu1 %v1143_v19  ;;  %v1185_v47 = vld [vmem:[%s1334_s7 + $0xa0] ss:$8 sps:$4 sm:$0xff]   ;;  %v1187_v49 = vld [vmem:[%s1334_s7 + $0xb4] ss:$8 sps:$4 sm:$0xff]   ;;  %v1191_v51 = vld [vmem:[%s1334_s7 + $0xb0] ss:$8 sps:$4 sm:$0xff]  }
  0x36   : > { %767 = vmatpush1.bf16.msra.mxu0 %v1144_v20  ;;  %725 = vmatprep.subr.bf16.mxu1 %v1145_v21  ;;  %v1186_v48 = vld [vmem:[%s1334_s7 + $0x1a0] ss:$8 sps:$4 sm:$0xff]   ;;  %v1189_v50 = vld [vmem:[%s1334_s7 + $0x1b4] ss:$8 sps:$4 sm:$0xff]   ;;  %v1192_v53 = vld [vmem:[%s1334_s7 + $0x1b0] ss:$8 sps:$4 sm:$0xff]  }
  0x37   : > { %768 = vmatprep.subr.bf16.mxu0 %v1147_v22  ;;  %v1219_v52 = vld [vmem:[%s1336_s8 + $0x4] ss:$16 sps:$4 sm:$0xff]   ;;  %v1222_v56 = vld [vmem:[%s1336_s8 + $0xc] ss:$16 sps:$4 sm:$0xff]   ;;  %v1197_v57 = vld [vmem:[%s1334_s7 + $0xc0] ss:$8 sps:$4 sm:$0xff]  }
  0x38   : > { %v1193_v54 = vld [vmem:[%s1334_s7 + $0xc4] ss:$8 sps:$4 sm:$0xff]   ;;  %749 = vmatprep.mubr.bf16.mxu1 %v1219_v52  ;;  %792 = vmatprep.mubr.bf16.mxu0 %v1222_v56  ;;  %v1198_v58 = vld [vmem:[%s1334_s7 + $0x1c0] ss:$8 sps:$4 sm:$0xff]   ;;  %v1199_v59 = vld [vmem:[%s1334_s7 + $0xd4] ss:$8 sps:$4 sm:$0xff]  }
  0x39   : > { %726 = vmatpush1.bf16.msra.mxu1 %v1149_v23  ;;  %v1195_v55 = vld [vmem:[%s1334_s7 + $0x1c4] ss:$8 sps:$4 sm:$0xff]   ;;  %v1201_v60 = vld [vmem:[%s1334_s7 + $0x1d4] ss:$8 sps:$4 sm:$0xff]   ;;  %v1203_v61 = vld [vmem:[%s1334_s7 + $0xd0] ss:$8 sps:$4 sm:$0xff]  }
  0x3a   : > { %769 = vmatpush1.bf16.msra.mxu0 %v1150_v24  ;;  %727 = vmatprep.subr.bf16.mxu1 %v1151_v25  ;;  %v1204_v62 = vld [vmem:[%s1334_s7 + $0x1d0] ss:$8 sps:$4 sm:$0xff]   ;;  %v1205_v63 = vld [vmem:[%s1334_s7 + $0xe4] ss:$8 sps:$4 sm:$0xff]   ;;  %v1209_v1 = vld [vmem:[%s1334_s7 + $0xe0] ss:$8 sps:$4 sm:$0xff]  }
  0x3b   : > { %770 = vmatprep.subr.bf16.mxu0 %v1153_v26  ;;  %v1207_v0 = vld [vmem:[%s1334_s7 + $0x1e4] ss:$8 sps:$4 sm:$0xff]   ;;  %v1210_v2 = vld [vmem:[%s1334_s7 + $0x1e0] ss:$8 sps:$4 sm:$0xff]   ;;  %v1211_v3 = vld [vmem:[%s1334_s7 + $0xf4] ss:$8 sps:$4 sm:$0xff]  }
  0x3c   : > { %v1213_v4 = vld [vmem:[%s1334_s7 + $0x1f4] ss:$8 sps:$4 sm:$0xff]   ;;  %v1215_v5 = vld [vmem:[%s1334_s7 + $0xf0] ss:$8 sps:$4 sm:$0xff]   ;;  %v305_v10 = vld [vmem:[#allocation2] sm:$0xff]  ;;  %p1065_p11 = scmp.ne.s32.totalorder %s1253_s14, 3 }
  0x3d   : > { %728 = vmatpush1.bf16.msra.mxu1 %v1155_v27  ;;  %v1216_v6 = vld [vmem:[%s1334_s7 + $0x1f0] ss:$8 sps:$4 sm:$0xff]   ;;  %v306_v14 = vld [vmem:[#allocation2 + $0x8] sm:$0xff] }
  0x3e   : > { %771 = vmatpush1.bf16.msra.mxu0 %v1156_v28  ;;  %729 = vmatprep.subr.bf16.mxu1 %v1157_v29  ;;  %v1217_v7 = vld [vmem:[%s1336_s8] ss:$16 sps:$4 sm:$0xff]   ;;  %v1220_v8 = vld [vmem:[%s1336_s8 + $0x8] ss:$16 sps:$4 sm:$0xff]   ;;  %v821_v29 = vlaneseq (!%p1065_p11) }
  0x3f   : > { %772 = vmatprep.subr.bf16.mxu0 %v1159_v30  ;;  %v307_v18 = vld [vmem:[#allocation2 + $0x10] sm:$0xff]  ;;  %v308_v23 = vld [vmem:[#allocation2 + $0x18] sm:$0xff] }
  0x40   : > { %v822_v30 = vshrl.u32 (!%p1065_p11), %v821_v29, 7 }
  0x41   : > { %730 = vmatpush1.bf16.msra.mxu1 %v1161_v31  ;;  %v819_v31 = vld [vmem:[%s1434_s2] sm:$0x3] (!%p1065_p11) }
  0x42   : > { %773 = vmatpush1.bf16.msra.mxu0 %v1162_v32  ;;  %731 = vmatprep.subr.bf16.mxu1 %v1163_v33  ;;  %v823_v33 = vsub.s32 (!%p1065_p11), 0, %v822_v30 }
  0x43   : > { %774 = vmatprep.subr.bf16.mxu0 %v1165_v34  ;;  %v827_v34 = vsub.s32 (!%p1065_p11), 1, %v822_v30 }
  0x45   : > { %732 = vmatpush1.bf16.msra.mxu1 %v1167_v35 }
  0x46   : > { %775 = vmatpush1.bf16.msra.mxu0 %v1168_v36  ;;  %733 = vmatprep.subr.bf16.mxu1 %v1169_v37 }
  0x47   : > { %776 = vmatprep.subr.bf16.mxu0 %v1171_v38  ;;  %v824_v38 = vrot.slane (!%p1065_p11), %v819_v31, %v823_v33 }
  0x49   : > { %734 = vmatpush1.bf16.msra.mxu1 %v1173_v39  ;;  %v828_v39 = vrot.slane (!%p1065_p11), %v819_v31, %v827_v34 }
  0x4a   : > { %777 = vmatpush1.bf16.msra.mxu0 %v1174_v40  ;;  %735 = vmatprep.subr.bf16.mxu1 %v1175_v41 }
  0x4b   : > { %778 = vmatprep.subr.bf16.mxu0 %v1177_v42 }
  0x4d   : > { %736 = vmatpush1.bf16.msra.mxu1 %v1179_v43 }
  0x4e   : > { %779 = vmatpush1.bf16.msra.mxu0 %v1180_v44  ;;  %737 = vmatprep.subr.bf16.mxu1 %v1181_v45 }
  0x4f   : > { %780 = vmatprep.subr.bf16.mxu0 %v1183_v46 }
  0x51   : > { %738 = vmatpush1.bf16.msra.mxu1 %v1185_v47 }
  0x52   : > { %781 = vmatpush1.bf16.msra.mxu0 %v1186_v48  ;;  %739 = vmatprep.subr.bf16.mxu1 %v1187_v49 }
  0x53   : > { %782 = vmatprep.subr.bf16.mxu0 %v1189_v50 }
  0x55   : > { %740 = vmatpush1.bf16.msra.mxu1 %v1191_v51 }
  0x56   : > { %783 = vmatpush1.bf16.msra.mxu0 %v1192_v53  ;;  %741 = vmatprep.subr.bf16.mxu1 %v1193_v54 }
  0x57   : > { %784 = vmatprep.subr.bf16.mxu0 %v1195_v55 }
  0x59   : > { %742 = vmatpush1.bf16.msra.mxu1 %v1197_v57 }
  0x5a   : > { %785 = vmatpush1.bf16.msra.mxu0 %v1198_v58  ;;  %743 = vmatprep.subr.bf16.mxu1 %v1199_v59 }
  0x5b   : > { %786 = vmatprep.subr.bf16.mxu0 %v1201_v60 }
  0x5d   : > { %744 = vmatpush1.bf16.msra.mxu1 %v1203_v61 }
  0x5e   : > { %787 = vmatpush1.bf16.msra.mxu0 %v1204_v62  ;;  %745 = vmatprep.subr.bf16.mxu1 %v1205_v63 }
  0x5f   : > { %788 = vmatprep.subr.bf16.mxu0 %v1207_v0 }
  0x61   : > { %746 = vmatpush1.bf16.msra.mxu1 %v1209_v1 }
  0x62   : > { %789 = vmatpush1.bf16.msra.mxu0 %v1210_v2  ;;  %747 = vmatprep.subr.bf16.mxu1 %v1211_v3 }
  0x63   : > { %790 = vmatprep.subr.bf16.mxu0 %v1213_v4 }
  0x65   : > { %748 = vmatpush1.bf16.msra.mxu1 %v1215_v5 }
  0x66   : > { %791 = vmatpush1.bf16.msra.mxu0 %v1216_v6 }
  0x68   : > { %750 = vmatmul.mubr.bf16.vlgmr.msra.gmra.mrb[0].mxu1 %v1217_v7 }
  0x69   : > { %793 = vmatmul.mubr.bf16.vlgmr.msra.gmra.mrb[0].mxu0 %v1220_v8 }
 0x13b   : > { %v751_v9 = vpop.f32.mrb[0].mxu1 }
 0x13c   : > { %v794_v11 = vpop.f32.mrb[0].mxu0  ;;  %v753_v13 = vpop.f32.mrb[1].mxu1 }
 0x13d   : > { %v795_v12 = vadd.f32 %v794_v11, %v751_v9  ;;  %v796_v15 = vpop.f32.mrb[1].mxu0  ;;  %v755_v17 = vpop.f32.mrb[2].mxu1 }
 0x13e   : > { %v797_v16 = vadd.f32 %v796_v15, %v753_v13  ;;  %v798_v19 = vpop.f32.mrb[2].mxu0  ;;  %v757_v22 = vpop.f32.mrb[3].mxu1  ;;  %814 = sbr.rel (%p1065_p11) target bundleno = 340 (0x154), region = 63 }
 0x13f   : > { %v803_v20 = vadd.f32 %v795_v12, %v305_v10  ;;  %v799_v21 = vadd.f32 %v798_v19, %v755_v17  ;;  %v800_v24 = vpop.f32.mrb[3].mxu0 }
 0x140   : > { %v804_v25 = vadd.f32 %v797_v16, %v306_v14  ;;  %v801_v26 = vadd.f32 %v800_v24, %v757_v22 }
 0x141   : > { %807 = vst [vmem:[#allocation2] sm:$0xff] %v803_v20  ;;  %v805_v27 = vadd.f32 %v799_v21, %v307_v18 }
 0x142   : > { %808 = vst [vmem:[#allocation2 + $0x8] sm:$0xff] %v804_v25  ;;  %v806_v28 = vadd.f32 %v801_v26, %v308_v23 }
 0x143   : > { %809 = vst [vmem:[#allocation2 + $0x10] sm:$0xff] %v805_v27 }
 0x144   : > { %810 = vst [vmem:[#allocation2 + $0x18] sm:$0xff] %v806_v28 }
 0x148   : > { %v815_v32 = vld [vmem:[#allocation2] sm:$0xff] }
 0x149   : > { %v816_v35 = vld [vmem:[#allocation2 + $0x8] sm:$0xff]  ;;  %v831_v40 = vadd.f32 %v824_v38, %v815_v32 }
 0x14a   : > { %v817_v36 = vld [vmem:[#allocation2 + $0x10] sm:$0xff]  ;;  %v832_v41 = vadd.f32 %v828_v39, %v816_v35 }
 0x14b   : > { %v818_v37 = vld [vmem:[#allocation2 + $0x18] sm:$0xff]  ;;  %v833_v42 = vadd.f32 %v824_v38, %v817_v36  ;;  %vm835_vm0 = vcmp.ge.f32.partialorder %v831_v40, 0.0  ;;  %v839_v44 = vmul.f32 0.1, %v831_v40 }
 0x14c   : > { %v834_v43 = vadd.f32 %v828_v39, %v818_v37  ;;  %vm836_vm1 = vcmp.ge.f32.partialorder %v832_v41, 0.0  ;;  %v840_v45 = vmul.f32 0.1, %v832_v41 }
 0x14d   : > { %vm837_vm2 = vcmp.ge.f32.partialorder %v833_v42, 0.0  ;;  %v841_v46 = vmul.f32 0.1, %v833_v42  ;;  %v843_v48 = vsel %vm835_vm0, %v831_v40, %v839_v44 }
 0x14e   : > { %vm838_vm3 = vcmp.ge.f32.partialorder %v834_v43, 0.0  ;;  %v842_v47 = vmul.f32 0.1, %v834_v43  ;;  %v844_v49 = vsel %vm836_vm1, %v832_v41, %v840_v45 }
 0x14f   : > { %v1074_v50 = vpack.c.bf16 %v844_v49, %v843_v48  ;;  %v845_v51 = vsel %vm837_vm2, %v833_v42, %v841_v46 }
 0x150   : > { %v846_v52 = vsel %vm838_vm3, %v834_v43, %v842_v47 }
 0x151   : > { %v1075_v53 = vpack.c.bf16 %v846_v52, %v845_v51  ;;  %859 = vst [vmem:[%s1435_s3] sm:$0xff] %v1074_v50 }
 0x153   : > { %860 = vst [vmem:[%s1435_s3 + $0x8] sm:$0xff] %v1075_v53 }
 0x154 PF: > { %s13_s16 = sadd.s32 1, %s1261_s16   ;;  %s1436_s12 = smov %s1249_s13 }
 0x155   : > { %p10_p12 = scmp.ge.s32.totalorder %s13_s16, 6   ;;  %s1437_s13 = smov %s1319_s20 }
 0x156   : > { %s1438_s14 = smov %s1257_s15  ;;  %s1439_s15 = smov %s1441_s17 }
 0x157   :  { %12 = sbr.rel (!%p10_p12) target bundleno = 3 (0x3), region = 104 }

// kernel: upconv7_forward.18
= control target key start
LH: loop header
LB: loop body
LE: loop exit
PB: predicated region body
PF: predicated region fallthrough
CT: control target
= control target key end

     0   :  { %s864_s12 = smov 0   ;;  %s866_s13 = smov 0   ;;  %s965_s0 = inlined_call_operand.vmem [shape: bf16[16,128], index: 0, kind: input, shape index: {}]   ;;  %s966_s1 = inlined_call_operand.vmem [shape: bf16[128,1024], index: 1, kind: input, shape index: {}]   ;;  %s967_s2 = inlined_call_operand.vmem [shape: f32[1,1024], index: 2, kind: input, shape index: {}]   ;;  %s968_s3 = inlined_call_operand.vmem [shape: bf16[16,1024], index: 3, kind: output, shape index: {}]  }
   0x1   :  { %s868_s14 = smov 0   ;;  %s870_s15 = smov 0  }
   0x2   :  { %s872_s16 = smov 0  }
   0x3 LB: > { %s28_s17 = sadd.s32 1, %s837_s15  ;;  %s697_s18 = sadd.s32 4294967295, %s841_s16   ;;  %s841_s16 = sphi %s872_s16, %s13_s16   ;;  %s837_s15 = sphi %s870_s15, %s973_s15   ;;  %s833_s14 = sphi %s868_s14, %s972_s14   ;;  %s829_s13 = sphi %s866_s13, %s971_s13   ;;  %s825_s12 = sphi %s864_s12, %s970_s12  }
   0x4   : > { %p30_p0 = scmp.ge.s32.totalorder %s28_s17, 4  ;;  %p76_p1 = scmp.ne.s32.totalorder %s829_s13, %s825_s12 }
   0x5   : > { %p77_p2 = scmp.eq.s32.totalorder %s841_s16, 0  ;;  %p134_p4 = scmp.eq.s32.totalorder %s697_s18, 3 }
   0x6   : > { %s975_s17 = smov (%p30_p0, %s28_s17), 0  ;;  %s69_s20 = sadd.s32 1, %s829_s13 }
   0x7   : > { %p78_p3 = por %p77_p2, %p76_p1  ;;  %s65_s19 = ssub.s32 %s837_s15, %s975_s17 }
   0x8   : > { %p67_p5 = scmp.eq.s32.totalorder %s65_s19, 0  ;;  %p899_p6 = por %p134_p4, %p76_p1 }
   0x9   : > { %p701_p7 = scmp.ge.s32.totalorder %s841_s16, 4 }
   0xa   : > { %s904_s22 = scalar_select %p67_p5, %s829_s13, %s69_s20  }
   0xb   : > { %168 = sbr.rel (%p701_p7) target bundleno = 38 (0x26), region = 20 }
  0x12   : > { %171 = sbr.rel (!%p78_p3) target bundleno = 38 (0x26), region = 24  ;;  %s173_s23 = sand.u32 (%p78_p3), 1, %s829_s13  }
  0x13   : > { %s733_s24 = sshll.u32 (%p78_p3), %s837_s15, 3  ;;  %s702_s25 = sshll.u32 (%p78_p3), %s173_s23, 7 }
  0x14   : > { %s912_s28 = scalar_lea.vmem (%p78_p3), %s966_s1, %s733_s24  ;;  %s175_s29 = scalar_lea.vmem (%p78_p3), [#allocation3], %s702_s25 }
  0x15   : > { %v239_v0 = vld [vmem:[%s912_s28] sm:$0xff] (%p78_p3) }
  0x16   : > { %v241_v1 = vld [vmem:[%s912_s28 + $0x20] sm:$0xff] (%p78_p3)  ;;  %240 = vst [vmem:[%s175_s29] sm:$0xff] (%p78_p3), %v239_v0 }
  0x17   : > { %v243_v2 = vld [vmem:[%s912_s28 + $0x40] sm:$0xff] (%p78_p3)  ;;  %242 = vst [vmem:[%s175_s29 + $0x8] sm:$0xff] (%p78_p3), %v241_v1 }
  0x18   : > { %244 = vst [vmem:[%s175_s29 + $0x10] sm:$0xff] (%p78_p3), %v243_v2  ;;  %v245_v3 = vld [vmem:[%s912_s28 + $0x60] sm:$0xff] (%p78_p3) }
  0x19   : > { %v247_v4 = vld [vmem:[%s912_s28 + $0x80] sm:$0xff]  ;;  %246 = vst [vmem:[%s175_s29 + $0x18] sm:$0xff] %v245_v3 }
  0x1a   : > { %v249_v5 = vld [vmem:[%s912_s28 + $0xa0] sm:$0xff]  ;;  %248 = vst [vmem:[%s175_s29 + $0x20] sm:$0xff] %v247_v4 }
  0x1b   : > { %250 = vst [vmem:[%s175_s29 + $0x28] sm:$0xff] %v249_v5  ;;  %v251_v6 = vld [vmem:[%s912_s28 + $0xc0] sm:$0xff] }
  0x1c   : > { %v253_v7 = vld [vmem:[%s912_s28 + $0xe0] sm:$0xff]  ;;  %252 = vst [vmem:[%s175_s29 + $0x30] sm:$0xff] %v251_v6 }
  0x1d   : > { %v255_v8 = vld [vmem:[%s912_s28 + $0x100] sm:$0xff]  ;;  %254 = vst [vmem:[%s175_s29 + $0x38] sm:$0xff] %v253_v7 }
  0x1e   : > { %256 = vst [vmem:[%s175_s29 + $0x40] sm:$0xff] %v255_v8  ;;  %v257_v9 = vld [vmem:[%s912_s28 + $0x120] sm:$0xff] }
  0x1f   : > { %v259_v10 = vld [vmem:[%s912_s28 + $0x140] sm:$0xff]  ;;  %258 = vst [vmem:[%s175_s29 + $0x48] sm:$0xff] %v257_v9 }
  0x20   : > { %v261_v11 = vld [vmem:[%s912_s28 + $0x160] sm:$0xff]  ;;  %260 = vst [vmem:[%s175_s29 + $0x50] sm:$0xff] %v259_v10 }
  0x21   : > { %262 = vst [vmem:[%s175_s29 + $0x58] sm:$0xff] %v261_v11  ;;  %v263_v12 = vld [vmem:[%s912_s28 + $0x180] sm:$0xff] }
  0x22   : > { %v265_v13 = vld [vmem:[%s912_s28 + $0x1a0] sm:$0xff]  ;;  %264 = vst [vmem:[%s175_s29 + $0x60] sm:$0xff] %v263_v12 }
  0x23   : > { %v267_v14 = vld [vmem:[%s912_s28 + $0x1c0] sm:$0xff]  ;;  %266 = vst [vmem:[%s175_s29 + $0x68] sm:$0xff] %v265_v13 }
  0x24   : > { %268 = vst [vmem:[%s175_s29 + $0x70] sm:$0xff] %v267_v14  ;;  %v269_v15 = vld [vmem:[%s912_s28 + $0x1e0] sm:$0xff] }
  0x25   : > { %270 = vst [vmem:[%s175_s29 + $0x78] sm:$0xff] %v269_v15 }
  0x26 PF: > { %p705_p8 = scmp.ge.s32.totalorder %s841_s16, 1  ;;  %p283_p9 = scmp.lt.s32.totalorder %s841_s16, 5 }
  0x28   : > { %p284_p10 = pnand %p705_p8, %p283_p9 }
  0x29   : > { %s290_s30 = sand.u32 (!%p284_p10), 1, %s825_s12   ;;  %v843_v16 = vmov (!%p284_p10), 0   ;;  %v802_v33 = vld [vmem:[%s965_s0] sm:$0xff] (!%p284_p10)   ;;  %s708_s8 = sshll.u32 (!%p284_p10), %s833_s14, 1  ;;  %v519_v34 = vlaneseq (!%p284_p10) }
  0x2a   : > { %287 = sbr.rel (%p284_p10) target bundleno = 305 (0x131), region = 66  ;;  %s706_s4 = sshll.u32 (!%p284_p10), %s290_s30, 7  ;;  %491 = vmatprep.mubr.bf16.mxu0 (!%p284_p10), %v843_v16 }
  0x2b   : > { %s292_s5 = scalar_lea.vmem (!%p284_p10), [#allocation3], %s706_s4  ;;  %p336_p11 = scmp.lt.s32.totalorder (!%p284_p10), %s708_s8, 7  ;;  %v520_v35 = vshrl.u32 (!%p284_p10), %v519_v34, 7 }
  0x2c   : > { %v778_v17 = vld [vmem:[%s292_s5 + $0x4] ss:$8 sps:$4 sm:$0xff] (!%p284_p10)   ;;  %v780_v18 = vld [vmem:[%s292_s5] ss:$8 sps:$4 sm:$0xff] (!%p284_p10)   ;;  %v781_v19 = vld [vmem:[%s292_s5 + $0x14] ss:$8 sps:$4 sm:$0xff] (!%p284_p10)  }
  0x2d   : > { %459 = vmatprep.subr.bf16.mxu0 (!%p284_p10), %v778_v17  ;;  %v783_v20 = vld [vmem:[%s292_s5 + $0x10] ss:$8 sps:$4 sm:$0xff] (!%p284_p10)   ;;  %v784_v21 = vld [vmem:[%s292_s5 + $0x24] ss:$8 sps:$4 sm:$0xff] (!%p284_p10)   ;;  %v786_v22 = vld [vmem:[%s292_s5 + $0x20] ss:$8 sps:$4 sm:$0xff] (!%p284_p10)  }
  0x2e   : > { %460 = vmatpush1.bf16.msra.mxu0 (!%p284_p10), %v780_v18  ;;  %v787_v23 = vld [vmem:[%s292_s5 + $0x34] ss:$8 sps:$4 sm:$0xff] (!%p284_p10)   ;;  %v789_v24 = vld [vmem:[%s292_s5 + $0x30] ss:$8 sps:$4 sm:$0xff] (!%p284_p10)   ;;  %v790_v25 = vld [vmem:[%s292_s5 + $0x44] ss:$8 sps:$4 sm:$0xff] (!%p284_p10)  }
  0x2f   : > { %461 = vmatprep.subr.bf16.mxu0 (!%p284_p10), %v781_v19  ;;  %v792_v26 = vld [vmem:[%s292_s5 + $0x40] ss:$8 sps:$4 sm:$0xff] (!%p284_p10)   ;;  %v793_v27 = vld [vmem:[%s292_s5 + $0x54] ss:$8 sps:$4 sm:$0xff] (!%p284_p10)   ;;  %v795_v28 = vld [vmem:[%s292_s5 + $0x50] ss:$8 sps:$4 sm:$0xff] (!%p284_p10)  }
  0x30   : > { %v796_v29 = vld [vmem:[%s292_s5 + $0x64] ss:$8 sps:$4 sm:$0xff] (!%p284_p10)   ;;  %v798_v30 = vld [vmem:[%s292_s5 + $0x60] ss:$8 sps:$4 sm:$0xff] (!%p284_p10)   ;;  %v799_v31 = vld [vmem:[%s292_s5 + $0x74] ss:$8 sps:$4 sm:$0xff] (!%p284_p10)  }
  0x31   : > { %v801_v32 = vld [vmem:[%s292_s5 + $0x70] ss:$8 sps:$4 sm:$0xff]   ;;  %s977_s8 = smov (!%p336_p11, %s708_s8), 7  ;;  %v521_v36 = vsub.s32 0, %v520_v35  ;;  %v525_v38 = vsub.s32 1, %v520_v35  ;;  %s707_s18 = sshll.u32 %s290_s30, 4 }
  0x32   : > { %462 = vmatpush1.bf16.msra.mxu0 %v783_v20  ;;  %s338_s11 = scalar_lea.vmem %s967_s2, %s977_s8  ;;  %s323_s19 = scalar_lea.vmem [#allocation4], %s707_s18 }
  0x33   : > { %463 = vmatprep.subr.bf16.mxu0 %v784_v21  ;;  %v517_v37 = vld [vmem:[%s338_s11] sm:$0x3]  ;;  %s736_s20 = sshll.u32 (%p899_p6), %s833_s14, 3 }
  0x34   : > { %v522_v39 = vrot.slane %v517_v37, %v521_v36  ;;  %v526_v40 = vrot.slane %v517_v37, %v525_v38  ;;  %s559_s24 = scalar_lea.vmem (%p899_p6), %s968_s3, %s736_s20 }
  0x36   : > { %464 = vmatpush1.bf16.msra.mxu0 %v786_v22 }
  0x37   : > { %465 = vmatprep.subr.bf16.mxu0 %v787_v23 }
  0x3a   : > { %466 = vmatpush1.bf16.msra.mxu0 %v789_v24 }
  0x3b   : > { %467 = vmatprep.subr.bf16.mxu0 %v790_v25 }
  0x3e   : > { %468 = vmatpush1.bf16.msra.mxu0 %v792_v26 }
  0x3f   : > { %469 = vmatprep.subr.bf16.mxu0 %v793_v27 }
  0x42   : > { %470 = vmatpush1.bf16.msra.mxu0 %v795_v28 }
  0x43   : > { %471 = vmatprep.subr.bf16.mxu0 %v796_v29 }
  0x46   : > { %472 = vmatpush1.bf16.msra.mxu0 %v798_v30 }
  0x47   : > { %473 = vmatprep.subr.bf16.mxu0 %v799_v31 }
  0x4a   : > { %474 = vmatpush1.bf16.msra.mxu0 %v801_v32 }
  0x4d   : > { %492 = vmatmul.mubr.bf16.vlgmr.msra.gmra.mrb[0].mxu0 %v802_v33 }
 0x120   : > { %v493_v41 = vpop.f32.mrb[0].mxu0 }
 0x121   : > { %v529_v42 = vadd.f32 %v522_v39, %v493_v41  ;;  %v495_v43 = vpop.f32.mrb[1].mxu0 }
 0x122   : > { %v530_v44 = vadd.f32 %v526_v40, %v495_v43  ;;  %v497_v45 = vpop.f32.mrb[2].mxu0  ;;  %553 = sbr.rel (!%p899_p6) target bundleno = 305 (0x131), region = 82 }
 0x123   : > { %v531_v46 = vadd.f32 %v522_v39, %v497_v45  ;;  %v499_v47 = vpop.f32.mrb[3].mxu0 }
 0x124   : > { %v734_v48 = vpack.c.bf16 %v530_v44, %v529_v42  ;;  %v532_v49 = vadd.f32 %v526_v40, %v499_v47 }
 0x126   : > { %545 = vst [vmem:[%s323_s19] sm:$0xff] %v734_v48  ;;  %v735_v50 = vpack.c.bf16 %v532_v49, %v531_v46 }
 0x128   : > { %546 = vst [vmem:[%s323_s19 + $0x8] sm:$0xff] %v735_v50 }
 0x12d   : > { %v589_v51 = vld [vmem:[%s323_s19] sm:$0xff] }
 0x12e   : > { %590 = vst [vmem:[%s559_s24] sm:$0xff] %v589_v51 }
 0x12f   : > { %v591_v52 = vld [vmem:[%s323_s19 + $0x8] sm:$0xff] }
 0x130   : > { %592 = vst [vmem:[%s559_s24 + $0x20] sm:$0xff] %v591_v52 }
 0x131 PF: > { %s13_s16 = sadd.s32 1, %s841_s16   ;;  %s970_s12 = smov %s829_s13 }
 0x132   : > { %p10_p12 = scmp.ge.s32.totalorder %s13_s16, 6   ;;  %s971_s13 = smov %s904_s22 }
 0x133   : > { %s972_s14 = smov %s837_s15  ;;  %s973_s15 = smov %s975_s17 }
 0x134   :  { %12 = sbr.rel (!%p10_p12) target bundleno = 3 (0x3), region = 157 }

// kernel: upconv7_forward.19
= control target key start
LH: loop header
LB: loop body
LE: loop exit
PB: predicated region body
PF: predicated region fallthrough
CT: control target
= control target key end

     0   :  { %s864_s12 = smov 0   ;;  %s866_s13 = smov 0   ;;  %s965_s0 = inlined_call_operand.vmem [shape: bf16[16,128], index: 0, kind: input, shape index: {}]   ;;  %s966_s1 = inlined_call_operand.vmem [shape: bf16[128,4096], index: 1, kind: input, shape index: {}]   ;;  %s967_s2 = inlined_call_operand.vmem [shape: f32[1,4096], index: 2, kind: input, shape index: {}]   ;;  %s968_s3 = inlined_call_operand.vmem [shape: bf16[16,4096], index: 3, kind: output, shape index: {}]  }
   0x1   :  { %s868_s14 = smov 0   ;;  %s870_s15 = smov 0  }
   0x2   :  { %s872_s16 = smov 0  }
   0x3 LB: > { %s28_s17 = sadd.s32 1, %s837_s15  ;;  %s697_s18 = sadd.s32 4294967295, %s841_s16   ;;  %s841_s16 = sphi %s872_s16, %s13_s16   ;;  %s837_s15 = sphi %s870_s15, %s973_s15   ;;  %s833_s14 = sphi %s868_s14, %s972_s14   ;;  %s829_s13 = sphi %s866_s13, %s971_s13   ;;  %s825_s12 = sphi %s864_s12, %s970_s12  }
   0x4   : > { %p30_p0 = scmp.ge.s32.totalorder %s28_s17, 16  ;;  %p76_p1 = scmp.ne.s32.totalorder %s829_s13, %s825_s12 }
   0x5   : > { %p77_p2 = scmp.eq.s32.totalorder %s841_s16, 0  ;;  %p134_p4 = scmp.eq.s32.totalorder %s697_s18, 15 }
   0x6   : > { %s975_s17 = smov (%p30_p0, %s28_s17), 0  ;;  %s69_s20 = sadd.s32 1, %s829_s13 }
   0x7   : > { %p78_p3 = por %p77_p2, %p76_p1  ;;  %s65_s19 = ssub.s32 %s837_s15, %s975_s17 }
   0x8   : > { %p67_p5 = scmp.eq.s32.totalorder %s65_s19, 0  ;;  %p899_p6 = por %p134_p4, %p76_p1 }
   0x9   : > { %p701_p7 = scmp.ge.s32.totalorder %s841_s16, 16 }
   0xa   : > { %s904_s22 = scalar_select %p67_p5, %s829_s13, %s69_s20  }
   0xb   : > { %168 = sbr.rel (%p701_p7) target bundleno = 38 (0x26), region = 20 }
  0x12   : > { %171 = sbr.rel (!%p78_p3) target bundleno = 38 (0x26), region = 24  ;;  %s173_s23 = sand.u32 (%p78_p3), 1, %s829_s13  }
  0x13   : > { %s733_s24 = sshll.u32 (%p78_p3), %s837_s15, 3  ;;  %s702_s25 = sshll.u32 (%p78_p3), %s173_s23, 7 }
  0x14   : > { %s912_s28 = scalar_lea.vmem (%p78_p3), %s966_s1, %s733_s24  ;;  %s175_s29 = scalar_lea.vmem (%p78_p3), [#allocation3], %s702_s25 }
  0x15   : > { %v239_v0 = vld [vmem:[%s912_s28] sm:$0xff] (%p78_p3) }
  0x16   : > { %v241_v1 = vld [vmem:[%s912_s28 + $0x80] sm:$0xff] (%p78_p3)  ;;  %240 = vst [vmem:[%s175_s29] sm:$0xff] (%p78_p3), %v239_v0 }
  0x17   : > { %v243_v2 = vld [vmem:[%s912_s28 + $0x100] sm:$0xff] (%p78_p3)  ;;  %242 = vst [vmem:[%s175_s29 + $0x8] sm:$0xff] (%p78_p3), %v241_v1 }
  0x18   : > { %244 = vst [vmem:[%s175_s29 + $0x10] sm:$0xff] (%p78_p3), %v243_v2  ;;  %v245_v3 = vld [vmem:[%s912_s28 + $0x180] sm:$0xff] (%p78_p3) }
  0x19   : > { %v247_v4 = vld [vmem:[%s912_s28 + $0x200] sm:$0xff]  ;;  %246 = vst [vmem:[%s175_s29 + $0x18] sm:$0xff] %v245_v3 }
  0x1a   : > { %v249_v5 = vld [vmem:[%s912_s28 + $0x280] sm:$0xff]  ;;  %248 = vst [vmem:[%s175_s29 + $0x20] sm:$0xff] %v247_v4 }
  0x1b   : > { %250 = vst [vmem:[%s175_s29 + $0x28] sm:$0xff] %v249_v5  ;;  %v251_v6 = vld [vmem:[%s912_s28 + $0x300] sm:$0xff] }
  0x1c   : > { %v253_v7 = vld [vmem:[%s912_s28 + $0x380] sm:$0xff]  ;;  %252 = vst [vmem:[%s175_s29 + $0x30] sm:$0xff] %v251_v6 }
  0x1d   : > { %v255_v8 = vld [vmem:[%s912_s28 + $0x400] sm:$0xff]  ;;  %254 = vst [vmem:[%s175_s29 + $0x38] sm:$0xff] %v253_v7 }
  0x1e   : > { %256 = vst [vmem:[%s175_s29 + $0x40] sm:$0xff] %v255_v8  ;;  %v257_v9 = vld [vmem:[%s912_s28 + $0x480] sm:$0xff] }
  0x1f   : > { %v259_v10 = vld [vmem:[%s912_s28 + $0x500] sm:$0xff]  ;;  %258 = vst [vmem:[%s175_s29 + $0x48] sm:$0xff] %v257_v9 }
  0x20   : > { %v261_v11 = vld [vmem:[%s912_s28 + $0x580] sm:$0xff]  ;;  %260 = vst [vmem:[%s175_s29 + $0x50] sm:$0xff] %v259_v10 }
  0x21   : > { %262 = vst [vmem:[%s175_s29 + $0x58] sm:$0xff] %v261_v11  ;;  %v263_v12 = vld [vmem:[%s912_s28 + $0x600] sm:$0xff] }
  0x22   : > { %v265_v13 = vld [vmem:[%s912_s28 + $0x680] sm:$0xff]  ;;  %264 = vst [vmem:[%s175_s29 + $0x60] sm:$0xff] %v263_v12 }
  0x23   : > { %v267_v14 = vld [vmem:[%s912_s28 + $0x700] sm:$0xff]  ;;  %266 = vst [vmem:[%s175_s29 + $0x68] sm:$0xff] %v265_v13 }
  0x24   : > { %268 = vst [vmem:[%s175_s29 + $0x70] sm:$0xff] %v267_v14  ;;  %v269_v15 = vld [vmem:[%s912_s28 + $0x780] sm:$0xff] }
  0x25   : > { %270 = vst [vmem:[%s175_s29 + $0x78] sm:$0xff] %v269_v15 }
  0x26 PF: > { %p705_p8 = scmp.ge.s32.totalorder %s841_s16, 1  ;;  %p283_p9 = scmp.lt.s32.totalorder %s841_s16, 17 }
  0x28   : > { %p284_p10 = pnand %p705_p8, %p283_p9 }
  0x29   : > { %s290_s30 = sand.u32 (!%p284_p10), 1, %s825_s12   ;;  %v843_v16 = vmov (!%p284_p10), 0   ;;  %v802_v33 = vld [vmem:[%s965_s0] sm:$0xff] (!%p284_p10)   ;;  %s708_s8 = sshll.u32 (!%p284_p10), %s833_s14, 1  ;;  %v519_v34 = vlaneseq (!%p284_p10) }
  0x2a   : > { %287 = sbr.rel (%p284_p10) target bundleno = 305 (0x131), region = 66  ;;  %s706_s4 = sshll.u32 (!%p284_p10), %s290_s30, 7  ;;  %491 = vmatprep.mubr.bf16.mxu0 (!%p284_p10), %v843_v16 }
  0x2b   : > { %s292_s5 = scalar_lea.vmem (!%p284_p10), [#allocation3], %s706_s4  ;;  %p336_p11 = scmp.lt.s32.totalorder (!%p284_p10), %s708_s8, 31  ;;  %v520_v35 = vshrl.u32 (!%p284_p10), %v519_v34, 7 }
  0x2c   : > { %v778_v17 = vld [vmem:[%s292_s5 + $0x4] ss:$8 sps:$4 sm:$0xff] (!%p284_p10)   ;;  %v780_v18 = vld [vmem:[%s292_s5] ss:$8 sps:$4 sm:$0xff] (!%p284_p10)   ;;  %v781_v19 = vld [vmem:[%s292_s5 + $0x14] ss:$8 sps:$4 sm:$0xff] (!%p284_p10)  }
  0x2d   : > { %459 = vmatprep.subr.bf16.mxu0 (!%p284_p10), %v778_v17  ;;  %v783_v20 = vld [vmem:[%s292_s5 + $0x10] ss:$8 sps:$4 sm:$0xff] (!%p284_p10)   ;;  %v784_v21 = vld [vmem:[%s292_s5 + $0x24] ss:$8 sps:$4 sm:$0xff] (!%p284_p10)   ;;  %v786_v22 = vld [vmem:[%s292_s5 + $0x20] ss:$8 sps:$4 sm:$0xff] (!%p284_p10)  }
  0x2e   : > { %460 = vmatpush1.bf16.msra.mxu0 (!%p284_p10), %v780_v18  ;;  %v787_v23 = vld [vmem:[%s292_s5 + $0x34] ss:$8 sps:$4 sm:$0xff] (!%p284_p10)   ;;  %v789_v24 = vld [vmem:[%s292_s5 + $0x30] ss:$8 sps:$4 sm:$0xff] (!%p284_p10)   ;;  %v790_v25 = vld [vmem:[%s292_s5 + $0x44] ss:$8 sps:$4 sm:$0xff] (!%p284_p10)  }
  0x2f   : > { %461 = vmatprep.subr.bf16.mxu0 (!%p284_p10), %v781_v19  ;;  %v792_v26 = vld [vmem:[%s292_s5 + $0x40] ss:$8 sps:$4 sm:$0xff] (!%p284_p10)   ;;  %v793_v27 = vld [vmem:[%s292_s5 + $0x54] ss:$8 sps:$4 sm:$0xff] (!%p284_p10)   ;;  %v795_v28 = vld [vmem:[%s292_s5 + $0x50] ss:$8 sps:$4 sm:$0xff] (!%p284_p10)  }
  0x30   : > { %v796_v29 = vld [vmem:[%s292_s5 + $0x64] ss:$8 sps:$4 sm:$0xff] (!%p284_p10)   ;;  %v798_v30 = vld [vmem:[%s292_s5 + $0x60] ss:$8 sps:$4 sm:$0xff] (!%p284_p10)   ;;  %v799_v31 = vld [vmem:[%s292_s5 + $0x74] ss:$8 sps:$4 sm:$0xff] (!%p284_p10)  }
  0x31   : > { %v801_v32 = vld [vmem:[%s292_s5 + $0x70] ss:$8 sps:$4 sm:$0xff]   ;;  %s977_s8 = smov (!%p336_p11, %s708_s8), 31  ;;  %v521_v36 = vsub.s32 0, %v520_v35  ;;  %v525_v38 = vsub.s32 1, %v520_v35  ;;  %s707_s18 = sshll.u32 %s290_s30, 4 }
  0x32   : > { %462 = vmatpush1.bf16.msra.mxu0 %v783_v20  ;;  %s338_s11 = scalar_lea.vmem %s967_s2, %s977_s8  ;;  %s323_s19 = scalar_lea.vmem [#allocation4], %s707_s18 }
  0x33   : > { %463 = vmatprep.subr.bf16.mxu0 %v784_v21  ;;  %v517_v37 = vld [vmem:[%s338_s11] sm:$0x3]  ;;  %s736_s20 = sshll.u32 (%p899_p6), %s833_s14, 3 }
  0x34   : > { %v522_v39 = vrot.slane %v517_v37, %v521_v36  ;;  %v526_v40 = vrot.slane %v517_v37, %v525_v38  ;;  %s559_s24 = scalar_lea.vmem (%p899_p6), %s968_s3, %s736_s20 }
  0x36   : > { %464 = vmatpush1.bf16.msra.mxu0 %v786_v22 }
  0x37   : > { %465 = vmatprep.subr.bf16.mxu0 %v787_v23 }
  0x3a   : > { %466 = vmatpush1.bf16.msra.mxu0 %v789_v24 }
  0x3b   : > { %467 = vmatprep.subr.bf16.mxu0 %v790_v25 }
  0x3e   : > { %468 = vmatpush1.bf16.msra.mxu0 %v792_v26 }
  0x3f   : > { %469 = vmatprep.subr.bf16.mxu0 %v793_v27 }
  0x42   : > { %470 = vmatpush1.bf16.msra.mxu0 %v795_v28 }
  0x43   : > { %471 = vmatprep.subr.bf16.mxu0 %v796_v29 }
  0x46   : > { %472 = vmatpush1.bf16.msra.mxu0 %v798_v30 }
  0x47   : > { %473 = vmatprep.subr.bf16.mxu0 %v799_v31 }
  0x4a   : > { %474 = vmatpush1.bf16.msra.mxu0 %v801_v32 }
  0x4d   : > { %492 = vmatmul.mubr.bf16.vlgmr.msra.gmra.mrb[0].mxu0 %v802_v33 }
 0x120   : > { %v493_v41 = vpop.f32.mrb[0].mxu0 }
 0x121   : > { %v529_v42 = vadd.f32 %v522_v39, %v493_v41  ;;  %v495_v43 = vpop.f32.mrb[1].mxu0 }
 0x122   : > { %v530_v44 = vadd.f32 %v526_v40, %v495_v43  ;;  %v497_v45 = vpop.f32.mrb[2].mxu0  ;;  %553 = sbr.rel (!%p899_p6) target bundleno = 305 (0x131), region = 82 }
 0x123   : > { %v531_v46 = vadd.f32 %v522_v39, %v497_v45  ;;  %v499_v47 = vpop.f32.mrb[3].mxu0 }
 0x124   : > { %v734_v48 = vpack.c.bf16 %v530_v44, %v529_v42  ;;  %v532_v49 = vadd.f32 %v526_v40, %v499_v47 }
 0x126   : > { %545 = vst [vmem:[%s323_s19] sm:$0xff] %v734_v48  ;;  %v735_v50 = vpack.c.bf16 %v532_v49, %v531_v46 }
 0x128   : > { %546 = vst [vmem:[%s323_s19 + $0x8] sm:$0xff] %v735_v50 }
 0x12d   : > { %v589_v51 = vld [vmem:[%s323_s19] sm:$0xff] }
 0x12e   : > { %590 = vst [vmem:[%s559_s24] sm:$0xff] %v589_v51 }
 0x12f   : > { %v591_v52 = vld [vmem:[%s323_s19 + $0x8] sm:$0xff] }
 0x130   : > { %592 = vst [vmem:[%s559_s24 + $0x80] sm:$0xff] %v591_v52 }
 0x131 PF: > { %s13_s16 = sadd.s32 1, %s841_s16   ;;  %s970_s12 = smov %s829_s13 }
 0x132   : > { %p10_p12 = scmp.ge.s32.totalorder %s13_s16, 18   ;;  %s971_s13 = smov %s904_s22 }
 0x133   : > { %s972_s14 = smov %s837_s15  ;;  %s973_s15 = smov %s975_s17 }
 0x134   :  { %12 = sbr.rel (!%p10_p12) target bundleno = 3 (0x3), region = 157 }

// kernel: upconv7_forward.20
= control target key start
LH: loop header
LB: loop body
LE: loop exit
PB: predicated region body
PF: predicated region fallthrough
CT: control target
= control target key end

     0   :  { %v1713_v0 = vmov 0.0   ;;  %vm1714_vm0 = vmmov 0   ;;  %s2030_s1 = inlined_call_operand.vmem [shape: bf16[128,128], index: 1, kind: input, shape index: {}]   ;;  %s2031_s0 = inlined_call_operand.vmem [shape: bf16[400,128], index: 0, kind: input, shape index: {}]   ;;  %s2032_s2 = inlined_call_operand.vmem [shape: f32[1,128], index: 2, kind: input, shape index: {}]   ;;  %s2033_s3 = inlined_call_operand.vmem [shape: bf16[400,128], index: 3, kind: output, shape index: {}]  }
   0x1   :  { %1546 = vmatprep.subr.bf16.mxu0 %v1713_v0  ;;  %v1680_v1 = vld [vmem:[%s2030_s1] sm:$0xff]   ;;  %1662 = vmatprep.subr.bf16.mxu1 %v1713_v0  ;;  %v1681_v2 = vld [vmem:[%s2030_s1 + $0x8] sm:$0xff]   ;;  %v1682_v3 = vld [vmem:[%s2030_s1 + $0x10] sm:$0xff]  }
   0x2   :  { %1562 = vmatprep.mubr.msk.bf16.mxu0 %vm1714_vm0, %v1713_v0  ;;  %1614 = vmatprep.mubr.msk.bf16.mxu1 %vm1714_vm0, %v1713_v0  ;;  %v1683_v4 = vld [vmem:[%s2030_s1 + $0x18] sm:$0xff]   ;;  %v1684_v5 = vld [vmem:[%s2030_s1 + $0x20] sm:$0xff]   ;;  %v1685_v6 = vld [vmem:[%s2030_s1 + $0x28] sm:$0xff]  }
   0x3   :  { %1547 = vmatpush3.bf16.msra.mxu0 %v1680_v1  ;;  %1670 = vmatpush3.bf16.msra.mxu1 %v1680_v1  ;;  %v1686_v7 = vld [vmem:[%s2030_s1 + $0x30] sm:$0xff]   ;;  %v1687_v8 = vld [vmem:[%s2030_s1 + $0x38] sm:$0xff]   ;;  %v1688_v9 = vld [vmem:[%s2031_s0] sm:$0xff]  }
   0x4   :  { %1548 = vmatprep.subr.bf16.mxu0 %v1713_v0  ;;  %1663 = vmatprep.subr.bf16.mxu1 %v1713_v0  ;;  %v1689_v10 = vld [vmem:[%s2031_s0 + $0x68] sm:$0xff]   ;;  %v1691_v12 = vld [vmem:[%s2031_s0 + $0x70] sm:$0xff]   ;;  %v1693_v14 = vld [vmem:[%s2031_s0 + $0x78] sm:$0xff]  }
   0x5   :  { %v1690_v11 = vld [vmem:[%s2031_s0 + $0x8] sm:$0xff]   ;;  %v1692_v13 = vld [vmem:[%s2031_s0 + $0x10] sm:$0xff]   ;;  %v1694_v15 = vld [vmem:[%s2031_s0 + $0x18] sm:$0xff]  }
   0x6   :  { %v1695_v16 = vld [vmem:[%s2031_s0 + $0x80] sm:$0xff]   ;;  %v1697_v18 = vld [vmem:[%s2031_s0 + $0x88] sm:$0xff]   ;;  %v1699_v20 = vld [vmem:[%s2031_s0 + $0x90] sm:$0xff]  }
   0x7   :  { %1549 = vmatpush3.bf16.msra.mxu0 %v1681_v2  ;;  %1671 = vmatpush3.bf16.msra.mxu1 %v1681_v2  ;;  %v1696_v17 = vld [vmem:[%s2031_s0 + $0x20] sm:$0xff]   ;;  %v1698_v19 = vld [vmem:[%s2031_s0 + $0x28] sm:$0xff]   ;;  %v1700_v21 = vld [vmem:[%s2031_s0 + $0x30] sm:$0xff]  }
   0x8   :  { %1550 = vmatprep.subr.bf16.mxu0 %v1713_v0  ;;  %1664 = vmatprep.subr.bf16.mxu1 %v1713_v0  ;;  %v1701_v22 = vld [vmem:[%s2031_s0 + $0x98] sm:$0xff]   ;;  %v1703_v24 = vld [vmem:[%s2031_s0 + $0xa0] sm:$0xff]   ;;  %v1705_v26 = vld [vmem:[%s2031_s0 + $0xa8] sm:$0xff]  }
   0x9   :  { %v1702_v23 = vld [vmem:[%s2031_s0 + $0x38] sm:$0xff]   ;;  %v1704_v25 = vld [vmem:[%s2031_s0 + $0x40] sm:$0xff]   ;;  %v1706_v27 = vld [vmem:[%s2031_s0 + $0x48] sm:$0xff]  }
   0xa   :  { %v1707_v28 = vld [vmem:[%s2031_s0 + $0xb0] sm:$0xff]   ;;  %v1709_v30 = vld [vmem:[%s2031_s0 + $0xb8] sm:$0xff]   ;;  %v1711_v32 = vld [vmem:[%s2031_s0 + $0xc0] sm:$0xff]  }
   0xb   :  { %1551 = vmatpush3.bf16.msra.mxu0 %v1682_v3  ;;  %1672 = vmatpush3.bf16.msra.mxu1 %v1682_v3  ;;  %v1708_v29 = vld [vmem:[%s2031_s0 + $0x50] sm:$0xff]   ;;  %v1710_v31 = vld [vmem:[%s2031_s0 + $0x58] sm:$0xff]   ;;  %v1712_v33 = vld [vmem:[%s2031_s0 + $0x60] sm:$0xff]  }
   0xc   :  { %1552 = vmatprep.subr.bf16.mxu0 %v1713_v0  ;;  %1665 = vmatprep.subr.bf16.mxu1 %v1713_v0  ;;  %v1903_v34 = vld [vmem:[%s2032_s2] ss:$0 sm:$0xff] }
   0xf   :  { %1553 = vmatpush3.bf16.msra.mxu0 %v1683_v4  ;;  %1673 = vmatpush3.bf16.msra.mxu1 %v1683_v4 }
  0x10   :  { %1554 = vmatprep.subr.bf16.mxu0 %v1713_v0  ;;  %1666 = vmatprep.subr.bf16.mxu1 %v1713_v0 }
  0x13   :  { %1555 = vmatpush3.bf16.msra.mxu0 %v1684_v5  ;;  %1674 = vmatpush3.bf16.msra.mxu1 %v1684_v5 }
  0x14   :  { %1556 = vmatprep.subr.bf16.mxu0 %v1713_v0  ;;  %1667 = vmatprep.subr.bf16.mxu1 %v1713_v0 }
  0x17   :  { %1557 = vmatpush3.bf16.msra.mxu0 %v1685_v6  ;;  %1675 = vmatpush3.bf16.msra.mxu1 %v1685_v6 }
  0x18   :  { %1558 = vmatprep.subr.bf16.mxu0 %v1713_v0  ;;  %1668 = vmatprep.subr.bf16.mxu1 %v1713_v0 }
  0x1b   :  { %1559 = vmatpush3.bf16.msra.mxu0 %v1686_v7  ;;  %1676 = vmatpush3.bf16.msra.mxu1 %v1686_v7 }
  0x1c   :  { %1560 = vmatprep.subr.bf16.mxu0 %v1713_v0  ;;  %1669 = vmatprep.subr.bf16.mxu1 %v1713_v0 }
  0x1f   :  { %1561 = vmatpush3.bf16.msra.mxu0 %v1687_v8  ;;  %1677 = vmatpush3.bf16.msra.mxu1 %v1687_v8 }
  0x22   :  { %1563 = vmatmul.mubr.bf16.vlgmr.msra.gmra.mrb[0].mxu0 %v1688_v9  ;;  %1615 = vmatmul.mubr.bf16.vlgmr.msra.gmra.mrb[0].mxu1 %v1689_v10 }
  0x23   :  { %1566 = vmatprep.mubr.msk.bf16.mxu0 %vm1714_vm0, %v1713_v0  ;;  %1618 = vmatprep.mubr.msk.bf16.mxu1 %vm1714_vm0, %v1713_v0 }
  0x2a   :  { %1567 = vmatmul.mubr.bf16.gmra.mrb[4].mxu0 %v1690_v11  ;;  %1619 = vmatmul.mubr.bf16.gmra.mrb[4].mxu1 %v1691_v12 }
  0x2b   :  { %1570 = vmatprep.mubr.msk.bf16.mxu0 %vm1714_vm0, %v1713_v0  ;;  %1622 = vmatprep.mubr.msk.bf16.mxu1 %vm1714_vm0, %v1713_v0 }
  0x32   :  { %1571 = vmatmul.mubr.bf16.gmra.mrb[8].mxu0 %v1692_v13  ;;  %1623 = vmatmul.mubr.bf16.gmra.mrb[8].mxu1 %v1693_v14 }
  0x33   :  { %1574 = vmatprep.mubr.msk.bf16.mxu0 %vm1714_vm0, %v1713_v0  ;;  %1626 = vmatprep.mubr.msk.bf16.mxu1 %vm1714_vm0, %v1713_v0 }
  0x3a   :  { %1575 = vmatmul.mubr.bf16.gmra.mrb[12].mxu0 %v1694_v15  ;;  %1627 = vmatmul.mubr.bf16.gmra.mrb[12].mxu1 %v1695_v16 }
  0x3b   :  { %1578 = vmatprep.mubr.msk.bf16.mxu0 %vm1714_vm0, %v1713_v0  ;;  %1630 = vmatprep.mubr.msk.bf16.mxu1 %vm1714_vm0, %v1713_v0 }
  0x42   :  { %1579 = vmatmul.mubr.bf16.gmra.mrb[16].mxu0 %v1696_v17  ;;  %1631 = vmatmul.mubr.bf16.gmra.mrb[16].mxu1 %v1697_v18 }
  0x43   :  { %1582 = vmatprep.mubr.msk.bf16.mxu0 %vm1714_vm0, %v1713_v0  ;;  %1634 = vmatprep.mubr.msk.bf16.mxu1 %vm1714_vm0, %v1713_v0 }
  0x4a   :  { %1583 = vmatmul.mubr.bf16.gmra.mrb[20].mxu0 %v1698_v19  ;;  %1635 = vmatmul.mubr.bf16.gmra.mrb[20].mxu1 %v1699_v20 }
  0x4b   :  { %1586 = vmatprep.mubr.msk.bf16.mxu0 %vm1714_vm0, %v1713_v0  ;;  %1638 = vmatprep.mubr.msk.bf16.mxu1 %vm1714_vm0, %v1713_v0 }
  0x52   :  { %1587 = vmatmul.mubr.bf16.gmra.mrb[24].mxu0 %v1700_v21  ;;  %1639 = vmatmul.mubr.bf16.gmra.mrb[24].mxu1 %v1701_v22 }
  0x53   :  { %1590 = vmatprep.mubr.msk.bf16.mxu0 %vm1714_vm0, %v1713_v0  ;;  %1642 = vmatprep.mubr.msk.bf16.mxu1 %vm1714_vm0, %v1713_v0 }
  0x5a   :  { %1591 = vmatmul.mubr.bf16.gmra.mrb[28].mxu0 %v1702_v23  ;;  %1643 = vmatmul.mubr.bf16.gmra.mrb[28].mxu1 %v1703_v24 }
  0x5b   :  { %1594 = vmatprep.mubr.msk.bf16.mxu0 %vm1714_vm0, %v1713_v0  ;;  %1646 = vmatprep.mubr.msk.bf16.mxu1 %vm1714_vm0, %v1713_v0 }
  0x62   :  { %1595 = vmatmul.mubr.bf16.gmra.mrb[32].mxu0 %v1704_v25  ;;  %1647 = vmatmul.mubr.bf16.gmra.mrb[32].mxu1 %v1705_v26 }
  0x63   :  { %1598 = vmatprep.mubr.msk.bf16.mxu0 %vm1714_vm0, %v1713_v0  ;;  %1650 = vmatprep.mubr.msk.bf16.mxu1 %vm1714_vm0, %v1713_v0 }
  0x6a   :  { %1599 = vmatmul.mubr.bf16.gmra.mrb[36].mxu0 %v1706_v27  ;;  %1651 = vmatmul.mubr.bf16.gmra.mrb[36].mxu1 %v1707_v28 }
  0x6b   :  { %1602 = vmatprep.mubr.msk.bf16.mxu0 %vm1714_vm0, %v1713_v0  ;;  %1654 = vmatprep.mubr.msk.bf16.mxu1 %vm1714_vm0, %v1713_v0 }
  0x72   :  { %1603 = vmatmul.mubr.bf16.gmra.mrb[40].mxu0 %v1708_v29  ;;  %1655 = vmatmul.mubr.bf16.gmra.mrb[40].mxu1 %v1709_v30 }
  0x73   :  { %1606 = vmatprep.mubr.msk.bf16.mxu0 %vm1714_vm0, %v1713_v0  ;;  %1658 = vmatprep.mubr.msk.bf16.mxu1 %vm1714_vm0, %v1713_v0 }
  0x7a   :  { %1607 = vmatmul.mubr.bf16.gmra.mrb[44].mxu0 %v1710_v31  ;;  %1659 = vmatmul.mubr.bf16.gmra.mrb[44].mxu1 %v1711_v32 }
  0x7b   :  { %1610 = vmatprep.mubr.msk.bf16.mxu0 %vm1714_vm0, %v1713_v0 }
  0x82   :  { %1611 = vmatmul.mubr.bf16.gmra.mrb[48].mxu0 %v1712_v33 }
  0xf5   :  { %v417_v35 = vpop.f32.mrb[0].mxu0  ;;  %v521_v36 = vpop.f32.mrb[0].mxu1 }
  0xf6   :  { %v776_v37 = vadd.f32 %v1903_v34, %v417_v35  ;;  %v1564_v38 = vpop.f32.mrb[1].mxu0  ;;  %v802_v39 = vadd.f32 %v1903_v34, %v521_v36  ;;  %v1616_v40 = vpop.f32.mrb[1].mxu1 }
  0xf7   :  { %v420_v41 = vpop.f32.mrb[2].mxu0  ;;  %v524_v42 = vpop.f32.mrb[2].mxu1 }
  0xf8   :  { %v876_v43 = vmul.f32 0.1, %v776_v37  ;;  %v777_v44 = vadd.f32 %v1903_v34, %v420_v41  ;;  %v1565_v45 = vpop.f32.mrb[3].mxu0  ;;  %vm852_vm1 = vcmp.ge.f32.partialorder %v802_v39, 0.0  ;;  %v1617_v46 = vpop.f32.mrb[3].mxu1  ;;  %vm826_vm2 = vcmp.ge.f32.partialorder %v776_v37, 0.0 }
  0xf9   :  { %v902_v47 = vmul.f32 0.1, %v802_v39  ;;  %v803_v48 = vadd.f32 %v1903_v34, %v524_v42 }
  0xfa   :  { %vm827_vm3 = vcmp.ge.f32.partialorder %v777_v44, 0.0  ;;  %v877_v49 = vmul.f32 0.1, %v777_v44  ;;  %v926_v52 = vsel %vm826_vm2, %v776_v37, %v876_v43 }
  0xfb   :  { %v952_v50 = vsel %vm852_vm1, %v802_v39, %v902_v47  ;;  %vm853_vm4 = vcmp.ge.f32.partialorder %v803_v48, 0.0  ;;  %v903_v51 = vmul.f32 0.1, %v803_v48 }
  0xfc   :  { %v927_v53 = vsel %vm827_vm3, %v777_v44, %v877_v49 }
  0xfd   :  { %v1367_v54 = vpack.c.bf16 %v927_v53, %v926_v52  ;;  %v953_v55 = vsel %vm853_vm4, %v803_v48, %v903_v51  ;;  %v425_v56 = vpop.f32.mrb[4].mxu0  ;;  %v529_v57 = vpop.f32.mrb[4].mxu1 }
  0xfe   :  { %v1432_v58 = vpack.c.bf16 %v953_v55, %v952_v50  ;;  %v778_v59 = vadd.f32 %v1903_v34, %v425_v56  ;;  %v1568_v60 = vpop.f32.mrb[5].mxu0  ;;  %v804_v61 = vadd.f32 %v1903_v34, %v529_v57  ;;  %v1620_v62 = vpop.f32.mrb[5].mxu1 }
  0xff   :  { %1368 = vst [vmem:[%s2033_s3] sm:$0xff] %v1367_v54   ;;  %v428_v63 = vpop.f32.mrb[6].mxu0  ;;  %v532_v0 = vpop.f32.mrb[6].mxu1 }
 0x100   :  { %1501 = vst [vmem:[%s2033_s3 + $0x68] sm:$0xff] %v1432_v58   ;;  %v878_v1 = vmul.f32 0.1, %v778_v59  ;;  %v779_v2 = vadd.f32 %v1903_v34, %v428_v63  ;;  %v1569_v3 = vpop.f32.mrb[7].mxu0  ;;  %vm854_vm5 = vcmp.ge.f32.partialorder %v804_v61, 0.0  ;;  %v1621_v4 = vpop.f32.mrb[7].mxu1  ;;  %v805_v6 = vadd.f32 %v1903_v34, %v532_v0 }
 0x101   :  { %vm828_vm6 = vcmp.ge.f32.partialorder %v778_v59, 0.0  ;;  %v904_v5 = vmul.f32 0.1, %v804_v61 }
 0x102   :  { %vm829_vm7 = vcmp.ge.f32.partialorder %v779_v2, 0.0  ;;  %v879_v7 = vmul.f32 0.1, %v779_v2  ;;  %vm855_vm8 = vcmp.ge.f32.partialorder %v805_v6, 0.0  ;;  %v905_v9 = vmul.f32 0.1, %v805_v6 }
 0x103   :  { %v954_v8 = vsel %vm854_vm5, %v804_v61, %v904_v5  ;;  %v928_v10 = vsel %vm828_vm6, %v778_v59, %v878_v1 }
 0x104   :  { %v929_v11 = vsel %vm829_vm7, %v779_v2, %v879_v7  ;;  %v955_v13 = vsel %vm855_vm8, %v805_v6, %v905_v9 }
 0x105   :  { %v1372_v12 = vpack.c.bf16 %v929_v11, %v928_v10  ;;  %v433_v14 = vpop.f32.mrb[8].mxu0  ;;  %v537_v15 = vpop.f32.mrb[8].mxu1  ;;  %v1437_v16 = vpack.c.bf16 %v955_v13, %v954_v8 }
 0x106   :  { %v780_v17 = vadd.f32 %v1903_v34, %v433_v14  ;;  %v1572_v18 = vpop.f32.mrb[9].mxu0  ;;  %v806_v19 = vadd.f32 %v1903_v34, %v537_v15  ;;  %v1624_v20 = vpop.f32.mrb[9].mxu1 }
 0x107   :  { %1489 = vst [vmem:[%s2033_s3 + $0x8] sm:$0xff] %v1372_v12   ;;  %v436_v21 = vpop.f32.mrb[10].mxu0  ;;  %v540_v22 = vpop.f32.mrb[10].mxu1  ;;  %1502 = vst [vmem:[%s2033_s3 + $0x70] sm:$0xff] %v1437_v16  }
 0x108   :  { %v880_v23 = vmul.f32 0.1, %v780_v17  ;;  %v781_v24 = vadd.f32 %v1903_v34, %v436_v21  ;;  %v1573_v25 = vpop.f32.mrb[11].mxu0  ;;  %vm856_vm9 = vcmp.ge.f32.partialorder %v806_v19, 0.0  ;;  %v1625_v26 = vpop.f32.mrb[11].mxu1  ;;  %vm830_vm10 = vcmp.ge.f32.partialorder %v780_v17, 0.0 }
 0x109   :  { %v906_v27 = vmul.f32 0.1, %v806_v19  ;;  %v807_v28 = vadd.f32 %v1903_v34, %v540_v22 }
 0x10a   :  { %vm831_vm11 = vcmp.ge.f32.partialorder %v781_v24, 0.0  ;;  %v881_v29 = vmul.f32 0.1, %v781_v24  ;;  %v930_v32 = vsel %vm830_vm10, %v780_v17, %v880_v23 }
 0x10b   :  { %v956_v30 = vsel %vm856_vm9, %v806_v19, %v906_v27  ;;  %vm857_vm12 = vcmp.ge.f32.partialorder %v807_v28, 0.0  ;;  %v907_v31 = vmul.f32 0.1, %v807_v28 }
 0x10c   :  { %v931_v33 = vsel %vm831_vm11, %v781_v24, %v881_v29 }
 0x10d   :  { %v1377_v35 = vpack.c.bf16 %v931_v33, %v930_v32  ;;  %v957_v36 = vsel %vm857_vm12, %v807_v28, %v907_v31  ;;  %v441_v37 = vpop.f32.mrb[12].mxu0  ;;  %v545_v38 = vpop.f32.mrb[12].mxu1 }
 0x10e   :  { %v1442_v39 = vpack.c.bf16 %v957_v36, %v956_v30  ;;  %v782_v40 = vadd.f32 %v1903_v34, %v441_v37  ;;  %v1576_v41 = vpop.f32.mrb[13].mxu0  ;;  %v808_v42 = vadd.f32 %v1903_v34, %v545_v38  ;;  %v1628_v43 = vpop.f32.mrb[13].mxu1 }
 0x10f   :  { %1490 = vst [vmem:[%s2033_s3 + $0x10] sm:$0xff] %v1377_v35   ;;  %v444_v44 = vpop.f32.mrb[14].mxu0  ;;  %v548_v45 = vpop.f32.mrb[14].mxu1 }
 0x110   :  { %1503 = vst [vmem:[%s2033_s3 + $0x78] sm:$0xff] %v1442_v39   ;;  %v882_v46 = vmul.f32 0.1, %v782_v40  ;;  %v783_v47 = vadd.f32 %v1903_v34, %v444_v44  ;;  %v1577_v48 = vpop.f32.mrb[15].mxu0  ;;  %vm858_vm13 = vcmp.ge.f32.partialorder %v808_v42, 0.0  ;;  %v1629_v49 = vpop.f32.mrb[15].mxu1  ;;  %v809_v51 = vadd.f32 %v1903_v34, %v548_v45 }
 0x111   :  { %vm832_vm14 = vcmp.ge.f32.partialorder %v782_v40, 0.0  ;;  %v908_v50 = vmul.f32 0.1, %v808_v42 }
 0x112   :  { %vm833_vm15 = vcmp.ge.f32.partialorder %v783_v47, 0.0  ;;  %v883_v52 = vmul.f32 0.1, %v783_v47  ;;  %vm859_vm0 = vcmp.ge.f32.partialorder %v809_v51, 0.0  ;;  %v909_v54 = vmul.f32 0.1, %v809_v51 }
 0x113   :  { %v958_v53 = vsel %vm858_vm13, %v808_v42, %v908_v50  ;;  %v932_v55 = vsel %vm832_vm14, %v782_v40, %v882_v46 }
 0x114   :  { %v933_v56 = vsel %vm833_vm15, %v783_v47, %v883_v52  ;;  %v959_v58 = vsel %vm859_vm0, %v809_v51, %v909_v54 }
 0x115   :  { %v1382_v57 = vpack.c.bf16 %v933_v56, %v932_v55  ;;  %v449_v59 = vpop.f32.mrb[16].mxu0  ;;  %v553_v60 = vpop.f32.mrb[16].mxu1  ;;  %v1447_v61 = vpack.c.bf16 %v959_v58, %v958_v53 }
 0x116   :  { %v784_v62 = vadd.f32 %v1903_v34, %v449_v59  ;;  %v1580_v63 = vpop.f32.mrb[17].mxu0  ;;  %v810_v0 = vadd.f32 %v1903_v34, %v553_v60  ;;  %v1632_v1 = vpop.f32.mrb[17].mxu1 }
 0x117   :  { %1491 = vst [vmem:[%s2033_s3 + $0x18] sm:$0xff] %v1382_v57   ;;  %v452_v2 = vpop.f32.mrb[18].mxu0  ;;  %v556_v3 = vpop.f32.mrb[18].mxu1  ;;  %1504 = vst [vmem:[%s2033_s3 + $0x80] sm:$0xff] %v1447_v61  }
 0x118   :  { %v884_v4 = vmul.f32 0.1, %v784_v62  ;;  %v785_v5 = vadd.f32 %v1903_v34, %v452_v2  ;;  %v1581_v6 = vpop.f32.mrb[19].mxu0  ;;  %vm860_vm1 = vcmp.ge.f32.partialorder %v810_v0, 0.0  ;;  %v1633_v7 = vpop.f32.mrb[19].mxu1  ;;  %vm834_vm2 = vcmp.ge.f32.partialorder %v784_v62, 0.0 }
 0x119   :  { %v910_v8 = vmul.f32 0.1, %v810_v0  ;;  %v811_v9 = vadd.f32 %v1903_v34, %v556_v3 }
 0x11a   :  { %vm835_vm3 = vcmp.ge.f32.partialorder %v785_v5, 0.0  ;;  %v885_v10 = vmul.f32 0.1, %v785_v5  ;;  %v934_v13 = vsel %vm834_vm2, %v784_v62, %v884_v4 }
 0x11b   :  { %v960_v11 = vsel %vm860_vm1, %v810_v0, %v910_v8  ;;  %vm861_vm4 = vcmp.ge.f32.partialorder %v811_v9, 0.0  ;;  %v911_v12 = vmul.f32 0.1, %v811_v9 }
 0x11c   :  { %v935_v14 = vsel %vm835_vm3, %v785_v5, %v885_v10 }
 0x11d   :  { %v1387_v15 = vpack.c.bf16 %v935_v14, %v934_v13  ;;  %v961_v16 = vsel %vm861_vm4, %v811_v9, %v911_v12  ;;  %v457_v17 = vpop.f32.mrb[20].mxu0  ;;  %v561_v18 = vpop.f32.mrb[20].mxu1 }
 0x11e   :  { %v1452_v19 = vpack.c.bf16 %v961_v16, %v960_v11  ;;  %v786_v20 = vadd.f32 %v1903_v34, %v457_v17  ;;  %v1584_v21 = vpop.f32.mrb[21].mxu0  ;;  %v812_v22 = vadd.f32 %v1903_v34, %v561_v18  ;;  %v1636_v23 = vpop.f32.mrb[21].mxu1 }
 0x11f   :  { %1492 = vst [vmem:[%s2033_s3 + $0x20] sm:$0xff] %v1387_v15   ;;  %v460_v24 = vpop.f32.mrb[22].mxu0  ;;  %v564_v25 = vpop.f32.mrb[22].mxu1 }
 0x120   :  { %1505 = vst [vmem:[%s2033_s3 + $0x88] sm:$0xff] %v1452_v19   ;;  %v886_v26 = vmul.f32 0.1, %v786_v20  ;;  %v787_v27 = vadd.f32 %v1903_v34, %v460_v24  ;;  %v1585_v28 = vpop.f32.mrb[23].mxu0  ;;  %vm862_vm5 = vcmp.ge.f32.partialorder %v812_v22, 0.0  ;;  %v1637_v29 = vpop.f32.mrb[23].mxu1  ;;  %v813_v31 = vadd.f32 %v1903_v34, %v564_v25 }
 0x121   :  { %vm836_vm6 = vcmp.ge.f32.partialorder %v786_v20, 0.0  ;;  %v912_v30 = vmul.f32 0.1, %v812_v22 }
 0x122   :  { %vm837_vm7 = vcmp.ge.f32.partialorder %v787_v27, 0.0  ;;  %v887_v32 = vmul.f32 0.1, %v787_v27  ;;  %vm863_vm8 = vcmp.ge.f32.partialorder %v813_v31, 0.0  ;;  %v913_v35 = vmul.f32 0.1, %v813_v31 }
 0x123   :  { %v962_v33 = vsel %vm862_vm5, %v812_v22, %v912_v30  ;;  %v936_v36 = vsel %vm836_vm6, %v786_v20, %v886_v26 }
 0x124   :  { %v937_v37 = vsel %vm837_vm7, %v787_v27, %v887_v32  ;;  %v963_v39 = vsel %vm863_vm8, %v813_v31, %v913_v35 }
 0x125   :  { %v1392_v38 = vpack.c.bf16 %v937_v37, %v936_v36  ;;  %v465_v40 = vpop.f32.mrb[24].mxu0  ;;  %v569_v41 = vpop.f32.mrb[24].mxu1  ;;  %v1457_v42 = vpack.c.bf16 %v963_v39, %v962_v33 }
 0x126   :  { %v788_v43 = vadd.f32 %v1903_v34, %v465_v40  ;;  %v1588_v44 = vpop.f32.mrb[25].mxu0  ;;  %v814_v45 = vadd.f32 %v1903_v34, %v569_v41  ;;  %v1640_v46 = vpop.f32.mrb[25].mxu1 }
 0x127   :  { %1493 = vst [vmem:[%s2033_s3 + $0x28] sm:$0xff] %v1392_v38   ;;  %v468_v47 = vpop.f32.mrb[26].mxu0  ;;  %v572_v48 = vpop.f32.mrb[26].mxu1  ;;  %1506 = vst [vmem:[%s2033_s3 + $0x90] sm:$0xff] %v1457_v42  }
 0x128   :  { %v888_v49 = vmul.f32 0.1, %v788_v43  ;;  %v789_v50 = vadd.f32 %v1903_v34, %v468_v47  ;;  %v1589_v51 = vpop.f32.mrb[27].mxu0  ;;  %vm864_vm9 = vcmp.ge.f32.partialorder %v814_v45, 0.0  ;;  %v1641_v52 = vpop.f32.mrb[27].mxu1  ;;  %vm838_vm10 = vcmp.ge.f32.partialorder %v788_v43, 0.0 }
 0x129   :  { %v914_v53 = vmul.f32 0.1, %v814_v45  ;;  %v815_v54 = vadd.f32 %v1903_v34, %v572_v48 }
 0x12a   :  { %vm839_vm11 = vcmp.ge.f32.partialorder %v789_v50, 0.0  ;;  %v889_v55 = vmul.f32 0.1, %v789_v50  ;;  %v938_v58 = vsel %vm838_vm10, %v788_v43, %v888_v49 }
 0x12b   :  { %v964_v56 = vsel %vm864_vm9, %v814_v45, %v914_v53  ;;  %vm865_vm12 = vcmp.ge.f32.partialorder %v815_v54, 0.0  ;;  %v915_v57 = vmul.f32 0.1, %v815_v54 }
 0x12c   :  { %v939_v59 = vsel %vm839_vm11, %v789_v50, %v889_v55 }
 0x12d   :  { %v1397_v60 = vpack.c.bf16 %v939_v59, %v938_v58  ;;  %v965_v61 = vsel %vm865_vm12, %v815_v54, %v915_v57  ;;  %v473_v62 = vpop.f32.mrb[28].mxu0  ;;  %v577_v63 = vpop.f32.mrb[28].mxu1 }
 0x12e   :  { %v1462_v0 = vpack.c.bf16 %v965_v61, %v964_v56  ;;  %v790_v1 = vadd.f32 %v1903_v34, %v473_v62  ;;  %v1592_v2 = vpop.f32.mrb[29].mxu0  ;;  %v816_v3 = vadd.f32 %v1903_v34, %v577_v63  ;;  %v1644_v4 = vpop.f32.mrb[29].mxu1 }
 0x12f   :  { %1494 = vst [vmem:[%s2033_s3 + $0x30] sm:$0xff] %v1397_v60   ;;  %v476_v5 = vpop.f32.mrb[30].mxu0  ;;  %v580_v6 = vpop.f32.mrb[30].mxu1 }
 0x130   :  { %1507 = vst [vmem:[%s2033_s3 + $0x98] sm:$0xff] %v1462_v0   ;;  %v890_v7 = vmul.f32 0.1, %v790_v1  ;;  %v791_v8 = vadd.f32 %v1903_v34, %v476_v5  ;;  %v1593_v9 = vpop.f32.mrb[31].mxu0  ;;  %vm866_vm13 = vcmp.ge.f32.partialorder %v816_v3, 0.0  ;;  %v1645_v10 = vpop.f32.mrb[31].mxu1  ;;  %v817_v12 = vadd.f32 %v1903_v34, %v580_v6 }
 0x131   :  { %vm840_vm14 = vcmp.ge.f32.partialorder %v790_v1, 0.0  ;;  %v916_v11 = vmul.f32 0.1, %v816_v3 }
 0x132   :  { %vm841_vm15 = vcmp.ge.f32.partialorder %v791_v8, 0.0  ;;  %v891_v13 = vmul.f32 0.1, %v791_v8  ;;  %vm867_vm0 = vcmp.ge.f32.partialorder %v817_v12, 0.0  ;;  %v917_v15 = vmul.f32 0.1, %v817_v12 }
 0x133   :  { %v966_v14 = vsel %vm866_vm13, %v816_v3, %v916_v11  ;;  %v940_v16 = vsel %vm840_vm14, %v790_v1, %v890_v7 }
 0x134   :  { %v941_v17 = vsel %vm841_vm15, %v791_v8, %v891_v13  ;;  %v967_v19 = vsel %vm867_vm0, %v817_v12, %v917_v15 }
 0x135   :  { %v1402_v18 = vpack.c.bf16 %v941_v17, %v940_v16  ;;  %v481_v20 = vpop.f32.mrb[32].mxu0  ;;  %v585_v21 = vpop.f32.mrb[32].mxu1  ;;  %v1467_v22 = vpack.c.bf16 %v967_v19, %v966_v14 }
 0x136   :  { %v792_v23 = vadd.f32 %v1903_v34, %v481_v20  ;;  %v1596_v24 = vpop.f32.mrb[33].mxu0  ;;  %v818_v25 = vadd.f32 %v1903_v34, %v585_v21  ;;  %v1648_v26 = vpop.f32.mrb[33].mxu1 }
 0x137   :  { %1495 = vst [vmem:[%s2033_s3 + $0x38] sm:$0xff] %v1402_v18   ;;  %v484_v27 = vpop.f32.mrb[34].mxu0  ;;  %v588_v28 = vpop.f32.mrb[34].mxu1  ;;  %1508 = vst [vmem:[%s2033_s3 + $0xa0] sm:$0xff] %v1467_v22  }
 0x138   :  { %v892_v29 = vmul.f32 0.1, %v792_v23  ;;  %v793_v30 = vadd.f32 %v1903_v34, %v484_v27  ;;  %v1597_v31 = vpop.f32.mrb[35].mxu0  ;;  %vm868_vm1 = vcmp.ge.f32.partialorder %v818_v25, 0.0  ;;  %v1649_v32 = vpop.f32.mrb[35].mxu1  ;;  %vm842_vm2 = vcmp.ge.f32.partialorder %v792_v23, 0.0 }
 0x139   :  { %v918_v33 = vmul.f32 0.1, %v818_v25  ;;  %v819_v35 = vadd.f32 %v1903_v34, %v588_v28 }
 0x13a   :  { %vm843_vm3 = vcmp.ge.f32.partialorder %v793_v30, 0.0  ;;  %v893_v36 = vmul.f32 0.1, %v793_v30  ;;  %v942_v39 = vsel %vm842_vm2, %v792_v23, %v892_v29 }
 0x13b   :  { %v968_v37 = vsel %vm868_vm1, %v818_v25, %v918_v33  ;;  %vm869_vm4 = vcmp.ge.f32.partialorder %v819_v35, 0.0  ;;  %v919_v38 = vmul.f32 0.1, %v819_v35 }
 0x13c   :  { %v943_v40 = vsel %vm843_vm3, %v793_v30, %v893_v36 }
 0x13d   :  { %v1407_v41 = vpack.c.bf16 %v943_v40, %v942_v39  ;;  %v969_v42 = vsel %vm869_vm4, %v819_v35, %v919_v38  ;;  %v489_v43 = vpop.f32.mrb[36].mxu0  ;;  %v593_v44 = vpop.f32.mrb[36].mxu1 }
 0x13e   :  { %v1472_v45 = vpack.c.bf16 %v969_v42, %v968_v37  ;;  %v794_v46 = vadd.f32 %v1903_v34, %v489_v43  ;;  %v1600_v47 = vpop.f32.mrb[37].mxu0  ;;  %v820_v48 = vadd.f32 %v1903_v34, %v593_v44  ;;  %v1652_v49 = vpop.f32.mrb[37].mxu1 }
 0x13f   :  { %1496 = vst [vmem:[%s2033_s3 + $0x40] sm:$0xff] %v1407_v41   ;;  %v492_v50 = vpop.f32.mrb[38].mxu0  ;;  %v596_v51 = vpop.f32.mrb[38].mxu1 }
 0x140   :  { %1509 = vst [vmem:[%s2033_s3 + $0xa8] sm:$0xff] %v1472_v45   ;;  %v894_v52 = vmul.f32 0.1, %v794_v46  ;;  %v795_v53 = vadd.f32 %v1903_v34, %v492_v50  ;;  %v1601_v54 = vpop.f32.mrb[39].mxu0  ;;  %vm870_vm5 = vcmp.ge.f32.partialorder %v820_v48, 0.0  ;;  %v1653_v55 = vpop.f32.mrb[39].mxu1  ;;  %v821_v57 = vadd.f32 %v1903_v34, %v596_v51 }
 0x141   :  { %vm844_vm6 = vcmp.ge.f32.partialorder %v794_v46, 0.0  ;;  %v920_v56 = vmul.f32 0.1, %v820_v48 }
 0x142   :  { %vm845_vm7 = vcmp.ge.f32.partialorder %v795_v53, 0.0  ;;  %v895_v58 = vmul.f32 0.1, %v795_v53  ;;  %vm871_vm8 = vcmp.ge.f32.partialorder %v821_v57, 0.0  ;;  %v921_v60 = vmul.f32 0.1, %v821_v57 }
 0x143   :  { %v970_v59 = vsel %vm870_vm5, %v820_v48, %v920_v56  ;;  %v944_v61 = vsel %vm844_vm6, %v794_v46, %v894_v52 }
 0x144   :  { %v945_v62 = vsel %vm845_vm7, %v795_v53, %v895_v58  ;;  %v971_v0 = vsel %vm871_vm8, %v821_v57, %v921_v60 }
 0x145   :  { %v1412_v63 = vpack.c.bf16 %v945_v62, %v944_v61  ;;  %v497_v1 = vpop.f32.mrb[40].mxu0  ;;  %v601_v2 = vpop.f32.mrb[40].mxu1  ;;  %v1477_v3 = vpack.c.bf16 %v971_v0, %v970_v59 }
 0x146   :  { %v796_v4 = vadd.f32 %v1903_v34, %v497_v1  ;;  %v1604_v5 = vpop.f32.mrb[41].mxu0  ;;  %v822_v6 = vadd.f32 %v1903_v34, %v601_v2  ;;  %v1656_v7 = vpop.f32.mrb[41].mxu1 }
 0x147   :  { %1497 = vst [vmem:[%s2033_s3 + $0x48] sm:$0xff] %v1412_v63   ;;  %v500_v8 = vpop.f32.mrb[42].mxu0  ;;  %v604_v9 = vpop.f32.mrb[42].mxu1  ;;  %1510 = vst [vmem:[%s2033_s3 + $0xb0] sm:$0xff] %v1477_v3  }
 0x148   :  { %v896_v10 = vmul.f32 0.1, %v796_v4  ;;  %v797_v11 = vadd.f32 %v1903_v34, %v500_v8  ;;  %v1605_v12 = vpop.f32.mrb[43].mxu0  ;;  %vm872_vm9 = vcmp.ge.f32.partialorder %v822_v6, 0.0  ;;  %v1657_v13 = vpop.f32.mrb[43].mxu1  ;;  %vm846_vm10 = vcmp.ge.f32.partialorder %v796_v4, 0.0 }
 0x149   :  { %v922_v14 = vmul.f32 0.1, %v822_v6  ;;  %v823_v15 = vadd.f32 %v1903_v34, %v604_v9 }
 0x14a   :  { %vm847_vm11 = vcmp.ge.f32.partialorder %v797_v11, 0.0  ;;  %v897_v16 = vmul.f32 0.1, %v797_v11  ;;  %v946_v19 = vsel %vm846_vm10, %v796_v4, %v896_v10 }
 0x14b   :  { %v972_v17 = vsel %vm872_vm9, %v822_v6, %v922_v14  ;;  %vm873_vm12 = vcmp.ge.f32.partialorder %v823_v15, 0.0  ;;  %v923_v18 = vmul.f32 0.1, %v823_v15 }
 0x14c   :  { %v947_v20 = vsel %vm847_vm11, %v797_v11, %v897_v16 }
 0x14d   :  { %v1417_v21 = vpack.c.bf16 %v947_v20, %v946_v19  ;;  %v973_v22 = vsel %vm873_vm12, %v823_v15, %v923_v18  ;;  %v505_v23 = vpop.f32.mrb[44].mxu0  ;;  %v609_v24 = vpop.f32.mrb[44].mxu1 }
 0x14e   :  { %v1482_v25 = vpack.c.bf16 %v973_v22, %v972_v17  ;;  %v798_v26 = vadd.f32 %v1903_v34, %v505_v23  ;;  %v1608_v27 = vpop.f32.mrb[45].mxu0  ;;  %v824_v28 = vadd.f32 %v1903_v34, %v609_v24  ;;  %v1660_v29 = vpop.f32.mrb[45].mxu1 }
 0x14f   :  { %1498 = vst [vmem:[%s2033_s3 + $0x50] sm:$0xff] %v1417_v21   ;;  %v508_v30 = vpop.f32.mrb[46].mxu0  ;;  %v612_v31 = vpop.f32.mrb[46].mxu1 }
 0x150   :  { %1511 = vst [vmem:[%s2033_s3 + $0xb8] sm:$0xff] %v1482_v25   ;;  %v898_v32 = vmul.f32 0.1, %v798_v26  ;;  %v799_v33 = vadd.f32 %v1903_v34, %v508_v30  ;;  %v1609_v35 = vpop.f32.mrb[47].mxu0  ;;  %vm874_vm13 = vcmp.ge.f32.partialorder %v824_v28, 0.0  ;;  %v1661_v36 = vpop.f32.mrb[47].mxu1  ;;  %v825_v38 = vadd.f32 %v1903_v34, %v612_v31 }
 0x151   :  { %vm848_vm14 = vcmp.ge.f32.partialorder %v798_v26, 0.0  ;;  %v924_v37 = vmul.f32 0.1, %v824_v28 }
 0x152   :  { %vm849_vm15 = vcmp.ge.f32.partialorder %v799_v33, 0.0  ;;  %v899_v39 = vmul.f32 0.1, %v799_v33  ;;  %vm875_vm0 = vcmp.ge.f32.partialorder %v825_v38, 0.0  ;;  %v925_v41 = vmul.f32 0.1, %v825_v38 }
 0x153   :  { %v974_v40 = vsel %vm874_vm13, %v824_v28, %v924_v37  ;;  %v948_v42 = vsel %vm848_vm14, %v798_v26, %v898_v32 }
 0x154   :  { %v949_v43 = vsel %vm849_vm15, %v799_v33, %v899_v39  ;;  %v975_v45 = vsel %vm875_vm0, %v825_v38, %v925_v41 }
 0x155   :  { %v1422_v44 = vpack.c.bf16 %v949_v43, %v948_v42  ;;  %v513_v46 = vpop.f32.mrb[48].mxu0  ;;  %v1487_v47 = vpack.c.bf16 %v975_v45, %v974_v40 }
 0x156   :  { %v800_v48 = vadd.f32 %v1903_v34, %v513_v46  ;;  %v1612_v49 = vpop.f32.mrb[49].mxu0 }
 0x157   :  { %1499 = vst [vmem:[%s2033_s3 + $0x58] sm:$0xff] %v1422_v44   ;;  %v516_v50 = vpop.f32.mrb[50].mxu0  ;;  %1512 = vst [vmem:[%s2033_s3 + $0xc0] sm:$0xff] %v1487_v47  }
 0x158   :  { %v900_v51 = vmul.f32 0.1, %v800_v48  ;;  %v801_v52 = vadd.f32 %v1903_v34, %v516_v50  ;;  %v1613_v53 = vpop.f32.mrb[51].mxu0  ;;  %vm850_vm1 = vcmp.ge.f32.partialorder %v800_v48, 0.0 }
 0x15a   :  { %vm851_vm2 = vcmp.ge.f32.partialorder %v801_v52, 0.0  ;;  %v901_v54 = vmul.f32 0.1, %v801_v52  ;;  %v950_v55 = vsel %vm850_vm1, %v800_v48, %v900_v51 }
 0x15c   :  { %v951_v56 = vsel %vm851_vm2, %v801_v52, %v901_v54 }
 0x15d   :  { %v1427_v57 = vpack.c.bf16 %v951_v56, %v950_v55 }
 0x15f   :  { %1500 = vst [vmem:[%s2033_s3 + $0x60] sm:$0xff] %v1427_v57  }

// kernel: upconv7_forward.21
= control target key start
LH: loop header
LB: loop body
LE: loop exit
PB: predicated region body
PF: predicated region fallthrough
CT: control target
= control target key end

     0   :  { %v1393_v0 = vmov 0   ;;  %s1697_s1 = inlined_call_operand.vmem [shape: bf16[256,128], index: 1, kind: input, shape index: {}]   ;;  %s1698_s0 = inlined_call_operand.vmem [shape: bf16[288,256], index: 0, kind: input, shape index: {}]   ;;  %s1699_s2 = inlined_call_operand.vmem [shape: f32[1,128], index: 2, kind: input, shape index: {}]   ;;  %s1700_s3 = inlined_call_operand.vmem [shape: bf16[288,128], index: 3, kind: output, shape index: {}]  }
   0x1   :  { %435 = vmatprep.subr.bf16.mxu0 %v1393_v0  ;;  %1290 = vmatprep.subr.bf16.mxu1 %v1393_v0  ;;  %v1323_v1 = vld [vmem:[%s1697_s1] sm:$0xff]   ;;  %v1324_v2 = vld [vmem:[%s1697_s1 + $0x8] sm:$0xff]   ;;  %v1325_v3 = vld [vmem:[%s1697_s1 + $0x10] sm:$0xff]  }
   0x2   :  { %436 = vmatpush1.bf16.msra.mxu0 %v1323_v1  ;;  %1306 = vmatpush1.bf16.msra.mxu1 %v1323_v1  ;;  %v1326_v4 = vld [vmem:[%s1697_s1 + $0x18] sm:$0xff]   ;;  %v1327_v5 = vld [vmem:[%s1697_s1 + $0x20] sm:$0xff]   ;;  %v1328_v7 = vld [vmem:[%s1697_s1 + $0x28] sm:$0xff]  }
   0x3   :  { %437 = vmatprep.subr.bf16.mxu0 %v1393_v0  ;;  %1291 = vmatprep.subr.bf16.mxu1 %v1393_v0  ;;  %v1341_v6 = vld [vmem:[%s1698_s0 + $0x4] ss:$8 sps:$4 sm:$0xff]   ;;  %v1344_v8 = vld [vmem:[%s1698_s0 + $0x94] ss:$8 sps:$4 sm:$0xff]   ;;  %v1339_v19 = vld [vmem:[%s1698_s0] ss:$8 sps:$4 sm:$0xff]  }
   0x4   :  { %467 = vmatprep.mubr.bf16.mxu0 %v1341_v6  ;;  %539 = vmatprep.mubr.bf16.mxu1 %v1344_v8  ;;  %v1329_v9 = vld [vmem:[%s1697_s1 + $0x30] sm:$0xff]   ;;  %v1330_v10 = vld [vmem:[%s1697_s1 + $0x38] sm:$0xff]   ;;  %v1331_v11 = vld [vmem:[%s1697_s1 + $0x40] sm:$0xff]  }
   0x5   :  { %v1332_v12 = vld [vmem:[%s1697_s1 + $0x48] sm:$0xff]   ;;  %v1333_v13 = vld [vmem:[%s1697_s1 + $0x50] sm:$0xff]   ;;  %v1334_v14 = vld [vmem:[%s1697_s1 + $0x58] sm:$0xff]  }
   0x6   :  { %438 = vmatpush1.bf16.msra.mxu0 %v1324_v2  ;;  %1307 = vmatpush1.bf16.msra.mxu1 %v1324_v2  ;;  %v1335_v15 = vld [vmem:[%s1697_s1 + $0x60] sm:$0xff]   ;;  %v1336_v16 = vld [vmem:[%s1697_s1 + $0x68] sm:$0xff]   ;;  %v1337_v17 = vld [vmem:[%s1697_s1 + $0x70] sm:$0xff]  }
   0x7   :  { %439 = vmatprep.subr.bf16.mxu0 %v1393_v0  ;;  %1292 = vmatprep.subr.bf16.mxu1 %v1393_v0  ;;  %v1338_v18 = vld [vmem:[%s1697_s1 + $0x78] sm:$0xff]   ;;  %v1347_v22 = vld [vmem:[%s1698_s0 + $0xa4] ss:$8 sps:$4 sm:$0xff]   ;;  %v1350_v24 = vld [vmem:[%s1698_s0 + $0xa0] ss:$8 sps:$4 sm:$0xff]  }
   0x8   :  { %v1342_v20 = vld [vmem:[%s1698_s0 + $0x90] ss:$8 sps:$4 sm:$0xff]   ;;  %v1345_v21 = vld [vmem:[%s1698_s0 + $0x14] ss:$8 sps:$4 sm:$0xff]   ;;  %v1351_v25 = vld [vmem:[%s1698_s0 + $0x24] ss:$8 sps:$4 sm:$0xff]  }
   0x9   :  { %v1349_v23 = vld [vmem:[%s1698_s0 + $0x10] ss:$8 sps:$4 sm:$0xff]   ;;  %v1353_v26 = vld [vmem:[%s1698_s0 + $0xb4] ss:$8 sps:$4 sm:$0xff]   ;;  %v1355_v27 = vld [vmem:[%s1698_s0 + $0x20] ss:$8 sps:$4 sm:$0xff]  }
   0xa   :  { %440 = vmatpush1.bf16.msra.mxu0 %v1325_v3  ;;  %1308 = vmatpush1.bf16.msra.mxu1 %v1325_v3  ;;  %v1356_v28 = vld [vmem:[%s1698_s0 + $0xb0] ss:$8 sps:$4 sm:$0xff]   ;;  %v1357_v29 = vld [vmem:[%s1698_s0 + $0x34] ss:$8 sps:$4 sm:$0xff]   ;;  %v1359_v30 = vld [vmem:[%s1698_s0 + $0xc4] ss:$8 sps:$4 sm:$0xff]  }
   0xb   :  { %441 = vmatprep.subr.bf16.mxu0 %v1393_v0  ;;  %1293 = vmatprep.subr.bf16.mxu1 %v1393_v0  ;;  %v1361_v31 = vld [vmem:[%s1698_s0 + $0x30] ss:$8 sps:$4 sm:$0xff]   ;;  %v1362_v32 = vld [vmem:[%s1698_s0 + $0xc0] ss:$8 sps:$4 sm:$0xff]   ;;  %v1363_v33 = vld [vmem:[%s1698_s0 + $0x44] ss:$8 sps:$4 sm:$0xff]  }
   0xc   :  { %v1365_v34 = vld [vmem:[%s1698_s0 + $0xd4] ss:$8 sps:$4 sm:$0xff]   ;;  %v1367_v35 = vld [vmem:[%s1698_s0 + $0x40] ss:$8 sps:$4 sm:$0xff]   ;;  %v1368_v36 = vld [vmem:[%s1698_s0 + $0xd0] ss:$8 sps:$4 sm:$0xff]  }
   0xd   :  { %v1369_v37 = vld [vmem:[%s1698_s0 + $0x54] ss:$8 sps:$4 sm:$0xff]   ;;  %v1371_v38 = vld [vmem:[%s1698_s0 + $0xe4] ss:$8 sps:$4 sm:$0xff]   ;;  %v1373_v39 = vld [vmem:[%s1698_s0 + $0x50] ss:$8 sps:$4 sm:$0xff]  }
   0xe   :  { %442 = vmatpush1.bf16.msra.mxu0 %v1326_v4  ;;  %1309 = vmatpush1.bf16.msra.mxu1 %v1326_v4  ;;  %v1374_v40 = vld [vmem:[%s1698_s0 + $0xe0] ss:$8 sps:$4 sm:$0xff]   ;;  %v1375_v41 = vld [vmem:[%s1698_s0 + $0x64] ss:$8 sps:$4 sm:$0xff]   ;;  %v1377_v42 = vld [vmem:[%s1698_s0 + $0xf4] ss:$8 sps:$4 sm:$0xff]  }
   0xf   :  { %443 = vmatprep.subr.bf16.mxu0 %v1393_v0  ;;  %1294 = vmatprep.subr.bf16.mxu1 %v1393_v0  ;;  %v1379_v43 = vld [vmem:[%s1698_s0 + $0x60] ss:$8 sps:$4 sm:$0xff]   ;;  %v1380_v44 = vld [vmem:[%s1698_s0 + $0xf0] ss:$8 sps:$4 sm:$0xff]   ;;  %v1381_v45 = vld [vmem:[%s1698_s0 + $0x74] ss:$8 sps:$4 sm:$0xff]  }
  0x10   :  { %v1383_v46 = vld [vmem:[%s1698_s0 + $0x104] ss:$8 sps:$4 sm:$0xff]   ;;  %v1385_v47 = vld [vmem:[%s1698_s0 + $0x70] ss:$8 sps:$4 sm:$0xff]   ;;  %v1386_v48 = vld [vmem:[%s1698_s0 + $0x100] ss:$8 sps:$4 sm:$0xff]  }
  0x11   :  { %v1387_v49 = vld [vmem:[%s1698_s0 + $0x84] ss:$8 sps:$4 sm:$0xff]   ;;  %v1389_v50 = vld [vmem:[%s1698_s0 + $0x114] ss:$8 sps:$4 sm:$0xff]   ;;  %v1391_v51 = vld [vmem:[%s1698_s0 + $0x80] ss:$8 sps:$4 sm:$0xff]  }
  0x12   :  { %444 = vmatpush1.bf16.msra.mxu0 %v1327_v5  ;;  %1310 = vmatpush1.bf16.msra.mxu1 %v1327_v5  ;;  %v1392_v52 = vld [vmem:[%s1698_s0 + $0x110] ss:$8 sps:$4 sm:$0xff]   ;;  %v1605_v53 = vld [vmem:[%s1699_s2] ss:$0 sm:$0xff] }
  0x13   :  { %445 = vmatprep.subr.bf16.mxu0 %v1393_v0  ;;  %1295 = vmatprep.subr.bf16.mxu1 %v1393_v0 }
  0x16   :  { %446 = vmatpush1.bf16.msra.mxu0 %v1328_v7  ;;  %1311 = vmatpush1.bf16.msra.mxu1 %v1328_v7 }
  0x17   :  { %447 = vmatprep.subr.bf16.mxu0 %v1393_v0  ;;  %1296 = vmatprep.subr.bf16.mxu1 %v1393_v0 }
  0x1a   :  { %448 = vmatpush1.bf16.msra.mxu0 %v1329_v9  ;;  %1312 = vmatpush1.bf16.msra.mxu1 %v1329_v9 }
  0x1b   :  { %449 = vmatprep.subr.bf16.mxu0 %v1393_v0  ;;  %1297 = vmatprep.subr.bf16.mxu1 %v1393_v0 }
  0x1e   :  { %450 = vmatpush1.bf16.msra.mxu0 %v1330_v10  ;;  %1313 = vmatpush1.bf16.msra.mxu1 %v1330_v10 }
  0x1f   :  { %451 = vmatprep.subr.bf16.mxu0 %v1393_v0  ;;  %1298 = vmatprep.subr.bf16.mxu1 %v1393_v0 }
  0x22   :  { %452 = vmatpush1.bf16.msra.mxu0 %v1331_v11  ;;  %1314 = vmatpush1.bf16.msra.mxu1 %v1331_v11 }
  0x23   :  { %453 = vmatprep.subr.bf16.mxu0 %v1393_v0  ;;  %1299 = vmatprep.subr.bf16.mxu1 %v1393_v0 }
  0x26   :  { %454 = vmatpush1.bf16.msra.mxu0 %v1332_v12  ;;  %1315 = vmatpush1.bf16.msra.mxu1 %v1332_v12 }
  0x27   :  { %455 = vmatprep.subr.bf16.mxu0 %v1393_v0  ;;  %1300 = vmatprep.subr.bf16.mxu1 %v1393_v0 }
  0x2a   :  { %456 = vmatpush1.bf16.msra.mxu0 %v1333_v13  ;;  %1316 = vmatpush1.bf16.msra.mxu1 %v1333_v13 }
  0x2b   :  { %457 = vmatprep.subr.bf16.mxu0 %v1393_v0  ;;  %1301 = vmatprep.subr.bf16.mxu1 %v1393_v0 }
  0x2e   :  { %458 = vmatpush1.bf16.msra.mxu0 %v1334_v14  ;;  %1317 = vmatpush1.bf16.msra.mxu1 %v1334_v14 }
  0x2f   :  { %459 = vmatprep.subr.bf16.mxu0 %v1393_v0  ;;  %1302 = vmatprep.subr.bf16.mxu1 %v1393_v0 }
  0x32   :  { %460 = vmatpush1.bf16.msra.mxu0 %v1335_v15  ;;  %1318 = vmatpush1.bf16.msra.mxu1 %v1335_v15 }
  0x33   :  { %461 = vmatprep.subr.bf16.mxu0 %v1393_v0  ;;  %1303 = vmatprep.subr.bf16.mxu1 %v1393_v0 }
  0x36   :  { %462 = vmatpush1.bf16.msra.mxu0 %v1336_v16  ;;  %1319 = vmatpush1.bf16.msra.mxu1 %v1336_v16 }
  0x37   :  { %463 = vmatprep.subr.bf16.mxu0 %v1393_v0  ;;  %1304 = vmatprep.subr.bf16.mxu1 %v1393_v0 }
  0x3a   :  { %464 = vmatpush1.bf16.msra.mxu0 %v1337_v17  ;;  %1320 = vmatpush1.bf16.msra.mxu1 %v1337_v17 }
  0x3b   :  { %465 = vmatprep.subr.bf16.mxu0 %v1393_v0  ;;  %1305 = vmatprep.subr.bf16.mxu1 %v1393_v0 }
  0x3e   :  { %466 = vmatpush1.bf16.msra.mxu0 %v1338_v18  ;;  %1321 = vmatpush1.bf16.msra.mxu1 %v1338_v18 }
  0x41   :  { %468 = vmatmul.mubr.bf16.vlgmr.msra.gmra.mrb[0].mxu0 %v1339_v19  ;;  %540 = vmatmul.mubr.bf16.vlgmr.msra.gmra.mrb[0].mxu1 %v1342_v20 }
  0x42   :  { %475 = vmatprep.mubr.bf16.mxu0 %v1345_v21  ;;  %547 = vmatprep.mubr.bf16.mxu1 %v1347_v22 }
  0x49   :  { %476 = vmatmul.mubr.bf16.gmra.mrb[4].mxu0 %v1349_v23  ;;  %548 = vmatmul.mubr.bf16.gmra.mrb[4].mxu1 %v1350_v24 }
  0x4a   :  { %483 = vmatprep.mubr.bf16.mxu0 %v1351_v25  ;;  %555 = vmatprep.mubr.bf16.mxu1 %v1353_v26 }
  0x51   :  { %484 = vmatmul.mubr.bf16.gmra.mrb[8].mxu0 %v1355_v27  ;;  %556 = vmatmul.mubr.bf16.gmra.mrb[8].mxu1 %v1356_v28 }
  0x52   :  { %491 = vmatprep.mubr.bf16.mxu0 %v1357_v29  ;;  %563 = vmatprep.mubr.bf16.mxu1 %v1359_v30 }
  0x59   :  { %492 = vmatmul.mubr.bf16.gmra.mrb[12].mxu0 %v1361_v31  ;;  %564 = vmatmul.mubr.bf16.gmra.mrb[12].mxu1 %v1362_v32 }
  0x5a   :  { %499 = vmatprep.mubr.bf16.mxu0 %v1363_v33  ;;  %571 = vmatprep.mubr.bf16.mxu1 %v1365_v34 }
  0x61   :  { %500 = vmatmul.mubr.bf16.gmra.mrb[16].mxu0 %v1367_v35  ;;  %572 = vmatmul.mubr.bf16.gmra.mrb[16].mxu1 %v1368_v36 }
  0x62   :  { %507 = vmatprep.mubr.bf16.mxu0 %v1369_v37  ;;  %579 = vmatprep.mubr.bf16.mxu1 %v1371_v38 }
  0x69   :  { %508 = vmatmul.mubr.bf16.gmra.mrb[20].mxu0 %v1373_v39  ;;  %580 = vmatmul.mubr.bf16.gmra.mrb[20].mxu1 %v1374_v40 }
  0x6a   :  { %515 = vmatprep.mubr.bf16.mxu0 %v1375_v41  ;;  %587 = vmatprep.mubr.bf16.mxu1 %v1377_v42 }
  0x71   :  { %516 = vmatmul.mubr.bf16.gmra.mrb[24].mxu0 %v1379_v43  ;;  %588 = vmatmul.mubr.bf16.gmra.mrb[24].mxu1 %v1380_v44 }
  0x72   :  { %523 = vmatprep.mubr.bf16.mxu0 %v1381_v45  ;;  %595 = vmatprep.mubr.bf16.mxu1 %v1383_v46 }
  0x79   :  { %524 = vmatmul.mubr.bf16.gmra.mrb[28].mxu0 %v1385_v47  ;;  %596 = vmatmul.mubr.bf16.gmra.mrb[28].mxu1 %v1386_v48 }
  0x7a   :  { %531 = vmatprep.mubr.bf16.mxu0 %v1387_v49  ;;  %603 = vmatprep.mubr.bf16.mxu1 %v1389_v50 }
  0x81   :  { %532 = vmatmul.mubr.bf16.gmra.mrb[32].mxu0 %v1391_v51  ;;  %604 = vmatmul.mubr.bf16.gmra.mrb[32].mxu1 %v1392_v52 }
 0x114   :  { %v469_v54 = vpop.f32.mrb[0].mxu0  ;;  %v541_v55 = vpop.f32.mrb[0].mxu1 }
 0x115   :  { %v730_v56 = vadd.f32 %v1605_v53, %v469_v54  ;;  %v748_v57 = vadd.f32 %v1605_v53, %v541_v55  ;;  %v471_v58 = vpop.f32.mrb[1].mxu0  ;;  %v543_v59 = vpop.f32.mrb[1].mxu1 }
 0x116   :  { %v472_v60 = vpop.f32.mrb[2].mxu0  ;;  %v544_v61 = vpop.f32.mrb[2].mxu1 }
 0x117   :  { %v802_v62 = vmul.f32 0.1, %v730_v56  ;;  %v820_v63 = vmul.f32 0.1, %v748_v57  ;;  %v731_v0 = vadd.f32 %v1605_v53, %v472_v60  ;;  %v749_v1 = vadd.f32 %v1605_v53, %v544_v61  ;;  %v474_v2 = vpop.f32.mrb[3].mxu0  ;;  %v546_v3 = vpop.f32.mrb[3].mxu1 }
 0x118   :  { %vm766_vm0 = vcmp.ge.f32.partialorder %v730_v56, 0.0  ;;  %vm784_vm1 = vcmp.ge.f32.partialorder %v748_v57, 0.0 }
 0x119   :  { %vm767_vm2 = vcmp.ge.f32.partialorder %v731_v0, 0.0  ;;  %v803_v4 = vmul.f32 0.1, %v731_v0  ;;  %vm785_vm3 = vcmp.ge.f32.partialorder %v749_v1, 0.0  ;;  %v821_v5 = vmul.f32 0.1, %v749_v1 }
 0x11a   :  { %v838_v6 = vsel %vm766_vm0, %v730_v56, %v802_v62  ;;  %v856_v7 = vsel %vm784_vm1, %v748_v57, %v820_v63 }
 0x11b   :  { %v839_v8 = vsel %vm767_vm2, %v731_v0, %v803_v4  ;;  %v857_v9 = vsel %vm785_vm3, %v749_v1, %v821_v5 }
 0x11c   :  { %v477_v10 = vpop.f32.mrb[4].mxu0  ;;  %v549_v11 = vpop.f32.mrb[4].mxu1  ;;  %v1186_v12 = vpack.c.bf16 %v839_v8, %v838_v6  ;;  %v1231_v13 = vpack.c.bf16 %v857_v9, %v856_v7 }
 0x11d   :  { %v732_v14 = vadd.f32 %v1605_v53, %v477_v10  ;;  %v750_v15 = vadd.f32 %v1605_v53, %v549_v11  ;;  %v479_v16 = vpop.f32.mrb[5].mxu0  ;;  %v551_v17 = vpop.f32.mrb[5].mxu1 }
 0x11e   :  { %v480_v18 = vpop.f32.mrb[6].mxu0  ;;  %v552_v19 = vpop.f32.mrb[6].mxu1  ;;  %1187 = vst [vmem:[%s1700_s3] sm:$0xff] %v1186_v12   ;;  %1281 = vst [vmem:[%s1700_s3 + $0x48] sm:$0xff] %v1231_v13  }
 0x11f   :  { %v804_v20 = vmul.f32 0.1, %v732_v14  ;;  %v822_v21 = vmul.f32 0.1, %v750_v15  ;;  %v733_v22 = vadd.f32 %v1605_v53, %v480_v18  ;;  %v751_v23 = vadd.f32 %v1605_v53, %v552_v19  ;;  %v482_v24 = vpop.f32.mrb[7].mxu0  ;;  %v554_v25 = vpop.f32.mrb[7].mxu1 }
 0x120   :  { %vm768_vm4 = vcmp.ge.f32.partialorder %v732_v14, 0.0  ;;  %vm786_vm5 = vcmp.ge.f32.partialorder %v750_v15, 0.0 }
 0x121   :  { %vm769_vm6 = vcmp.ge.f32.partialorder %v733_v22, 0.0  ;;  %v805_v26 = vmul.f32 0.1, %v733_v22  ;;  %vm787_vm7 = vcmp.ge.f32.partialorder %v751_v23, 0.0  ;;  %v823_v27 = vmul.f32 0.1, %v751_v23 }
 0x122   :  { %v840_v28 = vsel %vm768_vm4, %v732_v14, %v804_v20  ;;  %v858_v29 = vsel %vm786_vm5, %v750_v15, %v822_v21 }
 0x123   :  { %v841_v30 = vsel %vm769_vm6, %v733_v22, %v805_v26  ;;  %v859_v31 = vsel %vm787_vm7, %v751_v23, %v823_v27 }
 0x124   :  { %v485_v32 = vpop.f32.mrb[8].mxu0  ;;  %v557_v33 = vpop.f32.mrb[8].mxu1  ;;  %v1191_v34 = vpack.c.bf16 %v841_v30, %v840_v28  ;;  %v1236_v35 = vpack.c.bf16 %v859_v31, %v858_v29 }
 0x125   :  { %v734_v36 = vadd.f32 %v1605_v53, %v485_v32  ;;  %v752_v37 = vadd.f32 %v1605_v53, %v557_v33  ;;  %v487_v38 = vpop.f32.mrb[9].mxu0  ;;  %v559_v39 = vpop.f32.mrb[9].mxu1 }
 0x126   :  { %v488_v40 = vpop.f32.mrb[10].mxu0  ;;  %v560_v41 = vpop.f32.mrb[10].mxu1  ;;  %1273 = vst [vmem:[%s1700_s3 + $0x8] sm:$0xff] %v1191_v34   ;;  %1282 = vst [vmem:[%s1700_s3 + $0x50] sm:$0xff] %v1236_v35  }
 0x127   :  { %v806_v42 = vmul.f32 0.1, %v734_v36  ;;  %v824_v43 = vmul.f32 0.1, %v752_v37  ;;  %v735_v44 = vadd.f32 %v1605_v53, %v488_v40  ;;  %v753_v45 = vadd.f32 %v1605_v53, %v560_v41  ;;  %v490_v46 = vpop.f32.mrb[11].mxu0  ;;  %v562_v47 = vpop.f32.mrb[11].mxu1 }
 0x128   :  { %vm770_vm8 = vcmp.ge.f32.partialorder %v734_v36, 0.0  ;;  %vm788_vm9 = vcmp.ge.f32.partialorder %v752_v37, 0.0 }
 0x129   :  { %vm771_vm10 = vcmp.ge.f32.partialorder %v735_v44, 0.0  ;;  %v807_v48 = vmul.f32 0.1, %v735_v44  ;;  %vm789_vm11 = vcmp.ge.f32.partialorder %v753_v45, 0.0  ;;  %v825_v49 = vmul.f32 0.1, %v753_v45 }
 0x12a   :  { %v842_v50 = vsel %vm770_vm8, %v734_v36, %v806_v42  ;;  %v860_v51 = vsel %vm788_vm9, %v752_v37, %v824_v43 }
 0x12b   :  { %v843_v52 = vsel %vm771_vm10, %v735_v44, %v807_v48  ;;  %v861_v54 = vsel %vm789_vm11, %v753_v45, %v825_v49 }
 0x12c   :  { %v493_v55 = vpop.f32.mrb[12].mxu0  ;;  %v565_v56 = vpop.f32.mrb[12].mxu1  ;;  %v1196_v57 = vpack.c.bf16 %v843_v52, %v842_v50  ;;  %v1241_v58 = vpack.c.bf16 %v861_v54, %v860_v51 }
 0x12d   :  { %v736_v59 = vadd.f32 %v1605_v53, %v493_v55  ;;  %v754_v60 = vadd.f32 %v1605_v53, %v565_v56  ;;  %v495_v61 = vpop.f32.mrb[13].mxu0  ;;  %v567_v62 = vpop.f32.mrb[13].mxu1 }
 0x12e   :  { %v496_v63 = vpop.f32.mrb[14].mxu0  ;;  %v568_v0 = vpop.f32.mrb[14].mxu1  ;;  %1274 = vst [vmem:[%s1700_s3 + $0x10] sm:$0xff] %v1196_v57   ;;  %1283 = vst [vmem:[%s1700_s3 + $0x58] sm:$0xff] %v1241_v58  }
 0x12f   :  { %v808_v1 = vmul.f32 0.1, %v736_v59  ;;  %v826_v2 = vmul.f32 0.1, %v754_v60  ;;  %v737_v3 = vadd.f32 %v1605_v53, %v496_v63  ;;  %v755_v4 = vadd.f32 %v1605_v53, %v568_v0  ;;  %v498_v5 = vpop.f32.mrb[15].mxu0  ;;  %v570_v6 = vpop.f32.mrb[15].mxu1 }
 0x130   :  { %vm772_vm12 = vcmp.ge.f32.partialorder %v736_v59, 0.0  ;;  %vm790_vm13 = vcmp.ge.f32.partialorder %v754_v60, 0.0 }
 0x131   :  { %vm773_vm14 = vcmp.ge.f32.partialorder %v737_v3, 0.0  ;;  %v809_v7 = vmul.f32 0.1, %v737_v3  ;;  %vm791_vm15 = vcmp.ge.f32.partialorder %v755_v4, 0.0  ;;  %v827_v8 = vmul.f32 0.1, %v755_v4 }
 0x132   :  { %v844_v9 = vsel %vm772_vm12, %v736_v59, %v808_v1  ;;  %v862_v10 = vsel %vm790_vm13, %v754_v60, %v826_v2 }
 0x133   :  { %v845_v11 = vsel %vm773_vm14, %v737_v3, %v809_v7  ;;  %v863_v12 = vsel %vm791_vm15, %v755_v4, %v827_v8 }
 0x134   :  { %v501_v13 = vpop.f32.mrb[16].mxu0  ;;  %v573_v14 = vpop.f32.mrb[16].mxu1  ;;  %v1201_v15 = vpack.c.bf16 %v845_v11, %v844_v9  ;;  %v1246_v16 = vpack.c.bf16 %v863_v12, %v862_v10 }
 0x135   :  { %v738_v17 = vadd.f32 %v1605_v53, %v501_v13  ;;  %v756_v18 = vadd.f32 %v1605_v53, %v573_v14  ;;  %v503_v19 = vpop.f32.mrb[17].mxu0  ;;  %v575_v20 = vpop.f32.mrb[17].mxu1 }
 0x136   :  { %v504_v21 = vpop.f32.mrb[18].mxu0  ;;  %v576_v22 = vpop.f32.mrb[18].mxu1  ;;  %1275 = vst [vmem:[%s1700_s3 + $0x18] sm:$0xff] %v1201_v15   ;;  %1284 = vst [vmem:[%s1700_s3 + $0x60] sm:$0xff] %v1246_v16  }
 0x137   :  { %v810_v23 = vmul.f32 0.1, %v738_v17  ;;  %v828_v24 = vmul.f32 0.1, %v756_v18  ;;  %v739_v25 = vadd.f32 %v1605_v53, %v504_v21  ;;  %v757_v26 = vadd.f32 %v1605_v53, %v576_v22  ;;  %v506_v27 = vpop.f32.mrb[19].mxu0  ;;  %v578_v28 = vpop.f32.mrb[19].mxu1 }
 0x138   :  { %vm774_vm0 = vcmp.ge.f32.partialorder %v738_v17, 0.0  ;;  %vm792_vm1 = vcmp.ge.f32.partialorder %v756_v18, 0.0 }
 0x139   :  { %vm775_vm2 = vcmp.ge.f32.partialorder %v739_v25, 0.0  ;;  %v811_v29 = vmul.f32 0.1, %v739_v25  ;;  %vm793_vm3 = vcmp.ge.f32.partialorder %v757_v26, 0.0  ;;  %v829_v30 = vmul.f32 0.1, %v757_v26 }
 0x13a   :  { %v846_v31 = vsel %vm774_vm0, %v738_v17, %v810_v23  ;;  %v864_v32 = vsel %vm792_vm1, %v756_v18, %v828_v24 }
 0x13b   :  { %v847_v33 = vsel %vm775_vm2, %v739_v25, %v811_v29  ;;  %v865_v34 = vsel %vm793_vm3, %v757_v26, %v829_v30 }
 0x13c   :  { %v509_v35 = vpop.f32.mrb[20].mxu0  ;;  %v581_v36 = vpop.f32.mrb[20].mxu1  ;;  %v1206_v37 = vpack.c.bf16 %v847_v33, %v846_v31  ;;  %v1251_v38 = vpack.c.bf16 %v865_v34, %v864_v32 }
 0x13d   :  { %v740_v39 = vadd.f32 %v1605_v53, %v509_v35  ;;  %v758_v40 = vadd.f32 %v1605_v53, %v581_v36  ;;  %v511_v41 = vpop.f32.mrb[21].mxu0  ;;  %v583_v42 = vpop.f32.mrb[21].mxu1 }
 0x13e   :  { %v512_v43 = vpop.f32.mrb[22].mxu0  ;;  %v584_v44 = vpop.f32.mrb[22].mxu1  ;;  %1276 = vst [vmem:[%s1700_s3 + $0x20] sm:$0xff] %v1206_v37   ;;  %1285 = vst [vmem:[%s1700_s3 + $0x68] sm:$0xff] %v1251_v38  }
 0x13f   :  { %v812_v45 = vmul.f32 0.1, %v740_v39  ;;  %v830_v46 = vmul.f32 0.1, %v758_v40  ;;  %v741_v47 = vadd.f32 %v1605_v53, %v512_v43  ;;  %v759_v48 = vadd.f32 %v1605_v53, %v584_v44  ;;  %v514_v49 = vpop.f32.mrb[23].mxu0  ;;  %v586_v50 = vpop.f32.mrb[23].mxu1 }
 0x140   :  { %vm776_vm4 = vcmp.ge.f32.partialorder %v740_v39, 0.0  ;;  %vm794_vm5 = vcmp.ge.f32.partialorder %v758_v40, 0.0 }
 0x141   :  { %vm777_vm6 = vcmp.ge.f32.partialorder %v741_v47, 0.0  ;;  %v813_v51 = vmul.f32 0.1, %v741_v47  ;;  %vm795_vm7 = vcmp.ge.f32.partialorder %v759_v48, 0.0  ;;  %v831_v52 = vmul.f32 0.1, %v759_v48 }
 0x142   :  { %v848_v54 = vsel %vm776_vm4, %v740_v39, %v812_v45  ;;  %v866_v55 = vsel %vm794_vm5, %v758_v40, %v830_v46 }
 0x143   :  { %v849_v56 = vsel %vm777_vm6, %v741_v47, %v813_v51  ;;  %v867_v57 = vsel %vm795_vm7, %v759_v48, %v831_v52 }
 0x144   :  { %v517_v58 = vpop.f32.mrb[24].mxu0  ;;  %v589_v59 = vpop.f32.mrb[24].mxu1  ;;  %v1211_v60 = vpack.c.bf16 %v849_v56, %v848_v54  ;;  %v1256_v61 = vpack.c.bf16 %v867_v57, %v866_v55 }
 0x145   :  { %v742_v62 = vadd.f32 %v1605_v53, %v517_v58  ;;  %v760_v63 = vadd.f32 %v1605_v53, %v589_v59  ;;  %v519_v0 = vpop.f32.mrb[25].mxu0  ;;  %v591_v1 = vpop.f32.mrb[25].mxu1 }
 0x146   :  { %v520_v2 = vpop.f32.mrb[26].mxu0  ;;  %v592_v3 = vpop.f32.mrb[26].mxu1  ;;  %1277 = vst [vmem:[%s1700_s3 + $0x28] sm:$0xff] %v1211_v60   ;;  %1286 = vst [vmem:[%s1700_s3 + $0x70] sm:$0xff] %v1256_v61  }
 0x147   :  { %v814_v4 = vmul.f32 0.1, %v742_v62  ;;  %v832_v5 = vmul.f32 0.1, %v760_v63  ;;  %v743_v6 = vadd.f32 %v1605_v53, %v520_v2  ;;  %v761_v7 = vadd.f32 %v1605_v53, %v592_v3  ;;  %v522_v8 = vpop.f32.mrb[27].mxu0  ;;  %v594_v9 = vpop.f32.mrb[27].mxu1 }
 0x148   :  { %vm778_vm8 = vcmp.ge.f32.partialorder %v742_v62, 0.0  ;;  %vm796_vm9 = vcmp.ge.f32.partialorder %v760_v63, 0.0 }
 0x149   :  { %vm779_vm10 = vcmp.ge.f32.partialorder %v743_v6, 0.0  ;;  %v815_v10 = vmul.f32 0.1, %v743_v6  ;;  %vm797_vm11 = vcmp.ge.f32.partialorder %v761_v7, 0.0  ;;  %v833_v11 = vmul.f32 0.1, %v761_v7 }
 0x14a   :  { %v850_v12 = vsel %vm778_vm8, %v742_v62, %v814_v4  ;;  %v868_v13 = vsel %vm796_vm9, %v760_v63, %v832_v5 }
 0x14b   :  { %v851_v14 = vsel %vm779_vm10, %v743_v6, %v815_v10  ;;  %v869_v15 = vsel %vm797_vm11, %v761_v7, %v833_v11 }
 0x14c   :  { %v525_v16 = vpop.f32.mrb[28].mxu0  ;;  %v597_v17 = vpop.f32.mrb[28].mxu1  ;;  %v1216_v18 = vpack.c.bf16 %v851_v14, %v850_v12  ;;  %v1261_v19 = vpack.c.bf16 %v869_v15, %v868_v13 }
 0x14d   :  { %v744_v20 = vadd.f32 %v1605_v53, %v525_v16  ;;  %v762_v21 = vadd.f32 %v1605_v53, %v597_v17  ;;  %v527_v22 = vpop.f32.mrb[29].mxu0  ;;  %v599_v23 = vpop.f32.mrb[29].mxu1 }
 0x14e   :  { %v528_v24 = vpop.f32.mrb[30].mxu0  ;;  %v600_v25 = vpop.f32.mrb[30].mxu1  ;;  %1278 = vst [vmem:[%s1700_s3 + $0x30] sm:$0xff] %v1216_v18   ;;  %1287 = vst [vmem:[%s1700_s3 + $0x78] sm:$0xff] %v1261_v19  }
 0x14f   :  { %v816_v26 = vmul.f32 0.1, %v744_v20  ;;  %v834_v27 = vmul.f32 0.1, %v762_v21  ;;  %v745_v28 = vadd.f32 %v1605_v53, %v528_v24  ;;  %v763_v29 = vadd.f32 %v1605_v53, %v600_v25  ;;  %v530_v30 = vpop.f32.mrb[31].mxu0  ;;  %v602_v31 = vpop.f32.mrb[31].mxu1 }
 0x150   :  { %vm780_vm12 = vcmp.ge.f32.partialorder %v744_v20, 0.0  ;;  %vm798_vm13 = vcmp.ge.f32.partialorder %v762_v21, 0.0 }
 0x151   :  { %vm781_vm14 = vcmp.ge.f32.partialorder %v745_v28, 0.0  ;;  %v817_v32 = vmul.f32 0.1, %v745_v28  ;;  %vm799_vm15 = vcmp.ge.f32.partialorder %v763_v29, 0.0  ;;  %v835_v33 = vmul.f32 0.1, %v763_v29 }
 0x152   :  { %v852_v34 = vsel %vm780_vm12, %v744_v20, %v816_v26  ;;  %v870_v35 = vsel %vm798_vm13, %v762_v21, %v834_v27 }
 0x153   :  { %v853_v36 = vsel %vm781_vm14, %v745_v28, %v817_v32  ;;  %v871_v37 = vsel %vm799_vm15, %v763_v29, %v835_v33 }
 0x154   :  { %v533_v38 = vpop.f32.mrb[32].mxu0  ;;  %v605_v39 = vpop.f32.mrb[32].mxu1  ;;  %v1221_v40 = vpack.c.bf16 %v853_v36, %v852_v34  ;;  %v1266_v41 = vpack.c.bf16 %v871_v37, %v870_v35 }
 0x155   :  { %v746_v42 = vadd.f32 %v1605_v53, %v533_v38  ;;  %v764_v43 = vadd.f32 %v1605_v53, %v605_v39  ;;  %v535_v44 = vpop.f32.mrb[33].mxu0  ;;  %v607_v45 = vpop.f32.mrb[33].mxu1 }
 0x156   :  { %v536_v46 = vpop.f32.mrb[34].mxu0  ;;  %v608_v47 = vpop.f32.mrb[34].mxu1  ;;  %1279 = vst [vmem:[%s1700_s3 + $0x38] sm:$0xff] %v1221_v40   ;;  %1288 = vst [vmem:[%s1700_s3 + $0x80] sm:$0xff] %v1266_v41  }
 0x157   :  { %v818_v48 = vmul.f32 0.1, %v746_v42  ;;  %v836_v49 = vmul.f32 0.1, %v764_v43  ;;  %v747_v50 = vadd.f32 %v1605_v53, %v536_v46  ;;  %v765_v51 = vadd.f32 %v1605_v53, %v608_v47  ;;  %v538_v52 = vpop.f32.mrb[35].mxu0  ;;  %v610_v54 = vpop.f32.mrb[35].mxu1 }
 0x158   :  { %vm782_vm0 = vcmp.ge.f32.partialorder %v746_v42, 0.0  ;;  %vm800_vm1 = vcmp.ge.f32.partialorder %v764_v43, 0.0 }
 0x159   :  { %vm783_vm2 = vcmp.ge.f32.partialorder %v747_v50, 0.0  ;;  %v819_v55 = vmul.f32 0.1, %v747_v50  ;;  %vm801_vm3 = vcmp.ge.f32.partialorder %v765_v51, 0.0  ;;  %v837_v56 = vmul.f32 0.1, %v765_v51 }
 0x15a   :  { %v854_v57 = vsel %vm782_vm0, %v746_v42, %v818_v48  ;;  %v872_v58 = vsel %vm800_vm1, %v764_v43, %v836_v49 }
 0x15b   :  { %v855_v59 = vsel %vm783_vm2, %v747_v50, %v819_v55  ;;  %v873_v60 = vsel %vm801_vm3, %v765_v51, %v837_v56 }
 0x15c   :  { %v1226_v61 = vpack.c.bf16 %v855_v59, %v854_v57  ;;  %v1271_v62 = vpack.c.bf16 %v873_v60, %v872_v58 }
 0x15e   :  { %1280 = vst [vmem:[%s1700_s3 + $0x40] sm:$0xff] %v1226_v61   ;;  %1289 = vst [vmem:[%s1700_s3 + $0x88] sm:$0xff] %v1271_v62  }

// kernel: upconv7_forward.22
= control target key start
LH: loop header
LB: loop body
LE: loop exit
PB: predicated region body
PF: predicated region fallthrough
CT: control target
= control target key end

     0   :  { %v1577_v1 = vmov 0.0   ;;  %vm1578_vm0 = vmmov 0   ;;  %s1892_s1 = inlined_call_operand.vmem [shape: bf16[384,128], index: 1, kind: input, shape index: {}]   ;;  %s1893_s0 = inlined_call_operand.vmem [shape: bf16[208,384], index: 0, kind: input, shape index: {}]   ;;  %s1894_s2 = inlined_call_operand.vmem [shape: f32[1,128], index: 2, kind: input, shape index: {}]   ;;  %s1895_s3 = inlined_call_operand.vmem [shape: bf16[208,128], index: 3, kind: output, shape index: {}]  }
   0x1   :  { %v1501_v0 = vld [vmem:[%s1892_s1 + $0x40] sm:$0xff]   ;;  %1431 = vmatprep.subr.bf16.mxu1 %v1577_v1  ;;  %1447 = vmatprep.mubr.msk.bf16.mxu1 %vm1578_vm0, %v1577_v1  ;;  %v1504_v4 = vld [vmem:[%s1892_s1 + $0x48] sm:$0xff]   ;;  %v1507_v7 = vld [vmem:[%s1892_s1 + $0x50] sm:$0xff]  }
   0x2   :  { %v1502_v2 = vld [vmem:[%s1892_s1] sm:$0xff]   ;;  %1316 = vmatprep.subr.bf16.mxu0 %v1501_v0  ;;  %v1505_v5 = vld [vmem:[%s1892_s1 + $0x8] sm:$0xff]   ;;  %v1508_v8 = vld [vmem:[%s1892_s1 + $0x10] sm:$0xff]  }
   0x3   :  { %v1503_v3 = vld [vmem:[%s1892_s1 + $0x80] sm:$0xff]   ;;  %1317 = vmatpush3.bf16.msra.mxu0 %v1502_v2  ;;  %v1506_v6 = vld [vmem:[%s1892_s1 + $0x88] sm:$0xff]   ;;  %v1509_v9 = vld [vmem:[%s1892_s1 + $0x90] sm:$0xff]  }
   0x4   :  { %1432 = vmatpush3.bf16.msra.mxu1 %v1503_v3  ;;  %1318 = vmatprep.subr.bf16.mxu0 %v1504_v4  ;;  %v1510_v10 = vld [vmem:[%s1892_s1 + $0x58] sm:$0xff]   ;;  %v1513_v13 = vld [vmem:[%s1892_s1 + $0x60] sm:$0xff]   ;;  %v1516_v16 = vld [vmem:[%s1892_s1 + $0x68] sm:$0xff]  }
   0x5   :  { %1433 = vmatprep.subr.bf16.mxu1 %v1577_v1  ;;  %v1511_v11 = vld [vmem:[%s1892_s1 + $0x18] sm:$0xff]   ;;  %v1514_v14 = vld [vmem:[%s1892_s1 + $0x20] sm:$0xff]   ;;  %v1517_v17 = vld [vmem:[%s1892_s1 + $0x28] sm:$0xff]  }
   0x6   :  { %v1512_v12 = vld [vmem:[%s1892_s1 + $0x98] sm:$0xff]   ;;  %v1515_v15 = vld [vmem:[%s1892_s1 + $0xa0] sm:$0xff]   ;;  %v1518_v18 = vld [vmem:[%s1892_s1 + $0xa8] sm:$0xff]  }
   0x7   :  { %1319 = vmatpush3.bf16.msra.mxu0 %v1505_v5  ;;  %v1519_v19 = vld [vmem:[%s1892_s1 + $0x70] sm:$0xff]   ;;  %v1522_v22 = vld [vmem:[%s1892_s1 + $0x78] sm:$0xff]   ;;  %v1525_v26 = vld [vmem:[%s1893_s0] ss:$12 sps:$4 sm:$0xff]  }
   0x8   :  { %1434 = vmatpush3.bf16.msra.mxu1 %v1506_v6  ;;  %1320 = vmatprep.subr.bf16.mxu0 %v1507_v7  ;;  %v1520_v20 = vld [vmem:[%s1892_s1 + $0x30] sm:$0xff]   ;;  %v1523_v24 = vld [vmem:[%s1892_s1 + $0x38] sm:$0xff]   ;;  %v1532_v30 = vld [vmem:[%s1893_s0 + $0x20] ss:$12 sps:$4 sm:$0xff]  }
   0x9   :  { %1435 = vmatprep.subr.bf16.mxu1 %v1577_v1  ;;  %v1521_v21 = vld [vmem:[%s1892_s1 + $0xb0] sm:$0xff]   ;;  %v1524_v25 = vld [vmem:[%s1892_s1 + $0xb8] sm:$0xff]   ;;  %v1543_v38 = vld [vmem:[%s1893_s0 + $0x60] ss:$12 sps:$4 sm:$0xff]  }
   0xa   :  { %v1527_v23 = vld [vmem:[%s1893_s0 + $0x4] ss:$12 sps:$4 sm:$0xff]   ;;  %v1528_v27 = vld [vmem:[%s1893_s0 + $0x8] ss:$12 sps:$4 sm:$0xff]   ;;  %v1537_v34 = vld [vmem:[%s1893_s0 + $0x4c] ss:$12 sps:$4 sm:$0xff]  }
   0xb   :  { %1321 = vmatpush3.bf16.msra.mxu0 %v1508_v8  ;;  %555 = vmatprep.mubr.bf16.mxu0 %v1527_v23  ;;  %v1529_v28 = vld [vmem:[%s1893_s0 + $0x1c] ss:$12 sps:$4 sm:$0xff]   ;;  %v1531_v29 = vld [vmem:[%s1893_s0 + $0x18] ss:$12 sps:$4 sm:$0xff]   ;;  %v1533_v31 = vld [vmem:[%s1893_s0 + $0x34] ss:$12 sps:$4 sm:$0xff]  }
   0xc   :  { %1436 = vmatpush3.bf16.msra.mxu1 %v1509_v9  ;;  %1322 = vmatprep.subr.bf16.mxu0 %v1510_v10  ;;  %v1535_v32 = vld [vmem:[%s1893_s0 + $0x30] ss:$12 sps:$4 sm:$0xff]   ;;  %v1536_v33 = vld [vmem:[%s1893_s0 + $0x38] ss:$12 sps:$4 sm:$0xff]   ;;  %v1539_v35 = vld [vmem:[%s1893_s0 + $0x48] ss:$12 sps:$4 sm:$0xff]  }
   0xd   :  { %1437 = vmatprep.subr.bf16.mxu1 %v1577_v1  ;;  %v1540_v36 = vld [vmem:[%s1893_s0 + $0x50] ss:$12 sps:$4 sm:$0xff]   ;;  %v1544_v39 = vld [vmem:[%s1893_s0 + $0x68] ss:$12 sps:$4 sm:$0xff]   ;;  %v1547_v41 = vld [vmem:[%s1893_s0 + $0x78] ss:$12 sps:$4 sm:$0xff]  }
   0xe   :  { %v1541_v37 = vld [vmem:[%s1893_s0 + $0x64] ss:$12 sps:$4 sm:$0xff]   ;;  %v1545_v40 = vld [vmem:[%s1893_s0 + $0x7c] ss:$12 sps:$4 sm:$0xff]   ;;  %v1548_v42 = vld [vmem:[%s1893_s0 + $0x80] ss:$12 sps:$4 sm:$0xff]  }
   0xf   :  { %1323 = vmatpush3.bf16.msra.mxu0 %v1511_v11  ;;  %v1549_v43 = vld [vmem:[%s1893_s0 + $0x94] ss:$12 sps:$4 sm:$0xff]   ;;  %v1551_v44 = vld [vmem:[%s1893_s0 + $0x90] ss:$12 sps:$4 sm:$0xff]   ;;  %v1552_v45 = vld [vmem:[%s1893_s0 + $0x98] ss:$12 sps:$4 sm:$0xff]  }
  0x10   :  { %1438 = vmatpush3.bf16.msra.mxu1 %v1512_v12  ;;  %1324 = vmatprep.subr.bf16.mxu0 %v1513_v13  ;;  %v1553_v46 = vld [vmem:[%s1893_s0 + $0xac] ss:$12 sps:$4 sm:$0xff]   ;;  %v1555_v47 = vld [vmem:[%s1893_s0 + $0xa8] ss:$12 sps:$4 sm:$0xff]   ;;  %v1556_v48 = vld [vmem:[%s1893_s0 + $0xb0] ss:$12 sps:$4 sm:$0xff]  }
  0x11   :  { %1439 = vmatprep.subr.bf16.mxu1 %v1577_v1  ;;  %v1557_v49 = vld [vmem:[%s1893_s0 + $0xc4] ss:$12 sps:$4 sm:$0xff]   ;;  %v1559_v50 = vld [vmem:[%s1893_s0 + $0xc0] ss:$12 sps:$4 sm:$0xff]   ;;  %v1560_v51 = vld [vmem:[%s1893_s0 + $0xc8] ss:$12 sps:$4 sm:$0xff]  }
  0x12   :  { %v1561_v52 = vld [vmem:[%s1893_s0 + $0xdc] ss:$12 sps:$4 sm:$0xff]   ;;  %v1563_v53 = vld [vmem:[%s1893_s0 + $0xd8] ss:$12 sps:$4 sm:$0xff]   ;;  %v1564_v54 = vld [vmem:[%s1893_s0 + $0xe0] ss:$12 sps:$4 sm:$0xff]  }
  0x13   :  { %1325 = vmatpush3.bf16.msra.mxu0 %v1514_v14  ;;  %v1565_v55 = vld [vmem:[%s1893_s0 + $0xf4] ss:$12 sps:$4 sm:$0xff]   ;;  %v1567_v56 = vld [vmem:[%s1893_s0 + $0xf0] ss:$12 sps:$4 sm:$0xff]   ;;  %v1568_v57 = vld [vmem:[%s1893_s0 + $0xf8] ss:$12 sps:$4 sm:$0xff]  }
  0x14   :  { %1440 = vmatpush3.bf16.msra.mxu1 %v1515_v15  ;;  %1326 = vmatprep.subr.bf16.mxu0 %v1516_v16  ;;  %v1569_v58 = vld [vmem:[%s1893_s0 + $0x10c] ss:$12 sps:$4 sm:$0xff]   ;;  %v1571_v59 = vld [vmem:[%s1893_s0 + $0x108] ss:$12 sps:$4 sm:$0xff]   ;;  %v1572_v60 = vld [vmem:[%s1893_s0 + $0x110] ss:$12 sps:$4 sm:$0xff]  }
  0x15   :  { %1441 = vmatprep.subr.bf16.mxu1 %v1577_v1  ;;  %v1573_v61 = vld [vmem:[%s1893_s0 + $0x124] ss:$12 sps:$4 sm:$0xff]   ;;  %v1575_v62 = vld [vmem:[%s1893_s0 + $0x120] ss:$12 sps:$4 sm:$0xff]   ;;  %v1576_v63 = vld [vmem:[%s1893_s0 + $0x128] ss:$12 sps:$4 sm:$0xff]  }
  0x17   :  { %1327 = vmatpush3.bf16.msra.mxu0 %v1517_v17 }
  0x18   :  { %1442 = vmatpush3.bf16.msra.mxu1 %v1518_v18  ;;  %1328 = vmatprep.subr.bf16.mxu0 %v1519_v19 }
  0x19   :  { %1443 = vmatprep.subr.bf16.mxu1 %v1577_v1 }
  0x1b   :  { %1329 = vmatpush3.bf16.msra.mxu0 %v1520_v20 }
  0x1c   :  { %1444 = vmatpush3.bf16.msra.mxu1 %v1521_v21  ;;  %1330 = vmatprep.subr.bf16.mxu0 %v1522_v22 }
  0x1d   :  { %1445 = vmatprep.subr.bf16.mxu1 %v1577_v1 }
  0x1f   :  { %1331 = vmatpush3.bf16.msra.mxu0 %v1523_v24 }
  0x20   :  { %1446 = vmatpush3.bf16.msra.mxu1 %v1524_v25 }
  0x22   :  { %556 = vmatmul.mubr.bf16.vlgmr.msra.gmra.mrb[0].mxu0 %v1525_v26 }
  0x23   :  { %1448 = vmatmul.mubr.bf16.vlgmr.msra.gmra.mrb[0].mxu1 %v1528_v27  ;;  %563 = vmatprep.mubr.bf16.mxu0 %v1529_v28 }
  0x24   :  { %1451 = vmatprep.mubr.msk.bf16.mxu1 %vm1578_vm0, %v1577_v1 }
  0x2a   :  { %564 = vmatmul.mubr.bf16.gmra.mrb[4].mxu0 %v1531_v29 }
  0x2b   :  { %1452 = vmatmul.mubr.bf16.gmra.mrb[4].mxu1 %v1532_v30  ;;  %571 = vmatprep.mubr.bf16.mxu0 %v1533_v31 }
  0x2c   :  { %1455 = vmatprep.mubr.msk.bf16.mxu1 %vm1578_vm0, %v1577_v1 }
  0x32   :  { %572 = vmatmul.mubr.bf16.gmra.mrb[8].mxu0 %v1535_v32 }
  0x33   :  { %1456 = vmatmul.mubr.bf16.gmra.mrb[8].mxu1 %v1536_v33  ;;  %579 = vmatprep.mubr.bf16.mxu0 %v1537_v34 }
  0x34   :  { %1459 = vmatprep.mubr.msk.bf16.mxu1 %vm1578_vm0, %v1577_v1 }
  0x3a   :  { %580 = vmatmul.mubr.bf16.gmra.mrb[12].mxu0 %v1539_v35 }
  0x3b   :  { %1460 = vmatmul.mubr.bf16.gmra.mrb[12].mxu1 %v1540_v36  ;;  %587 = vmatprep.mubr.bf16.mxu0 %v1541_v37 }
  0x3c   :  { %1463 = vmatprep.mubr.msk.bf16.mxu1 %vm1578_vm0, %v1577_v1 }
  0x42   :  { %588 = vmatmul.mubr.bf16.gmra.mrb[16].mxu0 %v1543_v38 }
  0x43   :  { %1464 = vmatmul.mubr.bf16.gmra.mrb[16].mxu1 %v1544_v39  ;;  %595 = vmatprep.mubr.bf16.mxu0 %v1545_v40 }
  0x44   :  { %1467 = vmatprep.mubr.msk.bf16.mxu1 %vm1578_vm0, %v1577_v1 }
  0x4a   :  { %596 = vmatmul.mubr.bf16.gmra.mrb[20].mxu0 %v1547_v41 }
  0x4b   :  { %1468 = vmatmul.mubr.bf16.gmra.mrb[20].mxu1 %v1548_v42  ;;  %603 = vmatprep.mubr.bf16.mxu0 %v1549_v43 }
  0x4c   :  { %1471 = vmatprep.mubr.msk.bf16.mxu1 %vm1578_vm0, %v1577_v1 }
  0x52   :  { %604 = vmatmul.mubr.bf16.gmra.mrb[24].mxu0 %v1551_v44 }
  0x53   :  { %1472 = vmatmul.mubr.bf16.gmra.mrb[24].mxu1 %v1552_v45  ;;  %611 = vmatprep.mubr.bf16.mxu0 %v1553_v46 }
  0x54   :  { %1475 = vmatprep.mubr.msk.bf16.mxu1 %vm1578_vm0, %v1577_v1 }
  0x5a   :  { %612 = vmatmul.mubr.bf16.gmra.mrb[28].mxu0 %v1555_v47 }
  0x5b   :  { %1476 = vmatmul.mubr.bf16.gmra.mrb[28].mxu1 %v1556_v48  ;;  %619 = vmatprep.mubr.bf16.mxu0 %v1557_v49 }
  0x5c   :  { %1479 = vmatprep.mubr.msk.bf16.mxu1 %vm1578_vm0, %v1577_v1 }
  0x62   :  { %620 = vmatmul.mubr.bf16.gmra.mrb[32].mxu0 %v1559_v50 }
  0x63   :  { %1480 = vmatmul.mubr.bf16.gmra.mrb[32].mxu1 %v1560_v51  ;;  %627 = vmatprep.mubr.bf16.mxu0 %v1561_v52 }
  0x64   :  { %1483 = vmatprep.mubr.msk.bf16.mxu1 %vm1578_vm0, %v1577_v1 }
  0x6a   :  { %628 = vmatmul.mubr.bf16.gmra.mrb[36].mxu0 %v1563_v53 }
  0x6b   :  { %1484 = vmatmul.mubr.bf16.gmra.mrb[36].mxu1 %v1564_v54  ;;  %635 = vmatprep.mubr.bf16.mxu0 %v1565_v55 }
  0x6c   :  { %1487 = vmatprep.mubr.msk.bf16.mxu1 %vm1578_vm0, %v1577_v1 }
  0x72   :  { %636 = vmatmul.mubr.bf16.gmra.mrb[40].mxu0 %v1567_v56 }
  0x73   :  { %1488 = vmatmul.mubr.bf16.gmra.mrb[40].mxu1 %v1568_v57  ;;  %643 = vmatprep.mubr.bf16.mxu0 %v1569_v58 }
  0x74   :  { %1491 = vmatprep.mubr.msk.bf16.mxu1 %vm1578_vm0, %v1577_v1 }
  0x7a   :  { %644 = vmatmul.mubr.bf16.gmra.mrb[44].mxu0 %v1571_v59 }
  0x7b   :  { %1492 = vmatmul.mubr.bf16.gmra.mrb[44].mxu1 %v1572_v60  ;;  %651 = vmatprep.mubr.bf16.mxu0 %v1573_v61 }
  0x7c   :  { %1495 = vmatprep.mubr.msk.bf16.mxu1 %vm1578_vm0, %v1577_v1  ;;  %v1825_v1 = vld [vmem:[%s1894_s2] ss:$0 sm:$0xff] }
  0x82   :  { %652 = vmatmul.mubr.bf16.gmra.mrb[48].mxu0 %v1575_v62 }
  0x83   :  { %1496 = vmatmul.mubr.bf16.gmra.mrb[48].mxu1 %v1576_v63 }
  0xf5   :  { %v1332_v0 = vpop.f32.mrb[0].mxu0 }
  0xf6   :  { %v694_v2 = vpop.f32.mrb[0].mxu1  ;;  %v1333_v3 = vpop.f32.mrb[1].mxu0 }
  0xf7   :  { %v1334_v4 = vadd.f32 %v1333_v3, %v1332_v0  ;;  %v1449_v5 = vpop.f32.mrb[1].mxu1  ;;  %v1335_v6 = vpop.f32.mrb[2].mxu0 }
  0xf8   :  { %v697_v7 = vpop.f32.mrb[2].mxu1  ;;  %v1336_v8 = vpop.f32.mrb[3].mxu0 }
  0xf9   :  { %v695_v9 = vadd.f32 %v1334_v4, %v694_v2  ;;  %v1337_v10 = vadd.f32 %v1336_v8, %v1335_v6  ;;  %v1450_v11 = vpop.f32.mrb[3].mxu1 }
  0xfb   :  { %v885_v12 = vadd.f32 %v1825_v1, %v695_v9  ;;  %v698_v13 = vadd.f32 %v1337_v10, %v697_v7 }
  0xfd   :  { %v937_v14 = vmul.f32 0.1, %v885_v12  ;;  %v886_v15 = vadd.f32 %v1825_v1, %v698_v13  ;;  %v1338_v16 = vpop.f32.mrb[4].mxu0  ;;  %vm911_vm1 = vcmp.ge.f32.partialorder %v885_v12, 0.0 }
  0xfe   :  { %v702_v17 = vpop.f32.mrb[4].mxu1  ;;  %v1339_v18 = vpop.f32.mrb[5].mxu0 }
  0xff   :  { %vm912_vm2 = vcmp.ge.f32.partialorder %v886_v15, 0.0  ;;  %v938_v19 = vmul.f32 0.1, %v886_v15  ;;  %v1340_v20 = vadd.f32 %v1339_v18, %v1338_v16  ;;  %v1453_v21 = vpop.f32.mrb[5].mxu1  ;;  %v1341_v22 = vpop.f32.mrb[6].mxu0  ;;  %v963_v25 = vsel %vm911_vm1, %v885_v12, %v937_v14 }
 0x100   :  { %v705_v23 = vpop.f32.mrb[6].mxu1  ;;  %v1342_v24 = vpop.f32.mrb[7].mxu0 }
 0x101   :  { %v964_v26 = vsel %vm912_vm2, %v886_v15, %v938_v19  ;;  %v703_v27 = vadd.f32 %v1340_v20, %v702_v17  ;;  %v1343_v28 = vadd.f32 %v1342_v24, %v1341_v22  ;;  %v1454_v29 = vpop.f32.mrb[7].mxu1 }
 0x102   :  { %v1242_v30 = vpack.c.bf16 %v964_v26, %v963_v25 }
 0x103   :  { %v887_v31 = vadd.f32 %v1825_v1, %v703_v27  ;;  %v706_v32 = vadd.f32 %v1343_v28, %v705_v23 }
 0x104   :  { %1243 = vst [vmem:[%s1895_s3] sm:$0xff] %v1242_v30  }
 0x105   :  { %v939_v33 = vmul.f32 0.1, %v887_v31  ;;  %v888_v34 = vadd.f32 %v1825_v1, %v706_v32  ;;  %v1344_v35 = vpop.f32.mrb[8].mxu0  ;;  %vm913_vm3 = vcmp.ge.f32.partialorder %v887_v31, 0.0 }
 0x106   :  { %v710_v36 = vpop.f32.mrb[8].mxu1  ;;  %v1345_v37 = vpop.f32.mrb[9].mxu0 }
 0x107   :  { %vm914_vm4 = vcmp.ge.f32.partialorder %v888_v34, 0.0  ;;  %v940_v38 = vmul.f32 0.1, %v888_v34  ;;  %v1346_v39 = vadd.f32 %v1345_v37, %v1344_v35  ;;  %v1457_v40 = vpop.f32.mrb[9].mxu1  ;;  %v1347_v41 = vpop.f32.mrb[10].mxu0  ;;  %v965_v44 = vsel %vm913_vm3, %v887_v31, %v939_v33 }
 0x108   :  { %v713_v42 = vpop.f32.mrb[10].mxu1  ;;  %v1348_v43 = vpop.f32.mrb[11].mxu0 }
 0x109   :  { %v966_v45 = vsel %vm914_vm4, %v888_v34, %v940_v38  ;;  %v711_v46 = vadd.f32 %v1346_v39, %v710_v36  ;;  %v1349_v47 = vadd.f32 %v1348_v43, %v1347_v41  ;;  %v1458_v48 = vpop.f32.mrb[11].mxu1 }
 0x10a   :  { %v1247_v49 = vpack.c.bf16 %v966_v45, %v965_v44 }
 0x10b   :  { %v889_v50 = vadd.f32 %v1825_v1, %v711_v46  ;;  %v714_v51 = vadd.f32 %v1349_v47, %v713_v42 }
 0x10c   :  { %1304 = vst [vmem:[%s1895_s3 + $0x8] sm:$0xff] %v1247_v49  }
 0x10d   :  { %v941_v52 = vmul.f32 0.1, %v889_v50  ;;  %v890_v53 = vadd.f32 %v1825_v1, %v714_v51  ;;  %v1350_v54 = vpop.f32.mrb[12].mxu0  ;;  %vm915_vm5 = vcmp.ge.f32.partialorder %v889_v50, 0.0 }
 0x10e   :  { %v718_v55 = vpop.f32.mrb[12].mxu1  ;;  %v1351_v56 = vpop.f32.mrb[13].mxu0 }
 0x10f   :  { %vm916_vm6 = vcmp.ge.f32.partialorder %v890_v53, 0.0  ;;  %v942_v57 = vmul.f32 0.1, %v890_v53  ;;  %v1352_v58 = vadd.f32 %v1351_v56, %v1350_v54  ;;  %v1461_v59 = vpop.f32.mrb[13].mxu1  ;;  %v1353_v60 = vpop.f32.mrb[14].mxu0  ;;  %v967_v63 = vsel %vm915_vm5, %v889_v50, %v941_v52 }
 0x110   :  { %v721_v61 = vpop.f32.mrb[14].mxu1  ;;  %v1354_v62 = vpop.f32.mrb[15].mxu0 }
 0x111   :  { %v968_v0 = vsel %vm916_vm6, %v890_v53, %v942_v57  ;;  %v719_v2 = vadd.f32 %v1352_v58, %v718_v55  ;;  %v1355_v3 = vadd.f32 %v1354_v62, %v1353_v60  ;;  %v1462_v4 = vpop.f32.mrb[15].mxu1 }
 0x112   :  { %v1252_v5 = vpack.c.bf16 %v968_v0, %v967_v63 }
 0x113   :  { %v891_v6 = vadd.f32 %v1825_v1, %v719_v2  ;;  %v722_v7 = vadd.f32 %v1355_v3, %v721_v61 }
 0x114   :  { %1305 = vst [vmem:[%s1895_s3 + $0x10] sm:$0xff] %v1252_v5  }
 0x115   :  { %v943_v8 = vmul.f32 0.1, %v891_v6  ;;  %v892_v9 = vadd.f32 %v1825_v1, %v722_v7  ;;  %v1356_v10 = vpop.f32.mrb[16].mxu0  ;;  %vm917_vm7 = vcmp.ge.f32.partialorder %v891_v6, 0.0 }
 0x116   :  { %v726_v11 = vpop.f32.mrb[16].mxu1  ;;  %v1357_v12 = vpop.f32.mrb[17].mxu0 }
 0x117   :  { %vm918_vm8 = vcmp.ge.f32.partialorder %v892_v9, 0.0  ;;  %v944_v13 = vmul.f32 0.1, %v892_v9  ;;  %v1358_v14 = vadd.f32 %v1357_v12, %v1356_v10  ;;  %v1465_v15 = vpop.f32.mrb[17].mxu1  ;;  %v1359_v16 = vpop.f32.mrb[18].mxu0  ;;  %v969_v19 = vsel %vm917_vm7, %v891_v6, %v943_v8 }
 0x118   :  { %v729_v17 = vpop.f32.mrb[18].mxu1  ;;  %v1360_v18 = vpop.f32.mrb[19].mxu0 }
 0x119   :  { %v970_v20 = vsel %vm918_vm8, %v892_v9, %v944_v13  ;;  %v727_v21 = vadd.f32 %v1358_v14, %v726_v11  ;;  %v1361_v22 = vadd.f32 %v1360_v18, %v1359_v16  ;;  %v1466_v23 = vpop.f32.mrb[19].mxu1 }
 0x11a   :  { %v1257_v24 = vpack.c.bf16 %v970_v20, %v969_v19 }
 0x11b   :  { %v893_v25 = vadd.f32 %v1825_v1, %v727_v21  ;;  %v730_v26 = vadd.f32 %v1361_v22, %v729_v17 }
 0x11c   :  { %1306 = vst [vmem:[%s1895_s3 + $0x18] sm:$0xff] %v1257_v24  }
 0x11d   :  { %v945_v27 = vmul.f32 0.1, %v893_v25  ;;  %v894_v28 = vadd.f32 %v1825_v1, %v730_v26  ;;  %v1362_v29 = vpop.f32.mrb[20].mxu0  ;;  %vm919_vm9 = vcmp.ge.f32.partialorder %v893_v25, 0.0 }
 0x11e   :  { %v734_v30 = vpop.f32.mrb[20].mxu1  ;;  %v1363_v31 = vpop.f32.mrb[21].mxu0 }
 0x11f   :  { %vm920_vm10 = vcmp.ge.f32.partialorder %v894_v28, 0.0  ;;  %v946_v32 = vmul.f32 0.1, %v894_v28  ;;  %v1364_v33 = vadd.f32 %v1363_v31, %v1362_v29  ;;  %v1469_v34 = vpop.f32.mrb[21].mxu1  ;;  %v1365_v35 = vpop.f32.mrb[22].mxu0  ;;  %v971_v38 = vsel %vm919_vm9, %v893_v25, %v945_v27 }
 0x120   :  { %v737_v36 = vpop.f32.mrb[22].mxu1  ;;  %v1366_v37 = vpop.f32.mrb[23].mxu0 }
 0x121   :  { %v972_v39 = vsel %vm920_vm10, %v894_v28, %v946_v32  ;;  %v735_v40 = vadd.f32 %v1364_v33, %v734_v30  ;;  %v1367_v41 = vadd.f32 %v1366_v37, %v1365_v35  ;;  %v1470_v42 = vpop.f32.mrb[23].mxu1 }
 0x122   :  { %v1262_v43 = vpack.c.bf16 %v972_v39, %v971_v38 }
 0x123   :  { %v895_v44 = vadd.f32 %v1825_v1, %v735_v40  ;;  %v738_v45 = vadd.f32 %v1367_v41, %v737_v36 }
 0x124   :  { %1307 = vst [vmem:[%s1895_s3 + $0x20] sm:$0xff] %v1262_v43  }
 0x125   :  { %v947_v46 = vmul.f32 0.1, %v895_v44  ;;  %v896_v47 = vadd.f32 %v1825_v1, %v738_v45  ;;  %v1368_v48 = vpop.f32.mrb[24].mxu0  ;;  %vm921_vm11 = vcmp.ge.f32.partialorder %v895_v44, 0.0 }
 0x126   :  { %v742_v49 = vpop.f32.mrb[24].mxu1  ;;  %v1369_v50 = vpop.f32.mrb[25].mxu0 }
 0x127   :  { %vm922_vm12 = vcmp.ge.f32.partialorder %v896_v47, 0.0  ;;  %v948_v51 = vmul.f32 0.1, %v896_v47  ;;  %v1370_v52 = vadd.f32 %v1369_v50, %v1368_v48  ;;  %v1473_v53 = vpop.f32.mrb[25].mxu1  ;;  %v1371_v54 = vpop.f32.mrb[26].mxu0  ;;  %v973_v57 = vsel %vm921_vm11, %v895_v44, %v947_v46 }
 0x128   :  { %v745_v55 = vpop.f32.mrb[26].mxu1  ;;  %v1372_v56 = vpop.f32.mrb[27].mxu0 }
 0x129   :  { %v974_v58 = vsel %vm922_vm12, %v896_v47, %v948_v51  ;;  %v743_v59 = vadd.f32 %v1370_v52, %v742_v49  ;;  %v1373_v60 = vadd.f32 %v1372_v56, %v1371_v54  ;;  %v1474_v61 = vpop.f32.mrb[27].mxu1 }
 0x12a   :  { %v1267_v62 = vpack.c.bf16 %v974_v58, %v973_v57 }
 0x12b   :  { %v897_v63 = vadd.f32 %v1825_v1, %v743_v59  ;;  %v746_v0 = vadd.f32 %v1373_v60, %v745_v55 }
 0x12c   :  { %1308 = vst [vmem:[%s1895_s3 + $0x28] sm:$0xff] %v1267_v62  }
 0x12d   :  { %v949_v2 = vmul.f32 0.1, %v897_v63  ;;  %v898_v3 = vadd.f32 %v1825_v1, %v746_v0  ;;  %v1374_v4 = vpop.f32.mrb[28].mxu0  ;;  %vm923_vm13 = vcmp.ge.f32.partialorder %v897_v63, 0.0 }
 0x12e   :  { %v750_v5 = vpop.f32.mrb[28].mxu1  ;;  %v1375_v6 = vpop.f32.mrb[29].mxu0 }
 0x12f   :  { %vm924_vm14 = vcmp.ge.f32.partialorder %v898_v3, 0.0  ;;  %v950_v7 = vmul.f32 0.1, %v898_v3  ;;  %v1376_v8 = vadd.f32 %v1375_v6, %v1374_v4  ;;  %v1477_v9 = vpop.f32.mrb[29].mxu1  ;;  %v1377_v10 = vpop.f32.mrb[30].mxu0  ;;  %v975_v13 = vsel %vm923_vm13, %v897_v63, %v949_v2 }
 0x130   :  { %v753_v11 = vpop.f32.mrb[30].mxu1  ;;  %v1378_v12 = vpop.f32.mrb[31].mxu0 }
 0x131   :  { %v976_v14 = vsel %vm924_vm14, %v898_v3, %v950_v7  ;;  %v751_v15 = vadd.f32 %v1376_v8, %v750_v5  ;;  %v1379_v16 = vadd.f32 %v1378_v12, %v1377_v10  ;;  %v1478_v17 = vpop.f32.mrb[31].mxu1 }
 0x132   :  { %v1272_v18 = vpack.c.bf16 %v976_v14, %v975_v13 }
 0x133   :  { %v899_v19 = vadd.f32 %v1825_v1, %v751_v15  ;;  %v754_v20 = vadd.f32 %v1379_v16, %v753_v11 }
 0x134   :  { %1309 = vst [vmem:[%s1895_s3 + $0x30] sm:$0xff] %v1272_v18  }
 0x135   :  { %v951_v21 = vmul.f32 0.1, %v899_v19  ;;  %v900_v22 = vadd.f32 %v1825_v1, %v754_v20  ;;  %v1380_v23 = vpop.f32.mrb[32].mxu0  ;;  %vm925_vm15 = vcmp.ge.f32.partialorder %v899_v19, 0.0 }
 0x136   :  { %v758_v24 = vpop.f32.mrb[32].mxu1  ;;  %v1381_v25 = vpop.f32.mrb[33].mxu0 }
 0x137   :  { %vm926_vm0 = vcmp.ge.f32.partialorder %v900_v22, 0.0  ;;  %v952_v26 = vmul.f32 0.1, %v900_v22  ;;  %v1382_v27 = vadd.f32 %v1381_v25, %v1380_v23  ;;  %v1481_v28 = vpop.f32.mrb[33].mxu1  ;;  %v1383_v29 = vpop.f32.mrb[34].mxu0  ;;  %v977_v32 = vsel %vm925_vm15, %v899_v19, %v951_v21 }
 0x138   :  { %v761_v30 = vpop.f32.mrb[34].mxu1  ;;  %v1384_v31 = vpop.f32.mrb[35].mxu0 }
 0x139   :  { %v978_v33 = vsel %vm926_vm0, %v900_v22, %v952_v26  ;;  %v759_v34 = vadd.f32 %v1382_v27, %v758_v24  ;;  %v1385_v35 = vadd.f32 %v1384_v31, %v1383_v29  ;;  %v1482_v36 = vpop.f32.mrb[35].mxu1 }
 0x13a   :  { %v1277_v37 = vpack.c.bf16 %v978_v33, %v977_v32 }
 0x13b   :  { %v901_v38 = vadd.f32 %v1825_v1, %v759_v34  ;;  %v762_v39 = vadd.f32 %v1385_v35, %v761_v30 }
 0x13c   :  { %1310 = vst [vmem:[%s1895_s3 + $0x38] sm:$0xff] %v1277_v37  }
 0x13d   :  { %v953_v40 = vmul.f32 0.1, %v901_v38  ;;  %v902_v41 = vadd.f32 %v1825_v1, %v762_v39  ;;  %v1386_v42 = vpop.f32.mrb[36].mxu0  ;;  %vm927_vm1 = vcmp.ge.f32.partialorder %v901_v38, 0.0 }
 0x13e   :  { %v766_v43 = vpop.f32.mrb[36].mxu1  ;;  %v1387_v44 = vpop.f32.mrb[37].mxu0 }
 0x13f   :  { %vm928_vm2 = vcmp.ge.f32.partialorder %v902_v41, 0.0  ;;  %v954_v45 = vmul.f32 0.1, %v902_v41  ;;  %v1388_v46 = vadd.f32 %v1387_v44, %v1386_v42  ;;  %v1485_v47 = vpop.f32.mrb[37].mxu1  ;;  %v1389_v48 = vpop.f32.mrb[38].mxu0  ;;  %v979_v51 = vsel %vm927_vm1, %v901_v38, %v953_v40 }
 0x140   :  { %v769_v49 = vpop.f32.mrb[38].mxu1  ;;  %v1390_v50 = vpop.f32.mrb[39].mxu0 }
 0x141   :  { %v980_v52 = vsel %vm928_vm2, %v902_v41, %v954_v45  ;;  %v767_v53 = vadd.f32 %v1388_v46, %v766_v43  ;;  %v1391_v54 = vadd.f32 %v1390_v50, %v1389_v48  ;;  %v1486_v55 = vpop.f32.mrb[39].mxu1 }
 0x142   :  { %v1282_v56 = vpack.c.bf16 %v980_v52, %v979_v51 }
 0x143   :  { %v903_v57 = vadd.f32 %v1825_v1, %v767_v53  ;;  %v770_v58 = vadd.f32 %v1391_v54, %v769_v49 }
 0x144   :  { %1311 = vst [vmem:[%s1895_s3 + $0x40] sm:$0xff] %v1282_v56  }
 0x145   :  { %v955_v59 = vmul.f32 0.1, %v903_v57  ;;  %v904_v60 = vadd.f32 %v1825_v1, %v770_v58  ;;  %v1392_v61 = vpop.f32.mrb[40].mxu0  ;;  %vm929_vm3 = vcmp.ge.f32.partialorder %v903_v57, 0.0 }
 0x146   :  { %v774_v62 = vpop.f32.mrb[40].mxu1  ;;  %v1393_v63 = vpop.f32.mrb[41].mxu0 }
 0x147   :  { %vm930_vm4 = vcmp.ge.f32.partialorder %v904_v60, 0.0  ;;  %v956_v0 = vmul.f32 0.1, %v904_v60  ;;  %v1394_v2 = vadd.f32 %v1393_v63, %v1392_v61  ;;  %v1489_v3 = vpop.f32.mrb[41].mxu1  ;;  %v1395_v4 = vpop.f32.mrb[42].mxu0  ;;  %v981_v7 = vsel %vm929_vm3, %v903_v57, %v955_v59 }
 0x148   :  { %v777_v5 = vpop.f32.mrb[42].mxu1  ;;  %v1396_v6 = vpop.f32.mrb[43].mxu0 }
 0x149   :  { %v982_v8 = vsel %vm930_vm4, %v904_v60, %v956_v0  ;;  %v775_v9 = vadd.f32 %v1394_v2, %v774_v62  ;;  %v1397_v10 = vadd.f32 %v1396_v6, %v1395_v4  ;;  %v1490_v11 = vpop.f32.mrb[43].mxu1 }
 0x14a   :  { %v1287_v12 = vpack.c.bf16 %v982_v8, %v981_v7 }
 0x14b   :  { %v905_v13 = vadd.f32 %v1825_v1, %v775_v9  ;;  %v778_v14 = vadd.f32 %v1397_v10, %v777_v5 }
 0x14c   :  { %1312 = vst [vmem:[%s1895_s3 + $0x48] sm:$0xff] %v1287_v12  }
 0x14d   :  { %v957_v15 = vmul.f32 0.1, %v905_v13  ;;  %v906_v16 = vadd.f32 %v1825_v1, %v778_v14  ;;  %v1398_v17 = vpop.f32.mrb[44].mxu0  ;;  %vm931_vm5 = vcmp.ge.f32.partialorder %v905_v13, 0.0 }
 0x14e   :  { %v782_v18 = vpop.f32.mrb[44].mxu1  ;;  %v1399_v19 = vpop.f32.mrb[45].mxu0 }
 0x14f   :  { %vm932_vm6 = vcmp.ge.f32.partialorder %v906_v16, 0.0  ;;  %v958_v20 = vmul.f32 0.1, %v906_v16  ;;  %v1400_v21 = vadd.f32 %v1399_v19, %v1398_v17  ;;  %v1493_v22 = vpop.f32.mrb[45].mxu1  ;;  %v1401_v23 = vpop.f32.mrb[46].mxu0  ;;  %v983_v26 = vsel %vm931_vm5, %v905_v13, %v957_v15 }
 0x150   :  { %v785_v24 = vpop.f32.mrb[46].mxu1  ;;  %v1402_v25 = vpop.f32.mrb[47].mxu0 }
 0x151   :  { %v984_v27 = vsel %vm932_vm6, %v906_v16, %v958_v20  ;;  %v783_v28 = vadd.f32 %v1400_v21, %v782_v18  ;;  %v1403_v29 = vadd.f32 %v1402_v25, %v1401_v23  ;;  %v1494_v30 = vpop.f32.mrb[47].mxu1 }
 0x152   :  { %v1292_v31 = vpack.c.bf16 %v984_v27, %v983_v26 }
 0x153   :  { %v907_v32 = vadd.f32 %v1825_v1, %v783_v28  ;;  %v786_v33 = vadd.f32 %v1403_v29, %v785_v24 }
 0x154   :  { %1313 = vst [vmem:[%s1895_s3 + $0x50] sm:$0xff] %v1292_v31  }
 0x155   :  { %v959_v34 = vmul.f32 0.1, %v907_v32  ;;  %v908_v35 = vadd.f32 %v1825_v1, %v786_v33  ;;  %v1404_v36 = vpop.f32.mrb[48].mxu0  ;;  %vm933_vm7 = vcmp.ge.f32.partialorder %v907_v32, 0.0 }
 0x156   :  { %v790_v37 = vpop.f32.mrb[48].mxu1  ;;  %v1405_v38 = vpop.f32.mrb[49].mxu0 }
 0x157   :  { %vm934_vm8 = vcmp.ge.f32.partialorder %v908_v35, 0.0  ;;  %v960_v39 = vmul.f32 0.1, %v908_v35  ;;  %v1406_v40 = vadd.f32 %v1405_v38, %v1404_v36  ;;  %v1497_v41 = vpop.f32.mrb[49].mxu1  ;;  %v1407_v42 = vpop.f32.mrb[50].mxu0  ;;  %v985_v45 = vsel %vm933_vm7, %v907_v32, %v959_v34 }
 0x158   :  { %v793_v43 = vpop.f32.mrb[50].mxu1  ;;  %v1408_v44 = vpop.f32.mrb[51].mxu0 }
 0x159   :  { %v986_v46 = vsel %vm934_vm8, %v908_v35, %v960_v39  ;;  %v791_v47 = vadd.f32 %v1406_v40, %v790_v37  ;;  %v1409_v48 = vadd.f32 %v1408_v44, %v1407_v42  ;;  %v1498_v49 = vpop.f32.mrb[51].mxu1 }
 0x15a   :  { %v1297_v50 = vpack.c.bf16 %v986_v46, %v985_v45 }
 0x15b   :  { %v909_v51 = vadd.f32 %v1825_v1, %v791_v47  ;;  %v794_v52 = vadd.f32 %v1409_v48, %v793_v43 }
 0x15c   :  { %1314 = vst [vmem:[%s1895_s3 + $0x58] sm:$0xff] %v1297_v50  }
 0x15d   :  { %v961_v53 = vmul.f32 0.1, %v909_v51  ;;  %v910_v54 = vadd.f32 %v1825_v1, %v794_v52  ;;  %vm935_vm9 = vcmp.ge.f32.partialorder %v909_v51, 0.0 }
 0x15f   :  { %vm936_vm10 = vcmp.ge.f32.partialorder %v910_v54, 0.0  ;;  %v962_v55 = vmul.f32 0.1, %v910_v54  ;;  %v987_v56 = vsel %vm935_vm9, %v909_v51, %v961_v53 }
 0x161   :  { %v988_v57 = vsel %vm936_vm10, %v910_v54, %v962_v55 }
 0x162   :  { %v1302_v58 = vpack.c.bf16 %v988_v57, %v987_v56 }
 0x164   :  { %1315 = vst [vmem:[%s1895_s3 + $0x60] sm:$0xff] %v1302_v58  }

// kernel: upconv7_forward.23
= control target key start
LH: loop header
LB: loop body
LE: loop exit
PB: predicated region body
PF: predicated region fallthrough
CT: control target
= control target key end

     0   :  { %s1800_s12 = smov 0   ;;  %s1802_s13 = smov 0   ;;  %s2048_s0 = inlined_call_operand.vmem [shape: bf16[128,1024], index: 0, kind: input, shape index: {}]   ;;  %s2049_s1 = inlined_call_operand.vmem [shape: bf16[1024,128], index: 1, kind: input, shape index: {}]   ;;  %s2050_s2 = inlined_call_operand.vmem [shape: f32[1,128], index: 2, kind: input, shape index: {}]   ;;  %s2051_s3 = inlined_call_operand.vmem [shape: bf16[128,128], index: 3, kind: output, shape index: {}]  }
   0x1   :  { %s1804_s14 = smov 0   ;;  %s1806_s15 = smov 0  }
   0x2   :  { %s1808_s16 = smov 0  }
   0x3 LB: > { %s25_s17 = sadd.s32 1, %s1773_s15  ;;  %p48_p1 = scmp.ne.s32.totalorder %s1765_s13, %s1761_s12  ;;  %s1777_s16 = sphi %s1808_s16, %s13_s16   ;;  %s1773_s15 = sphi %s1806_s15, %s2055_s15   ;;  %s1769_s14 = sphi %s1804_s14, %s2054_s14   ;;  %s1765_s13 = sphi %s1802_s13, %s2053_s13   ;;  %s1761_s12 = sphi %s1800_s12, %s2052_s12  }
   0x4   : > { %p26_p0 = scmp.ge.s32.totalorder %s25_s17, 2  ;;  %p49_p2 = scmp.eq.s32.totalorder %s1777_s16, 0 }
   0x5   : > { %s41_s19 = sadd.s32 1, %s1765_s13  ;;  %p1331_p5 = scmp.ge.s32.totalorder %s1777_s16, 2 }
   0x6   : > { %s2057_s17 = smov (%p26_p0, %s25_s17), 0  ;;  %p50_p3 = por %p49_p2, %p48_p1 }
   0x7   : > { %s37_s18 = ssub.s32 %s1773_s15, %s2057_s17  ;;  %162 = sbr.rel (%p1331_p5) target bundleno = 34 (0x22), region = 20 }
   0x8   : > { %p39_p4 = scmp.eq.s32.totalorder %s37_s18, 0 }
   0xa   : > { %s1835_s20 = scalar_select %p39_p4, %s1765_s13, %s41_s19  }
   0xe   : > { %165 = sbr.rel (!%p50_p3) target bundleno = 34 (0x22), region = 24  ;;  %s167_s21 = sand.u32 (%p50_p3), 1, %s1765_s13  }
   0xf   : > { %s1426_s22 = sshll.u32 (%p50_p3), %s1773_s15, 4  ;;  %s1332_s23 = sshll.u32 (%p50_p3), %s167_s21, 8 }
  0x10   : > { %s1843_s26 = scalar_lea.vmem (%p50_p3), %s2048_s0, %s1426_s22  ;;  %s1848_s27 = scalar_lea.vmem (%p50_p3), [#allocation3], %s1332_s23 }
  0x11   : > { %v188_v0 = vld [vmem:[%s1843_s26] sm:$0xff] (%p50_p3)  ;;  %v190_v1 = vld [vmem:[%s1843_s26 + $0x8] sm:$0xff] (%p50_p3) }
  0x12   : > { %v192_v2 = vld [vmem:[%s1843_s26 + $0x20] sm:$0xff] (%p50_p3)  ;;  %189 = vst [vmem:[%s1848_s27] sm:$0xff] (%p50_p3), %v188_v0  ;;  %191 = vst [vmem:[%s1848_s27 + $0x8] sm:$0xff] (%p50_p3), %v190_v1  ;;  %v194_v3 = vld [vmem:[%s1843_s26 + $0x28] sm:$0xff] (%p50_p3) }
  0x13   : > { %193 = vst [vmem:[%s1848_s27 + $0x10] sm:$0xff] (%p50_p3), %v192_v2  ;;  %v196_v4 = vld [vmem:[%s1843_s26 + $0x40] sm:$0xff] (%p50_p3)  ;;  %v198_v5 = vld [vmem:[%s1843_s26 + $0x48] sm:$0xff] (%p50_p3)  ;;  %195 = vst [vmem:[%s1848_s27 + $0x18] sm:$0xff] (%p50_p3), %v194_v3 }
  0x14   : > { %197 = vst [vmem:[%s1848_s27 + $0x20] sm:$0xff] (%p50_p3), %v196_v4  ;;  %199 = vst [vmem:[%s1848_s27 + $0x28] sm:$0xff] (%p50_p3), %v198_v5  ;;  %v200_v6 = vld [vmem:[%s1843_s26 + $0x60] sm:$0xff] (%p50_p3)  ;;  %v202_v7 = vld [vmem:[%s1843_s26 + $0x68] sm:$0xff] (%p50_p3) }
  0x15   : > { %v204_v8 = vld [vmem:[%s1843_s26 + $0x80] sm:$0xff]  ;;  %201 = vst [vmem:[%s1848_s27 + $0x30] sm:$0xff] %v200_v6  ;;  %203 = vst [vmem:[%s1848_s27 + $0x38] sm:$0xff] %v202_v7  ;;  %v206_v9 = vld [vmem:[%s1843_s26 + $0x88] sm:$0xff] }
  0x16   : > { %205 = vst [vmem:[%s1848_s27 + $0x40] sm:$0xff] %v204_v8  ;;  %v208_v10 = vld [vmem:[%s1843_s26 + $0xa0] sm:$0xff]  ;;  %v210_v11 = vld [vmem:[%s1843_s26 + $0xa8] sm:$0xff]  ;;  %207 = vst [vmem:[%s1848_s27 + $0x48] sm:$0xff] %v206_v9 }
  0x17   : > { %209 = vst [vmem:[%s1848_s27 + $0x50] sm:$0xff] %v208_v10  ;;  %211 = vst [vmem:[%s1848_s27 + $0x58] sm:$0xff] %v210_v11  ;;  %v212_v12 = vld [vmem:[%s1843_s26 + $0xc0] sm:$0xff]  ;;  %v214_v13 = vld [vmem:[%s1843_s26 + $0xc8] sm:$0xff] }
  0x18   : > { %v216_v14 = vld [vmem:[%s1843_s26 + $0xe0] sm:$0xff]  ;;  %213 = vst [vmem:[%s1848_s27 + $0x60] sm:$0xff] %v212_v12  ;;  %215 = vst [vmem:[%s1848_s27 + $0x68] sm:$0xff] %v214_v13  ;;  %v218_v15 = vld [vmem:[%s1843_s26 + $0xe8] sm:$0xff] }
  0x19   : > { %217 = vst [vmem:[%s1848_s27 + $0x70] sm:$0xff] %v216_v14  ;;  %v220_v16 = vld [vmem:[%s1843_s26 + $0x100] sm:$0xff]  ;;  %v222_v17 = vld [vmem:[%s1843_s26 + $0x108] sm:$0xff]  ;;  %219 = vst [vmem:[%s1848_s27 + $0x78] sm:$0xff] %v218_v15 }
  0x1a   : > { %221 = vst [vmem:[%s1848_s27 + $0x80] sm:$0xff] %v220_v16  ;;  %223 = vst [vmem:[%s1848_s27 + $0x88] sm:$0xff] %v222_v17  ;;  %v224_v18 = vld [vmem:[%s1843_s26 + $0x120] sm:$0xff]  ;;  %v226_v19 = vld [vmem:[%s1843_s26 + $0x128] sm:$0xff] }
  0x1b   : > { %v228_v20 = vld [vmem:[%s1843_s26 + $0x140] sm:$0xff]  ;;  %225 = vst [vmem:[%s1848_s27 + $0x90] sm:$0xff] %v224_v18  ;;  %227 = vst [vmem:[%s1848_s27 + $0x98] sm:$0xff] %v226_v19  ;;  %v230_v21 = vld [vmem:[%s1843_s26 + $0x148] sm:$0xff] }
  0x1c   : > { %229 = vst [vmem:[%s1848_s27 + $0xa0] sm:$0xff] %v228_v20  ;;  %v232_v22 = vld [vmem:[%s1843_s26 + $0x160] sm:$0xff]  ;;  %v234_v23 = vld [vmem:[%s1843_s26 + $0x168] sm:$0xff]  ;;  %231 = vst [vmem:[%s1848_s27 + $0xa8] sm:$0xff] %v230_v21 }
  0x1d   : > { %233 = vst [vmem:[%s1848_s27 + $0xb0] sm:$0xff] %v232_v22  ;;  %235 = vst [vmem:[%s1848_s27 + $0xb8] sm:$0xff] %v234_v23  ;;  %v236_v24 = vld [vmem:[%s1843_s26 + $0x180] sm:$0xff]  ;;  %v238_v25 = vld [vmem:[%s1843_s26 + $0x188] sm:$0xff] }
  0x1e   : > { %v240_v26 = vld [vmem:[%s1843_s26 + $0x1a0] sm:$0xff]  ;;  %237 = vst [vmem:[%s1848_s27 + $0xc0] sm:$0xff] %v236_v24  ;;  %239 = vst [vmem:[%s1848_s27 + $0xc8] sm:$0xff] %v238_v25  ;;  %v242_v27 = vld [vmem:[%s1843_s26 + $0x1a8] sm:$0xff] }
  0x1f   : > { %241 = vst [vmem:[%s1848_s27 + $0xd0] sm:$0xff] %v240_v26  ;;  %v244_v28 = vld [vmem:[%s1843_s26 + $0x1c0] sm:$0xff]  ;;  %v246_v29 = vld [vmem:[%s1843_s26 + $0x1c8] sm:$0xff]  ;;  %243 = vst [vmem:[%s1848_s27 + $0xd8] sm:$0xff] %v242_v27 }
  0x20   : > { %245 = vst [vmem:[%s1848_s27 + $0xe0] sm:$0xff] %v244_v28  ;;  %247 = vst [vmem:[%s1848_s27 + $0xe8] sm:$0xff] %v246_v29  ;;  %v248_v30 = vld [vmem:[%s1843_s26 + $0x1e0] sm:$0xff]  ;;  %v250_v31 = vld [vmem:[%s1843_s26 + $0x1e8] sm:$0xff] }
  0x21   : > { %249 = vst [vmem:[%s1848_s27 + $0xf0] sm:$0xff] %v248_v30  ;;  %251 = vst [vmem:[%s1848_s27 + $0xf8] sm:$0xff] %v250_v31 }
  0x22 PF: > { %p1335_p6 = scmp.ge.s32.totalorder %s1777_s16, 1  ;;  %p268_p7 = scmp.lt.s32.totalorder %s1777_s16, 3 }
  0x24   : > { %p269_p8 = pnand %p1335_p6, %p268_p7 }
  0x25   : > { %s275_s28 = sand.u32 (!%p269_p8), 1, %s1761_s12   ;;  %s1337_s29 = sshll.u32 (!%p269_p8), %s1769_s14, 6 }
  0x26   : > { %272 = sbr.rel (%p269_p8) target bundleno = 383 (0x17f), region = 51  ;;  %s1336_s30 = sshll.u32 (!%p269_p8), %s275_s28, 8 }
  0x27   : > { %p315_p9 = scmp.lt.s32.totalorder (!%p269_p8), %s1337_s29, 127  ;;  %s1920_s8 = scalar_lea.vmem (!%p269_p8), [#allocation3], %s1336_s30 }
  0x28   : > { %p1339_p10 = scmp.ne.s32.totalorder (!%p269_p8), %s1769_s14, 0 }
  0x2d   : > { %s2059_s29 = smov (!%p315_p9, %s1337_s29), 127  ;;  %339 = sbr.rel (%p1339_p10) target bundleno = 55 (0x37), region = 59 }
  0x2e   : > { %s1338_s4 = sshll.u32 %s2059_s29, 2  ;;  %v1779_v32 = vmov (!%p1339_p10), 0.0  }
  0x2f   : > { %s1918_s7 = scalar_lea.vmem %s2049_s1, %s1338_s4  ;;  %340 = vst [vmem:[#allocation2] sm:$0xff] (!%p1339_p10), %v1779_v32  ;;  %341 = vst [vmem:[#allocation2 + $0x8] sm:$0xff] (!%p1339_p10), %v1779_v32 }
  0x30   : > { %342 = vst [vmem:[#allocation2 + $0x10] sm:$0xff] (!%p1339_p10), %v1779_v32  ;;  %343 = vst [vmem:[#allocation2 + $0x18] sm:$0xff] (!%p1339_p10), %v1779_v32 }
  0x31   : > { %344 = vst [vmem:[#allocation2 + $0x20] sm:$0xff] (!%p1339_p10), %v1779_v32  ;;  %345 = vst [vmem:[#allocation2 + $0x28] sm:$0xff] (!%p1339_p10), %v1779_v32 }
  0x32   : > { %346 = vst [vmem:[#allocation2 + $0x30] sm:$0xff] (!%p1339_p10), %v1779_v32  ;;  %347 = vst [vmem:[#allocation2 + $0x38] sm:$0xff] (!%p1339_p10), %v1779_v32 }
  0x33   : > { %348 = vst [vmem:[#allocation2 + $0x40] sm:$0xff] (!%p1339_p10), %v1779_v32  ;;  %349 = vst [vmem:[#allocation2 + $0x48] sm:$0xff] (!%p1339_p10), %v1779_v32 }
  0x34   : > { %350 = vst [vmem:[#allocation2 + $0x50] sm:$0xff] %v1779_v32  ;;  %351 = vst [vmem:[#allocation2 + $0x58] sm:$0xff] %v1779_v32 }
  0x35   : > { %352 = vst [vmem:[#allocation2 + $0x60] sm:$0xff] %v1779_v32  ;;  %353 = vst [vmem:[#allocation2 + $0x68] sm:$0xff] %v1779_v32 }
  0x36   : > { %354 = vst [vmem:[#allocation2 + $0x70] sm:$0xff] %v1779_v32  ;;  %355 = vst [vmem:[#allocation2 + $0x78] sm:$0xff] %v1779_v32 }
  0x37 PF: > { %v1659_v33 = vld [vmem:[%s1918_s7 + $0x40] sm:$0xff]   ;;  %v1663_v37 = vld [vmem:[%s1918_s7 + $0x48] sm:$0xff]   ;;  %v1667_v41 = vld [vmem:[%s1918_s7 + $0x50] sm:$0xff]   ;;  %p1404_p11 = scmp.ne.s32.totalorder %s1769_s14, 1 }
  0x38   : > { %v1660_v34 = vld [vmem:[%s1918_s7 + $0xc0] sm:$0xff]   ;;  %1490 = vmatprep.subr.bf16.mxu0 %v1659_v33  ;;  %v1664_v38 = vld [vmem:[%s1918_s7 + $0xc8] sm:$0xff]   ;;  %v1668_v42 = vld [vmem:[%s1918_s7 + $0xd0] sm:$0xff]  }
  0x39   : > { %v1661_v35 = vld [vmem:[%s1918_s7] sm:$0xff]   ;;  %1554 = vmatprep.subr.bf16.mxu1 %v1660_v34  ;;  %v1665_v39 = vld [vmem:[%s1918_s7 + $0x8] sm:$0xff]   ;;  %v1669_v43 = vld [vmem:[%s1918_s7 + $0x10] sm:$0xff]  }
  0x3a   : > { %v1662_v36 = vld [vmem:[%s1918_s7 + $0x80] sm:$0xff]   ;;  %1491 = vmatpush3.bf16.msra.mxu0 %v1661_v35  ;;  %v1666_v40 = vld [vmem:[%s1918_s7 + $0x88] sm:$0xff]   ;;  %v1670_v44 = vld [vmem:[%s1918_s7 + $0x90] sm:$0xff]  }
  0x3b   : > { %1555 = vmatpush3.bf16.msra.mxu1 %v1662_v36  ;;  %1492 = vmatprep.subr.bf16.mxu0 %v1663_v37  ;;  %v1671_v45 = vld [vmem:[%s1918_s7 + $0x58] sm:$0xff]   ;;  %v1675_v49 = vld [vmem:[%s1918_s7 + $0x60] sm:$0xff]   ;;  %v1679_v53 = vld [vmem:[%s1918_s7 + $0x68] sm:$0xff]  }
  0x3c   : > { %1556 = vmatprep.subr.bf16.mxu1 %v1664_v38  ;;  %v1672_v46 = vld [vmem:[%s1918_s7 + $0xd8] sm:$0xff]   ;;  %v1676_v50 = vld [vmem:[%s1918_s7 + $0xe0] sm:$0xff]   ;;  %v1680_v54 = vld [vmem:[%s1918_s7 + $0xe8] sm:$0xff]  }
  0x3d   : > { %v1673_v47 = vld [vmem:[%s1918_s7 + $0x18] sm:$0xff]   ;;  %v1677_v51 = vld [vmem:[%s1918_s7 + $0x20] sm:$0xff]   ;;  %v1681_v55 = vld [vmem:[%s1918_s7 + $0x28] sm:$0xff]  }
  0x3e   : > { %1493 = vmatpush3.bf16.msra.mxu0 %v1665_v39  ;;  %v1674_v48 = vld [vmem:[%s1918_s7 + $0x98] sm:$0xff]   ;;  %v1678_v52 = vld [vmem:[%s1918_s7 + $0xa0] sm:$0xff]   ;;  %v1682_v56 = vld [vmem:[%s1918_s7 + $0xa8] sm:$0xff]  }
  0x3f   : > { %1557 = vmatpush3.bf16.msra.mxu1 %v1666_v40  ;;  %1494 = vmatprep.subr.bf16.mxu0 %v1667_v41  ;;  %v1683_v57 = vld [vmem:[%s1918_s7 + $0x70] sm:$0xff]   ;;  %v1687_v61 = vld [vmem:[%s1918_s7 + $0x78] sm:$0xff]  }
  0x40   : > { %1558 = vmatprep.subr.bf16.mxu1 %v1668_v42  ;;  %v1684_v58 = vld [vmem:[%s1918_s7 + $0xf0] sm:$0xff]   ;;  %v1688_v62 = vld [vmem:[%s1918_s7 + $0xf8] sm:$0xff]   ;;  %v356_v42 = vld [vmem:[#allocation2] sm:$0xff] }
  0x41   : > { %v1685_v59 = vld [vmem:[%s1918_s7 + $0x30] sm:$0xff]   ;;  %v1689_v63 = vld [vmem:[%s1918_s7 + $0x38] sm:$0xff]  }
  0x42   : > { %1495 = vmatpush3.bf16.msra.mxu0 %v1669_v43  ;;  %v1686_v60 = vld [vmem:[%s1918_s7 + $0xb0] sm:$0xff]   ;;  %v1690_v0 = vld [vmem:[%s1918_s7 + $0xb8] sm:$0xff]  }
  0x43   : > { %1559 = vmatpush3.bf16.msra.mxu1 %v1670_v44  ;;  %1496 = vmatprep.subr.bf16.mxu0 %v1671_v45  ;;  %v1691_v1 = vld [vmem:[%s1920_s8] ss:$16 sps:$4 sm:$0xff]   ;;  %v1693_v2 = vld [vmem:[%s1920_s8 + $0x4] ss:$16 sps:$4 sm:$0xff]   ;;  %v1694_v3 = vld [vmem:[%s1920_s8 + $0x8] ss:$16 sps:$4 sm:$0xff]  }
  0x44   : > { %1560 = vmatprep.subr.bf16.mxu1 %v1672_v46  ;;  %v1696_v4 = vld [vmem:[%s1920_s8 + $0xc] ss:$16 sps:$4 sm:$0xff]   ;;  %852 = vmatprep.mubr.bf16.mxu0 %v1693_v2  ;;  %v1697_v5 = vld [vmem:[%s1920_s8 + $0x24] ss:$16 sps:$4 sm:$0xff]   ;;  %v1701_v7 = vld [vmem:[%s1920_s8 + $0x20] ss:$16 sps:$4 sm:$0xff]  }
  0x45   : > { %949 = vmatprep.mubr.bf16.mxu1 %v1696_v4  ;;  %v1699_v6 = vld [vmem:[%s1920_s8 + $0x2c] ss:$16 sps:$4 sm:$0xff]   ;;  %v1702_v8 = vld [vmem:[%s1920_s8 + $0x28] ss:$16 sps:$4 sm:$0xff]   ;;  %v1703_v9 = vld [vmem:[%s1920_s8 + $0x44] ss:$16 sps:$4 sm:$0xff]  }
  0x46   : > { %1497 = vmatpush3.bf16.msra.mxu0 %v1673_v47  ;;  %v1705_v10 = vld [vmem:[%s1920_s8 + $0x4c] ss:$16 sps:$4 sm:$0xff]   ;;  %v1707_v11 = vld [vmem:[%s1920_s8 + $0x40] ss:$16 sps:$4 sm:$0xff]   ;;  %v1708_v12 = vld [vmem:[%s1920_s8 + $0x48] ss:$16 sps:$4 sm:$0xff]  }
  0x47   : > { %1561 = vmatpush3.bf16.msra.mxu1 %v1674_v48  ;;  %1498 = vmatprep.subr.bf16.mxu0 %v1675_v49  ;;  %v1709_v13 = vld [vmem:[%s1920_s8 + $0x64] ss:$16 sps:$4 sm:$0xff]   ;;  %v1711_v14 = vld [vmem:[%s1920_s8 + $0x6c] ss:$16 sps:$4 sm:$0xff]   ;;  %v1713_v15 = vld [vmem:[%s1920_s8 + $0x60] ss:$16 sps:$4 sm:$0xff]  }
  0x48   : > { %1562 = vmatprep.subr.bf16.mxu1 %v1676_v50  ;;  %v1714_v16 = vld [vmem:[%s1920_s8 + $0x68] ss:$16 sps:$4 sm:$0xff]   ;;  %v1715_v17 = vld [vmem:[%s1920_s8 + $0x84] ss:$16 sps:$4 sm:$0xff]   ;;  %v1717_v18 = vld [vmem:[%s1920_s8 + $0x8c] ss:$16 sps:$4 sm:$0xff]  }
  0x49   : > { %v1719_v19 = vld [vmem:[%s1920_s8 + $0x80] ss:$16 sps:$4 sm:$0xff]   ;;  %v1720_v20 = vld [vmem:[%s1920_s8 + $0x88] ss:$16 sps:$4 sm:$0xff]   ;;  %v1721_v21 = vld [vmem:[%s1920_s8 + $0xa4] ss:$16 sps:$4 sm:$0xff]  }
  0x4a   : > { %1499 = vmatpush3.bf16.msra.mxu0 %v1677_v51  ;;  %v1723_v22 = vld [vmem:[%s1920_s8 + $0xac] ss:$16 sps:$4 sm:$0xff]   ;;  %v1725_v23 = vld [vmem:[%s1920_s8 + $0xa0] ss:$16 sps:$4 sm:$0xff]   ;;  %v1726_v24 = vld [vmem:[%s1920_s8 + $0xa8] ss:$16 sps:$4 sm:$0xff]  }
  0x4b   : > { %1563 = vmatpush3.bf16.msra.mxu1 %v1678_v52  ;;  %1500 = vmatprep.subr.bf16.mxu0 %v1679_v53  ;;  %v1727_v25 = vld [vmem:[%s1920_s8 + $0xc4] ss:$16 sps:$4 sm:$0xff]   ;;  %v1729_v26 = vld [vmem:[%s1920_s8 + $0xcc] ss:$16 sps:$4 sm:$0xff]   ;;  %v1731_v27 = vld [vmem:[%s1920_s8 + $0xc0] ss:$16 sps:$4 sm:$0xff]  }
  0x4c   : > { %1564 = vmatprep.subr.bf16.mxu1 %v1680_v54  ;;  %v1732_v28 = vld [vmem:[%s1920_s8 + $0xc8] ss:$16 sps:$4 sm:$0xff]   ;;  %v1733_v29 = vld [vmem:[%s1920_s8 + $0xe4] ss:$16 sps:$4 sm:$0xff]   ;;  %v1735_v30 = vld [vmem:[%s1920_s8 + $0xec] ss:$16 sps:$4 sm:$0xff]  }
  0x4d   : > { %v1737_v31 = vld [vmem:[%s1920_s8 + $0xe0] ss:$16 sps:$4 sm:$0xff]   ;;  %v1738_v32 = vld [vmem:[%s1920_s8 + $0xe8] ss:$16 sps:$4 sm:$0xff]  }
  0x4e   : > { %1501 = vmatpush3.bf16.msra.mxu0 %v1681_v55  ;;  %v357_v47 = vld [vmem:[#allocation2 + $0x8] sm:$0xff] }
  0x4f   : > { %1565 = vmatpush3.bf16.msra.mxu1 %v1682_v56  ;;  %1502 = vmatprep.subr.bf16.mxu0 %v1683_v57 }
  0x50   : > { %1566 = vmatprep.subr.bf16.mxu1 %v1684_v58 }
  0x52   : > { %1503 = vmatpush3.bf16.msra.mxu0 %v1685_v59 }
  0x53   : > { %1567 = vmatpush3.bf16.msra.mxu1 %v1686_v60  ;;  %1504 = vmatprep.subr.bf16.mxu0 %v1687_v61  ;;  %v358_v60 = vld [vmem:[#allocation2 + $0x10] sm:$0xff] }
  0x54   : > { %1568 = vmatprep.subr.bf16.mxu1 %v1688_v62 }
  0x56   : > { %1505 = vmatpush3.bf16.msra.mxu0 %v1689_v63 }
  0x57   : > { %1569 = vmatpush3.bf16.msra.mxu1 %v1690_v0 }
  0x59   : > { %853 = vmatmul.mubr.bf16.vlgmr.msra.gmra.mrb[0].mxu0 %v1691_v1  ;;  %v359_v1 = vld [vmem:[#allocation2 + $0x18] sm:$0xff] }
  0x5a   : > { %950 = vmatmul.mubr.bf16.vlgmr.msra.gmra.mrb[0].mxu1 %v1694_v3  ;;  %860 = vmatprep.mubr.bf16.mxu0 %v1697_v5 }
  0x5b   : > { %957 = vmatprep.mubr.bf16.mxu1 %v1699_v6 }
  0x61   : > { %861 = vmatmul.mubr.bf16.gmra.mrb[4].mxu0 %v1701_v7 }
  0x62   : > { %958 = vmatmul.mubr.bf16.gmra.mrb[4].mxu1 %v1702_v8  ;;  %868 = vmatprep.mubr.bf16.mxu0 %v1703_v9 }
  0x63   : > { %965 = vmatprep.mubr.bf16.mxu1 %v1705_v10 }
  0x69   : > { %869 = vmatmul.mubr.bf16.gmra.mrb[8].mxu0 %v1707_v11 }
  0x6a   : > { %966 = vmatmul.mubr.bf16.gmra.mrb[8].mxu1 %v1708_v12  ;;  %876 = vmatprep.mubr.bf16.mxu0 %v1709_v13 }
  0x6b   : > { %973 = vmatprep.mubr.bf16.mxu1 %v1711_v14  ;;  %v360_v14 = vld [vmem:[#allocation2 + $0x20] sm:$0xff] }
  0x71   : > { %877 = vmatmul.mubr.bf16.gmra.mrb[12].mxu0 %v1713_v15 }
  0x72   : > { %974 = vmatmul.mubr.bf16.gmra.mrb[12].mxu1 %v1714_v16  ;;  %884 = vmatprep.mubr.bf16.mxu0 %v1715_v17 }
  0x73   : > { %981 = vmatprep.mubr.bf16.mxu1 %v1717_v18 }
  0x79   : > { %885 = vmatmul.mubr.bf16.gmra.mrb[16].mxu0 %v1719_v19  ;;  %v361_v19 = vld [vmem:[#allocation2 + $0x28] sm:$0xff] }
  0x7a   : > { %982 = vmatmul.mubr.bf16.gmra.mrb[16].mxu1 %v1720_v20  ;;  %892 = vmatprep.mubr.bf16.mxu0 %v1721_v21 }
  0x7b   : > { %989 = vmatprep.mubr.bf16.mxu1 %v1723_v22 }
  0x81   : > { %893 = vmatmul.mubr.bf16.gmra.mrb[20].mxu0 %v1725_v23 }
  0x82   : > { %990 = vmatmul.mubr.bf16.gmra.mrb[20].mxu1 %v1726_v24  ;;  %900 = vmatprep.mubr.bf16.mxu0 %v1727_v25 }
  0x83   : > { %997 = vmatprep.mubr.bf16.mxu1 %v1729_v26 }
  0x89   : > { %901 = vmatmul.mubr.bf16.gmra.mrb[24].mxu0 %v1731_v27 }
  0x8a   : > { %998 = vmatmul.mubr.bf16.gmra.mrb[24].mxu1 %v1732_v28  ;;  %908 = vmatprep.mubr.bf16.mxu0 %v1733_v29 }
  0x8b   : > { %1005 = vmatprep.mubr.bf16.mxu1 %v1735_v30 }
  0x91   : > { %909 = vmatmul.mubr.bf16.gmra.mrb[28].mxu0 %v1737_v31 }
  0x92   : > { %1006 = vmatmul.mubr.bf16.gmra.mrb[28].mxu1 %v1738_v32  ;;  %v362_v32 = vld [vmem:[#allocation2 + $0x30] sm:$0xff] }
 0x12c   : > { %v1506_v33 = vpop.f32.mrb[0].mxu0 }
 0x12d   : > { %v1570_v34 = vpop.f32.mrb[0].mxu1  ;;  %v1507_v35 = vpop.f32.mrb[1].mxu0 }
 0x12e   : > { %v1508_v36 = vadd.f32 %v1507_v35, %v1506_v33  ;;  %v1571_v37 = vpop.f32.mrb[1].mxu1  ;;  %v1509_v38 = vpop.f32.mrb[2].mxu0 }
 0x12f   : > { %v1572_v39 = vadd.f32 %v1571_v37, %v1570_v34  ;;  %v1573_v40 = vpop.f32.mrb[2].mxu1  ;;  %v1510_v41 = vpop.f32.mrb[3].mxu0  ;;  %v363_v37 = vld [vmem:[#allocation2 + $0x38] sm:$0xff] }
 0x130   : > { %v1511_v43 = vadd.f32 %v1510_v41, %v1509_v38  ;;  %v1574_v44 = vpop.f32.mrb[3].mxu1 }
 0x131   : > { %v952_v45 = vadd.f32 %v1572_v39, %v1508_v36  ;;  %v1575_v46 = vadd.f32 %v1574_v44, %v1573_v40 }
 0x133   : > { %v1014_v48 = vadd.f32 %v952_v45, %v356_v42  ;;  %v955_v49 = vadd.f32 %v1575_v46, %v1511_v43 }
 0x134   : > { %v1512_v50 = vpop.f32.mrb[4].mxu0 }
 0x135   : > { %1030 = vst [vmem:[#allocation2] sm:$0xff] %v1014_v48  ;;  %v1015_v51 = vadd.f32 %v955_v49, %v357_v47  ;;  %v1576_v52 = vpop.f32.mrb[4].mxu1  ;;  %v1513_v53 = vpop.f32.mrb[5].mxu0 }
 0x136   : > { %v1514_v54 = vadd.f32 %v1513_v53, %v1512_v50  ;;  %v1577_v55 = vpop.f32.mrb[5].mxu1  ;;  %v1515_v56 = vpop.f32.mrb[6].mxu0  ;;  %v364_v50 = vld [vmem:[#allocation2 + $0x40] sm:$0xff] }
 0x137   : > { %1031 = vst [vmem:[#allocation2 + $0x8] sm:$0xff] %v1015_v51  ;;  %v1578_v57 = vadd.f32 %v1577_v55, %v1576_v52  ;;  %v1579_v58 = vpop.f32.mrb[6].mxu1  ;;  %v1516_v59 = vpop.f32.mrb[7].mxu0  ;;  %v365_v55 = vld [vmem:[#allocation2 + $0x48] sm:$0xff] }
 0x138   : > { %v1517_v61 = vadd.f32 %v1516_v59, %v1515_v56  ;;  %v1580_v62 = vpop.f32.mrb[7].mxu1 }
 0x139   : > { %v960_v63 = vadd.f32 %v1578_v57, %v1514_v54  ;;  %v1581_v0 = vadd.f32 %v1580_v62, %v1579_v58 }
 0x13b   : > { %v1016_v2 = vadd.f32 %v960_v63, %v358_v60  ;;  %v963_v3 = vadd.f32 %v1581_v0, %v1517_v61 }
 0x13c   : > { %v1518_v4 = vpop.f32.mrb[8].mxu0 }
 0x13d   : > { %1032 = vst [vmem:[#allocation2 + $0x10] sm:$0xff] %v1016_v2  ;;  %v1017_v5 = vadd.f32 %v963_v3, %v359_v1  ;;  %v1582_v6 = vpop.f32.mrb[8].mxu1  ;;  %v1519_v7 = vpop.f32.mrb[9].mxu0 }
 0x13e   : > { %v1520_v8 = vadd.f32 %v1519_v7, %v1518_v4  ;;  %v1583_v9 = vpop.f32.mrb[9].mxu1  ;;  %v1521_v10 = vpop.f32.mrb[10].mxu0  ;;  %v366_v4 = vld [vmem:[#allocation2 + $0x50] sm:$0xff] }
 0x13f   : > { %1033 = vst [vmem:[#allocation2 + $0x18] sm:$0xff] %v1017_v5  ;;  %v1584_v11 = vadd.f32 %v1583_v9, %v1582_v6  ;;  %v1585_v12 = vpop.f32.mrb[10].mxu1  ;;  %v1522_v13 = vpop.f32.mrb[11].mxu0  ;;  %v367_v9 = vld [vmem:[#allocation2 + $0x58] sm:$0xff] }
 0x140   : > { %v1523_v15 = vadd.f32 %v1522_v13, %v1521_v10  ;;  %v1586_v16 = vpop.f32.mrb[11].mxu1 }
 0x141   : > { %v968_v17 = vadd.f32 %v1584_v11, %v1520_v8  ;;  %v1587_v18 = vadd.f32 %v1586_v16, %v1585_v12 }
 0x143   : > { %v1018_v20 = vadd.f32 %v968_v17, %v360_v14  ;;  %v971_v21 = vadd.f32 %v1587_v18, %v1523_v15 }
 0x144   : > { %v1524_v22 = vpop.f32.mrb[12].mxu0 }
 0x145   : > { %1034 = vst [vmem:[#allocation2 + $0x20] sm:$0xff] %v1018_v20  ;;  %v1019_v23 = vadd.f32 %v971_v21, %v361_v19  ;;  %v1588_v24 = vpop.f32.mrb[12].mxu1  ;;  %v1525_v25 = vpop.f32.mrb[13].mxu0 }
 0x146   : > { %v1526_v26 = vadd.f32 %v1525_v25, %v1524_v22  ;;  %v1589_v27 = vpop.f32.mrb[13].mxu1  ;;  %v1527_v28 = vpop.f32.mrb[14].mxu0  ;;  %v368_v22 = vld [vmem:[#allocation2 + $0x60] sm:$0xff] }
 0x147   : > { %1035 = vst [vmem:[#allocation2 + $0x28] sm:$0xff] %v1019_v23  ;;  %v1590_v29 = vadd.f32 %v1589_v27, %v1588_v24  ;;  %v1591_v30 = vpop.f32.mrb[14].mxu1  ;;  %v1528_v31 = vpop.f32.mrb[15].mxu0  ;;  %v369_v27 = vld [vmem:[#allocation2 + $0x68] sm:$0xff] }
 0x148   : > { %v1529_v33 = vadd.f32 %v1528_v31, %v1527_v28  ;;  %v1592_v34 = vpop.f32.mrb[15].mxu1 }
 0x149   : > { %v976_v35 = vadd.f32 %v1590_v29, %v1526_v26  ;;  %v1593_v36 = vadd.f32 %v1592_v34, %v1591_v30 }
 0x14b   : > { %v1020_v38 = vadd.f32 %v976_v35, %v362_v32  ;;  %v979_v39 = vadd.f32 %v1593_v36, %v1529_v33 }
 0x14c   : > { %v1530_v40 = vpop.f32.mrb[16].mxu0 }
 0x14d   : > { %1036 = vst [vmem:[#allocation2 + $0x30] sm:$0xff] %v1020_v38  ;;  %v1021_v41 = vadd.f32 %v979_v39, %v363_v37  ;;  %v1594_v42 = vpop.f32.mrb[16].mxu1  ;;  %v1531_v43 = vpop.f32.mrb[17].mxu0 }
 0x14e   : > { %v1532_v44 = vadd.f32 %v1531_v43, %v1530_v40  ;;  %v1595_v45 = vpop.f32.mrb[17].mxu1  ;;  %v1533_v46 = vpop.f32.mrb[18].mxu0  ;;  %v370_v40 = vld [vmem:[#allocation2 + $0x70] sm:$0xff] }
 0x14f   : > { %1037 = vst [vmem:[#allocation2 + $0x38] sm:$0xff] %v1021_v41  ;;  %v1596_v47 = vadd.f32 %v1595_v45, %v1594_v42  ;;  %v1597_v48 = vpop.f32.mrb[18].mxu1  ;;  %v1534_v49 = vpop.f32.mrb[19].mxu0  ;;  %v371_v45 = vld [vmem:[#allocation2 + $0x78] sm:$0xff] }
 0x150   : > { %v1535_v51 = vadd.f32 %v1534_v49, %v1533_v46  ;;  %v1598_v52 = vpop.f32.mrb[19].mxu1  ;;  %v1050_v49 = vld [vmem:[#allocation2] sm:$0xff] (!%p1404_p11) }
 0x151   : > { %v984_v53 = vadd.f32 %v1596_v47, %v1532_v44  ;;  %v1599_v54 = vadd.f32 %v1598_v52, %v1597_v48 }
 0x153   : > { %v1022_v56 = vadd.f32 %v984_v53, %v364_v50  ;;  %v987_v57 = vadd.f32 %v1599_v54, %v1535_v51  ;;  %v1051_v50 = vld [vmem:[#allocation2 + $0x8] sm:$0xff] (!%p1404_p11)  ;;  %v1991_v51 = vld [vmem:[%s2050_s2] ss:$0 sm:$0xff] (!%p1404_p11)  ;;  %v1052_v54 = vld [vmem:[#allocation2 + $0x10] sm:$0xff] (!%p1404_p11) }
 0x154   : > { %v1536_v58 = vpop.f32.mrb[20].mxu0  ;;  %v1073_v52 = vadd.f32 (!%p1404_p11), %v1991_v51, %v1050_v49  ;;  %v1074_v53 = vadd.f32 (!%p1404_p11), %v1991_v51, %v1051_v50 }
 0x155   : > { %1038 = vst [vmem:[#allocation2 + $0x40] sm:$0xff] %v1022_v56  ;;  %v1023_v59 = vadd.f32 %v987_v57, %v365_v55  ;;  %v1600_v60 = vpop.f32.mrb[20].mxu1  ;;  %v1537_v61 = vpop.f32.mrb[21].mxu0  ;;  %v1053_v55 = vld [vmem:[#allocation2 + $0x18] sm:$0xff] (!%p1404_p11)  ;;  %v1054_v56 = vld [vmem:[#allocation2 + $0x20] sm:$0xff] (!%p1404_p11)  ;;  %v1075_v57 = vadd.f32 (!%p1404_p11), %v1991_v51, %v1052_v54 }
 0x156   : > { %v1538_v62 = vadd.f32 %v1537_v61, %v1536_v58  ;;  %v1601_v63 = vpop.f32.mrb[21].mxu1  ;;  %v1539_v0 = vpop.f32.mrb[22].mxu0  ;;  %v1076_v58 = vadd.f32 (!%p1404_p11), %v1991_v51, %v1053_v55  ;;  %v1056_v61 = vld [vmem:[#allocation2 + $0x30] sm:$0xff] (!%p1404_p11)  ;;  %vm1089_vm0 = vcmp.ge.f32.partialorder (!%p1404_p11), %v1073_v52, 0.0  ;;  %vm1090_vm1 = vcmp.ge.f32.partialorder (!%p1404_p11), %v1074_v53, 0.0 }
 0x157   : > { %1039 = vst [vmem:[#allocation2 + $0x48] sm:$0xff] %v1023_v59  ;;  %v1602_v1 = vadd.f32 %v1601_v63, %v1600_v60  ;;  %v1603_v2 = vpop.f32.mrb[22].mxu1  ;;  %v1540_v3 = vpop.f32.mrb[23].mxu0  ;;  %v1055_v59 = vld [vmem:[#allocation2 + $0x28] sm:$0xff] (!%p1404_p11)  ;;  %v1077_v60 = vadd.f32 (!%p1404_p11), %v1991_v51, %v1054_v56  ;;  %v1106_v63 = vmul.f32 (!%p1404_p11), 0.1, %v1074_v53 }
 0x158   : > { %v1541_v5 = vadd.f32 %v1540_v3, %v1539_v0  ;;  %v1604_v6 = vpop.f32.mrb[23].mxu1  ;;  %vm1091_vm2 = vcmp.ge.f32.partialorder (!%p1404_p11), %v1075_v57, 0.0  ;;  %vm1092_vm3 = vcmp.ge.f32.partialorder (!%p1404_p11), %v1076_v58, 0.0  ;;  %v1107_v0 = vmul.f32 (!%p1404_p11), 0.1, %v1075_v57 }
 0x159   : > { %v992_v7 = vadd.f32 %v1602_v1, %v1538_v62  ;;  %v1605_v8 = vadd.f32 %v1604_v6, %v1603_v2  ;;  %v1105_v62 = vmul.f32 (!%p1404_p11), 0.1, %v1073_v52  ;;  %v1108_v1 = vmul.f32 (!%p1404_p11), 0.1, %v1076_v58 }
 0x15a   : > { %v1122_v3 = vsel (!%p1404_p11), %vm1090_vm1, %v1074_v53, %v1106_v63  ;;  %vm1093_vm4 = vcmp.ge.f32.partialorder (!%p1404_p11), %v1077_v60, 0.0 }
 0x15b   : > { %v1024_v10 = vadd.f32 %v992_v7, %v366_v4  ;;  %v995_v11 = vadd.f32 %v1605_v8, %v1541_v5  ;;  %v1121_v2 = vsel (!%p1404_p11), %vm1089_vm0, %v1073_v52, %v1105_v62  ;;  %v1078_v4 = vadd.f32 (!%p1404_p11), %v1991_v51, %v1055_v59  ;;  %v1057_v5 = vld [vmem:[#allocation2 + $0x38] sm:$0xff] (!%p1404_p11) }
 0x15c   : > { %v1542_v12 = vpop.f32.mrb[24].mxu0  ;;  %v1058_v6 = vld [vmem:[#allocation2 + $0x40] sm:$0xff] (!%p1404_p11)  ;;  %v1446_v8 = vpack.c.bf16 (!%p1404_p11), %v1122_v3, %v1121_v2 }
 0x15d   : > { %1040 = vst [vmem:[#allocation2 + $0x50] sm:$0xff] %v1024_v10  ;;  %v1025_v13 = vadd.f32 %v995_v11, %v367_v9  ;;  %v1606_v14 = vpop.f32.mrb[24].mxu1  ;;  %v1543_v15 = vpop.f32.mrb[25].mxu0  ;;  %v1123_v9 = vsel (!%p1404_p11), %vm1091_vm2, %v1075_v57, %v1107_v0  ;;  %v1124_v10 = vsel (!%p1404_p11), %vm1092_vm3, %v1076_v58, %v1108_v1  ;;  %v1109_v11 = vmul.f32 (!%p1404_p11), 0.1, %v1077_v60 }
 0x15e   : > { %v1544_v16 = vadd.f32 %v1543_v15, %v1542_v12  ;;  %v1607_v17 = vpop.f32.mrb[25].mxu1  ;;  %v1545_v18 = vpop.f32.mrb[26].mxu0  ;;  %v1059_v7 = vld [vmem:[#allocation2 + $0x48] sm:$0xff] (!%p1404_p11)  ;;  %vm1094_vm5 = vcmp.ge.f32.partialorder (!%p1404_p11), %v1078_v4, 0.0  ;;  %v1079_v15 = vadd.f32 (!%p1404_p11), %v1991_v51, %v1056_v61  ;;  %1447 = vst [vmem:[%s2051_s3] sm:$0xff] (!%p1404_p11), %v1446_v8  }
 0x15f   : > { %1041 = vst [vmem:[#allocation2 + $0x58] sm:$0xff] %v1025_v13  ;;  %v1608_v19 = vadd.f32 %v1607_v17, %v1606_v14  ;;  %v1609_v20 = vpop.f32.mrb[26].mxu1  ;;  %v1546_v21 = vpop.f32.mrb[27].mxu0  ;;  %v1451_v13 = vpack.c.bf16 (!%p1404_p11), %v1124_v10, %v1123_v9  ;;  %v1110_v14 = vmul.f32 (!%p1404_p11), 0.1, %v1078_v4  ;;  %v1080_v17 = vadd.f32 (!%p1404_p11), %v1991_v51, %v1057_v5 }
 0x160   : > { %v1547_v23 = vadd.f32 %v1546_v21, %v1545_v18  ;;  %v1610_v24 = vpop.f32.mrb[27].mxu1  ;;  %v1081_v18 = vadd.f32 (!%p1404_p11), %v1991_v51, %v1058_v6  ;;  %vm1095_vm6 = vcmp.ge.f32.partialorder (!%p1404_p11), %v1079_v15, 0.0  ;;  %v1111_v21 = vmul.f32 (!%p1404_p11), 0.1, %v1079_v15 }
 0x161   : > { %v1000_v25 = vadd.f32 %v1608_v19, %v1544_v16  ;;  %v1611_v26 = vadd.f32 %v1610_v24, %v1609_v20  ;;  %v1125_v16 = vsel (!%p1404_p11), %vm1093_vm4, %v1077_v60, %v1109_v11  ;;  %v1082_v19 = vadd.f32 (!%p1404_p11), %v1991_v51, %v1059_v7  ;;  %1483 = vst [vmem:[%s2051_s3 + $0x8] sm:$0xff] (!%p1404_p11), %v1451_v13  }
 0x162   : > { %v1126_v20 = vsel (!%p1404_p11), %vm1094_vm5, %v1078_v4, %v1110_v14  ;;  %vm1096_vm7 = vcmp.ge.f32.partialorder (!%p1404_p11), %v1080_v17, 0.0  ;;  %vm1097_vm8 = vcmp.ge.f32.partialorder (!%p1404_p11), %v1081_v18, 0.0 }
 0x163   : > { %v1026_v28 = vadd.f32 %v1000_v25, %v368_v22  ;;  %v1003_v29 = vadd.f32 %v1611_v26, %v1547_v23  ;;  %v1456_v24 = vpack.c.bf16 (!%p1404_p11), %v1126_v20, %v1125_v16  ;;  %v1112_v25 = vmul.f32 (!%p1404_p11), 0.1, %v1080_v17 }
 0x164   : > { %v1548_v30 = vpop.f32.mrb[28].mxu0  ;;  %v1060_v12 = vld [vmem:[#allocation2 + $0x50] sm:$0xff] (!%p1404_p11)  ;;  %vm1098_vm9 = vcmp.ge.f32.partialorder (!%p1404_p11), %v1082_v19, 0.0 }
 0x165   : > { %1042 = vst [vmem:[#allocation2 + $0x60] sm:$0xff] %v1026_v28  ;;  %v1027_v31 = vadd.f32 %v1003_v29, %v369_v27  ;;  %v1612_v32 = vpop.f32.mrb[28].mxu1  ;;  %v1549_v33 = vpop.f32.mrb[29].mxu0  ;;  %v1083_v23 = vadd.f32 (!%p1404_p11), %v1991_v51, %v1060_v12  ;;  %v1127_v27 = vsel (!%p1404_p11), %vm1095_vm6, %v1079_v15, %v1111_v21  ;;  %v1113_v28 = vmul.f32 (!%p1404_p11), 0.1, %v1081_v18  ;;  %1484 = vst [vmem:[%s2051_s3 + $0x10] sm:$0xff] (!%p1404_p11), %v1456_v24  }
 0x166   : > { %v1550_v34 = vadd.f32 %v1549_v33, %v1548_v30  ;;  %v1613_v35 = vpop.f32.mrb[29].mxu1  ;;  %v1551_v36 = vpop.f32.mrb[30].mxu0  ;;  %v1061_v22 = vld [vmem:[#allocation2 + $0x58] sm:$0xff] (!%p1404_p11)  ;;  %v1114_v29 = vmul.f32 (!%p1404_p11), 0.1, %v1082_v19  ;;  %v1128_v30 = vsel (!%p1404_p11), %vm1096_vm7, %v1080_v17, %v1112_v25 }
 0x167   : > { %1043 = vst [vmem:[#allocation2 + $0x68] sm:$0xff] %v1027_v31  ;;  %v1614_v37 = vadd.f32 %v1613_v35, %v1612_v32  ;;  %v1615_v38 = vpop.f32.mrb[30].mxu1  ;;  %v1552_v39 = vpop.f32.mrb[31].mxu0  ;;  %v1084_v31 = vadd.f32 (!%p1404_p11), %v1991_v51, %v1061_v22  ;;  %vm1099_vm10 = vcmp.ge.f32.partialorder (!%p1404_p11), %v1083_v23, 0.0  ;;  %v1115_v32 = vmul.f32 (!%p1404_p11), 0.1, %v1083_v23 }
 0x168   : > { %v1553_v41 = vadd.f32 %v1552_v39, %v1551_v36  ;;  %v1616_v42 = vpop.f32.mrb[31].mxu1  ;;  %v1461_v35 = vpack.c.bf16 (!%p1404_p11), %v1128_v30, %v1127_v27  ;;  %v1129_v36 = vsel (!%p1404_p11), %vm1097_vm8, %v1081_v18, %v1113_v28 }
 0x169   : > { %v1008_v43 = vadd.f32 %v1614_v37, %v1550_v34  ;;  %v1617_v44 = vadd.f32 %v1616_v42, %v1615_v38  ;;  %1049 = sbr.rel (%p1404_p11) target bundleno = 383 (0x17f), region = 63  ;;  %v1130_v37 = vsel (!%p1404_p11), %vm1098_vm9, %v1082_v19, %v1114_v29  ;;  %vm1100_vm11 = vcmp.ge.f32.partialorder (!%p1404_p11), %v1084_v31, 0.0 }
 0x16a   : > { %v1131_v42 = vsel (!%p1404_p11), %vm1099_vm10, %v1083_v23, %v1115_v32  ;;  %1485 = vst [vmem:[%s2051_s3 + $0x18] sm:$0xff] (!%p1404_p11), %v1461_v35  }
 0x16b   : > { %v1028_v46 = vadd.f32 %v1008_v43, %v370_v40  ;;  %v1011_v47 = vadd.f32 %v1617_v44, %v1553_v41  ;;  %v1466_v40 = vpack.c.bf16 (!%p1404_p11), %v1130_v37, %v1129_v36  ;;  %v1116_v41 = vmul.f32 (!%p1404_p11), 0.1, %v1084_v31 }
 0x16c   : > { %v1062_v26 = vld [vmem:[#allocation2 + $0x60] sm:$0xff] (!%p1404_p11) }
 0x16d   : > { %1044 = vst [vmem:[#allocation2 + $0x70] sm:$0xff] %v1028_v46  ;;  %v1029_v48 = vadd.f32 %v1011_v47, %v371_v45  ;;  %v1085_v38 = vadd.f32 (!%p1404_p11), %v1991_v51, %v1062_v26  ;;  %1486 = vst [vmem:[%s2051_s3 + $0x20] sm:$0xff] (!%p1404_p11), %v1466_v40   ;;  %v1132_v46 = vsel (!%p1404_p11), %vm1100_vm11, %v1084_v31, %v1116_v41 }
 0x16e   : > { %v1063_v33 = vld [vmem:[#allocation2 + $0x68] sm:$0xff] (!%p1404_p11) }
 0x16f   : > { %1045 = vst [vmem:[#allocation2 + $0x78] sm:$0xff] %v1029_v48  ;;  %v1086_v43 = vadd.f32 (!%p1404_p11), %v1991_v51, %v1063_v33  ;;  %vm1101_vm12 = vcmp.ge.f32.partialorder (!%p1404_p11), %v1085_v38, 0.0  ;;  %v1117_v44 = vmul.f32 (!%p1404_p11), 0.1, %v1085_v38  ;;  %v1471_v48 = vpack.c.bf16 (!%p1404_p11), %v1132_v46, %v1131_v42 }
 0x171   : > { %vm1102_vm13 = vcmp.ge.f32.partialorder %v1086_v43, 0.0  ;;  %v1118_v49 = vmul.f32 0.1, %v1086_v43  ;;  %v1133_v50 = vsel %vm1101_vm12, %v1085_v38, %v1117_v44  ;;  %1487 = vst [vmem:[%s2051_s3 + $0x28] sm:$0xff] %v1471_v48  }
 0x173   : > { %v1134_v54 = vsel %vm1102_vm13, %v1086_v43, %v1118_v49 }
 0x174   : > { %v1064_v34 = vld [vmem:[#allocation2 + $0x70] sm:$0xff]  ;;  %v1476_v55 = vpack.c.bf16 %v1134_v54, %v1133_v50 }
 0x175   : > { %v1087_v45 = vadd.f32 %v1991_v51, %v1064_v34 }
 0x176   : > { %v1065_v39 = vld [vmem:[#allocation2 + $0x78] sm:$0xff]  ;;  %1488 = vst [vmem:[%s2051_s3 + $0x30] sm:$0xff] %v1476_v55  }
 0x177   : > { %v1088_v47 = vadd.f32 %v1991_v51, %v1065_v39  ;;  %vm1103_vm14 = vcmp.ge.f32.partialorder %v1087_v45, 0.0  ;;  %v1119_v52 = vmul.f32 0.1, %v1087_v45 }
 0x179   : > { %vm1104_vm15 = vcmp.ge.f32.partialorder %v1088_v47, 0.0  ;;  %v1120_v53 = vmul.f32 0.1, %v1088_v47  ;;  %v1135_v56 = vsel %vm1103_vm14, %v1087_v45, %v1119_v52 }
 0x17b   : > { %v1136_v57 = vsel %vm1104_vm15, %v1088_v47, %v1120_v53 }
 0x17c   : > { %v1481_v58 = vpack.c.bf16 %v1136_v57, %v1135_v56 }
 0x17e   : > { %1489 = vst [vmem:[%s2051_s3 + $0x38] sm:$0xff] %v1481_v58  }
 0x17f PF: > { %s13_s16 = sadd.s32 1, %s1777_s16   ;;  %s2052_s12 = smov %s1765_s13 }
 0x180   : > { %p10_p12 = scmp.ge.s32.totalorder %s13_s16, 4   ;;  %s2053_s13 = smov %s1835_s20 }
 0x181   : > { %s2054_s14 = smov %s1773_s15  ;;  %s2055_s15 = smov %s2057_s17 }
 0x182   :  { %12 = sbr.rel (!%p10_p12) target bundleno = 3 (0x3), region = 104 }

// kernel: upconv7_forward.24
= control target key start
LH: loop header
LB: loop body
LE: loop exit
PB: predicated region body
PF: predicated region fallthrough
CT: control target
= control target key end

     0   :  { %s1764_s12 = smov 0   ;;  %s1766_s13 = smov 0   ;;  %s2021_s0 = inlined_call_operand.vmem [shape: bf16[80,3584], index: 0, kind: input, shape index: {}]   ;;  %s2022_s1 = inlined_call_operand.vmem [shape: bf16[3584,256], index: 1, kind: input, shape index: {}]   ;;  %s2023_s2 = inlined_call_operand.vmem [shape: f32[1,256], index: 2, kind: input, shape index: {}]   ;;  %s2024_s3 = inlined_call_operand.vmem [shape: bf16[80,256], index: 3, kind: output, shape index: {}]  }
   0x1   :  { %s1768_s14 = smov 0   ;;  %s1770_s15 = smov 0  }
   0x2   :  { %s1772_s16 = smov 0  }
   0x3 LB: > { %s25_s17 = sadd.s32 1, %s1737_s15  ;;  %p48_p1 = scmp.ne.s32.totalorder %s1729_s13, %s1725_s12  ;;  %s1741_s16 = sphi %s1772_s16, %s13_s16   ;;  %s1737_s15 = sphi %s1770_s15, %s2028_s15   ;;  %s1733_s14 = sphi %s1768_s14, %s2027_s14   ;;  %s1729_s13 = sphi %s1766_s13, %s2026_s13   ;;  %s1725_s12 = sphi %s1764_s12, %s2025_s12  }
   0x4   : > { %p26_p0 = scmp.ge.s32.totalorder %s25_s17, 7  ;;  %p49_p2 = scmp.eq.s32.totalorder %s1741_s16, 0 }
   0x5   : > { %s41_s19 = sadd.s32 1, %s1729_s13  ;;  %p1395_p5 = scmp.ge.s32.totalorder %s1741_s16, 7 }
   0x6   : > { %s2030_s17 = smov (%p26_p0, %s25_s17), 0  ;;  %p50_p3 = por %p49_p2, %p48_p1 }
   0x7   : > { %s37_s18 = ssub.s32 %s1737_s15, %s2030_s17  ;;  %164 = sbr.rel (%p1395_p5) target bundleno = 29 (0x1d), region = 20 }
   0x8   : > { %p39_p4 = scmp.eq.s32.totalorder %s37_s18, 0 }
   0xa   : > { %s1799_s20 = scalar_select %p39_p4, %s1729_s13, %s41_s19  }
   0xe   : > { %167 = sbr.rel (!%p50_p3) target bundleno = 29 (0x1d), region = 24  ;;  %s169_s21 = sand.u32 (%p50_p3), 1, %s1729_s13  }
   0xf   : > { %s1502_s22 = sshll.u32 (%p50_p3), %s1737_s15, 4  ;;  %s1534_s23 = smul.u32 (%p50_p3), 160, %s169_s21 }
  0x10   : > { %s1807_s26 = scalar_lea.vmem (%p50_p3), %s2021_s0, %s1502_s22 }
  0x11   : > { %v190_v0 = vld [vmem:[%s1807_s26] sm:$0xff] (%p50_p3)  ;;  %v192_v1 = vld [vmem:[%s1807_s26 + $0x8] sm:$0xff] (%p50_p3)  ;;  %v194_v2 = vld [vmem:[%s1807_s26 + $0x70] sm:$0xff] (%p50_p3)  ;;  %s1815_s27 = scalar_lea.vmem (%p50_p3), [#allocation3], %s1534_s23 }
  0x12   : > { %v196_v3 = vld [vmem:[%s1807_s26 + $0x78] sm:$0xff] (%p50_p3)  ;;  %v198_v4 = vld [vmem:[%s1807_s26 + $0xe0] sm:$0xff] (%p50_p3)  ;;  %v200_v5 = vld [vmem:[%s1807_s26 + $0xe8] sm:$0xff] (%p50_p3)  ;;  %191 = vst [vmem:[%s1815_s27] sm:$0xff] (%p50_p3), %v190_v0 }
  0x13   : > { %193 = vst [vmem:[%s1815_s27 + $0x8] sm:$0xff] (%p50_p3), %v192_v1  ;;  %195 = vst [vmem:[%s1815_s27 + $0x10] sm:$0xff] (%p50_p3), %v194_v2  ;;  %v202_v6 = vld [vmem:[%s1807_s26 + $0x150] sm:$0xff] (%p50_p3)  ;;  %v204_v7 = vld [vmem:[%s1807_s26 + $0x158] sm:$0xff] (%p50_p3) }
  0x14   : > { %197 = vst [vmem:[%s1815_s27 + $0x18] sm:$0xff] (%p50_p3), %v196_v3  ;;  %199 = vst [vmem:[%s1815_s27 + $0x20] sm:$0xff] (%p50_p3), %v198_v4  ;;  %v206_v8 = vld [vmem:[%s1807_s26 + $0x1c0] sm:$0xff] (%p50_p3)  ;;  %v208_v9 = vld [vmem:[%s1807_s26 + $0x1c8] sm:$0xff] (%p50_p3) }
  0x15   : > { %201 = vst [vmem:[%s1815_s27 + $0x28] sm:$0xff] %v200_v5  ;;  %203 = vst [vmem:[%s1815_s27 + $0x30] sm:$0xff] %v202_v6  ;;  %v210_v10 = vld [vmem:[%s1807_s26 + $0x230] sm:$0xff]  ;;  %v212_v11 = vld [vmem:[%s1807_s26 + $0x238] sm:$0xff] }
  0x16   : > { %205 = vst [vmem:[%s1815_s27 + $0x38] sm:$0xff] %v204_v7  ;;  %207 = vst [vmem:[%s1815_s27 + $0x40] sm:$0xff] %v206_v8  ;;  %v214_v12 = vld [vmem:[%s1807_s26 + $0x2a0] sm:$0xff]  ;;  %v216_v13 = vld [vmem:[%s1807_s26 + $0x2a8] sm:$0xff] }
  0x17   : > { %209 = vst [vmem:[%s1815_s27 + $0x48] sm:$0xff] %v208_v9  ;;  %211 = vst [vmem:[%s1815_s27 + $0x50] sm:$0xff] %v210_v10  ;;  %v218_v14 = vld [vmem:[%s1807_s26 + $0x310] sm:$0xff]  ;;  %v220_v15 = vld [vmem:[%s1807_s26 + $0x318] sm:$0xff] }
  0x18   : > { %213 = vst [vmem:[%s1815_s27 + $0x58] sm:$0xff] %v212_v11  ;;  %215 = vst [vmem:[%s1815_s27 + $0x60] sm:$0xff] %v214_v12  ;;  %v222_v16 = vld [vmem:[%s1807_s26 + $0x380] sm:$0xff]  ;;  %v224_v17 = vld [vmem:[%s1807_s26 + $0x388] sm:$0xff] }
  0x19   : > { %217 = vst [vmem:[%s1815_s27 + $0x68] sm:$0xff] %v216_v13  ;;  %219 = vst [vmem:[%s1815_s27 + $0x70] sm:$0xff] %v218_v14  ;;  %v226_v18 = vld [vmem:[%s1807_s26 + $0x3f0] sm:$0xff]  ;;  %v228_v19 = vld [vmem:[%s1807_s26 + $0x3f8] sm:$0xff] }
  0x1a   : > { %221 = vst [vmem:[%s1815_s27 + $0x78] sm:$0xff] %v220_v15  ;;  %223 = vst [vmem:[%s1815_s27 + $0x80] sm:$0xff] %v222_v16 }
  0x1b   : > { %225 = vst [vmem:[%s1815_s27 + $0x88] sm:$0xff] %v224_v17  ;;  %227 = vst [vmem:[%s1815_s27 + $0x90] sm:$0xff] %v226_v18 }
  0x1c   : > { %229 = vst [vmem:[%s1815_s27 + $0x98] sm:$0xff] %v228_v19 }
  0x1d PF: > { %p1398_p6 = scmp.ge.s32.totalorder %s1741_s16, 1  ;;  %p249_p7 = scmp.lt.s32.totalorder %s1741_s16, 8 }
  0x1f   : > { %p250_p8 = pnand %p1398_p6, %p249_p7 }
  0x20   : > { %s256_s28 = sand.u32 (!%p250_p8), 1, %s1725_s12   ;;  %s1399_s29 = sshll.u32 (!%p250_p8), %s1733_s14, 6 }
  0x21   : > { %253 = sbr.rel (%p250_p8) target bundleno = 385 (0x181), region = 51  ;;  %p302_p9 = scmp.lt.s32.totalorder (!%p250_p8), %s1399_s29, 447 }
  0x22   : > { %s1535_s30 = smul.u32 (!%p250_p8), 160, %s256_s28  ;;  %p1402_p10 = scmp.ne.s32.totalorder (!%p250_p8), %s1733_s14, 0 }
  0x24   : > { %s1860_s8 = scalar_lea.vmem (!%p250_p8), [#allocation3], %s1535_s30 }
  0x28   : > { %s2032_s29 = smov (!%p302_p9, %s1399_s29), 447  ;;  %332 = sbr.rel (%p1402_p10) target bundleno = 52 (0x34), region = 59 }
  0x29   : > { %s1503_s4 = sshll.u32 %s2032_s29, 3  ;;  %v1743_v20 = vmov (!%p1402_p10), 0.0  }
  0x2a   : > { %s1858_s7 = scalar_lea.vmem %s2022_s1, %s1503_s4  ;;  %333 = vst [vmem:[#allocation2] sm:$0xff] (!%p1402_p10), %v1743_v20  ;;  %334 = vst [vmem:[#allocation2 + $0x8] sm:$0xff] (!%p1402_p10), %v1743_v20 }
  0x2b   : > { %335 = vst [vmem:[#allocation2 + $0x10] sm:$0xff] (!%p1402_p10), %v1743_v20  ;;  %336 = vst [vmem:[#allocation2 + $0x18] sm:$0xff] (!%p1402_p10), %v1743_v20 }
  0x2c   : > { %337 = vst [vmem:[#allocation2 + $0x20] sm:$0xff] (!%p1402_p10), %v1743_v20  ;;  %338 = vst [vmem:[#allocation2 + $0x28] sm:$0xff] (!%p1402_p10), %v1743_v20 }
  0x2d   : > { %339 = vst [vmem:[#allocation2 + $0x30] sm:$0xff] (!%p1402_p10), %v1743_v20  ;;  %340 = vst [vmem:[#allocation2 + $0x38] sm:$0xff] (!%p1402_p10), %v1743_v20 }
  0x2e   : > { %341 = vst [vmem:[#allocation2 + $0x40] sm:$0xff] (!%p1402_p10), %v1743_v20  ;;  %342 = vst [vmem:[#allocation2 + $0x48] sm:$0xff] (!%p1402_p10), %v1743_v20 }
  0x2f   : > { %343 = vst [vmem:[#allocation2 + $0x50] sm:$0xff] %v1743_v20  ;;  %344 = vst [vmem:[#allocation2 + $0x58] sm:$0xff] %v1743_v20 }
  0x30   : > { %345 = vst [vmem:[#allocation2 + $0x60] sm:$0xff] %v1743_v20  ;;  %346 = vst [vmem:[#allocation2 + $0x68] sm:$0xff] %v1743_v20 }
  0x31   : > { %347 = vst [vmem:[#allocation2 + $0x70] sm:$0xff] %v1743_v20  ;;  %348 = vst [vmem:[#allocation2 + $0x78] sm:$0xff] %v1743_v20 }
  0x32   : > { %349 = vst [vmem:[#allocation2 + $0x80] sm:$0xff] %v1743_v20  ;;  %350 = vst [vmem:[#allocation2 + $0x88] sm:$0xff] %v1743_v20 }
  0x33   : > { %351 = vst [vmem:[#allocation2 + $0x90] sm:$0xff] %v1743_v20  ;;  %352 = vst [vmem:[#allocation2 + $0x98] sm:$0xff] %v1743_v20 }
  0x34 PF: > { %v1577_v21 = vld [vmem:[%s1858_s7 + $0x4] ss:$8 sps:$4 sm:$0xff]   ;;  %v1581_v23 = vld [vmem:[%s1858_s7] ss:$8 sps:$4 sm:$0xff]   ;;  %v1583_v25 = vld [vmem:[%s1858_s7 + $0x14] ss:$8 sps:$4 sm:$0xff]  }
  0x35   : > { %v1579_v22 = vld [vmem:[%s1858_s7 + $0x104] ss:$8 sps:$4 sm:$0xff]   ;;  %877 = vmatprep.subr.bf16.mxu1 %v1577_v21  ;;  %v1582_v24 = vld [vmem:[%s1858_s7 + $0x100] ss:$8 sps:$4 sm:$0xff]   ;;  %v1585_v26 = vld [vmem:[%s1858_s7 + $0x114] ss:$8 sps:$4 sm:$0xff]  }
  0x36   : > { %960 = vmatprep.subr.bf16.mxu0 %v1579_v22  ;;  %878 = vmatpush1.bf16.msra.mxu1 %v1581_v23  ;;  %v1587_v27 = vld [vmem:[%s1858_s7 + $0x10] ss:$8 sps:$4 sm:$0xff]   ;;  %v1589_v29 = vld [vmem:[%s1858_s7 + $0x24] ss:$8 sps:$4 sm:$0xff]   ;;  %v1593_v31 = vld [vmem:[%s1858_s7 + $0x20] ss:$8 sps:$4 sm:$0xff]  }
  0x37   : > { %961 = vmatpush1.bf16.msra.mxu0 %v1582_v24  ;;  %879 = vmatprep.subr.bf16.mxu1 %v1583_v25  ;;  %v1588_v28 = vld [vmem:[%s1858_s7 + $0x110] ss:$8 sps:$4 sm:$0xff]   ;;  %v1591_v30 = vld [vmem:[%s1858_s7 + $0x124] ss:$8 sps:$4 sm:$0xff]   ;;  %v1594_v32 = vld [vmem:[%s1858_s7 + $0x120] ss:$8 sps:$4 sm:$0xff]  }
  0x38   : > { %962 = vmatprep.subr.bf16.mxu0 %v1585_v26  ;;  %v1595_v33 = vld [vmem:[%s1858_s7 + $0x34] ss:$8 sps:$4 sm:$0xff]   ;;  %v1599_v35 = vld [vmem:[%s1858_s7 + $0x30] ss:$8 sps:$4 sm:$0xff]   ;;  %v1601_v37 = vld [vmem:[%s1858_s7 + $0x44] ss:$8 sps:$4 sm:$0xff]  }
  0x39   : > { %v1597_v34 = vld [vmem:[%s1858_s7 + $0x134] ss:$8 sps:$4 sm:$0xff]   ;;  %v1600_v36 = vld [vmem:[%s1858_s7 + $0x130] ss:$8 sps:$4 sm:$0xff]   ;;  %v1603_v38 = vld [vmem:[%s1858_s7 + $0x144] ss:$8 sps:$4 sm:$0xff]  }
  0x3a   : > { %880 = vmatpush1.bf16.msra.mxu1 %v1587_v27  ;;  %v1605_v39 = vld [vmem:[%s1858_s7 + $0x40] ss:$8 sps:$4 sm:$0xff]   ;;  %v1607_v41 = vld [vmem:[%s1858_s7 + $0x54] ss:$8 sps:$4 sm:$0xff]   ;;  %v1611_v43 = vld [vmem:[%s1858_s7 + $0x50] ss:$8 sps:$4 sm:$0xff]  }
  0x3b   : > { %963 = vmatpush1.bf16.msra.mxu0 %v1588_v28  ;;  %881 = vmatprep.subr.bf16.mxu1 %v1589_v29  ;;  %v1606_v40 = vld [vmem:[%s1858_s7 + $0x140] ss:$8 sps:$4 sm:$0xff]   ;;  %v1609_v42 = vld [vmem:[%s1858_s7 + $0x154] ss:$8 sps:$4 sm:$0xff]   ;;  %v1612_v44 = vld [vmem:[%s1858_s7 + $0x150] ss:$8 sps:$4 sm:$0xff]  }
  0x3c   : > { %964 = vmatprep.subr.bf16.mxu0 %v1591_v30  ;;  %v1613_v45 = vld [vmem:[%s1858_s7 + $0x64] ss:$8 sps:$4 sm:$0xff]   ;;  %v1617_v47 = vld [vmem:[%s1858_s7 + $0x60] ss:$8 sps:$4 sm:$0xff]   ;;  %v1619_v49 = vld [vmem:[%s1858_s7 + $0x74] ss:$8 sps:$4 sm:$0xff]  }
  0x3d   : > { %v1615_v46 = vld [vmem:[%s1858_s7 + $0x164] ss:$8 sps:$4 sm:$0xff]   ;;  %v1618_v48 = vld [vmem:[%s1858_s7 + $0x160] ss:$8 sps:$4 sm:$0xff]   ;;  %v1621_v50 = vld [vmem:[%s1858_s7 + $0x174] ss:$8 sps:$4 sm:$0xff]  }
  0x3e   : > { %882 = vmatpush1.bf16.msra.mxu1 %v1593_v31  ;;  %v1623_v51 = vld [vmem:[%s1858_s7 + $0x70] ss:$8 sps:$4 sm:$0xff]   ;;  %v1625_v53 = vld [vmem:[%s1858_s7 + $0x84] ss:$8 sps:$4 sm:$0xff]   ;;  %v1629_v55 = vld [vmem:[%s1858_s7 + $0x80] ss:$8 sps:$4 sm:$0xff]  }
  0x3f   : > { %965 = vmatpush1.bf16.msra.mxu0 %v1594_v32  ;;  %883 = vmatprep.subr.bf16.mxu1 %v1595_v33  ;;  %v1624_v52 = vld [vmem:[%s1858_s7 + $0x170] ss:$8 sps:$4 sm:$0xff]   ;;  %v1627_v54 = vld [vmem:[%s1858_s7 + $0x184] ss:$8 sps:$4 sm:$0xff]   ;;  %v1630_v56 = vld [vmem:[%s1858_s7 + $0x180] ss:$8 sps:$4 sm:$0xff]  }
  0x40   : > { %966 = vmatprep.subr.bf16.mxu0 %v1597_v34  ;;  %v1631_v57 = vld [vmem:[%s1858_s7 + $0x94] ss:$8 sps:$4 sm:$0xff]   ;;  %v1635_v59 = vld [vmem:[%s1858_s7 + $0x90] ss:$8 sps:$4 sm:$0xff]   ;;  %v1637_v61 = vld [vmem:[%s1858_s7 + $0xa4] ss:$8 sps:$4 sm:$0xff]  }
  0x41   : > { %v1633_v58 = vld [vmem:[%s1858_s7 + $0x194] ss:$8 sps:$4 sm:$0xff]   ;;  %v1636_v60 = vld [vmem:[%s1858_s7 + $0x190] ss:$8 sps:$4 sm:$0xff]   ;;  %v1639_v62 = vld [vmem:[%s1858_s7 + $0x1a4] ss:$8 sps:$4 sm:$0xff]  }
  0x42   : > { %884 = vmatpush1.bf16.msra.mxu1 %v1599_v35  ;;  %v1641_v63 = vld [vmem:[%s1858_s7 + $0xa0] ss:$8 sps:$4 sm:$0xff]   ;;  %v1643_v1 = vld [vmem:[%s1858_s7 + $0xb4] ss:$8 sps:$4 sm:$0xff]   ;;  %v1647_v3 = vld [vmem:[%s1858_s7 + $0xb0] ss:$8 sps:$4 sm:$0xff]  }
  0x43   : > { %967 = vmatpush1.bf16.msra.mxu0 %v1600_v36  ;;  %885 = vmatprep.subr.bf16.mxu1 %v1601_v37  ;;  %v1642_v0 = vld [vmem:[%s1858_s7 + $0x1a0] ss:$8 sps:$4 sm:$0xff]   ;;  %v1645_v2 = vld [vmem:[%s1858_s7 + $0x1b4] ss:$8 sps:$4 sm:$0xff]   ;;  %v1648_v4 = vld [vmem:[%s1858_s7 + $0x1b0] ss:$8 sps:$4 sm:$0xff]  }
  0x44   : > { %968 = vmatprep.subr.bf16.mxu0 %v1603_v38  ;;  %v1649_v5 = vld [vmem:[%s1858_s7 + $0xc4] ss:$8 sps:$4 sm:$0xff]   ;;  %v1653_v9 = vld [vmem:[%s1858_s7 + $0xc0] ss:$8 sps:$4 sm:$0xff]   ;;  %v1655_v11 = vld [vmem:[%s1858_s7 + $0xd4] ss:$8 sps:$4 sm:$0xff]  }
  0x45   : > { %v1675_v6 = vld [vmem:[%s1860_s8 + $0x4] ss:$16 sps:$4 sm:$0xff]   ;;  %v1678_v8 = vld [vmem:[%s1860_s8 + $0xc] ss:$16 sps:$4 sm:$0xff]   ;;  %v1654_v10 = vld [vmem:[%s1858_s7 + $0x1c0] ss:$8 sps:$4 sm:$0xff]  }
  0x46   : > { %886 = vmatpush1.bf16.msra.mxu1 %v1605_v39  ;;  %v1651_v7 = vld [vmem:[%s1858_s7 + $0x1c4] ss:$8 sps:$4 sm:$0xff]   ;;  %909 = vmatprep.mubr.bf16.mxu1 %v1675_v6  ;;  %v1657_v12 = vld [vmem:[%s1858_s7 + $0x1d4] ss:$8 sps:$4 sm:$0xff]   ;;  %v1659_v13 = vld [vmem:[%s1858_s7 + $0xd0] ss:$8 sps:$4 sm:$0xff]  }
  0x47   : > { %969 = vmatpush1.bf16.msra.mxu0 %v1606_v40  ;;  %887 = vmatprep.subr.bf16.mxu1 %v1607_v41  ;;  %v1660_v14 = vld [vmem:[%s1858_s7 + $0x1d0] ss:$8 sps:$4 sm:$0xff]   ;;  %v1661_v15 = vld [vmem:[%s1858_s7 + $0xe4] ss:$8 sps:$4 sm:$0xff]   ;;  %v1665_v17 = vld [vmem:[%s1858_s7 + $0xe0] ss:$8 sps:$4 sm:$0xff]  }
  0x48   : > { %970 = vmatprep.subr.bf16.mxu0 %v1609_v42  ;;  %992 = vmatprep.mubr.bf16.mxu0 %v1678_v8  ;;  %v1663_v16 = vld [vmem:[%s1858_s7 + $0x1e4] ss:$8 sps:$4 sm:$0xff]   ;;  %v1666_v18 = vld [vmem:[%s1858_s7 + $0x1e0] ss:$8 sps:$4 sm:$0xff]   ;;  %v1667_v19 = vld [vmem:[%s1858_s7 + $0xf4] ss:$8 sps:$4 sm:$0xff]  }
  0x49   : > { %v1669_v20 = vld [vmem:[%s1858_s7 + $0x1f4] ss:$8 sps:$4 sm:$0xff]   ;;  %v1671_v21 = vld [vmem:[%s1858_s7 + $0xf0] ss:$8 sps:$4 sm:$0xff]   ;;  %v353_v42 = vld [vmem:[#allocation2] sm:$0xff]  ;;  %p1487_p11 = scmp.ne.s32.totalorder %s1733_s14, 6 }
  0x4a   : > { %888 = vmatpush1.bf16.msra.mxu1 %v1611_v43  ;;  %v1672_v22 = vld [vmem:[%s1858_s7 + $0x1f0] ss:$8 sps:$4 sm:$0xff]   ;;  %v1679_v25 = vld [vmem:[%s1860_s8 + $0x24] ss:$16 sps:$4 sm:$0xff]   ;;  %v1681_v26 = vld [vmem:[%s1860_s8 + $0x2c] ss:$16 sps:$4 sm:$0xff]  }
  0x4b   : > { %971 = vmatpush1.bf16.msra.mxu0 %v1612_v44  ;;  %889 = vmatprep.subr.bf16.mxu1 %v1613_v45  ;;  %v1673_v23 = vld [vmem:[%s1860_s8] ss:$16 sps:$4 sm:$0xff]   ;;  %v1676_v24 = vld [vmem:[%s1860_s8 + $0x8] ss:$16 sps:$4 sm:$0xff]   ;;  %v1685_v29 = vld [vmem:[%s1860_s8 + $0x44] ss:$16 sps:$4 sm:$0xff]  }
  0x4c   : > { %972 = vmatprep.subr.bf16.mxu0 %v1615_v46  ;;  %v1683_v27 = vld [vmem:[%s1860_s8 + $0x20] ss:$16 sps:$4 sm:$0xff]   ;;  %v1684_v28 = vld [vmem:[%s1860_s8 + $0x28] ss:$16 sps:$4 sm:$0xff]   ;;  %v1687_v30 = vld [vmem:[%s1860_s8 + $0x4c] ss:$16 sps:$4 sm:$0xff]  }
  0x4d   : > { %v1689_v31 = vld [vmem:[%s1860_s8 + $0x40] ss:$16 sps:$4 sm:$0xff]   ;;  %v1690_v32 = vld [vmem:[%s1860_s8 + $0x48] ss:$16 sps:$4 sm:$0xff]   ;;  %v1691_v33 = vld [vmem:[%s1860_s8 + $0x64] ss:$16 sps:$4 sm:$0xff]  }
  0x4e   : > { %890 = vmatpush1.bf16.msra.mxu1 %v1617_v47  ;;  %v1693_v34 = vld [vmem:[%s1860_s8 + $0x6c] ss:$16 sps:$4 sm:$0xff]   ;;  %v1695_v35 = vld [vmem:[%s1860_s8 + $0x60] ss:$16 sps:$4 sm:$0xff]   ;;  %v1696_v36 = vld [vmem:[%s1860_s8 + $0x68] ss:$16 sps:$4 sm:$0xff]  }
  0x4f   : > { %973 = vmatpush1.bf16.msra.mxu0 %v1618_v48  ;;  %891 = vmatprep.subr.bf16.mxu1 %v1619_v49  ;;  %v1697_v37 = vld [vmem:[%s1860_s8 + $0x84] ss:$16 sps:$4 sm:$0xff]   ;;  %v1699_v38 = vld [vmem:[%s1860_s8 + $0x8c] ss:$16 sps:$4 sm:$0xff]   ;;  %v1701_v39 = vld [vmem:[%s1860_s8 + $0x80] ss:$16 sps:$4 sm:$0xff]  }
  0x50   : > { %974 = vmatprep.subr.bf16.mxu0 %v1621_v50  ;;  %v1702_v40 = vld [vmem:[%s1860_s8 + $0x88] ss:$16 sps:$4 sm:$0xff]   ;;  %v355_v50 = vld [vmem:[#allocation2 + $0x10] sm:$0xff] }
  0x51   : > { %v354_v46 = vld [vmem:[#allocation2 + $0x8] sm:$0xff]  ;;  %v359_v6 = vld [vmem:[#allocation2 + $0x30] sm:$0xff] }
  0x52   : > { %892 = vmatpush1.bf16.msra.mxu1 %v1623_v51 }
  0x53   : > { %975 = vmatpush1.bf16.msra.mxu0 %v1624_v52  ;;  %893 = vmatprep.subr.bf16.mxu1 %v1625_v53 }
  0x54   : > { %976 = vmatprep.subr.bf16.mxu0 %v1627_v54 }
  0x56   : > { %894 = vmatpush1.bf16.msra.mxu1 %v1629_v55  ;;  %v356_v55 = vld [vmem:[#allocation2 + $0x18] sm:$0xff] }
  0x57   : > { %977 = vmatpush1.bf16.msra.mxu0 %v1630_v56  ;;  %895 = vmatprep.subr.bf16.mxu1 %v1631_v57 }
  0x58   : > { %978 = vmatprep.subr.bf16.mxu0 %v1633_v58 }
  0x5a   : > { %896 = vmatpush1.bf16.msra.mxu1 %v1635_v59 }
  0x5b   : > { %979 = vmatpush1.bf16.msra.mxu0 %v1636_v60  ;;  %897 = vmatprep.subr.bf16.mxu1 %v1637_v61 }
  0x5c   : > { %980 = vmatprep.subr.bf16.mxu0 %v1639_v62  ;;  %v357_v62 = vld [vmem:[#allocation2 + $0x20] sm:$0xff] }
  0x5e   : > { %898 = vmatpush1.bf16.msra.mxu1 %v1641_v63 }
  0x5f   : > { %981 = vmatpush1.bf16.msra.mxu0 %v1642_v0  ;;  %899 = vmatprep.subr.bf16.mxu1 %v1643_v1 }
  0x60   : > { %982 = vmatprep.subr.bf16.mxu0 %v1645_v2  ;;  %v358_v2 = vld [vmem:[#allocation2 + $0x28] sm:$0xff] }
  0x62   : > { %900 = vmatpush1.bf16.msra.mxu1 %v1647_v3 }
  0x63   : > { %983 = vmatpush1.bf16.msra.mxu0 %v1648_v4  ;;  %901 = vmatprep.subr.bf16.mxu1 %v1649_v5 }
  0x64   : > { %984 = vmatprep.subr.bf16.mxu0 %v1651_v7 }
  0x66   : > { %902 = vmatpush1.bf16.msra.mxu1 %v1653_v9 }
  0x67   : > { %985 = vmatpush1.bf16.msra.mxu0 %v1654_v10  ;;  %903 = vmatprep.subr.bf16.mxu1 %v1655_v11  ;;  %v360_v11 = vld [vmem:[#allocation2 + $0x38] sm:$0xff] }
  0x68   : > { %986 = vmatprep.subr.bf16.mxu0 %v1657_v12 }
  0x6a   : > { %904 = vmatpush1.bf16.msra.mxu1 %v1659_v13 }
  0x6b   : > { %987 = vmatpush1.bf16.msra.mxu0 %v1660_v14  ;;  %905 = vmatprep.subr.bf16.mxu1 %v1661_v15 }
  0x6c   : > { %988 = vmatprep.subr.bf16.mxu0 %v1663_v16 }
  0x6e   : > { %906 = vmatpush1.bf16.msra.mxu1 %v1665_v17 }
  0x6f   : > { %989 = vmatpush1.bf16.msra.mxu0 %v1666_v18  ;;  %907 = vmatprep.subr.bf16.mxu1 %v1667_v19  ;;  %v361_v18 = vld [vmem:[#allocation2 + $0x40] sm:$0xff] }
  0x70   : > { %990 = vmatprep.subr.bf16.mxu0 %v1669_v20 }
  0x72   : > { %908 = vmatpush1.bf16.msra.mxu1 %v1671_v21 }
  0x73   : > { %991 = vmatpush1.bf16.msra.mxu0 %v1672_v22  ;;  %v362_v22 = vld [vmem:[#allocation2 + $0x48] sm:$0xff] }
  0x75   : > { %910 = vmatmul.mubr.bf16.vlgmr.msra.gmra.mrb[0].mxu1 %v1673_v23 }
  0x76   : > { %993 = vmatmul.mubr.bf16.vlgmr.msra.gmra.mrb[0].mxu0 %v1676_v24  ;;  %919 = vmatprep.mubr.bf16.mxu1 %v1679_v25 }
  0x77   : > { %1002 = vmatprep.mubr.bf16.mxu0 %v1681_v26  ;;  %v363_v26 = vld [vmem:[#allocation2 + $0x50] sm:$0xff] }
  0x7d   : > { %920 = vmatmul.mubr.bf16.gmra.mrb[4].mxu1 %v1683_v27 }
  0x7e   : > { %1003 = vmatmul.mubr.bf16.gmra.mrb[4].mxu0 %v1684_v28  ;;  %929 = vmatprep.mubr.bf16.mxu1 %v1685_v29 }
  0x7f   : > { %1012 = vmatprep.mubr.bf16.mxu0 %v1687_v30 }
  0x85   : > { %930 = vmatmul.mubr.bf16.gmra.mrb[8].mxu1 %v1689_v31  ;;  %v364_v31 = vld [vmem:[#allocation2 + $0x58] sm:$0xff] }
  0x86   : > { %1013 = vmatmul.mubr.bf16.gmra.mrb[8].mxu0 %v1690_v32  ;;  %939 = vmatprep.mubr.bf16.mxu1 %v1691_v33 }
  0x87   : > { %1022 = vmatprep.mubr.bf16.mxu0 %v1693_v34 }
  0x8d   : > { %940 = vmatmul.mubr.bf16.gmra.mrb[12].mxu1 %v1695_v35 }
  0x8e   : > { %1023 = vmatmul.mubr.bf16.gmra.mrb[12].mxu0 %v1696_v36  ;;  %949 = vmatprep.mubr.bf16.mxu1 %v1697_v37 }
  0x8f   : > { %1032 = vmatprep.mubr.bf16.mxu0 %v1699_v38  ;;  %v365_v38 = vld [vmem:[#allocation2 + $0x60] sm:$0xff] }
  0x95   : > { %950 = vmatmul.mubr.bf16.gmra.mrb[16].mxu1 %v1701_v39 }
  0x96   : > { %1033 = vmatmul.mubr.bf16.gmra.mrb[16].mxu0 %v1702_v40 }
 0x148   : > { %v911_v41 = vpop.f32.mrb[0].mxu1 }
 0x149   : > { %v994_v43 = vpop.f32.mrb[0].mxu0  ;;  %v913_v45 = vpop.f32.mrb[1].mxu1 }
 0x14a   : > { %v995_v44 = vadd.f32 %v994_v43, %v911_v41  ;;  %v996_v47 = vpop.f32.mrb[1].mxu0  ;;  %v915_v49 = vpop.f32.mrb[2].mxu1 }
 0x14b   : > { %v997_v48 = vadd.f32 %v996_v47, %v913_v45  ;;  %v998_v51 = vpop.f32.mrb[2].mxu0  ;;  %v917_v54 = vpop.f32.mrb[3].mxu1 }
 0x14c   : > { %v1043_v52 = vadd.f32 %v995_v44, %v353_v42  ;;  %v999_v53 = vadd.f32 %v998_v51, %v915_v49  ;;  %v1000_v56 = vpop.f32.mrb[3].mxu0  ;;  %v366_v42 = vld [vmem:[#allocation2 + $0x68] sm:$0xff]  ;;  %v368_v51 = vld [vmem:[#allocation2 + $0x78] sm:$0xff] }
 0x14d   : > { %v1044_v57 = vadd.f32 %v997_v48, %v354_v46  ;;  %v1001_v58 = vadd.f32 %v1000_v56, %v917_v54  ;;  %v367_v46 = vld [vmem:[#allocation2 + $0x70] sm:$0xff] }
 0x14e   : > { %1063 = vst [vmem:[#allocation2] sm:$0xff] %v1043_v52  ;;  %v1045_v59 = vadd.f32 %v999_v53, %v355_v50 }
 0x14f   : > { %1064 = vst [vmem:[#allocation2 + $0x8] sm:$0xff] %v1044_v57  ;;  %v1046_v60 = vadd.f32 %v1001_v58, %v356_v55  ;;  %v369_v58 = vld [vmem:[#allocation2 + $0x80] sm:$0xff] }
 0x150   : > { %1065 = vst [vmem:[#allocation2 + $0x10] sm:$0xff] %v1045_v59  ;;  %v921_v61 = vpop.f32.mrb[4].mxu1 }
 0x151   : > { %1066 = vst [vmem:[#allocation2 + $0x18] sm:$0xff] %v1046_v60  ;;  %v1004_v63 = vpop.f32.mrb[4].mxu0  ;;  %v923_v1 = vpop.f32.mrb[5].mxu1 }
 0x152   : > { %v1005_v0 = vadd.f32 %v1004_v63, %v921_v61  ;;  %v1006_v3 = vpop.f32.mrb[5].mxu0  ;;  %v925_v5 = vpop.f32.mrb[6].mxu1 }
 0x153   : > { %v1007_v4 = vadd.f32 %v1006_v3, %v923_v1  ;;  %v1008_v7 = vpop.f32.mrb[6].mxu0  ;;  %v927_v10 = vpop.f32.mrb[7].mxu1 }
 0x154   : > { %v1047_v8 = vadd.f32 %v1005_v0, %v357_v62  ;;  %v1009_v9 = vadd.f32 %v1008_v7, %v925_v5  ;;  %v1010_v12 = vpop.f32.mrb[7].mxu0  ;;  %v370_v62 = vld [vmem:[#allocation2 + $0x88] sm:$0xff]  ;;  %v372_v7 = vld [vmem:[#allocation2 + $0x98] sm:$0xff] }
 0x155   : > { %v1048_v13 = vadd.f32 %v1007_v4, %v358_v2  ;;  %v1011_v14 = vadd.f32 %v1010_v12, %v927_v10  ;;  %v371_v2 = vld [vmem:[#allocation2 + $0x90] sm:$0xff] }
 0x156   : > { %1067 = vst [vmem:[#allocation2 + $0x20] sm:$0xff] %v1047_v8  ;;  %v1049_v15 = vadd.f32 %v1009_v9, %v359_v6 }
 0x157   : > { %1068 = vst [vmem:[#allocation2 + $0x28] sm:$0xff] %v1048_v13  ;;  %v1050_v16 = vadd.f32 %v1011_v14, %v360_v11  ;;  %v1109_v13 = vlaneseq (!%p1487_p11) }
 0x158   : > { %1069 = vst [vmem:[#allocation2 + $0x30] sm:$0xff] %v1049_v15  ;;  %v931_v17 = vpop.f32.mrb[8].mxu1  ;;  %v1107_v15 = vld [vmem:[%s2023_s2] sm:$0x3] (!%p1487_p11) }
 0x159   : > { %1070 = vst [vmem:[#allocation2 + $0x38] sm:$0xff] %v1050_v16  ;;  %v1014_v19 = vpop.f32.mrb[8].mxu0  ;;  %v933_v21 = vpop.f32.mrb[9].mxu1  ;;  %v1110_v14 = vshrl.u32 (!%p1487_p11), %v1109_v13, 7  ;;  %v1087_v16 = vld [vmem:[#allocation2] sm:$0xff] (!%p1487_p11) }
 0x15a   : > { %v1015_v20 = vadd.f32 %v1014_v19, %v931_v17  ;;  %v1016_v23 = vpop.f32.mrb[9].mxu0  ;;  %v935_v25 = vpop.f32.mrb[10].mxu1  ;;  %v1088_v17 = vld [vmem:[#allocation2 + $0x8] sm:$0xff] (!%p1487_p11) }
 0x15b   : > { %v1017_v24 = vadd.f32 %v1016_v23, %v933_v21  ;;  %v1018_v27 = vpop.f32.mrb[10].mxu0  ;;  %v937_v30 = vpop.f32.mrb[11].mxu1  ;;  %v1115_v19 = vsub.s32 (!%p1487_p11), 1, %v1110_v14  ;;  %v1090_v21 = vld [vmem:[#allocation2 + $0x18] sm:$0xff] (!%p1487_p11) }
 0x15c   : > { %v1051_v28 = vadd.f32 %v1015_v20, %v361_v18  ;;  %v1019_v29 = vadd.f32 %v1018_v27, %v935_v25  ;;  %v1020_v32 = vpop.f32.mrb[11].mxu0  ;;  %v1111_v18 = vsub.s32 (!%p1487_p11), 0, %v1110_v14  ;;  %v1089_v20 = vld [vmem:[#allocation2 + $0x10] sm:$0xff] (!%p1487_p11) }
 0x15d   : > { %v1052_v33 = vadd.f32 %v1017_v24, %v362_v22  ;;  %v1021_v34 = vadd.f32 %v1020_v32, %v937_v30  ;;  %v1091_v22 = vld [vmem:[#allocation2 + $0x20] sm:$0xff] (!%p1487_p11)  ;;  %v1953_v24 = vrot.slane (!%p1487_p11), %v1107_v15, %v1115_v19 }
 0x15e   : > { %1071 = vst [vmem:[#allocation2 + $0x40] sm:$0xff] %v1051_v28  ;;  %v1053_v35 = vadd.f32 %v1019_v29, %v363_v26  ;;  %v1951_v23 = vrot.slane (!%p1487_p11), %v1107_v15, %v1111_v18  ;;  %v1092_v25 = vld [vmem:[#allocation2 + $0x28] sm:$0xff] (!%p1487_p11) }
 0x15f   : > { %1072 = vst [vmem:[#allocation2 + $0x48] sm:$0xff] %v1052_v33  ;;  %v1054_v36 = vadd.f32 %v1021_v34, %v364_v31  ;;  %v1093_v26 = vld [vmem:[#allocation2 + $0x30] sm:$0xff] (!%p1487_p11)  ;;  %v1120_v29 = vadd.f32 (!%p1487_p11), %v1953_v24, %v1088_v17  ;;  %v1122_v31 = vadd.f32 (!%p1487_p11), %v1953_v24, %v1090_v21  ;;  %v1124_v33 = vadd.f32 (!%p1487_p11), %v1953_v24, %v1092_v25 }
 0x160   : > { %1073 = vst [vmem:[#allocation2 + $0x50] sm:$0xff] %v1053_v35  ;;  %v941_v37 = vpop.f32.mrb[12].mxu1  ;;  %v1094_v27 = vld [vmem:[#allocation2 + $0x38] sm:$0xff] (!%p1487_p11)  ;;  %v1119_v28 = vadd.f32 (!%p1487_p11), %v1951_v23, %v1087_v16  ;;  %v1121_v30 = vadd.f32 (!%p1487_p11), %v1951_v23, %v1089_v20  ;;  %v1123_v32 = vadd.f32 (!%p1487_p11), %v1951_v23, %v1091_v22  ;;  %v1125_v34 = vadd.f32 (!%p1487_p11), %v1951_v23, %v1093_v26 }
 0x161   : > { %1074 = vst [vmem:[#allocation2 + $0x58] sm:$0xff] %v1054_v36  ;;  %v1024_v39 = vpop.f32.mrb[12].mxu0  ;;  %v943_v41 = vpop.f32.mrb[13].mxu1  ;;  %v1126_v35 = vadd.f32 (!%p1487_p11), %v1953_v24, %v1094_v27  ;;  %vm1140_vm1 = vcmp.ge.f32.partialorder (!%p1487_p11), %v1120_v29, 0.0  ;;  %vm1142_vm3 = vcmp.ge.f32.partialorder (!%p1487_p11), %v1122_v31, 0.0  ;;  %vm1144_vm5 = vcmp.ge.f32.partialorder (!%p1487_p11), %v1124_v33, 0.0 }
 0x162   : > { %v1025_v40 = vadd.f32 %v1024_v39, %v941_v37  ;;  %v1026_v43 = vpop.f32.mrb[13].mxu0  ;;  %v945_v45 = vpop.f32.mrb[14].mxu1  ;;  %vm1139_vm0 = vcmp.ge.f32.partialorder (!%p1487_p11), %v1119_v28, 0.0  ;;  %v1159_v36 = vmul.f32 (!%p1487_p11), 0.1, %v1119_v28  ;;  %vm1141_vm2 = vcmp.ge.f32.partialorder (!%p1487_p11), %v1121_v30, 0.0 }
 0x163   : > { %v1027_v44 = vadd.f32 %v1026_v43, %v943_v41  ;;  %v1028_v47 = vpop.f32.mrb[14].mxu0  ;;  %v947_v50 = vpop.f32.mrb[15].mxu1  ;;  %v1160_v37 = vmul.f32 (!%p1487_p11), 0.1, %v1120_v29  ;;  %v1162_v39 = vmul.f32 (!%p1487_p11), 0.1, %v1122_v31 }
 0x164   : > { %v1055_v48 = vadd.f32 %v1025_v40, %v365_v38  ;;  %v1029_v49 = vadd.f32 %v1028_v47, %v945_v45  ;;  %v1030_v52 = vpop.f32.mrb[15].mxu0  ;;  %v1161_v38 = vmul.f32 (!%p1487_p11), 0.1, %v1121_v30  ;;  %v1179_v40 = vsel (!%p1487_p11), %vm1139_vm0, %v1119_v28, %v1159_v36 }
 0x165   : > { %v1056_v53 = vadd.f32 %v1027_v44, %v366_v42  ;;  %v1031_v54 = vadd.f32 %v1030_v52, %v947_v50  ;;  %v1180_v41 = vsel (!%p1487_p11), %vm1140_vm1, %v1120_v29, %v1160_v37  ;;  %vm1143_vm4 = vcmp.ge.f32.partialorder (!%p1487_p11), %v1123_v32, 0.0  ;;  %v1095_v42 = vld [vmem:[#allocation2 + $0x40] sm:$0xff] (!%p1487_p11) }
 0x166   : > { %1075 = vst [vmem:[#allocation2 + $0x60] sm:$0xff] %v1055_v48  ;;  %v1057_v55 = vadd.f32 %v1029_v49, %v367_v46  ;;  %v1504_v43 = vpack.c.bf16 (!%p1487_p11), %v1180_v41, %v1179_v40  ;;  %v1181_v44 = vsel (!%p1487_p11), %vm1141_vm2, %v1121_v30, %v1161_v38  ;;  %v1182_v45 = vsel (!%p1487_p11), %vm1142_vm3, %v1122_v31, %v1162_v39  ;;  %v1096_v47 = vld [vmem:[#allocation2 + $0x48] sm:$0xff] (!%p1487_p11) }
 0x167   : > { %1076 = vst [vmem:[#allocation2 + $0x68] sm:$0xff] %v1056_v53  ;;  %v1058_v56 = vadd.f32 %v1031_v54, %v368_v51  ;;  %v1163_v46 = vmul.f32 (!%p1487_p11), 0.1, %v1123_v32  ;;  %v1097_v48 = vld [vmem:[#allocation2 + $0x50] sm:$0xff] (!%p1487_p11)  ;;  %v1505_v50 = vpack.c.bf16 (!%p1487_p11), %v1182_v45, %v1181_v44  ;;  %v1164_v51 = vmul.f32 (!%p1487_p11), 0.1, %v1124_v33 }
 0x168   : > { %1077 = vst [vmem:[#allocation2 + $0x70] sm:$0xff] %v1057_v55  ;;  %v951_v57 = vpop.f32.mrb[16].mxu1  ;;  %v1098_v49 = vld [vmem:[#allocation2 + $0x58] sm:$0xff] (!%p1487_p11)  ;;  %vm1145_vm6 = vcmp.ge.f32.partialorder (!%p1487_p11), %v1125_v34, 0.0  ;;  %vm1146_vm7 = vcmp.ge.f32.partialorder (!%p1487_p11), %v1126_v35, 0.0  ;;  %1259 = vst [vmem:[%s2024_s3] sm:$0xff] (!%p1487_p11), %v1504_v43  ;;  %v1127_v55 = vadd.f32 (!%p1487_p11), %v1951_v23, %v1095_v42 }
 0x169   : > { %1078 = vst [vmem:[#allocation2 + $0x78] sm:$0xff] %v1058_v56  ;;  %v1034_v59 = vpop.f32.mrb[16].mxu0  ;;  %v953_v61 = vpop.f32.mrb[17].mxu1  ;;  %v1183_v52 = vsel (!%p1487_p11), %vm1143_vm4, %v1123_v32, %v1163_v46  ;;  %v1165_v53 = vmul.f32 (!%p1487_p11), 0.1, %v1125_v34  ;;  %1260 = vst [vmem:[%s2024_s3 + $0x8] sm:$0xff] (!%p1487_p11), %v1505_v50  ;;  %v1184_v56 = vsel (!%p1487_p11), %vm1144_vm5, %v1124_v33, %v1164_v51 }
 0x16a   : > { %v1035_v60 = vadd.f32 %v1034_v59, %v951_v57  ;;  %v1036_v63 = vpop.f32.mrb[17].mxu0  ;;  %v955_v1 = vpop.f32.mrb[18].mxu1  ;;  %v1166_v54 = vmul.f32 (!%p1487_p11), 0.1, %v1126_v35  ;;  %v1128_v57 = vadd.f32 (!%p1487_p11), %v1953_v24, %v1096_v47  ;;  %v1130_v59 = vadd.f32 (!%p1487_p11), %v1953_v24, %v1098_v49 }
 0x16b   : > { %v1037_v0 = vadd.f32 %v1036_v63, %v953_v61  ;;  %v1038_v3 = vpop.f32.mrb[18].mxu0  ;;  %v957_v6 = vpop.f32.mrb[19].mxu1  ;;  %1086 = sbr.rel (%p1487_p11) target bundleno = 385 (0x181), region = 63  ;;  %v1185_v61 = vsel (!%p1487_p11), %vm1145_vm6, %v1125_v34, %v1165_v53  ;;  %vm1147_vm8 = vcmp.ge.f32.partialorder (!%p1487_p11), %v1127_v55, 0.0 }
 0x16c   : > { %v1059_v4 = vadd.f32 %v1035_v60, %v369_v58  ;;  %v1039_v5 = vadd.f32 %v1038_v3, %v955_v1  ;;  %v1040_v8 = vpop.f32.mrb[19].mxu0  ;;  %v1129_v58 = vadd.f32 (!%p1487_p11), %v1951_v23, %v1097_v48  ;;  %v1506_v60 = vpack.c.bf16 (!%p1487_p11), %v1184_v56, %v1183_v52 }
 0x16d   : > { %v1060_v9 = vadd.f32 %v1037_v0, %v370_v62  ;;  %v1041_v10 = vadd.f32 %v1040_v8, %v957_v6  ;;  %v1186_v62 = vsel (!%p1487_p11), %vm1146_vm7, %v1126_v35, %v1166_v54  ;;  %v1099_v63 = vld [vmem:[#allocation2 + $0x60] sm:$0xff] (!%p1487_p11)  ;;  %vm1148_vm9 = vcmp.ge.f32.partialorder (!%p1487_p11), %v1128_v57, 0.0 }
 0x16e   : > { %1079 = vst [vmem:[#allocation2 + $0x80] sm:$0xff] %v1059_v4  ;;  %v1061_v11 = vadd.f32 %v1039_v5, %v371_v2  ;;  %v1100_v0 = vld [vmem:[#allocation2 + $0x68] sm:$0xff] (!%p1487_p11)  ;;  %v1507_v1 = vpack.c.bf16 (!%p1487_p11), %v1186_v62, %v1185_v61  ;;  %v1167_v2 = vmul.f32 (!%p1487_p11), 0.1, %v1127_v55  ;;  %v1168_v3 = vmul.f32 (!%p1487_p11), 0.1, %v1128_v57 }
 0x16f   : > { %1080 = vst [vmem:[#allocation2 + $0x88] sm:$0xff] %v1060_v9  ;;  %v1062_v12 = vadd.f32 %v1041_v10, %v372_v7  ;;  %v1101_v4 = vld [vmem:[#allocation2 + $0x70] sm:$0xff] (!%p1487_p11)  ;;  %1261 = vst [vmem:[%s2024_s3 + $0x10] sm:$0xff] (!%p1487_p11), %v1506_v60  ;;  %vm1149_vm10 = vcmp.ge.f32.partialorder (!%p1487_p11), %v1129_v58, 0.0  ;;  %vm1150_vm11 = vcmp.ge.f32.partialorder (!%p1487_p11), %v1130_v59, 0.0  ;;  %v1131_v9 = vadd.f32 (!%p1487_p11), %v1951_v23, %v1099_v63 }
 0x170   : > { %1081 = vst [vmem:[#allocation2 + $0x90] sm:$0xff] %v1061_v11  ;;  %v1169_v5 = vmul.f32 (!%p1487_p11), 0.1, %v1129_v58  ;;  %v1170_v6 = vmul.f32 (!%p1487_p11), 0.1, %v1130_v59  ;;  %1262 = vst [vmem:[%s2024_s3 + $0x18] sm:$0xff] (!%p1487_p11), %v1507_v1  ;;  %v1187_v7 = vsel (!%p1487_p11), %vm1147_vm8, %v1127_v55, %v1167_v2  ;;  %v1188_v8 = vsel (!%p1487_p11), %vm1148_vm9, %v1128_v57, %v1168_v3 }
 0x171   : > { %1082 = vst [vmem:[#allocation2 + $0x98] sm:$0xff] %v1062_v12  ;;  %v1132_v10 = vadd.f32 (!%p1487_p11), %v1953_v24, %v1100_v0  ;;  %v1102_v11 = vld [vmem:[#allocation2 + $0x78] sm:$0xff] (!%p1487_p11)  ;;  %v1508_v12 = vpack.c.bf16 (!%p1487_p11), %v1188_v8, %v1187_v7  ;;  %v1133_v15 = vadd.f32 (!%p1487_p11), %v1951_v23, %v1101_v4  ;;  %vm1151_vm12 = vcmp.ge.f32.partialorder (!%p1487_p11), %v1131_v9, 0.0 }
 0x172   : > { %v1189_v13 = vsel %vm1149_vm10, %v1129_v58, %v1169_v5  ;;  %v1190_v14 = vsel %vm1150_vm11, %v1130_v59, %v1170_v6  ;;  %v1171_v20 = vmul.f32 0.1, %v1131_v9  ;;  %v1134_v22 = vadd.f32 %v1953_v24, %v1102_v11 }
 0x173   : > { %v1509_v19 = vpack.c.bf16 %v1190_v14, %v1189_v13  ;;  %vm1152_vm13 = vcmp.ge.f32.partialorder %v1132_v10, 0.0  ;;  %1263 = vst [vmem:[%s2024_s3 + $0x20] sm:$0xff] %v1508_v12  ;;  %v1172_v21 = vmul.f32 0.1, %v1132_v10  ;;  %vm1153_vm14 = vcmp.ge.f32.partialorder %v1133_v15, 0.0 }
 0x174   : > { %v1173_v25 = vmul.f32 0.1, %v1133_v15  ;;  %v1191_v26 = vsel %vm1151_vm12, %v1131_v9, %v1171_v20  ;;  %vm1154_vm15 = vcmp.ge.f32.partialorder %v1134_v22, 0.0  ;;  %v1174_v32 = vmul.f32 0.1, %v1134_v22 }
 0x175   : > { %v1103_v16 = vld [vmem:[#allocation2 + $0x80] sm:$0xff]  ;;  %1264 = vst [vmem:[%s2024_s3 + $0x28] sm:$0xff] %v1509_v19  ;;  %v1192_v31 = vsel %vm1152_vm13, %v1132_v10, %v1172_v21 }
 0x176   : > { %v1104_v17 = vld [vmem:[#allocation2 + $0x88] sm:$0xff]  ;;  %v1135_v27 = vadd.f32 %v1951_v23, %v1103_v16  ;;  %v1193_v33 = vsel %vm1153_vm14, %v1133_v15, %v1173_v25  ;;  %v1510_v34 = vpack.c.bf16 %v1192_v31, %v1191_v26  ;;  %v1194_v36 = vsel %vm1154_vm15, %v1134_v22, %v1174_v32 }
 0x177   : > { %v1105_v18 = vld [vmem:[#allocation2 + $0x90] sm:$0xff]  ;;  %v1136_v28 = vadd.f32 %v1953_v24, %v1104_v17  ;;  %v1511_v39 = vpack.c.bf16 %v1194_v36, %v1193_v33 }
 0x178   : > { %v1106_v29 = vld [vmem:[#allocation2 + $0x98] sm:$0xff]  ;;  %v1137_v30 = vadd.f32 %v1951_v23, %v1105_v18  ;;  %vm1155_vm0 = vcmp.ge.f32.partialorder %v1135_v27, 0.0  ;;  %v1175_v35 = vmul.f32 0.1, %v1135_v27  ;;  %1265 = vst [vmem:[%s2024_s3 + $0x30] sm:$0xff] %v1510_v34 }
 0x179   : > { %vm1156_vm1 = vcmp.ge.f32.partialorder %v1136_v28, 0.0  ;;  %v1176_v37 = vmul.f32 0.1, %v1136_v28  ;;  %v1138_v38 = vadd.f32 %v1953_v24, %v1106_v29  ;;  %1266 = vst [vmem:[%s2024_s3 + $0x38] sm:$0xff] %v1511_v39 }
 0x17a   : > { %vm1157_vm2 = vcmp.ge.f32.partialorder %v1137_v30, 0.0  ;;  %v1195_v40 = vsel %vm1155_vm0, %v1135_v27, %v1175_v35  ;;  %v1177_v23 = vmul.f32 0.1, %v1137_v30 }
 0x17b   : > { %v1196_v41 = vsel %vm1156_vm1, %v1136_v28, %v1176_v37  ;;  %vm1158_vm3 = vcmp.ge.f32.partialorder %v1138_v38, 0.0  ;;  %v1178_v42 = vmul.f32 0.1, %v1138_v38 }
 0x17c   : > { %v1512_v43 = vpack.c.bf16 %v1196_v41, %v1195_v40  ;;  %v1197_v44 = vsel %vm1157_vm2, %v1137_v30, %v1177_v23 }
 0x17d   : > { %v1198_v45 = vsel %vm1158_vm3, %v1138_v38, %v1178_v42 }
 0x17e   : > { %1267 = vst [vmem:[%s2024_s3 + $0x40] sm:$0xff] %v1512_v43  ;;  %v1513_v24 = vpack.c.bf16 %v1198_v45, %v1197_v44 }
 0x180   : > { %1268 = vst [vmem:[%s2024_s3 + $0x48] sm:$0xff] %v1513_v24 }
 0x181 PF: > { %s13_s16 = sadd.s32 1, %s1741_s16   ;;  %s2025_s12 = smov %s1729_s13 }
 0x182   : > { %p10_p12 = scmp.ge.s32.totalorder %s13_s16, 9   ;;  %s2026_s13 = smov %s1799_s20 }
 0x183   : > { %s2027_s14 = smov %s1737_s15  ;;  %s2028_s15 = smov %s2030_s17 }
 0x184   :  { %12 = sbr.rel (!%p10_p12) target bundleno = 3 (0x3), region = 104 }

// kernel: upconv7_forward.25
= control target key start
LH: loop header
LB: loop body
LE: loop exit
PB: predicated region body
PF: predicated region fallthrough
CT: control target
= control target key end

     0   :  { %s1404_s12 = smov 0   ;;  %s1406_s13 = smov 0   ;;  %s1562_s0 = inlined_call_operand.vmem [shape: bf16[32,2560], index: 0, kind: input, shape index: {}]   ;;  %s1563_s1 = inlined_call_operand.vmem [shape: bf16[2560,256], index: 1, kind: input, shape index: {}]   ;;  %s1564_s2 = inlined_call_operand.vmem [shape: f32[1,256], index: 2, kind: input, shape index: {}]   ;;  %s1565_s3 = inlined_call_operand.vmem [shape: bf16[32,256], index: 3, kind: output, shape index: {}]  }
   0x1   :  { %s1408_s14 = smov 0   ;;  %s1410_s15 = smov 0  }
   0x2   :  { %s1412_s16 = smov 0  }
   0x3 LB: > { %s25_s17 = sadd.s32 1, %s1377_s15  ;;  %p48_p1 = scmp.ne.s32.totalorder %s1369_s13, %s1365_s12  ;;  %s1381_s16 = sphi %s1412_s16, %s13_s16   ;;  %s1377_s15 = sphi %s1410_s15, %s1569_s15   ;;  %s1373_s14 = sphi %s1408_s14, %s1568_s14   ;;  %s1369_s13 = sphi %s1406_s13, %s1567_s13   ;;  %s1365_s12 = sphi %s1404_s12, %s1566_s12  }
   0x4   : > { %p26_p0 = scmp.ge.s32.totalorder %s25_s17, 5  ;;  %p49_p2 = scmp.eq.s32.totalorder %s1381_s16, 0 }
   0x5   : > { %s41_s19 = sadd.s32 1, %s1369_s13  ;;  %p1089_p5 = scmp.ge.s32.totalorder %s1381_s16, 5 }
   0x6   : > { %s1571_s17 = smov (%p26_p0, %s25_s17), 0  ;;  %p50_p3 = por %p49_p2, %p48_p1 }
   0x7   : > { %s37_s18 = ssub.s32 %s1377_s15, %s1571_s17  ;;  %164 = sbr.rel (%p1089_p5) target bundleno = 22 (0x16), region = 20 }
   0x8   : > { %p39_p4 = scmp.eq.s32.totalorder %s37_s18, 0 }
   0xa   : > { %s1439_s20 = scalar_select %p39_p4, %s1369_s13, %s41_s19  }
   0xe   : > { %167 = sbr.rel (!%p50_p3) target bundleno = 22 (0x16), region = 24  ;;  %s169_s21 = sand.u32 (%p50_p3), 1, %s1369_s13  }
   0xf   : > { %s1180_s22 = sshll.u32 (%p50_p3), %s1377_s15, 4  ;;  %s1090_s23 = sshll.u32 (%p50_p3), %s169_s21, 6 }
  0x10   : > { %s177_s26 = scalar_lea.vmem (%p50_p3), %s1562_s0, %s1180_s22  ;;  %s171_s27 = scalar_lea.vmem (%p50_p3), [#allocation3], %s1090_s23 }
  0x11   : > { %v190_v0 = vld [vmem:[%s177_s26] sm:$0xff] (%p50_p3)  ;;  %v192_v1 = vld [vmem:[%s177_s26 + $0x8] sm:$0xff] (%p50_p3)  ;;  %v194_v2 = vld [vmem:[%s177_s26 + $0x50] sm:$0xff] (%p50_p3) }
  0x12   : > { %191 = vst [vmem:[%s171_s27] sm:$0xff] (%p50_p3), %v190_v0  ;;  %193 = vst [vmem:[%s171_s27 + $0x8] sm:$0xff] (%p50_p3), %v192_v1  ;;  %v196_v3 = vld [vmem:[%s177_s26 + $0x58] sm:$0xff] (%p50_p3)  ;;  %v198_v4 = vld [vmem:[%s177_s26 + $0xa0] sm:$0xff] (%p50_p3) }
  0x13   : > { %195 = vst [vmem:[%s171_s27 + $0x10] sm:$0xff] (%p50_p3), %v194_v2  ;;  %v200_v5 = vld [vmem:[%s177_s26 + $0xa8] sm:$0xff] (%p50_p3)  ;;  %197 = vst [vmem:[%s171_s27 + $0x18] sm:$0xff] (%p50_p3), %v196_v3  ;;  %v202_v6 = vld [vmem:[%s177_s26 + $0xf0] sm:$0xff] (%p50_p3) }
  0x14   : > { %199 = vst [vmem:[%s171_s27 + $0x20] sm:$0xff] (%p50_p3), %v198_v4  ;;  %201 = vst [vmem:[%s171_s27 + $0x28] sm:$0xff] (%p50_p3), %v200_v5  ;;  %v204_v7 = vld [vmem:[%s177_s26 + $0xf8] sm:$0xff] (%p50_p3) }
  0x15   : > { %203 = vst [vmem:[%s171_s27 + $0x30] sm:$0xff] %v202_v6  ;;  %205 = vst [vmem:[%s171_s27 + $0x38] sm:$0xff] %v204_v7 }
  0x16 PF: > { %p1093_p6 = scmp.ge.s32.totalorder %s1381_s16, 1  ;;  %p225_p7 = scmp.lt.s32.totalorder %s1381_s16, 6 }
  0x18   : > { %p226_p8 = pnand %p1093_p6, %p225_p7 }
  0x19   : > { %s232_s28 = sand.u32 (!%p226_p8), 1, %s1365_s12   ;;  %s1095_s29 = sshll.u32 (!%p226_p8), %s1373_s14, 6 }
  0x1a   : > { %229 = sbr.rel (%p226_p8) target bundleno = 349 (0x15d), region = 51  ;;  %s1094_s30 = sshll.u32 (!%p226_p8), %s232_s28, 6 }
  0x1b   : > { %p278_p9 = scmp.lt.s32.totalorder (!%p226_p8), %s1095_s29, 319  ;;  %s1456_s8 = scalar_lea.vmem (!%p226_p8), [#allocation3], %s1094_s30 }
  0x1c   : > { %p1098_p10 = scmp.ne.s32.totalorder (!%p226_p8), %s1373_s14, 0 }
  0x21   : > { %s1573_s29 = smov (!%p278_p9, %s1095_s29), 319  ;;  %308 = sbr.rel (%p1098_p10) target bundleno = 40 (0x28), region = 59 }
  0x22   : > { %s1181_s4 = sshll.u32 %s1573_s29, 3  ;;  %v1383_v8 = vmov (!%p1098_p10), 0.0  }
  0x23   : > { %s1454_s7 = scalar_lea.vmem %s1563_s1, %s1181_s4  ;;  %309 = vst [vmem:[#allocation2] sm:$0xff] (!%p1098_p10), %v1383_v8  ;;  %310 = vst [vmem:[#allocation2 + $0x8] sm:$0xff] (!%p1098_p10), %v1383_v8 }
  0x24   : > { %311 = vst [vmem:[#allocation2 + $0x10] sm:$0xff] (!%p1098_p10), %v1383_v8  ;;  %312 = vst [vmem:[#allocation2 + $0x18] sm:$0xff] (!%p1098_p10), %v1383_v8 }
  0x25   : > { %313 = vst [vmem:[#allocation2 + $0x20] sm:$0xff] (!%p1098_p10), %v1383_v8  ;;  %314 = vst [vmem:[#allocation2 + $0x28] sm:$0xff] (!%p1098_p10), %v1383_v8 }
  0x26   : > { %315 = vst [vmem:[#allocation2 + $0x30] sm:$0xff] (!%p1098_p10), %v1383_v8  ;;  %316 = vst [vmem:[#allocation2 + $0x38] sm:$0xff] (!%p1098_p10), %v1383_v8 }
  0x28 PF: > { %v1235_v9 = vld [vmem:[%s1454_s7 + $0x4] ss:$8 sps:$4 sm:$0xff]   ;;  %v1239_v11 = vld [vmem:[%s1454_s7] ss:$8 sps:$4 sm:$0xff]   ;;  %v1241_v13 = vld [vmem:[%s1454_s7 + $0x14] ss:$8 sps:$4 sm:$0xff]  }
  0x29   : > { %v1237_v10 = vld [vmem:[%s1454_s7 + $0x104] ss:$8 sps:$4 sm:$0xff]   ;;  %757 = vmatprep.subr.bf16.mxu1 %v1235_v9  ;;  %v1240_v12 = vld [vmem:[%s1454_s7 + $0x100] ss:$8 sps:$4 sm:$0xff]   ;;  %v1243_v14 = vld [vmem:[%s1454_s7 + $0x114] ss:$8 sps:$4 sm:$0xff]  }
  0x2a   : > { %810 = vmatprep.subr.bf16.mxu0 %v1237_v10  ;;  %758 = vmatpush1.bf16.msra.mxu1 %v1239_v11  ;;  %v1245_v15 = vld [vmem:[%s1454_s7 + $0x10] ss:$8 sps:$4 sm:$0xff]   ;;  %v1247_v17 = vld [vmem:[%s1454_s7 + $0x24] ss:$8 sps:$4 sm:$0xff]   ;;  %v1251_v19 = vld [vmem:[%s1454_s7 + $0x20] ss:$8 sps:$4 sm:$0xff]  }
  0x2b   : > { %811 = vmatpush1.bf16.msra.mxu0 %v1240_v12  ;;  %759 = vmatprep.subr.bf16.mxu1 %v1241_v13  ;;  %v1246_v16 = vld [vmem:[%s1454_s7 + $0x110] ss:$8 sps:$4 sm:$0xff]   ;;  %v1249_v18 = vld [vmem:[%s1454_s7 + $0x124] ss:$8 sps:$4 sm:$0xff]   ;;  %v1252_v20 = vld [vmem:[%s1454_s7 + $0x120] ss:$8 sps:$4 sm:$0xff]  }
  0x2c   : > { %812 = vmatprep.subr.bf16.mxu0 %v1243_v14  ;;  %v1253_v21 = vld [vmem:[%s1454_s7 + $0x34] ss:$8 sps:$4 sm:$0xff]   ;;  %v1257_v23 = vld [vmem:[%s1454_s7 + $0x30] ss:$8 sps:$4 sm:$0xff]   ;;  %v1259_v25 = vld [vmem:[%s1454_s7 + $0x44] ss:$8 sps:$4 sm:$0xff]  }
  0x2d   : > { %v1255_v22 = vld [vmem:[%s1454_s7 + $0x134] ss:$8 sps:$4 sm:$0xff]   ;;  %v1258_v24 = vld [vmem:[%s1454_s7 + $0x130] ss:$8 sps:$4 sm:$0xff]   ;;  %v1261_v26 = vld [vmem:[%s1454_s7 + $0x144] ss:$8 sps:$4 sm:$0xff]  }
  0x2e   : > { %760 = vmatpush1.bf16.msra.mxu1 %v1245_v15  ;;  %v1263_v27 = vld [vmem:[%s1454_s7 + $0x40] ss:$8 sps:$4 sm:$0xff]   ;;  %v1265_v29 = vld [vmem:[%s1454_s7 + $0x54] ss:$8 sps:$4 sm:$0xff]   ;;  %v1269_v31 = vld [vmem:[%s1454_s7 + $0x50] ss:$8 sps:$4 sm:$0xff]  }
  0x2f   : > { %813 = vmatpush1.bf16.msra.mxu0 %v1246_v16  ;;  %761 = vmatprep.subr.bf16.mxu1 %v1247_v17  ;;  %v1264_v28 = vld [vmem:[%s1454_s7 + $0x140] ss:$8 sps:$4 sm:$0xff]   ;;  %v1267_v30 = vld [vmem:[%s1454_s7 + $0x154] ss:$8 sps:$4 sm:$0xff]   ;;  %v1270_v32 = vld [vmem:[%s1454_s7 + $0x150] ss:$8 sps:$4 sm:$0xff]  }
  0x30   : > { %814 = vmatprep.subr.bf16.mxu0 %v1249_v18  ;;  %v1271_v33 = vld [vmem:[%s1454_s7 + $0x64] ss:$8 sps:$4 sm:$0xff]   ;;  %v1275_v35 = vld [vmem:[%s1454_s7 + $0x60] ss:$8 sps:$4 sm:$0xff]   ;;  %v1277_v37 = vld [vmem:[%s1454_s7 + $0x74] ss:$8 sps:$4 sm:$0xff]  }
  0x31   : > { %v1273_v34 = vld [vmem:[%s1454_s7 + $0x164] ss:$8 sps:$4 sm:$0xff]   ;;  %v1276_v36 = vld [vmem:[%s1454_s7 + $0x160] ss:$8 sps:$4 sm:$0xff]   ;;  %v1279_v38 = vld [vmem:[%s1454_s7 + $0x174] ss:$8 sps:$4 sm:$0xff]  }
  0x32   : > { %762 = vmatpush1.bf16.msra.mxu1 %v1251_v19  ;;  %v1281_v39 = vld [vmem:[%s1454_s7 + $0x70] ss:$8 sps:$4 sm:$0xff]   ;;  %v1283_v41 = vld [vmem:[%s1454_s7 + $0x84] ss:$8 sps:$4 sm:$0xff]   ;;  %v1287_v43 = vld [vmem:[%s1454_s7 + $0x80] ss:$8 sps:$4 sm:$0xff]  }
  0x33   : > { %815 = vmatpush1.bf16.msra.mxu0 %v1252_v20  ;;  %763 = vmatprep.subr.bf16.mxu1 %v1253_v21  ;;  %v1282_v40 = vld [vmem:[%s1454_s7 + $0x170] ss:$8 sps:$4 sm:$0xff]   ;;  %v1285_v42 = vld [vmem:[%s1454_s7 + $0x184] ss:$8 sps:$4 sm:$0xff]   ;;  %v1288_v44 = vld [vmem:[%s1454_s7 + $0x180] ss:$8 sps:$4 sm:$0xff]  }
  0x34   : > { %816 = vmatprep.subr.bf16.mxu0 %v1255_v22  ;;  %v1289_v45 = vld [vmem:[%s1454_s7 + $0x94] ss:$8 sps:$4 sm:$0xff]   ;;  %v1293_v47 = vld [vmem:[%s1454_s7 + $0x90] ss:$8 sps:$4 sm:$0xff]   ;;  %v1295_v49 = vld [vmem:[%s1454_s7 + $0xa4] ss:$8 sps:$4 sm:$0xff]  }
  0x35   : > { %v1291_v46 = vld [vmem:[%s1454_s7 + $0x194] ss:$8 sps:$4 sm:$0xff]   ;;  %v1294_v48 = vld [vmem:[%s1454_s7 + $0x190] ss:$8 sps:$4 sm:$0xff]   ;;  %v1297_v50 = vld [vmem:[%s1454_s7 + $0x1a4] ss:$8 sps:$4 sm:$0xff]  }
  0x36   : > { %764 = vmatpush1.bf16.msra.mxu1 %v1257_v23  ;;  %v1299_v51 = vld [vmem:[%s1454_s7 + $0xa0] ss:$8 sps:$4 sm:$0xff]   ;;  %v1301_v53 = vld [vmem:[%s1454_s7 + $0xb4] ss:$8 sps:$4 sm:$0xff]   ;;  %v1305_v55 = vld [vmem:[%s1454_s7 + $0xb0] ss:$8 sps:$4 sm:$0xff]  }
  0x37   : > { %817 = vmatpush1.bf16.msra.mxu0 %v1258_v24  ;;  %765 = vmatprep.subr.bf16.mxu1 %v1259_v25  ;;  %v1300_v52 = vld [vmem:[%s1454_s7 + $0x1a0] ss:$8 sps:$4 sm:$0xff]   ;;  %v1303_v54 = vld [vmem:[%s1454_s7 + $0x1b4] ss:$8 sps:$4 sm:$0xff]   ;;  %v1306_v56 = vld [vmem:[%s1454_s7 + $0x1b0] ss:$8 sps:$4 sm:$0xff]  }
  0x38   : > { %818 = vmatprep.subr.bf16.mxu0 %v1261_v26  ;;  %v1307_v57 = vld [vmem:[%s1454_s7 + $0xc4] ss:$8 sps:$4 sm:$0xff]   ;;  %v1311_v61 = vld [vmem:[%s1454_s7 + $0xc0] ss:$8 sps:$4 sm:$0xff]   ;;  %v1313_v63 = vld [vmem:[%s1454_s7 + $0xd4] ss:$8 sps:$4 sm:$0xff]  }
  0x39   : > { %v1333_v58 = vld [vmem:[%s1456_s8 + $0x4] ss:$16 sps:$4 sm:$0xff]   ;;  %v1336_v60 = vld [vmem:[%s1456_s8 + $0xc] ss:$16 sps:$4 sm:$0xff]   ;;  %v1312_v62 = vld [vmem:[%s1454_s7 + $0x1c0] ss:$8 sps:$4 sm:$0xff]  }
  0x3a   : > { %766 = vmatpush1.bf16.msra.mxu1 %v1263_v27  ;;  %v1309_v59 = vld [vmem:[%s1454_s7 + $0x1c4] ss:$8 sps:$4 sm:$0xff]   ;;  %789 = vmatprep.mubr.bf16.mxu1 %v1333_v58  ;;  %v1315_v0 = vld [vmem:[%s1454_s7 + $0x1d4] ss:$8 sps:$4 sm:$0xff]   ;;  %v1317_v1 = vld [vmem:[%s1454_s7 + $0xd0] ss:$8 sps:$4 sm:$0xff]  }
  0x3b   : > { %819 = vmatpush1.bf16.msra.mxu0 %v1264_v28  ;;  %767 = vmatprep.subr.bf16.mxu1 %v1265_v29  ;;  %v1318_v2 = vld [vmem:[%s1454_s7 + $0x1d0] ss:$8 sps:$4 sm:$0xff]   ;;  %v1319_v3 = vld [vmem:[%s1454_s7 + $0xe4] ss:$8 sps:$4 sm:$0xff]   ;;  %v1323_v5 = vld [vmem:[%s1454_s7 + $0xe0] ss:$8 sps:$4 sm:$0xff]  }
  0x3c   : > { %820 = vmatprep.subr.bf16.mxu0 %v1267_v30  ;;  %842 = vmatprep.mubr.bf16.mxu0 %v1336_v60  ;;  %v1321_v4 = vld [vmem:[%s1454_s7 + $0x1e4] ss:$8 sps:$4 sm:$0xff]   ;;  %v1324_v6 = vld [vmem:[%s1454_s7 + $0x1e0] ss:$8 sps:$4 sm:$0xff]   ;;  %v1325_v7 = vld [vmem:[%s1454_s7 + $0xf4] ss:$8 sps:$4 sm:$0xff]  }
  0x3d   : > { %v1327_v8 = vld [vmem:[%s1454_s7 + $0x1f4] ss:$8 sps:$4 sm:$0xff]   ;;  %v1329_v9 = vld [vmem:[%s1454_s7 + $0xf0] ss:$8 sps:$4 sm:$0xff]   ;;  %v317_v18 = vld [vmem:[#allocation2] sm:$0xff]  ;;  %p1171_p11 = scmp.ne.s32.totalorder %s1373_s14, 4 }
  0x3e   : > { %768 = vmatpush1.bf16.msra.mxu1 %v1269_v31  ;;  %v1330_v10 = vld [vmem:[%s1454_s7 + $0x1f0] ss:$8 sps:$4 sm:$0xff]   ;;  %v1337_v13 = vld [vmem:[%s1456_s8 + $0x24] ss:$16 sps:$4 sm:$0xff]   ;;  %v1339_v14 = vld [vmem:[%s1456_s8 + $0x2c] ss:$16 sps:$4 sm:$0xff]  }
  0x3f   : > { %821 = vmatpush1.bf16.msra.mxu0 %v1270_v32  ;;  %769 = vmatprep.subr.bf16.mxu1 %v1271_v33  ;;  %v1331_v11 = vld [vmem:[%s1456_s8] ss:$16 sps:$4 sm:$0xff]   ;;  %v1334_v12 = vld [vmem:[%s1456_s8 + $0x8] ss:$16 sps:$4 sm:$0xff]  }
  0x40   : > { %822 = vmatprep.subr.bf16.mxu0 %v1273_v34  ;;  %v1341_v15 = vld [vmem:[%s1456_s8 + $0x20] ss:$16 sps:$4 sm:$0xff]   ;;  %v1342_v16 = vld [vmem:[%s1456_s8 + $0x28] ss:$16 sps:$4 sm:$0xff]  }
  0x41   : > { %v318_v22 = vld [vmem:[#allocation2 + $0x8] sm:$0xff]  ;;  %v319_v26 = vld [vmem:[#allocation2 + $0x10] sm:$0xff]  ;;  %v320_v31 = vld [vmem:[#allocation2 + $0x18] sm:$0xff] }
  0x42   : > { %770 = vmatpush1.bf16.msra.mxu1 %v1275_v35 }
  0x43   : > { %823 = vmatpush1.bf16.msra.mxu0 %v1276_v36  ;;  %771 = vmatprep.subr.bf16.mxu1 %v1277_v37 }
  0x44   : > { %824 = vmatprep.subr.bf16.mxu0 %v1279_v38  ;;  %v321_v38 = vld [vmem:[#allocation2 + $0x20] sm:$0xff] }
  0x46   : > { %772 = vmatpush1.bf16.msra.mxu1 %v1281_v39 }
  0x47   : > { %825 = vmatpush1.bf16.msra.mxu0 %v1282_v40  ;;  %773 = vmatprep.subr.bf16.mxu1 %v1283_v41 }
  0x48   : > { %826 = vmatprep.subr.bf16.mxu0 %v1285_v42  ;;  %v322_v42 = vld [vmem:[#allocation2 + $0x28] sm:$0xff] }
  0x4a   : > { %774 = vmatpush1.bf16.msra.mxu1 %v1287_v43 }
  0x4b   : > { %827 = vmatpush1.bf16.msra.mxu0 %v1288_v44  ;;  %775 = vmatprep.subr.bf16.mxu1 %v1289_v45 }
  0x4c   : > { %828 = vmatprep.subr.bf16.mxu0 %v1291_v46  ;;  %v323_v46 = vld [vmem:[#allocation2 + $0x30] sm:$0xff] }
  0x4e   : > { %776 = vmatpush1.bf16.msra.mxu1 %v1293_v47 }
  0x4f   : > { %829 = vmatpush1.bf16.msra.mxu0 %v1294_v48  ;;  %777 = vmatprep.subr.bf16.mxu1 %v1295_v49 }
  0x50   : > { %830 = vmatprep.subr.bf16.mxu0 %v1297_v50 }
  0x52   : > { %778 = vmatpush1.bf16.msra.mxu1 %v1299_v51  ;;  %v324_v51 = vld [vmem:[#allocation2 + $0x38] sm:$0xff] }
  0x53   : > { %831 = vmatpush1.bf16.msra.mxu0 %v1300_v52  ;;  %779 = vmatprep.subr.bf16.mxu1 %v1301_v53 }
  0x54   : > { %832 = vmatprep.subr.bf16.mxu0 %v1303_v54 }
  0x56   : > { %780 = vmatpush1.bf16.msra.mxu1 %v1305_v55 }
  0x57   : > { %833 = vmatpush1.bf16.msra.mxu0 %v1306_v56  ;;  %781 = vmatprep.subr.bf16.mxu1 %v1307_v57  ;;  %v893_v57 = vlaneseq (!%p1171_p11) }
  0x58   : > { %834 = vmatprep.subr.bf16.mxu0 %v1309_v59  ;;  %v891_v59 = vld [vmem:[%s1564_s2] sm:$0x3] (!%p1171_p11) }
  0x59   : > { %v894_v58 = vshrl.u32 (!%p1171_p11), %v893_v57, 7 }
  0x5a   : > { %782 = vmatpush1.bf16.msra.mxu1 %v1311_v61 }
  0x5b   : > { %835 = vmatpush1.bf16.msra.mxu0 %v1312_v62  ;;  %783 = vmatprep.subr.bf16.mxu1 %v1313_v63  ;;  %v895_v62 = vsub.s32 (!%p1171_p11), 0, %v894_v58  ;;  %v899_v63 = vsub.s32 (!%p1171_p11), 1, %v894_v58 }
  0x5c   : > { %836 = vmatprep.subr.bf16.mxu0 %v1315_v0 }
  0x5e   : > { %784 = vmatpush1.bf16.msra.mxu1 %v1317_v1 }
  0x5f   : > { %837 = vmatpush1.bf16.msra.mxu0 %v1318_v2  ;;  %785 = vmatprep.subr.bf16.mxu1 %v1319_v3  ;;  %v896_v3 = vrot.slane (!%p1171_p11), %v891_v59, %v895_v62 }
  0x60   : > { %838 = vmatprep.subr.bf16.mxu0 %v1321_v4  ;;  %v900_v4 = vrot.slane (!%p1171_p11), %v891_v59, %v899_v63 }
  0x62   : > { %786 = vmatpush1.bf16.msra.mxu1 %v1323_v5 }
  0x63   : > { %839 = vmatpush1.bf16.msra.mxu0 %v1324_v6  ;;  %787 = vmatprep.subr.bf16.mxu1 %v1325_v7 }
  0x64   : > { %840 = vmatprep.subr.bf16.mxu0 %v1327_v8 }
  0x66   : > { %788 = vmatpush1.bf16.msra.mxu1 %v1329_v9 }
  0x67   : > { %841 = vmatpush1.bf16.msra.mxu0 %v1330_v10 }
  0x69   : > { %790 = vmatmul.mubr.bf16.vlgmr.msra.gmra.mrb[0].mxu1 %v1331_v11 }
  0x6a   : > { %843 = vmatmul.mubr.bf16.vlgmr.msra.gmra.mrb[0].mxu0 %v1334_v12  ;;  %799 = vmatprep.mubr.bf16.mxu1 %v1337_v13 }
  0x6b   : > { %852 = vmatprep.mubr.bf16.mxu0 %v1339_v14 }
  0x71   : > { %800 = vmatmul.mubr.bf16.gmra.mrb[4].mxu1 %v1341_v15 }
  0x72   : > { %853 = vmatmul.mubr.bf16.gmra.mrb[4].mxu0 %v1342_v16 }
 0x13c   : > { %v791_v17 = vpop.f32.mrb[0].mxu1 }
 0x13d   : > { %v844_v19 = vpop.f32.mrb[0].mxu0  ;;  %v793_v21 = vpop.f32.mrb[1].mxu1 }
 0x13e   : > { %v845_v20 = vadd.f32 %v844_v19, %v791_v17  ;;  %v846_v23 = vpop.f32.mrb[1].mxu0  ;;  %v795_v25 = vpop.f32.mrb[2].mxu1 }
 0x13f   : > { %v847_v24 = vadd.f32 %v846_v23, %v793_v21  ;;  %v848_v27 = vpop.f32.mrb[2].mxu0  ;;  %v797_v30 = vpop.f32.mrb[3].mxu1 }
 0x140   : > { %v863_v28 = vadd.f32 %v845_v20, %v317_v18  ;;  %v849_v29 = vadd.f32 %v848_v27, %v795_v25  ;;  %v850_v32 = vpop.f32.mrb[3].mxu0 }
 0x141   : > { %v864_v33 = vadd.f32 %v847_v24, %v318_v22  ;;  %v851_v34 = vadd.f32 %v850_v32, %v797_v30 }
 0x142   : > { %871 = vst [vmem:[#allocation2] sm:$0xff] %v863_v28  ;;  %v865_v35 = vadd.f32 %v849_v29, %v319_v26 }
 0x143   : > { %872 = vst [vmem:[#allocation2 + $0x8] sm:$0xff] %v864_v33  ;;  %v866_v36 = vadd.f32 %v851_v34, %v320_v31 }
 0x144   : > { %873 = vst [vmem:[#allocation2 + $0x10] sm:$0xff] %v865_v35  ;;  %v801_v37 = vpop.f32.mrb[4].mxu1 }
 0x145   : > { %874 = vst [vmem:[#allocation2 + $0x18] sm:$0xff] %v866_v36  ;;  %v854_v39 = vpop.f32.mrb[4].mxu0  ;;  %v803_v41 = vpop.f32.mrb[5].mxu1 }
 0x146   : > { %v855_v40 = vadd.f32 %v854_v39, %v801_v37  ;;  %v856_v43 = vpop.f32.mrb[5].mxu0  ;;  %v805_v45 = vpop.f32.mrb[6].mxu1 }
 0x147   : > { %v857_v44 = vadd.f32 %v856_v43, %v803_v41  ;;  %v858_v47 = vpop.f32.mrb[6].mxu0  ;;  %v807_v50 = vpop.f32.mrb[7].mxu1  ;;  %882 = sbr.rel (%p1171_p11) target bundleno = 349 (0x15d), region = 63 }
 0x148   : > { %v867_v48 = vadd.f32 %v855_v40, %v321_v38  ;;  %v859_v49 = vadd.f32 %v858_v47, %v805_v45  ;;  %v860_v52 = vpop.f32.mrb[7].mxu0 }
 0x149   : > { %v868_v53 = vadd.f32 %v857_v44, %v322_v42  ;;  %v861_v54 = vadd.f32 %v860_v52, %v807_v50  ;;  %v883_v60 = vld [vmem:[#allocation2] sm:$0xff] (!%p1171_p11) }
 0x14a   : > { %875 = vst [vmem:[#allocation2 + $0x20] sm:$0xff] %v867_v48  ;;  %v869_v55 = vadd.f32 %v859_v49, %v323_v46  ;;  %v884_v61 = vld [vmem:[#allocation2 + $0x8] sm:$0xff] (!%p1171_p11)  ;;  %v903_v8 = vadd.f32 (!%p1171_p11), %v896_v3, %v883_v60 }
 0x14b   : > { %876 = vst [vmem:[#allocation2 + $0x28] sm:$0xff] %v868_v53  ;;  %v870_v56 = vadd.f32 %v861_v54, %v324_v51  ;;  %v885_v0 = vld [vmem:[#allocation2 + $0x10] sm:$0xff] (!%p1171_p11)  ;;  %v904_v9 = vadd.f32 (!%p1171_p11), %v900_v4, %v884_v61 }
 0x14c   : > { %877 = vst [vmem:[#allocation2 + $0x30] sm:$0xff] %v869_v55  ;;  %v886_v1 = vld [vmem:[#allocation2 + $0x18] sm:$0xff] (!%p1171_p11)  ;;  %v905_v10 = vadd.f32 (!%p1171_p11), %v896_v3, %v885_v0  ;;  %vm911_vm0 = vcmp.ge.f32.partialorder (!%p1171_p11), %v903_v8, 0.0  ;;  %v919_v16 = vmul.f32 (!%p1171_p11), 0.1, %v903_v8 }
 0x14d   : > { %878 = vst [vmem:[#allocation2 + $0x38] sm:$0xff] %v870_v56  ;;  %v906_v11 = vadd.f32 (!%p1171_p11), %v900_v4, %v886_v1  ;;  %vm912_vm1 = vcmp.ge.f32.partialorder (!%p1171_p11), %v904_v9, 0.0  ;;  %v920_v17 = vmul.f32 (!%p1171_p11), 0.1, %v904_v9 }
 0x14e   : > { %vm913_vm2 = vcmp.ge.f32.partialorder %v905_v10, 0.0  ;;  %v921_v18 = vmul.f32 0.1, %v905_v10  ;;  %v927_v20 = vsel %vm911_vm0, %v903_v8, %v919_v16 }
 0x14f   : > { %vm914_vm3 = vcmp.ge.f32.partialorder %v906_v11, 0.0  ;;  %v922_v19 = vmul.f32 0.1, %v906_v11  ;;  %v928_v21 = vsel %vm912_vm1, %v904_v9, %v920_v17 }
 0x150   : > { %v1182_v22 = vpack.c.bf16 %v928_v21, %v927_v20  ;;  %v929_v23 = vsel %vm913_vm2, %v905_v10, %v921_v18 }
 0x151   : > { %v887_v2 = vld [vmem:[#allocation2 + $0x20] sm:$0xff]  ;;  %v930_v24 = vsel %vm914_vm3, %v906_v11, %v922_v19 }
 0x152   : > { %v888_v5 = vld [vmem:[#allocation2 + $0x28] sm:$0xff]  ;;  %v907_v12 = vadd.f32 %v896_v3, %v887_v2  ;;  %v1183_v26 = vpack.c.bf16 %v930_v24, %v929_v23  ;;  %959 = vst [vmem:[%s1565_s3] sm:$0xff] %v1182_v22 }
 0x153   : > { %v889_v6 = vld [vmem:[#allocation2 + $0x30] sm:$0xff]  ;;  %v908_v13 = vadd.f32 %v900_v4, %v888_v5 }
 0x154   : > { %v890_v7 = vld [vmem:[#allocation2 + $0x38] sm:$0xff]  ;;  %v909_v14 = vadd.f32 %v896_v3, %v889_v6  ;;  %vm915_vm4 = vcmp.ge.f32.partialorder %v907_v12, 0.0  ;;  %v923_v25 = vmul.f32 0.1, %v907_v12  ;;  %960 = vst [vmem:[%s1565_s3 + $0x8] sm:$0xff] %v1183_v26 }
 0x155   : > { %v910_v15 = vadd.f32 %v900_v4, %v890_v7  ;;  %vm916_vm5 = vcmp.ge.f32.partialorder %v908_v13, 0.0  ;;  %v924_v27 = vmul.f32 0.1, %v908_v13 }
 0x156   : > { %vm917_vm6 = vcmp.ge.f32.partialorder %v909_v14, 0.0  ;;  %v931_v28 = vsel %vm915_vm4, %v907_v12, %v923_v25  ;;  %v925_v29 = vmul.f32 0.1, %v909_v14 }
 0x157   : > { %vm918_vm7 = vcmp.ge.f32.partialorder %v910_v15, 0.0  ;;  %v926_v30 = vmul.f32 0.1, %v910_v15  ;;  %v932_v31 = vsel %vm916_vm5, %v908_v13, %v924_v27 }
 0x158   : > { %v1184_v32 = vpack.c.bf16 %v932_v31, %v931_v28  ;;  %v933_v33 = vsel %vm917_vm6, %v909_v14, %v925_v29 }
 0x159   : > { %v934_v34 = vsel %vm918_vm7, %v910_v15, %v926_v30 }
 0x15a   : > { %v1185_v35 = vpack.c.bf16 %v934_v34, %v933_v33  ;;  %961 = vst [vmem:[%s1565_s3 + $0x10] sm:$0xff] %v1184_v32 }
 0x15c   : > { %962 = vst [vmem:[%s1565_s3 + $0x18] sm:$0xff] %v1185_v35 }
 0x15d PF: > { %s13_s16 = sadd.s32 1, %s1381_s16   ;;  %s1566_s12 = smov %s1369_s13 }
 0x15e   : > { %p10_p12 = scmp.ge.s32.totalorder %s13_s16, 7   ;;  %s1567_s13 = smov %s1439_s20 }
 0x15f   : > { %s1568_s14 = smov %s1377_s15  ;;  %s1569_s15 = smov %s1571_s17 }
 0x160   :  { %12 = sbr.rel (!%p10_p12) target bundleno = 3 (0x3), region = 104 }

// kernel: upconv7_forward.26
= control target key start
LH: loop header
LB: loop body
LE: loop exit
PB: predicated region body
PF: predicated region fallthrough
CT: control target
= control target key end

     0   :  { %s444_s1 = inlined_call_operand.vmem [shape: bf16[256,128], index: 1, kind: input, shape index: {}]   ;;  %s445_s0 = inlined_call_operand.vmem [shape: bf16[32,256], index: 0, kind: input, shape index: {}]   ;;  %s446_s2 = inlined_call_operand.vmem [shape: f32[1,128], index: 2, kind: input, shape index: {}]   ;;  %s447_s3 = inlined_call_operand.vmem [shape: f32[32,128], index: 3, kind: output, shape index: {}]  }
   0x1   :  { %v327_v0 = vld [vmem:[%s444_s1 + $0x40] sm:$0xff]   ;;  %v329_v2 = vld [vmem:[%s444_s1 + $0x48] sm:$0xff]   ;;  %v331_v4 = vld [vmem:[%s444_s1 + $0x50] sm:$0xff]  }
   0x2   :  { %v328_v1 = vld [vmem:[%s444_s1] sm:$0xff]   ;;  %283 = vmatprep.subr.bf16.mxu0 %v327_v0  ;;  %311 = vmatprep.subr.bf16.mxu1 %v327_v0  ;;  %v330_v3 = vld [vmem:[%s444_s1 + $0x8] sm:$0xff]   ;;  %v332_v5 = vld [vmem:[%s444_s1 + $0x10] sm:$0xff]  }
   0x3   :  { %284 = vmatpush3.bf16.msra.mxu0 %v328_v1  ;;  %319 = vmatpush3.bf16.msra.mxu1 %v328_v1  ;;  %v333_v6 = vld [vmem:[%s444_s1 + $0x58] sm:$0xff]   ;;  %v335_v8 = vld [vmem:[%s444_s1 + $0x60] sm:$0xff]   ;;  %v337_v10 = vld [vmem:[%s444_s1 + $0x68] sm:$0xff]  }
   0x4   :  { %285 = vmatprep.subr.bf16.mxu0 %v329_v2  ;;  %312 = vmatprep.subr.bf16.mxu1 %v329_v2  ;;  %v334_v7 = vld [vmem:[%s444_s1 + $0x18] sm:$0xff]   ;;  %v336_v9 = vld [vmem:[%s444_s1 + $0x20] sm:$0xff]   ;;  %v338_v13 = vld [vmem:[%s444_s1 + $0x28] sm:$0xff]  }
   0x5   :  { %v345_v11 = vld [vmem:[%s445_s0 + $0x4] ss:$8 sps:$4 sm:$0xff]   ;;  %v348_v12 = vld [vmem:[%s445_s0 + $0x14] ss:$8 sps:$4 sm:$0xff]   ;;  %v343_v18 = vld [vmem:[%s445_s0] ss:$8 sps:$4 sm:$0xff]  }
   0x6   :  { %v339_v14 = vld [vmem:[%s444_s1 + $0x70] sm:$0xff]   ;;  %211 = vmatprep.mubr.bf16.mxu0 %v345_v11  ;;  %219 = vmatprep.mubr.bf16.mxu1 %v348_v12  ;;  %v341_v16 = vld [vmem:[%s444_s1 + $0x78] sm:$0xff]   ;;  %v282_v23 = vld [vmem:[%s446_s2] ss:$0 sm:$0xff] }
   0x7   :  { %286 = vmatpush3.bf16.msra.mxu0 %v330_v3  ;;  %320 = vmatpush3.bf16.msra.mxu1 %v330_v3  ;;  %v340_v15 = vld [vmem:[%s444_s1 + $0x30] sm:$0xff]   ;;  %v342_v17 = vld [vmem:[%s444_s1 + $0x38] sm:$0xff]  }
   0x8   :  { %287 = vmatprep.subr.bf16.mxu0 %v331_v4  ;;  %313 = vmatprep.subr.bf16.mxu1 %v331_v4  ;;  %v346_v19 = vld [vmem:[%s445_s0 + $0x10] ss:$8 sps:$4 sm:$0xff]  }
   0xb   :  { %288 = vmatpush3.bf16.msra.mxu0 %v332_v5  ;;  %321 = vmatpush3.bf16.msra.mxu1 %v332_v5 }
   0xc   :  { %289 = vmatprep.subr.bf16.mxu0 %v333_v6  ;;  %314 = vmatprep.subr.bf16.mxu1 %v333_v6 }
   0xf   :  { %290 = vmatpush3.bf16.msra.mxu0 %v334_v7  ;;  %322 = vmatpush3.bf16.msra.mxu1 %v334_v7 }
  0x10   :  { %291 = vmatprep.subr.bf16.mxu0 %v335_v8  ;;  %315 = vmatprep.subr.bf16.mxu1 %v335_v8 }
  0x13   :  { %292 = vmatpush3.bf16.msra.mxu0 %v336_v9  ;;  %323 = vmatpush3.bf16.msra.mxu1 %v336_v9 }
  0x14   :  { %293 = vmatprep.subr.bf16.mxu0 %v337_v10  ;;  %316 = vmatprep.subr.bf16.mxu1 %v337_v10 }
  0x17   :  { %294 = vmatpush3.bf16.msra.mxu0 %v338_v13  ;;  %324 = vmatpush3.bf16.msra.mxu1 %v338_v13 }
  0x18   :  { %295 = vmatprep.subr.bf16.mxu0 %v339_v14  ;;  %317 = vmatprep.subr.bf16.mxu1 %v339_v14 }
  0x1b   :  { %296 = vmatpush3.bf16.msra.mxu0 %v340_v15  ;;  %325 = vmatpush3.bf16.msra.mxu1 %v340_v15 }
  0x1c   :  { %297 = vmatprep.subr.bf16.mxu0 %v341_v16  ;;  %318 = vmatprep.subr.bf16.mxu1 %v341_v16 }
  0x1f   :  { %298 = vmatpush3.bf16.msra.mxu0 %v342_v17  ;;  %326 = vmatpush3.bf16.msra.mxu1 %v342_v17 }
  0x22   :  { %212 = vmatmul.mubr.bf16.vlgmr.msra.gmra.mrb[0].mxu0 %v343_v18  ;;  %220 = vmatmul.mubr.bf16.vlgmr.msra.gmra.mrb[0].mxu1 %v346_v19 }
  0xf5   :  { %v299_v20 = vpop.f32.mrb[0].mxu0  ;;  %v305_v21 = vpop.f32.mrb[0].mxu1 }
  0xf6   :  { %v300_v22 = vpop.f32.mrb[1].mxu0  ;;  %v306_v24 = vpop.f32.mrb[1].mxu1 }
  0xf7   :  { %v301_v25 = vadd.f32 %v300_v22, %v299_v20  ;;  %v307_v26 = vadd.f32 %v306_v24, %v305_v21  ;;  %v302_v27 = vpop.f32.mrb[2].mxu0  ;;  %v308_v28 = vpop.f32.mrb[2].mxu1 }
  0xf8   :  { %v303_v29 = vpop.f32.mrb[3].mxu0  ;;  %v309_v30 = vpop.f32.mrb[3].mxu1 }
  0xf9   :  { %v250_v31 = vadd.f32 %v301_v25, %v282_v23  ;;  %v252_v32 = vadd.f32 %v307_v26, %v282_v23  ;;  %v304_v33 = vadd.f32 %v303_v29, %v302_v27  ;;  %v310_v34 = vadd.f32 %v309_v30, %v308_v28 }
  0xfb   :  { %254 = vst [vmem:[%s447_s3] sm:$0xff] %v250_v31  ;;  %256 = vst [vmem:[%s447_s3 + $0x10] sm:$0xff] %v252_v32  ;;  %v251_v35 = vadd.f32 %v304_v33, %v282_v23  ;;  %v253_v36 = vadd.f32 %v310_v34, %v282_v23 }
  0xfd   :  { %255 = vst [vmem:[%s447_s3 + $0x8] sm:$0xff] %v251_v35  ;;  %257 = vst [vmem:[%s447_s3 + $0x18] sm:$0xff] %v253_v36 }

// kernel: upconv7_forward.27
= control target key start
LH: loop header
LB: loop body
LE: loop exit
PB: predicated region body
PF: predicated region fallthrough
CT: control target
= control target key end

     0   :  { %s102_s0 = inlined_call_operand.vmem [shape: f32[8,4], index: 0, kind: input, shape index: {}]   ;;  %s103_s1 = inlined_call_operand.vmem [shape: f32[1,4], index: 1, kind: input, shape index: {}]   ;;  %s104_s2 = inlined_call_operand.hbm [shape: f32[8,4], index: 2, kind: output, shape index: {}]  }
   0x1   :  { %v12_v0 = vld [vmem:[%s102_s0] sm:$0xff] }
   0x2   :  { %v40_v1 = vld [vmem:[%s103_s1] ss:$0 sm:$0xff] }
   0x3   :  { %7 = vsyncpa [#allocation3], 0  ;;  %v20_v2 = vadd.f32 %v40_v1, %v12_v0  ;;  %s68_s13 = smov [#allocation2]   ;;  %vm24_vm0 = vcmask 31744  }
   0x4   :  { %s32_s14 = sshll.u32 %s68_s13, 4  ;;  %s33_s14 = int_to_ptr.vmem [resolvable:$true] %s32_s14 }
   0x5   :  { %42 = vtanh.f32 %v20_v2  ;;  %s44_s15 = scalar_lea.vmem %s33_s14, 128  ;;  %p49_p1 = scmp.lt.s32.totalorder %s33_s14, %s33_s14 }
   0x6   :  { %p45_p0 = scmp.ne.s32.totalorder %s33_s14, %s44_s15  ;;  %p50_p2 = scmp.lt.s32.totalorder %s44_s15, %s44_s15 }
   0x8   :  { %p51_p3 = por %p50_p2, %p49_p1 }
   0xa   :  { %p52_p4 = pnand %p51_p3, %p45_p0 }
   0xf   :  { %v43_v3 = vpop.eup %42 }
  0x10   :  { %v22_v4 = vmul.f32 0.55, %v43_v3 }
  0x12   :  { %v23_v5 = vsub.f32 0.5, %v22_v4 }
  0x14   :  { %25 = vst.msk [vmem:[#allocation2] sm:$0xff] %vm24_vm0, %v23_v5 }
  0x15   :  { %55 = shalt.err (!%p52_p4)
}
  0x16   :  { %s56_s16 = scalar_lea.hbm %s104_s2, 128 }
  0x17   :  { %p57_p5 = scmp.ne.s32.totalorder %s104_s2, %s56_s16  ;;  %p60_p6 = scmp.lt.u32.totalorder %s56_s16, %s104_s2 }
  0x19   :  { %p62_p7 = pnand %p60_p6, %p57_p5 }
  0x1b   :  { %65 = shalt.err (!%p62_p7)
}
  0x1c   :  { %35 = dma.vmem_to_hbm [thread:$0]  %s33_s14, 128, %s104_s2, [#allocation3]  }
  0x1d   :  { %66 = dma.done.wait [#allocation3], 128  }
  0x1e   :  { %67 = vsyncadd [#allocation3], 4294967168 }
  0x1f   :  { %39 = vsyncpa [#allocation3], 1 }

</bundles_post_ra>
